<compile_context>
chip_gen: v7x
topology: tpu7x:2x2x1
jax: 0.10.0
libtpu: 0.0.40
codegen_flags: <defaults>
</compile_context>

<pallas_src>
import jax
import jax.numpy as jnp
from jax.experimental import pallas as pl
from jax.experimental.pallas import tpu as pltpu

NUM_CLASSES = (6, 18, 128)   # [num_class1, num_class2, num_class3]
IMG_FEAT = 1792              # origin_input_channels of the image branches
TXT_FEAT = 768
LANE = 128                   # lane width; classifier outputs are padded to it
OUT_WIDTH = 3 * LANE         # single lane-dense output block [N, 384]


def _round_up(x, m):
    return (x + m - 1) // m * m


def _vmem_capacity_bytes():
    try:
        return int(pltpu.get_tpu_info().vmem_capacity_bytes)
    except Exception:                      # pragma: no cover - conservative fallback
        return 64 * 1024 * 1024            # v7x per-TC figure


def _pick_tile_n(n):
    """Batch tile: 16-aligned (bf16 sublane pack), generation-aware ceiling,
    and an even tile count so both v7x TensorCores get balanced work."""
    n16 = _round_up(max(n, 1), 16)
    max_tile = 512 if _vmem_capacity_bytes() <= 64 * 1024 * 1024 else 1024
    tile = min(max_tile, n16)
    num_tiles = -(-n16 // tile)
    if num_tiles > 1 and num_tiles % 2 == 1:
        tile = min(max_tile, _round_up(-(-n16 // (num_tiles + 1)), 16))
    return tile


def _vmem_limit_bytes(tile_n):
    """~1.3x the working set: ~13 MiB of (double-buffered) bf16 weights plus
    ~36 KiB/row of activations + f32 intermediates, floored at 24 MiB."""
    est = (16 << 20) + tile_n * 48 * 1024
    return min(max(est, 24 << 20), (_vmem_capacity_bytes() * 3) // 4)


def _hln2_kernel(
    # activations (batch-tiled, bf16)
    img_ref, txt_ref,
    # image fused branch heads
    w_ib_ref, b_ib_ref,
    # text main + fused branch heads
    w_tm_ref, b_tm_ref, w_tb_ref, b_tb_ref,
    # shared level heads (outputs zero-padded to 128 lanes)
    w_l1_ref, b_l1_ref, w_l2_ref, b_l2_ref, w_l3_ref, b_l3_ref,
    # final classifiers: row-stacked, zero-padded weights
    w_r1_ref, b_r1_ref, w_r2_ref, b_r2_ref, w_r3_ref, b_r3_ref,
    # lane-dense output: [T, 384] = [cat1_pad | cat2_pad | cat3]
    out_ref,
):
    f32 = jnp.float32
    bf16 = jnp.bfloat16

    def mm(x_bf, w_ref):
        # bf16 operands into the MXU, f32 accumulation.
        return jnp.dot(x_bf, w_ref[...], preferred_element_type=f32)

    relu = lambda x: jnp.maximum(x, 0.0)

    # ---------------- image stage ----------------
    # TODO(synk): EfficientNetV2 trunk stubbed; projection done in the wrapper,
    # img_ref already holds the [T, 1792] bf16 trunk feature.
    img_br = mm(img_ref[...], w_ib_ref) + b_ib_ref[...]          # [T, 896] = [128|256|512]

    # ---------------- text stage ----------------
    txt_feat = relu(mm(txt_ref[...], w_tm_ref) + b_tm_ref[...]).astype(bf16)   # [T, 768]
    # Dropout1d(p=0.35): identity at eval time.
    txt_br = relu(mm(txt_feat, w_tb_ref) + b_tb_ref[...])        # [T, 896]

    # ------------- shared level heads (original reuses linear_lvl*_img) -------------
    def level(br, lo, hi, w_ref, b_ref):
        # cast the consumed slice once; output cast to bf16 once (used once downstream)
        return (mm(br[:, lo:hi].astype(bf16), w_ref) + b_ref[...]).astype(bf16)

    img_l1 = level(img_br, 0, 128, w_l1_ref, b_l1_ref)           # [T, 128] (cols >=6 zero)
    img_l2 = level(img_br, 128, 384, w_l2_ref, b_l2_ref)         # [T, 128] (cols >=18 zero)
    img_l3 = level(img_br, 384, 896, w_l3_ref, b_l3_ref)         # [T, 128]
    txt_l1 = level(txt_br, 0, 128, w_l1_ref, b_l1_ref)
    txt_l2 = level(txt_br, 128, 384, w_l2_ref, b_l2_ref)
    txt_l3 = level(txt_br, 384, 896, w_l3_ref, b_l3_ref)

    # ---------------- final classification stage (fused, 3 matmuls) ----------------
    # softmax_reg1(cat(img_l1, txt_l1))
    cat1 = mm(jnp.concatenate([img_l1, txt_l1], axis=1), w_r1_ref) + b_r1_ref[...]
    cat1_bf = cat1.astype(bf16)                                  # reused by cat2 & cat3
    # softmax_reg2(cat(cat1, img_l2, txt_l2))
    cat2 = mm(jnp.concatenate([cat1_bf, img_l2, txt_l2], axis=1), w_r2_ref) + b_r2_ref[...]
    cat2_bf = cat2.astype(bf16)
    # softmax_reg3(cat(cat1, cat2, img_l3, txt_l3))
    cat3 = (mm(jnp.concatenate([cat1_bf, cat2_bf, img_l3, txt_l3], axis=1), w_r3_ref)
            + b_r3_ref[...])

    # single lane-dense store
    out_ref[...] = jnp.concatenate([cat1, cat2, cat3], axis=1)


def init_params(key, in_channels):
    """Deterministic synthetic parameters, pre-fused / pre-padded for the kernel.

    All matmul weights are bf16 ([in, out] layout); biases are f32.
    """
    c1, c2, c3 = NUM_CLASSES
    raw_shapes = [
        ("w_im_main", (in_channels, IMG_FEAT)), ("b_im_main", (1, IMG_FEAT)),
        ("w_ib1", (IMG_FEAT, 128)), ("b_ib1", (1, 128)),
        ("w_ib2", (IMG_FEAT, 256)), ("b_ib2", (1, 256)),
        ("w_ib3", (IMG_FEAT, 512)), ("b_ib3", (1, 512)),
        ("w_l1", (128, c1)), ("b_l1", (1, c1)),
        ("w_l2", (256, c2)), ("b_l2", (1, c2)),
        ("w_l3", (512, c3)), ("b_l3", (1, c3)),
        ("w_tm", (TXT_FEAT, TXT_FEAT)), ("b_tm", (1, TXT_FEAT)),
        ("w_tb1", (TXT_FEAT, 128)), ("b_tb1", (1, 128)),
        ("w_tb2", (TXT_FEAT, 256)), ("b_tb2", (1, 256)),
        ("w_tb3", (TXT_FEAT, 512)), ("b_tb3", (1, 512)),
        # softmax_reg1: Linear(2*c1 -> c1), row-split [c1 | c1]
        ("w_r1a", (c1, c1)), ("w_r1b", (c1, c1)), ("b_r1", (1, c1)),
        # softmax_reg2: Linear(c1 + 2*c2 -> c2), row-split [c1 | c2 | c2]
        ("w_r2a", (c1, c2)), ("w_r2b", (c2, c2)), ("w_r2c", (c2, c2)), ("b_r2", (1, c2)),
        # softmax_reg3: Linear(c1 + c2 + 2*c3 -> c3), row-split [c1 | c2 | c3 | c3]
        ("w_r3a", (c1, c3)), ("w_r3b", (c2, c3)), ("w_r3c", (c3, c3)),
        ("w_r3d", (c3, c3)), ("b_r3", (1, c3)),
    ]
    keys = jax.random.split(key, len(raw_shapes))
    raw = {}
    for k, (name, shape) in zip(keys, raw_shapes):
        fan_in = shape[0] if shape[0] > 1 else shape[1]
        raw[name] = jax.random.normal(k, shape, dtype=jnp.float32) / jnp.sqrt(float(fan_in))

    def pad2(a, rows, cols):
        return jnp.pad(a, ((0, rows - a.shape[0]), (0, cols - a.shape[1])))

    wq = lambda a: a.astype(jnp.bfloat16)   # MXU operands -> bf16
    bq = lambda a: a.astype(jnp.float32)    # biases / VPU side stays f32

    # Row-stacked, zero-padded classifier weights (one matmul per cat level).
    w_r1 = jnp.concatenate([pad2(raw["w_r1a"], LANE, LANE),
                            pad2(raw["w_r1b"], LANE, LANE)], axis=0)          # [256, 128]
    w_r2 = jnp.concatenate([pad2(raw["w_r2a"], LANE, LANE),
                            pad2(raw["w_r2b"], LANE, LANE),
                            pad2(raw["w_r2c"], LANE, LANE)], axis=0)          # [384, 128]
    w_r3 = jnp.concatenate([pad2(raw["w_r3a"], LANE, LANE),
                            pad2(raw["w_r3b"], LANE, LANE),
                            raw["w_r3c"], raw["w_r3d"]], axis=0)              # [512, 128]

    params = (
        # image trunk stub (applied in the wrapper)
        wq(raw["w_im_main"]), bq(raw["b_im_main"]),
        # image fused branch heads
        wq(jnp.concatenate([raw["w_ib1"], raw["w_ib2"], raw["w_ib3"]], axis=1)),
        bq(jnp.concatenate([raw["b_ib1"], raw["b_ib2"], raw["b_ib3"]], axis=1)),
        # text main + fused branch heads
        wq(raw["w_tm"]), bq(raw["b_tm"]),
        wq(jnp.concatenate([raw["w_tb1"], raw["w_tb2"], raw["w_tb3"]], axis=1)),
        bq(jnp.concatenate([raw["b_tb1"], raw["b_tb2"], raw["b_tb3"]], axis=1)),
        # shared level heads, output-padded to 128 lanes
        wq(pad2(raw["w_l1"], 128, LANE)), bq(pad2(raw["b_l1"], 1, LANE)),
        wq(pad2(raw["w_l2"], 256, LANE)), bq(pad2(raw["b_l2"], 1, LANE)),
        wq(pad2(raw["w_l3"], 512, LANE)), bq(pad2(raw["b_l3"], 1, LANE)),
        # fused final classifiers
        wq(w_r1), bq(pad2(raw["b_r1"], 1, LANE)),
        wq(w_r2), bq(pad2(raw["b_r2"], 1, LANE)),
        wq(w_r3), bq(pad2(raw["b_r3"], 1, LANE)),
    )
    return params


@jax.jit
def hln2_forward(x_img, x_txt, *params):
    w_im_main, b_im_main = params[0], params[1]
    kernel_params = params[2:]
    c1, c2, c3 = NUM_CLASSES

    # Glue: NCHW global average pool + stubbed trunk projection (K is tiny, so
    # keep this K=in_channels matmul out of the MXU-heavy kernel).
    # TODO(synk): real EfficientNetV2 'm' backbone unavailable; GAP->Linear->ReLU stub.
    pooled = jnp.mean(x_img.astype(jnp.float32), axis=(2, 3))                 # [N, C]
    img_feat = jnp.maximum(
        jnp.dot(pooled.astype(jnp.bfloat16), w_im_main,
                preferred_element_type=jnp.float32) + b_im_main, 0.0)
    img_feat = img_feat.astype(jnp.bfloat16)                                  # [N, 1792] bf16
    txt = x_txt.astype(jnp.bfloat16)                                          # [N, 768] bf16

    n = img_feat.shape[0]
    tile_n = _pick_tile_n(n)
    n_pad = _round_up(n, tile_n)
    if n_pad != n:
        img_feat = jnp.pad(img_feat, ((0, n_pad - n), (0, 0)))
        txt = jnp.pad(txt, ((0, n_pad - n), (0, 0)))

    # Activation/output tiles pipeline along the batch grid; constant-index
    # weight blocks stay VMEM-resident (default buffering — total footprint at
    # tile_n<=512 comfortably fits every generation's budget, so pl.Buffered(1)
    # is not required).
    in_specs = [pl.BlockSpec((tile_n, IMG_FEAT), lambda i: (i, 0)),
                pl.BlockSpec((tile_n, TXT_FEAT), lambda i: (i, 0))]
    in_specs += [pl.BlockSpec(p.shape, lambda i: (0, 0)) for p in kernel_params]

    out = pl.pallas_call(
        _hln2_kernel,
        out_shape=jax.ShapeDtypeStruct((n_pad, OUT_WIDTH), jnp.float32),
        grid=(n_pad // tile_n,),
        in_specs=in_specs,
        out_specs=pl.BlockSpec((tile_n, OUT_WIDTH), lambda i: (i, 0)),
        compiler_params=pltpu.CompilerParams(
            dimension_semantics=("parallel",),            # v7x: both TCs take batch tiles
            vmem_limit_bytes=_vmem_limit_bytes(tile_n),   # ~1.3x working set
        ),
    )(img_feat, txt, *kernel_params)

    cat1 = out[:n, 0:c1]
    cat2 = out[:n, LANE:LANE + c2]
    cat3 = out[:n, 2 * LANE:2 * LANE + c3]
    return cat1, cat2, cat3


if __name__ == "__main__":
    key = jax.random.PRNGKey(0)
    k_img, k_txt, k_par = jax.random.split(key, 3)

    N, C, H, W = 2, 4, 16, 16
    x_img = jax.random.normal(k_img, (N, C, H, W), dtype=jnp.float32)   # NCHW
    x_txt = jax.random.normal(k_txt, (N, TXT_FEAT), dtype=jnp.float32)

    params = init_params(k_par, in_channels=C)

    cat1, cat2, cat3 = hln2_forward(x_img, x_txt, *params)
    jax.block_until_ready((cat1, cat2, cat3))

    assert cat1.shape == (N, NUM_CLASSES[0])
    assert cat2.shape == (N, NUM_CLASSES[1])
    assert cat3.shape == (N, NUM_CLASSES[2])
    print("KERNEL_OK")
</pallas_src>

<mosaic_0001>
module attributes {stable_mosaic.version = 11 : i64} {
  func.func @_hln2_kernel(%arg0: i32, %arg1: memref<16x1792xbf16, #tpu.memory_space<vmem>>, %arg2: memref<16x768xbf16, #tpu.memory_space<vmem>>, %arg3: memref<1792x896xbf16, #tpu.memory_space<vmem>>, %arg4: memref<1x896xf32, #tpu.memory_space<vmem>>, %arg5: memref<768x768xbf16, #tpu.memory_space<vmem>>, %arg6: memref<1x768xf32, #tpu.memory_space<vmem>>, %arg7: memref<768x896xbf16, #tpu.memory_space<vmem>>, %arg8: memref<1x896xf32, #tpu.memory_space<vmem>>, %arg9: memref<128x128xbf16, #tpu.memory_space<vmem>>, %arg10: memref<1x128xf32, #tpu.memory_space<vmem>>, %arg11: memref<256x128xbf16, #tpu.memory_space<vmem>>, %arg12: memref<1x128xf32, #tpu.memory_space<vmem>>, %arg13: memref<512x128xbf16, #tpu.memory_space<vmem>>, %arg14: memref<1x128xf32, #tpu.memory_space<vmem>>, %arg15: memref<256x128xbf16, #tpu.memory_space<vmem>>, %arg16: memref<1x128xf32, #tpu.memory_space<vmem>>, %arg17: memref<384x128xbf16, #tpu.memory_space<vmem>>, %arg18: memref<1x128xf32, #tpu.memory_space<vmem>>, %arg19: memref<512x128xbf16, #tpu.memory_space<vmem>>, %arg20: memref<1x128xf32, #tpu.memory_space<vmem>>, %arg21: memref<16x384xf32, #tpu.memory_space<vmem>>) attributes {dimension_semantics = [#tpu.dimension_semantics<parallel>], iteration_bounds = array<i64: 1>, scalar_prefetch = 0 : i64, scratch_operands = 0 : i64, tpu.core_type = #tpu.core_type<tc>, window_params = [{transform_indices = @transform_0, window_bounds = array<i64: 16, 1792>}, {transform_indices = @transform_1, window_bounds = array<i64: 16, 768>}, {pipeline_mode = #tpu.pipeline_mode<synchronous>, transform_indices = @transform_2, window_bounds = array<i64: 1792, 896>}, {pipeline_mode = #tpu.pipeline_mode<synchronous>, transform_indices = @transform_3, window_bounds = array<i64: 1, 896>}, {pipeline_mode = #tpu.pipeline_mode<synchronous>, transform_indices = @transform_4, window_bounds = array<i64: 768, 768>}, {pipeline_mode = #tpu.pipeline_mode<synchronous>, transform_indices = @transform_5, window_bounds = array<i64: 1, 768>}, {pipeline_mode = #tpu.pipeline_mode<synchronous>, transform_indices = @transform_6, window_bounds = array<i64: 768, 896>}, {pipeline_mode = #tpu.pipeline_mode<synchronous>, transform_indices = @transform_7, window_bounds = array<i64: 1, 896>}, {pipeline_mode = #tpu.pipeline_mode<synchronous>, transform_indices = @transform_8, window_bounds = array<i64: 128, 128>}, {pipeline_mode = #tpu.pipeline_mode<synchronous>, transform_indices = @transform_9, window_bounds = array<i64: 1, 128>}, {pipeline_mode = #tpu.pipeline_mode<synchronous>, transform_indices = @transform_10, window_bounds = array<i64: 256, 128>}, {pipeline_mode = #tpu.pipeline_mode<synchronous>, transform_indices = @transform_11, window_bounds = array<i64: 1, 128>}, {pipeline_mode = #tpu.pipeline_mode<synchronous>, transform_indices = @transform_12, window_bounds = array<i64: 512, 128>}, {pipeline_mode = #tpu.pipeline_mode<synchronous>, transform_indices = @transform_13, window_bounds = array<i64: 1, 128>}, {pipeline_mode = #tpu.pipeline_mode<synchronous>, transform_indices = @transform_14, window_bounds = array<i64: 256, 128>}, {pipeline_mode = #tpu.pipeline_mode<synchronous>, transform_indices = @transform_15, window_bounds = array<i64: 1, 128>}, {pipeline_mode = #tpu.pipeline_mode<synchronous>, transform_indices = @transform_16, window_bounds = array<i64: 384, 128>}, {pipeline_mode = #tpu.pipeline_mode<synchronous>, transform_indices = @transform_17, window_bounds = array<i64: 1, 128>}, {pipeline_mode = #tpu.pipeline_mode<synchronous>, transform_indices = @transform_18, window_bounds = array<i64: 512, 128>}, {pipeline_mode = #tpu.pipeline_mode<synchronous>, transform_indices = @transform_19, window_bounds = array<i64: 1, 128>}, {transform_indices = @transform_20, window_bounds = array<i64: 16, 384>}]} {
    %c0 = arith.constant 0 : index
    %c0_0 = arith.constant 0 : index
    %0 = vector.load %arg1[%c0, %c0_0] : memref<16x1792xbf16, #tpu.memory_space<vmem>>, vector<16x1792xbf16>
    %c0_1 = arith.constant 0 : index
    %c0_2 = arith.constant 0 : index
    %1 = vector.load %arg3[%c0_1, %c0_2] : memref<1792x896xbf16, #tpu.memory_space<vmem>>, vector<1792x896xbf16>
    %cst = arith.constant dense<0.000000e+00> : vector<16x896xf32>
    %2 = tpu.matmul %0, %1, %cst {dimension_numbers = #tpu.dot_dimension_numbers<[1], [0], [0], [1], [0, 0, 1, 1], [], []>} : vector<16x1792xbf16>, vector<1792x896xbf16>, vector<16x896xf32> -> vector<16x896xf32>
    %c0_3 = arith.constant 0 : index
    %c0_4 = arith.constant 0 : index
    %3 = vector.load %arg4[%c0_3, %c0_4] : memref<1x896xf32, #tpu.memory_space<vmem>>, vector<1x896xf32>
    %4 = vector.broadcast %3 : vector<1x896xf32> to vector<16x896xf32>
    %5 = arith.addf %2, %4 : vector<16x896xf32>
    %c0_5 = arith.constant 0 : index
    %c0_6 = arith.constant 0 : index
    %6 = vector.load %arg2[%c0_5, %c0_6] : memref<16x768xbf16, #tpu.memory_space<vmem>>, vector<16x768xbf16>
    %c0_7 = arith.constant 0 : index
    %c0_8 = arith.constant 0 : index
    %7 = vector.load %arg5[%c0_7, %c0_8] : memref<768x768xbf16, #tpu.memory_space<vmem>>, vector<768x768xbf16>
    %cst_9 = arith.constant dense<0.000000e+00> : vector<16x768xf32>
    %8 = tpu.matmul %6, %7, %cst_9 {dimension_numbers = #tpu.dot_dimension_numbers<[1], [0], [0], [1], [0, 0, 1, 1], [], []>} : vector<16x768xbf16>, vector<768x768xbf16>, vector<16x768xf32> -> vector<16x768xf32>
    %c0_10 = arith.constant 0 : index
    %c0_11 = arith.constant 0 : index
    %9 = vector.load %arg6[%c0_10, %c0_11] : memref<1x768xf32, #tpu.memory_space<vmem>>, vector<1x768xf32>
    %10 = vector.broadcast %9 : vector<1x768xf32> to vector<16x768xf32>
    %11 = arith.addf %8, %10 : vector<16x768xf32>
    %cst_12 = arith.constant 0.000000e+00 : f32
    %12 = vector.broadcast %cst_12 : f32 to vector<16x768xf32>
    %13 = arith.maximumf %11, %12 : vector<16x768xf32>
    %14 = arith.truncf %13 : vector<16x768xf32> to vector<16x768xbf16>
    %c0_13 = arith.constant 0 : index
    %c0_14 = arith.constant 0 : index
    %15 = vector.load %arg7[%c0_13, %c0_14] : memref<768x896xbf16, #tpu.memory_space<vmem>>, vector<768x896xbf16>
    %cst_15 = arith.constant dense<0.000000e+00> : vector<16x896xf32>
    %16 = tpu.matmul %14, %15, %cst_15 {dimension_numbers = #tpu.dot_dimension_numbers<[1], [0], [0], [1], [0, 0, 1, 1], [], []>} : vector<16x768xbf16>, vector<768x896xbf16>, vector<16x896xf32> -> vector<16x896xf32>
    %c0_16 = arith.constant 0 : index
    %c0_17 = arith.constant 0 : index
    %17 = vector.load %arg8[%c0_16, %c0_17] : memref<1x896xf32, #tpu.memory_space<vmem>>, vector<1x896xf32>
    %18 = vector.broadcast %17 : vector<1x896xf32> to vector<16x896xf32>
    %19 = arith.addf %16, %18 : vector<16x896xf32>
    %cst_18 = arith.constant 0.000000e+00 : f32
    %20 = vector.broadcast %cst_18 : f32 to vector<16x896xf32>
    %21 = arith.maximumf %19, %20 : vector<16x896xf32>
    %22 = vector.extract_strided_slice %5 {offsets = [0, 0], sizes = [16, 128], strides = [1, 1]} : vector<16x896xf32> to vector<16x128xf32>
    %23 = arith.truncf %22 : vector<16x128xf32> to vector<16x128xbf16>
    %c0_19 = arith.constant 0 : index
    %c0_20 = arith.constant 0 : index
    %24 = vector.load %arg9[%c0_19, %c0_20] : memref<128x128xbf16, #tpu.memory_space<vmem>>, vector<128x128xbf16>
    %cst_21 = arith.constant dense<0.000000e+00> : vector<16x128xf32>
    %25 = tpu.matmul %23, %24, %cst_21 {dimension_numbers = #tpu.dot_dimension_numbers<[1], [0], [0], [1], [0, 0, 1, 1], [], []>} : vector<16x128xbf16>, vector<128x128xbf16>, vector<16x128xf32> -> vector<16x128xf32>
    %c0_22 = arith.constant 0 : index
    %c0_23 = arith.constant 0 : index
    %26 = vector.load %arg10[%c0_22, %c0_23] : memref<1x128xf32, #tpu.memory_space<vmem>>, vector<1x128xf32>
    %27 = vector.broadcast %26 : vector<1x128xf32> to vector<16x128xf32>
    %28 = arith.addf %25, %27 : vector<16x128xf32>
    %29 = arith.truncf %28 : vector<16x128xf32> to vector<16x128xbf16>
    %30 = vector.extract_strided_slice %5 {offsets = [0, 128], sizes = [16, 256], strides = [1, 1]} : vector<16x896xf32> to vector<16x256xf32>
    %31 = arith.truncf %30 : vector<16x256xf32> to vector<16x256xbf16>
    %c0_24 = arith.constant 0 : index
    %c0_25 = arith.constant 0 : index
    %32 = vector.load %arg11[%c0_24, %c0_25] : memref<256x128xbf16, #tpu.memory_space<vmem>>, vector<256x128xbf16>
    %cst_26 = arith.constant dense<0.000000e+00> : vector<16x128xf32>
    %33 = tpu.matmul %31, %32, %cst_26 {dimension_numbers = #tpu.dot_dimension_numbers<[1], [0], [0], [1], [0, 0, 1, 1], [], []>} : vector<16x256xbf16>, vector<256x128xbf16>, vector<16x128xf32> -> vector<16x128xf32>
    %c0_27 = arith.constant 0 : index
    %c0_28 = arith.constant 0 : index
    %34 = vector.load %arg12[%c0_27, %c0_28] : memref<1x128xf32, #tpu.memory_space<vmem>>, vector<1x128xf32>
    %35 = vector.broadcast %34 : vector<1x128xf32> to vector<16x128xf32>
    %36 = arith.addf %33, %35 : vector<16x128xf32>
    %37 = arith.truncf %36 : vector<16x128xf32> to vector<16x128xbf16>
    %38 = vector.extract_strided_slice %5 {offsets = [0, 384], sizes = [16, 512], strides = [1, 1]} : vector<16x896xf32> to vector<16x512xf32>
    %39 = arith.truncf %38 : vector<16x512xf32> to vector<16x512xbf16>
    %c0_29 = arith.constant 0 : index
    %c0_30 = arith.constant 0 : index
    %40 = vector.load %arg13[%c0_29, %c0_30] : memref<512x128xbf16, #tpu.memory_space<vmem>>, vector<512x128xbf16>
    %cst_31 = arith.constant dense<0.000000e+00> : vector<16x128xf32>
    %41 = tpu.matmul %39, %40, %cst_31 {dimension_numbers = #tpu.dot_dimension_numbers<[1], [0], [0], [1], [0, 0, 1, 1], [], []>} : vector<16x512xbf16>, vector<512x128xbf16>, vector<16x128xf32> -> vector<16x128xf32>
    %c0_32 = arith.constant 0 : index
    %c0_33 = arith.constant 0 : index
    %42 = vector.load %arg14[%c0_32, %c0_33] : memref<1x128xf32, #tpu.memory_space<vmem>>, vector<1x128xf32>
    %43 = vector.broadcast %42 : vector<1x128xf32> to vector<16x128xf32>
    %44 = arith.addf %41, %43 : vector<16x128xf32>
    %45 = arith.truncf %44 : vector<16x128xf32> to vector<16x128xbf16>
    %46 = vector.extract_strided_slice %21 {offsets = [0, 0], sizes = [16, 128], strides = [1, 1]} : vector<16x896xf32> to vector<16x128xf32>
    %47 = arith.truncf %46 : vector<16x128xf32> to vector<16x128xbf16>
    %c0_34 = arith.constant 0 : index
    %c0_35 = arith.constant 0 : index
    %48 = vector.load %arg9[%c0_34, %c0_35] : memref<128x128xbf16, #tpu.memory_space<vmem>>, vector<128x128xbf16>
    %cst_36 = arith.constant dense<0.000000e+00> : vector<16x128xf32>
    %49 = tpu.matmul %47, %48, %cst_36 {dimension_numbers = #tpu.dot_dimension_numbers<[1], [0], [0], [1], [0, 0, 1, 1], [], []>} : vector<16x128xbf16>, vector<128x128xbf16>, vector<16x128xf32> -> vector<16x128xf32>
    %c0_37 = arith.constant 0 : index
    %c0_38 = arith.constant 0 : index
    %50 = vector.load %arg10[%c0_37, %c0_38] : memref<1x128xf32, #tpu.memory_space<vmem>>, vector<1x128xf32>
    %51 = vector.broadcast %50 : vector<1x128xf32> to vector<16x128xf32>
    %52 = arith.addf %49, %51 : vector<16x128xf32>
    %53 = arith.truncf %52 : vector<16x128xf32> to vector<16x128xbf16>
    %54 = vector.extract_strided_slice %21 {offsets = [0, 128], sizes = [16, 256], strides = [1, 1]} : vector<16x896xf32> to vector<16x256xf32>
    %55 = arith.truncf %54 : vector<16x256xf32> to vector<16x256xbf16>
    %c0_39 = arith.constant 0 : index
    %c0_40 = arith.constant 0 : index
    %56 = vector.load %arg11[%c0_39, %c0_40] : memref<256x128xbf16, #tpu.memory_space<vmem>>, vector<256x128xbf16>
    %cst_41 = arith.constant dense<0.000000e+00> : vector<16x128xf32>
    %57 = tpu.matmul %55, %56, %cst_41 {dimension_numbers = #tpu.dot_dimension_numbers<[1], [0], [0], [1], [0, 0, 1, 1], [], []>} : vector<16x256xbf16>, vector<256x128xbf16>, vector<16x128xf32> -> vector<16x128xf32>
    %c0_42 = arith.constant 0 : index
    %c0_43 = arith.constant 0 : index
    %58 = vector.load %arg12[%c0_42, %c0_43] : memref<1x128xf32, #tpu.memory_space<vmem>>, vector<1x128xf32>
    %59 = vector.broadcast %58 : vector<1x128xf32> to vector<16x128xf32>
    %60 = arith.addf %57, %59 : vector<16x128xf32>
    %61 = arith.truncf %60 : vector<16x128xf32> to vector<16x128xbf16>
    %62 = vector.extract_strided_slice %21 {offsets = [0, 384], sizes = [16, 512], strides = [1, 1]} : vector<16x896xf32> to vector<16x512xf32>
    %63 = arith.truncf %62 : vector<16x512xf32> to vector<16x512xbf16>
    %c0_44 = arith.constant 0 : index
    %c0_45 = arith.constant 0 : index
    %64 = vector.load %arg13[%c0_44, %c0_45] : memref<512x128xbf16, #tpu.memory_space<vmem>>, vector<512x128xbf16>
    %cst_46 = arith.constant dense<0.000000e+00> : vector<16x128xf32>
    %65 = tpu.matmul %63, %64, %cst_46 {dimension_numbers = #tpu.dot_dimension_numbers<[1], [0], [0], [1], [0, 0, 1, 1], [], []>} : vector<16x512xbf16>, vector<512x128xbf16>, vector<16x128xf32> -> vector<16x128xf32>
    %c0_47 = arith.constant 0 : index
    %c0_48 = arith.constant 0 : index
    %66 = vector.load %arg14[%c0_47, %c0_48] : memref<1x128xf32, #tpu.memory_space<vmem>>, vector<1x128xf32>
    %67 = vector.broadcast %66 : vector<1x128xf32> to vector<16x128xf32>
    %68 = arith.addf %65, %67 : vector<16x128xf32>
    %69 = arith.truncf %68 : vector<16x128xf32> to vector<16x128xbf16>
    %70 = tpu.concatenate %29, %53 in 1 : vector<16x128xbf16>, vector<16x128xbf16> -> vector<16x256xbf16>
    %c0_49 = arith.constant 0 : index
    %c0_50 = arith.constant 0 : index
    %71 = vector.load %arg15[%c0_49, %c0_50] : memref<256x128xbf16, #tpu.memory_space<vmem>>, vector<256x128xbf16>
    %cst_51 = arith.constant dense<0.000000e+00> : vector<16x128xf32>
    %72 = tpu.matmul %70, %71, %cst_51 {dimension_numbers = #tpu.dot_dimension_numbers<[1], [0], [0], [1], [0, 0, 1, 1], [], []>} : vector<16x256xbf16>, vector<256x128xbf16>, vector<16x128xf32> -> vector<16x128xf32>
    %c0_52 = arith.constant 0 : index
    %c0_53 = arith.constant 0 : index
    %73 = vector.load %arg16[%c0_52, %c0_53] : memref<1x128xf32, #tpu.memory_space<vmem>>, vector<1x128xf32>
    %74 = vector.broadcast %73 : vector<1x128xf32> to vector<16x128xf32>
    %75 = arith.addf %72, %74 : vector<16x128xf32>
    %76 = arith.truncf %75 : vector<16x128xf32> to vector<16x128xbf16>
    %77 = tpu.concatenate %76, %37, %61 in 1 : vector<16x128xbf16>, vector<16x128xbf16>, vector<16x128xbf16> -> vector<16x384xbf16>
    %c0_54 = arith.constant 0 : index
    %c0_55 = arith.constant 0 : index
    %78 = vector.load %arg17[%c0_54, %c0_55] : memref<384x128xbf16, #tpu.memory_space<vmem>>, vector<384x128xbf16>
    %cst_56 = arith.constant dense<0.000000e+00> : vector<16x128xf32>
    %79 = tpu.matmul %77, %78, %cst_56 {dimension_numbers = #tpu.dot_dimension_numbers<[1], [0], [0], [1], [0, 0, 1, 1], [], []>} : vector<16x384xbf16>, vector<384x128xbf16>, vector<16x128xf32> -> vector<16x128xf32>
    %c0_57 = arith.constant 0 : index
    %c0_58 = arith.constant 0 : index
    %80 = vector.load %arg18[%c0_57, %c0_58] : memref<1x128xf32, #tpu.memory_space<vmem>>, vector<1x128xf32>
    %81 = vector.broadcast %80 : vector<1x128xf32> to vector<16x128xf32>
    %82 = arith.addf %79, %81 : vector<16x128xf32>
    %83 = arith.truncf %82 : vector<16x128xf32> to vector<16x128xbf16>
    %84 = tpu.concatenate %76, %83, %45, %69 in 1 : vector<16x128xbf16>, vector<16x128xbf16>, vector<16x128xbf16>, vector<16x128xbf16> -> vector<16x512xbf16>
    %c0_59 = arith.constant 0 : index
    %c0_60 = arith.constant 0 : index
    %85 = vector.load %arg19[%c0_59, %c0_60] : memref<512x128xbf16, #tpu.memory_space<vmem>>, vector<512x128xbf16>
    %cst_61 = arith.constant dense<0.000000e+00> : vector<16x128xf32>
    %86 = tpu.matmul %84, %85, %cst_61 {dimension_numbers = #tpu.dot_dimension_numbers<[1], [0], [0], [1], [0, 0, 1, 1], [], []>} : vector<16x512xbf16>, vector<512x128xbf16>, vector<16x128xf32> -> vector<16x128xf32>
    %c0_62 = arith.constant 0 : index
    %c0_63 = arith.constant 0 : index
    %87 = vector.load %arg20[%c0_62, %c0_63] : memref<1x128xf32, #tpu.memory_space<vmem>>, vector<1x128xf32>
    %88 = vector.broadcast %87 : vector<1x128xf32> to vector<16x128xf32>
    %89 = arith.addf %86, %88 : vector<16x128xf32>
    %90 = tpu.concatenate %75, %82, %89 in 1 : vector<16x128xf32>, vector<16x128xf32>, vector<16x128xf32> -> vector<16x384xf32>
    %c0_64 = arith.constant 0 : index
    %c0_65 = arith.constant 0 : index
    %91 = vector.load %arg21[%c0_64, %c0_65] : memref<16x384xf32, #tpu.memory_space<vmem>>, vector<16x384xf32>
    tpu.vector_store %arg21[%c0_64, %c0_65], %90 {strides = array<i32>} : memref<16x384xf32, #tpu.memory_space<vmem>>, vector<16x384xf32>,
    return
  }
  func.func @transform_0(%arg0: i32) -> (i32, i32) {
    %c0_i32 = arith.constant 0 : i32
    %c0_i32_0 = arith.constant 0 : i32
    return %arg0, %c0_i32 : i32, i32
  }
  func.func @transform_1(%arg0: i32) -> (i32, i32) {
    %c0_i32 = arith.constant 0 : i32
    %c0_i32_0 = arith.constant 0 : i32
    return %arg0, %c0_i32 : i32, i32
  }
  func.func @transform_2(%arg0: i32) -> (i32, i32) {
    %c0_i32 = arith.constant 0 : i32
    %c0_i32_0 = arith.constant 0 : i32
    %c0_i32_1 = arith.constant 0 : i32
    return %c0_i32, %c0_i32_0 : i32, i32
  }
  func.func @transform_3(%arg0: i32) -> (i32, i32) {
    %c0_i32 = arith.constant 0 : i32
    %c0_i32_0 = arith.constant 0 : i32
    %c0_i32_1 = arith.constant 0 : i32
    return %c0_i32, %c0_i32_0 : i32, i32
  }
  func.func @transform_4(%arg0: i32) -> (i32, i32) {
    %c0_i32 = arith.constant 0 : i32
    %c0_i32_0 = arith.constant 0 : i32
    %c0_i32_1 = arith.constant 0 : i32
    return %c0_i32, %c0_i32_0 : i32, i32
  }
  func.func @transform_5(%arg0: i32) -> (i32, i32) {
    %c0_i32 = arith.constant 0 : i32
    %c0_i32_0 = arith.constant 0 : i32
    %c0_i32_1 = arith.constant 0 : i32
    return %c0_i32, %c0_i32_0 : i32, i32
  }
  func.func @transform_6(%arg0: i32) -> (i32, i32) {
    %c0_i32 = arith.constant 0 : i32
    %c0_i32_0 = arith.constant 0 : i32
    %c0_i32_1 = arith.constant 0 : i32
    return %c0_i32, %c0_i32_0 : i32, i32
  }
  func.func @transform_7(%arg0: i32) -> (i32, i32) {
    %c0_i32 = arith.constant 0 : i32
    %c0_i32_0 = arith.constant 0 : i32
    %c0_i32_1 = arith.constant 0 : i32
    return %c0_i32, %c0_i32_0 : i32, i32
  }
  func.func @transform_8(%arg0: i32) -> (i32, i32) {
    %c0_i32 = arith.constant 0 : i32
    %c0_i32_0 = arith.constant 0 : i32
    %c0_i32_1 = arith.constant 0 : i32
    return %c0_i32, %c0_i32_0 : i32, i32
  }
  func.func @transform_9(%arg0: i32) -> (i32, i32) {
    %c0_i32 = arith.constant 0 : i32
    %c0_i32_0 = arith.constant 0 : i32
    %c0_i32_1 = arith.constant 0 : i32
    return %c0_i32, %c0_i32_0 : i32, i32
  }
  func.func @transform_10(%arg0: i32) -> (i32, i32) {
    %c0_i32 = arith.constant 0 : i32
    %c0_i32_0 = arith.constant 0 : i32
    %c0_i32_1 = arith.constant 0 : i32
    return %c0_i32, %c0_i32_0 : i32, i32
  }
  func.func @transform_11(%arg0: i32) -> (i32, i32) {
    %c0_i32 = arith.constant 0 : i32
    %c0_i32_0 = arith.constant 0 : i32
    %c0_i32_1 = arith.constant 0 : i32
    return %c0_i32, %c0_i32_0 : i32, i32
  }
  func.func @transform_12(%arg0: i32) -> (i32, i32) {
    %c0_i32 = arith.constant 0 : i32
    %c0_i32_0 = arith.constant 0 : i32
    %c0_i32_1 = arith.constant 0 : i32
    return %c0_i32, %c0_i32_0 : i32, i32
  }
  func.func @transform_13(%arg0: i32) -> (i32, i32) {
    %c0_i32 = arith.constant 0 : i32
    %c0_i32_0 = arith.constant 0 : i32
    %c0_i32_1 = arith.constant 0 : i32
    return %c0_i32, %c0_i32_0 : i32, i32
  }
  func.func @transform_14(%arg0: i32) -> (i32, i32) {
    %c0_i32 = arith.constant 0 : i32
    %c0_i32_0 = arith.constant 0 : i32
    %c0_i32_1 = arith.constant 0 : i32
    return %c0_i32, %c0_i32_0 : i32, i32
  }
  func.func @transform_15(%arg0: i32) -> (i32, i32) {
    %c0_i32 = arith.constant 0 : i32
    %c0_i32_0 = arith.constant 0 : i32
    %c0_i32_1 = arith.constant 0 : i32
    return %c0_i32, %c0_i32_0 : i32, i32
  }
  func.func @transform_16(%arg0: i32) -> (i32, i32) {
    %c0_i32 = arith.constant 0 : i32
    %c0_i32_0 = arith.constant 0 : i32
    %c0_i32_1 = arith.constant 0 : i32
    return %c0_i32, %c0_i32_0 : i32, i32
  }
  func.func @transform_17(%arg0: i32) -> (i32, i32) {
    %c0_i32 = arith.constant 0 : i32
    %c0_i32_0 = arith.constant 0 : i32
    %c0_i32_1 = arith.constant 0 : i32
    return %c0_i32, %c0_i32_0 : i32, i32
  }
  func.func @transform_18(%arg0: i32) -> (i32, i32) {
    %c0_i32 = arith.constant 0 : i32
    %c0_i32_0 = arith.constant 0 : i32
    %c0_i32_1 = arith.constant 0 : i32
    return %c0_i32, %c0_i32_0 : i32, i32
  }
  func.func @transform_19(%arg0: i32) -> (i32, i32) {
    %c0_i32 = arith.constant 0 : i32
    %c0_i32_0 = arith.constant 0 : i32
    %c0_i32_1 = arith.constant 0 : i32
    return %c0_i32, %c0_i32_0 : i32, i32
  }
  func.func @transform_20(%arg0: i32) -> (i32, i32) {
    %c0_i32 = arith.constant 0 : i32
    %c0_i32_0 = arith.constant 0 : i32
    return %arg0, %c0_i32 : i32, i32
  }
}

</mosaic_0001>

<bundles_post_ra>
// kernel: hln2_forward.1
= control target key start
LH: loop header
LB: loop body
LE: loop exit
PB: predicated region body
PF: predicated region fallthrough
CT: control target
= control target key end

     0   :  { %s19045_s0 = inlined_call_operand.vmem [shape: bf16[16,1792], index: 0, kind: input, shape index: {}]   ;;  %s19046_s1 = inlined_call_operand.vmem [shape: bf16[16,768], index: 1, kind: input, shape index: {}]   ;;  %s19047_s2 = inlined_call_operand.hbm [shape: bf16[1792,896], index: 2, kind: input, shape index: {}]   ;;  %s19048_s3 = inlined_call_operand.hbm [shape: f32[1,896], index: 3, kind: input, shape index: {}]   ;;  %s19049_s4 = inlined_call_operand.hbm [shape: bf16[768,768], index: 4, kind: input, shape index: {}]   ;;  %s19050_s5 = inlined_call_operand.hbm [shape: f32[1,768], index: 5, kind: input, shape index: {}]   ;;  %s19051_s6 = inlined_call_operand.hbm [shape: bf16[768,896], index: 6, kind: input, shape index: {}]   ;;  %s19052_s7 = inlined_call_operand.hbm [shape: f32[1,896], index: 7, kind: input, shape index: {}]   ;;  %s19053_s8 = inlined_call_operand.hbm [shape: bf16[128,128], index: 8, kind: input, shape index: {}]   ;;  %s19054_s9 = inlined_call_operand.hbm [shape: f32[1,128], index: 9, kind: input, shape index: {}]   ;;  %s19055_s10 = inlined_call_operand.hbm [shape: bf16[256,128], index: 10, kind: input, shape index: {}]   ;;  %s19056_s11 = inlined_call_operand.hbm [shape: f32[1,128], index: 11, kind: input, shape index: {}]   ;;  %s19057_s12 = inlined_call_operand.hbm [shape: bf16[512,128], index: 12, kind: input, shape index: {}]   ;;  %s19058_s13 = inlined_call_operand.hbm [shape: f32[1,128], index: 13, kind: input, shape index: {}]   ;;  %s19059_s14 = inlined_call_operand.hbm [shape: bf16[256,128], index: 14, kind: input, shape index: {}]   ;;  %s19060_s15 = inlined_call_operand.hbm [shape: f32[1,128], index: 15, kind: input, shape index: {}]   ;;  %s19061_s16 = inlined_call_operand.hbm [shape: bf16[384,128], index: 16, kind: input, shape index: {}]   ;;  %s19062_s17 = inlined_call_operand.hbm [shape: f32[1,128], index: 17, kind: input, shape index: {}]   ;;  %s19063_s18 = inlined_call_operand.hbm [shape: bf16[512,128], index: 18, kind: input, shape index: {}]   ;;  %s19064_s19 = inlined_call_operand.hbm [shape: f32[1,128], index: 19, kind: input, shape index: {}]   ;;  %s19065_s20 = inlined_call_operand.vmem [shape: f32[16,384], index: 20, kind: output, shape index: {}]  }
   0x1   :  { %19090 = sst [smem:[#allocation55_spill]] %s19045_s0 }
   0x2   :  { %19091 = sst [smem:[#allocation56_spill]] %s19046_s1 }
   0x3   :  { %19092 = sst [smem:[#allocation57_spill]] %s19047_s2 }
   0x4   :  { %19093 = sst [smem:[#allocation58_spill]] %s19048_s3 }
   0x5   :  { %19094 = sst [smem:[#allocation59_spill]] %s19049_s4 }
   0x6   :  { %25 = vsyncpa [#allocation3], 0 }
   0x7   :  { %26 = vsyncpa [#allocation5], 0 }
   0x8   :  { %27 = vsyncpa [#allocation8], 0 }
   0x9   :  { %28 = vsyncpa [#allocation11], 0 }
   0xa   :  { %29 = vsyncpa [#allocation14], 0 }
   0xb   :  { %30 = vsyncpa [#allocation17], 0 }
   0xc   :  { %31 = vsyncpa [#allocation20], 0 }
   0xd   :  { %32 = vsyncpa [#allocation23], 0 }
   0xe   :  { %33 = vsyncpa [#allocation26], 0 }
   0xf   :  { %34 = vsyncpa [#allocation29], 0  ;;  %s17951_s1 = smov [#allocation4]   ;;  %s17952_s23 = smov [#allocation7]  }
  0x10   :  { %s57_s22 = sshll.u32 %s17951_s1, 4  ;;  %s79_s24 = sshll.u32 %s17952_s23, 4  ;;  %s58_s22 = int_to_ptr.vmem [resolvable:$true] %s57_s22  ;;  %s80_s24 = int_to_ptr.vmem [resolvable:$true] %s79_s24 }
  0x11   :  { %s19095_s3 = sld [smem:[#allocation58_spill]] }
  0x17   :  { %s17535_s26 = scalar_lea.hbm %s19095_s3, 112 }
  0x18   :  { %p17536_p0 = scmp.ne.s32.totalorder %s19095_s3, %s17535_s26  ;;  %p17539_p1 = scmp.lt.u32.totalorder %s17535_s26, %s19095_s3 }
  0x1a   :  { %p17541_p2 = pnand %p17539_p1, %p17536_p0 }
  0x1c   :  { %17544 = shalt.err (!%p17541_p2)
}
  0x1d   :  { %s17545_s30 = scalar_lea.vmem %s58_s22, 112  ;;  %s17549_s0 = scalar_lea.vmem %s58_s22, 128 }
  0x1e   :  { %p17546_p3 = scmp.ne.s32.totalorder %s58_s22, %s17545_s30  ;;  %p17550_p4 = scmp.lt.s32.totalorder %s58_s22, %s58_s22 }
  0x1f   :  { %p17551_p5 = scmp.lt.s32.totalorder %s17549_s0, %s17545_s30 }
  0x21   :  { %p17552_p6 = por %p17551_p5, %p17550_p4 }
  0x23   :  { %p17553_p7 = pnand %p17552_p6, %p17546_p3 }
  0x25   :  { %17556 = shalt.err (!%p17553_p7)
}
  0x26   :  { %60 = dma.hbm_to_vmem [thread:$0]  %s19095_s3, 112, %s58_s22, [#allocation5]  }
  0x27   :  { %s17557_s25 = scalar_lea.hbm %s19050_s5, 96 }
  0x28   :  { %p17558_p8 = scmp.ne.s32.totalorder %s19050_s5, %s17557_s25  ;;  %p17561_p9 = scmp.lt.u32.totalorder %s17557_s25, %s19050_s5 }
  0x2a   :  { %p17563_p10 = pnand %p17561_p9, %p17558_p8 }
  0x2c   :  { %17566 = shalt.err (!%p17563_p10)
}
  0x2d   :  { %s17567_s29 = scalar_lea.vmem %s80_s24, 96  ;;  %p17572_p12 = scmp.lt.s32.totalorder %s80_s24, %s80_s24 }
  0x2e   :  { %p17568_p11 = scmp.ne.s32.totalorder %s80_s24, %s17567_s29  ;;  %p17573_p13 = scmp.lt.s32.totalorder %s17567_s29, %s17567_s29 }
  0x30   :  { %p17574_p0 = por %p17573_p13, %p17572_p12 }
  0x32   :  { %p17575_p1 = pnand %p17574_p0, %p17568_p11 }
  0x34   :  { %17578 = shalt.err (!%p17575_p1)
}
  0x35   :  { %82 = dma.hbm_to_vmem [thread:$0]  %s19050_s5, 96, %s80_s24, [#allocation8]  }
  0x36   :  { %s17953_s30 = smov [#allocation10]   ;;  %s17954_s21 = smov [#allocation13]  }
  0x37   :  { %s101_s0 = sshll.u32 %s17953_s30, 4  ;;  %s123_s1 = sshll.u32 %s17954_s21, 4  ;;  %s102_s0 = int_to_ptr.vmem [resolvable:$true] %s101_s0  ;;  %s124_s1 = int_to_ptr.vmem [resolvable:$true] %s123_s1 }
  0x38   :  { %s17579_s25 = scalar_lea.hbm %s19052_s7, 112 }
  0x39   :  { %p17580_p2 = scmp.ne.s32.totalorder %s19052_s7, %s17579_s25  ;;  %p17583_p3 = scmp.lt.u32.totalorder %s17579_s25, %s19052_s7 }
  0x3b   :  { %p17585_p4 = pnand %p17583_p3, %p17580_p2 }
  0x3d   :  { %17588 = shalt.err (!%p17585_p4)
}
  0x3e   :  { %s17589_s5 = scalar_lea.vmem %s102_s0, 112  ;;  %s17593_s24 = scalar_lea.vmem %s102_s0, 128 }
  0x3f   :  { %p17590_p5 = scmp.ne.s32.totalorder %s102_s0, %s17589_s5  ;;  %p17594_p6 = scmp.lt.s32.totalorder %s102_s0, %s102_s0 }
  0x40   :  { %p17595_p7 = scmp.lt.s32.totalorder %s17593_s24, %s17589_s5 }
  0x42   :  { %p17596_p8 = por %p17595_p7, %p17594_p6 }
  0x44   :  { %p17597_p9 = pnand %p17596_p8, %p17590_p5 }
  0x46   :  { %17600 = shalt.err (!%p17597_p9)
}
  0x47   :  { %104 = dma.hbm_to_vmem [thread:$0]  %s19052_s7, 112, %s102_s0, [#allocation11]  }
  0x48   :  { %s17601_s21 = scalar_lea.hbm %s19054_s9, 16 }
  0x49   :  { %p17602_p10 = scmp.ne.s32.totalorder %s19054_s9, %s17601_s21  ;;  %p17605_p11 = scmp.lt.u32.totalorder %s17601_s21, %s19054_s9 }
  0x4b   :  { %p17607_p12 = pnand %p17605_p11, %p17602_p10 }
  0x4d   :  { %17610 = shalt.err (!%p17607_p12)
}
  0x4e   :  { %s17611_s26 = scalar_lea.vmem %s124_s1, 16  ;;  %s17615_s28 = scalar_lea.vmem %s124_s1, 32 }
  0x4f   :  { %p17612_p13 = scmp.ne.s32.totalorder %s124_s1, %s17611_s26  ;;  %p17616_p0 = scmp.lt.s32.totalorder %s124_s1, %s124_s1 }
  0x50   :  { %p17617_p1 = scmp.lt.s32.totalorder %s17615_s28, %s17611_s26 }
  0x52   :  { %p17618_p2 = por %p17617_p1, %p17616_p0 }
  0x54   :  { %p17619_p3 = pnand %p17618_p2, %p17612_p13 }
  0x56   :  { %17622 = shalt.err (!%p17619_p3)
}
  0x57   :  { %126 = dma.hbm_to_vmem [thread:$0]  %s19054_s9, 16, %s124_s1, [#allocation14]  }
  0x58   :  { %s17955_s4 = smov [#allocation16]   ;;  %s17956_s24 = smov [#allocation19]  }
  0x59   :  { %s145_s5 = sshll.u32 %s17955_s4, 4  ;;  %s167_s29 = sshll.u32 %s17956_s24, 4  ;;  %s146_s5 = int_to_ptr.vmem [resolvable:$true] %s145_s5  ;;  %s168_s29 = int_to_ptr.vmem [resolvable:$true] %s167_s29 }
  0x5a   :  { %s17623_s30 = scalar_lea.hbm %s19056_s11, 16 }
  0x5b   :  { %p17624_p4 = scmp.ne.s32.totalorder %s19056_s11, %s17623_s30  ;;  %p17627_p5 = scmp.lt.u32.totalorder %s17623_s30, %s19056_s11 }
  0x5d   :  { %p17629_p6 = pnand %p17627_p5, %p17624_p4 }
  0x5f   :  { %17632 = shalt.err (!%p17629_p6)
}
  0x60   :  { %s17633_s9 = scalar_lea.vmem %s146_s5, 16  ;;  %s17637_s1 = scalar_lea.vmem %s146_s5, 32 }
  0x61   :  { %p17634_p7 = scmp.ne.s32.totalorder %s146_s5, %s17633_s9  ;;  %p17638_p8 = scmp.lt.s32.totalorder %s146_s5, %s146_s5 }
  0x62   :  { %p17639_p9 = scmp.lt.s32.totalorder %s17637_s1, %s17633_s9 }
  0x64   :  { %p17640_p10 = por %p17639_p9, %p17638_p8 }
  0x66   :  { %p17641_p11 = pnand %p17640_p10, %p17634_p7 }
  0x68   :  { %17644 = shalt.err (!%p17641_p11)
}
  0x69   :  { %148 = dma.hbm_to_vmem [thread:$0]  %s19056_s11, 16, %s146_s5, [#allocation17]  }
  0x6a   :  { %s17645_s0 = scalar_lea.hbm %s19058_s13, 16 }
  0x6b   :  { %p17646_p12 = scmp.ne.s32.totalorder %s19058_s13, %s17645_s0  ;;  %p17649_p13 = scmp.lt.u32.totalorder %s17645_s0, %s19058_s13 }
  0x6d   :  { %p17651_p0 = pnand %p17649_p13, %p17646_p12 }
  0x6f   :  { %17654 = shalt.err (!%p17651_p0)
}
  0x70   :  { %s17655_s30 = scalar_lea.vmem %s168_s29, 16  ;;  %s17659_s21 = scalar_lea.vmem %s168_s29, 32 }
  0x71   :  { %p17656_p1 = scmp.ne.s32.totalorder %s168_s29, %s17655_s30  ;;  %p17660_p2 = scmp.lt.s32.totalorder %s168_s29, %s168_s29 }
  0x72   :  { %p17661_p3 = scmp.lt.s32.totalorder %s17659_s21, %s17655_s30 }
  0x74   :  { %p17662_p4 = por %p17661_p3, %p17660_p2 }
  0x76   :  { %p17663_p5 = pnand %p17662_p4, %p17656_p1 }
  0x78   :  { %17666 = shalt.err (!%p17663_p5)
}
  0x79   :  { %170 = dma.hbm_to_vmem [thread:$0]  %s19058_s13, 16, %s168_s29, [#allocation20]  }
  0x7a   :  { %s17957_s23 = smov [#allocation22]   ;;  %s17958_s25 = smov [#allocation25]  }
  0x7b   :  { %s189_s2 = sshll.u32 %s17957_s23, 4  ;;  %s211_s9 = sshll.u32 %s17958_s25, 4  ;;  %s190_s2 = int_to_ptr.vmem [resolvable:$true] %s189_s2  ;;  %s212_s9 = int_to_ptr.vmem [resolvable:$true] %s211_s9 }
  0x7c   :  { %s17667_s26 = scalar_lea.hbm %s19060_s15, 16 }
  0x7d   :  { %p17668_p6 = scmp.ne.s32.totalorder %s19060_s15, %s17667_s26  ;;  %p17671_p7 = scmp.lt.u32.totalorder %s17667_s26, %s19060_s15 }
  0x7f   :  { %p17673_p8 = pnand %p17671_p7, %p17668_p6 }
  0x81   :  { %17676 = shalt.err (!%p17673_p8)
}
  0x82   :  { %s17677_s13 = scalar_lea.vmem %s190_s2, 16  ;;  %s17681_s29 = scalar_lea.vmem %s190_s2, 32 }
  0x83   :  { %p17678_p9 = scmp.ne.s32.totalorder %s190_s2, %s17677_s13  ;;  %p17682_p10 = scmp.lt.s32.totalorder %s190_s2, %s190_s2 }
  0x84   :  { %p17683_p11 = scmp.lt.s32.totalorder %s17681_s29, %s17677_s13 }
  0x86   :  { %p17684_p12 = por %p17683_p11, %p17682_p10 }
  0x88   :  { %p17685_p13 = pnand %p17684_p12, %p17678_p9 }
  0x8a   :  { %17688 = shalt.err (!%p17685_p13)
}
  0x8b   :  { %192 = dma.hbm_to_vmem [thread:$0]  %s19060_s15, 16, %s190_s2, [#allocation23]  }
  0x8c   :  { %s17689_s21 = scalar_lea.hbm %s19062_s17, 16 }
  0x8d   :  { %p17690_p0 = scmp.ne.s32.totalorder %s19062_s17, %s17689_s21  ;;  %p17693_p1 = scmp.lt.u32.totalorder %s17689_s21, %s19062_s17 }
  0x8f   :  { %p17695_p2 = pnand %p17693_p1, %p17690_p0 }
  0x91   :  { %17698 = shalt.err (!%p17695_p2)
}
  0x92   :  { %s17699_s1 = scalar_lea.vmem %s212_s9, 16  ;;  %s17703_s27 = scalar_lea.vmem %s212_s9, 32 }
  0x93   :  { %p17700_p3 = scmp.ne.s32.totalorder %s212_s9, %s17699_s1  ;;  %p17704_p4 = scmp.lt.s32.totalorder %s212_s9, %s212_s9 }
  0x94   :  { %p17705_p5 = scmp.lt.s32.totalorder %s17703_s27, %s17699_s1 }
  0x96   :  { %p17706_p6 = por %p17705_p5, %p17704_p4 }
  0x98   :  { %p17707_p7 = pnand %p17706_p6, %p17700_p3 }
  0x9a   :  { %17710 = shalt.err (!%p17707_p7)
}
  0x9b   :  { %214 = dma.hbm_to_vmem [thread:$0]  %s19062_s17, 16, %s212_s9, [#allocation26]  }
  0x9c   :  { %s17959_s26 = smov [#allocation2]   ;;  %s19096_s4 = sld [smem:[#allocation57_spill]] }
  0x9d   :  { %s44_s28 = sshll.u32 %s17959_s26, 4  ;;  %s45_s28 = int_to_ptr.vmem [resolvable:$true] %s44_s28 }
  0xa2   :  { %s17711_s13 = scalar_lea.hbm %s19096_s4, 100352 }
  0xa3   :  { %p17712_p8 = scmp.ne.s32.totalorder %s19096_s4, %s17711_s13  ;;  %p17715_p9 = scmp.lt.u32.totalorder %s17711_s13, %s19096_s4 }
  0xa5   :  { %p17717_p10 = pnand %p17715_p9, %p17712_p8 }
  0xa7   :  { %17720 = shalt.err (!%p17717_p10)
}
  0xa8   :  { %s17721_s30 = scalar_lea.vmem %s45_s28, 100352  ;;  %p17726_p12 = scmp.lt.s32.totalorder %s45_s28, %s45_s28 }
  0xa9   :  { %p17722_p11 = scmp.ne.s32.totalorder %s45_s28, %s17721_s30  ;;  %p17727_p13 = scmp.lt.s32.totalorder %s17721_s30, %s17721_s30 }
  0xab   :  { %p17728_p0 = por %p17727_p13, %p17726_p12 }
  0xad   :  { %p17729_p1 = pnand %p17728_p0, %p17722_p11 }
  0xaf   :  { %17732 = shalt.err (!%p17729_p1)
}
  0xb0   :  { %s17960_s17 = smov 448   ;;  %s17961_s9 = smov 28  }
  0xb1   :  { %50 = dma.hbm_to_vmem [thread:$0]  %s19096_s4, 100352, %s45_s28, [#allocation3], %s17960_s17, %s17960_s17, %s17961_s9  }
  0xb2   :  { %s17962_s5 = smov [#allocation6]   ;;  %s19097_s27 = sld [smem:[#allocation59_spill]] }
  0xb3   :  { %s66_s23 = sshll.u32 %s17962_s5, 4  ;;  %s67_s23 = int_to_ptr.vmem [resolvable:$true] %s66_s23 }
  0xb8   :  { %s17733_s15 = scalar_lea.hbm %s19097_s27, 36864 }
  0xb9   :  { %p17734_p2 = scmp.ne.s32.totalorder %s19097_s27, %s17733_s15  ;;  %p17737_p3 = scmp.lt.u32.totalorder %s17733_s15, %s19097_s27 }
  0xbb   :  { %p17739_p4 = pnand %p17737_p3, %p17734_p2 }
  0xbd   :  { %17742 = shalt.err (!%p17739_p4)
}
  0xbe   :  { %s17743_s13 = scalar_lea.vmem %s67_s23, 36864  ;;  %p17748_p6 = scmp.lt.s32.totalorder %s67_s23, %s67_s23 }
  0xbf   :  { %p17744_p5 = scmp.ne.s32.totalorder %s67_s23, %s17743_s13  ;;  %p17749_p7 = scmp.lt.s32.totalorder %s17743_s13, %s17743_s13 }
  0xc1   :  { %p17750_p8 = por %p17749_p7, %p17748_p6 }
  0xc3   :  { %p17751_p9 = pnand %p17750_p8, %p17744_p5 }
  0xc5   :  { %17754 = shalt.err (!%p17751_p9)
}
  0xc6   :  { %s17963_s28 = smov 384   ;;  %s17964_s4 = smov 24  }
  0xc7   :  { %72 = dma.hbm_to_vmem [thread:$0]  %s19097_s27, 36864, %s67_s23, [#allocation5], %s17963_s28, %s17963_s28, %s17964_s4  }
  0xc8   :  { %s17965_s22 = smov [#allocation9]   ;;  %s17966_s30 = smov [#allocation12]  }
  0xc9   :  { %s88_s3 = sshll.u32 %s17965_s22, 4  ;;  %s110_s21 = sshll.u32 %s17966_s30, 4  ;;  %s89_s3 = int_to_ptr.vmem [resolvable:$true] %s88_s3  ;;  %s18205_s21 = int_to_ptr.vmem [resolvable:$true] %s110_s21 }
  0xca   :  { %s17755_s25 = scalar_lea.hbm %s19051_s6, 43008 }
  0xcb   :  { %p17756_p10 = scmp.ne.s32.totalorder %s19051_s6, %s17755_s25  ;;  %p17759_p11 = scmp.lt.u32.totalorder %s17755_s25, %s19051_s6 }
  0xcd   :  { %p17761_p12 = pnand %p17759_p11, %p17756_p10 }
  0xcf   :  { %17764 = shalt.err (!%p17761_p12)
}
  0xd0   :  { %s17765_s23 = scalar_lea.vmem %s89_s3, 43008  ;;  %p17770_p0 = scmp.lt.s32.totalorder %s89_s3, %s89_s3 }
  0xd1   :  { %p17766_p13 = scmp.ne.s32.totalorder %s89_s3, %s17765_s23  ;;  %p17771_p1 = scmp.lt.s32.totalorder %s17765_s23, %s17765_s23 }
  0xd3   :  { %p17772_p2 = por %p17771_p1, %p17770_p0 }
  0xd5   :  { %p17773_p3 = pnand %p17772_p2, %p17766_p13 }
  0xd7   :  { %17776 = shalt.err (!%p17773_p3)
}
  0xd8   :  { %94 = dma.hbm_to_vmem [thread:$0]  %s19051_s6, 43008, %s89_s3, [#allocation8], %s17960_s17, %s17960_s17, %s17961_s9  }
  0xd9   :  { %s17777_s28 = scalar_lea.hbm %s19053_s8, 1024 }
  0xda   :  { %p17778_p4 = scmp.ne.s32.totalorder %s19053_s8, %s17777_s28  ;;  %p17781_p5 = scmp.lt.u32.totalorder %s17777_s28, %s19053_s8 }
  0xdc   :  { %p17783_p6 = pnand %p17781_p5, %p17778_p4 }
  0xde   :  { %17786 = shalt.err (!%p17783_p6)
}
  0xdf   :  { %s17787_s30 = scalar_lea.vmem %s18205_s21, 1024  ;;  %p17792_p8 = scmp.lt.s32.totalorder %s18205_s21, %s18205_s21 }
  0xe0   :  { %p17788_p7 = scmp.ne.s32.totalorder %s18205_s21, %s17787_s30  ;;  %p17793_p9 = scmp.lt.s32.totalorder %s17787_s30, %s17787_s30 }
  0xe2   :  { %p17794_p10 = por %p17793_p9, %p17792_p8 }
  0xe4   :  { %p17795_p11 = pnand %p17794_p10, %p17788_p7 }
  0xe6   :  { %17798 = shalt.err (!%p17795_p11)
}
  0xe7   :  { %s17967_s6 = smov 64   ;;  %s17968_s17 = smov 4  }
  0xe8   :  { %116 = dma.hbm_to_vmem [thread:$0]  %s19053_s8, 1024, %s18205_s21, [#allocation11], %s17967_s6, %s17967_s6, %s17968_s17  }
  0xe9   :  { %s17969_s11 = smov [#allocation15]   ;;  %s17970_s25 = smov [#allocation18]  }
  0xea   :  { %s132_s5 = sshll.u32 %s17969_s11, 4  ;;  %s154_s1 = sshll.u32 %s17970_s25, 4  ;;  %s133_s5 = int_to_ptr.vmem [resolvable:$true] %s132_s5  ;;  %s18242_s1 = int_to_ptr.vmem [resolvable:$true] %s154_s1 }
  0xeb   :  { %s17799_s26 = scalar_lea.hbm %s19055_s10, 2048 }
  0xec   :  { %p17800_p12 = scmp.ne.s32.totalorder %s19055_s10, %s17799_s26  ;;  %p17803_p13 = scmp.lt.u32.totalorder %s17799_s26, %s19055_s10 }
  0xee   :  { %p17805_p0 = pnand %p17803_p13, %p17800_p12 }
  0xf0   :  { %17808 = shalt.err (!%p17805_p0)
}
  0xf1   :  { %s17809_s8 = scalar_lea.vmem %s133_s5, 2048  ;;  %p17814_p2 = scmp.lt.s32.totalorder %s133_s5, %s133_s5 }
  0xf2   :  { %p17810_p1 = scmp.ne.s32.totalorder %s133_s5, %s17809_s8  ;;  %p17815_p3 = scmp.lt.s32.totalorder %s17809_s8, %s17809_s8 }
  0xf4   :  { %p17816_p4 = por %p17815_p3, %p17814_p2 }
  0xf6   :  { %p17817_p5 = pnand %p17816_p4, %p17810_p1 }
  0xf8   :  { %17820 = shalt.err (!%p17817_p5)
}
  0xf9   :  { %138 = dma.hbm_to_vmem [thread:$0]  %s19055_s10, 2048, %s133_s5, [#allocation14], %s17967_s6, %s17967_s6, %s17968_s17  }
  0xfa   :  { %s17821_s29 = scalar_lea.hbm %s19057_s12, 4096 }
  0xfb   :  { %p17822_p6 = scmp.ne.s32.totalorder %s19057_s12, %s17821_s29  ;;  %p17825_p7 = scmp.lt.u32.totalorder %s17821_s29, %s19057_s12 }
  0xfd   :  { %p17827_p8 = pnand %p17825_p7, %p17822_p6 }
  0xff   :  { %17830 = shalt.err (!%p17827_p8)
}
 0x100   :  { %s17831_s3 = scalar_lea.vmem %s18242_s1, 4096  ;;  %p17836_p10 = scmp.lt.s32.totalorder %s18242_s1, %s18242_s1 }
 0x101   :  { %p17832_p9 = scmp.ne.s32.totalorder %s18242_s1, %s17831_s3  ;;  %p17837_p11 = scmp.lt.s32.totalorder %s17831_s3, %s17831_s3 }
 0x103   :  { %p17838_p12 = por %p17837_p11, %p17836_p10 }
 0x105   :  { %p17839_p13 = pnand %p17838_p12, %p17832_p9 }
 0x107   :  { %17842 = shalt.err (!%p17839_p13)
}
 0x108   :  { %160 = dma.hbm_to_vmem [thread:$0]  %s19057_s12, 4096, %s18242_s1, [#allocation17], %s17967_s6, %s17967_s6, %s17968_s17  }
 0x109   :  { %s17971_s5 = smov [#allocation21]   ;;  %s17972_s15 = smov [#allocation24]  }
 0x10a   :  { %s176_s25 = sshll.u32 %s17971_s5, 4  ;;  %s198_s2 = sshll.u32 %s17972_s15, 4  ;;  %s177_s25 = int_to_ptr.vmem [resolvable:$true] %s176_s25  ;;  %s18279_s2 = int_to_ptr.vmem [resolvable:$true] %s198_s2 }
 0x10b   :  { %s17843_s27 = scalar_lea.hbm %s19059_s14, 2048 }
 0x10c   :  { %p17844_p0 = scmp.ne.s32.totalorder %s19059_s14, %s17843_s27  ;;  %p17847_p1 = scmp.lt.u32.totalorder %s17843_s27, %s19059_s14 }
 0x10e   :  { %p17849_p2 = pnand %p17847_p1, %p17844_p0 }
 0x110   :  { %17852 = shalt.err (!%p17849_p2)
}
 0x111   :  { %s17853_s12 = scalar_lea.vmem %s177_s25, 2048  ;;  %p17858_p4 = scmp.lt.s32.totalorder %s177_s25, %s177_s25 }
 0x112   :  { %p17854_p3 = scmp.ne.s32.totalorder %s177_s25, %s17853_s12  ;;  %p17859_p5 = scmp.lt.s32.totalorder %s17853_s12, %s17853_s12 }
 0x114   :  { %p17860_p6 = por %p17859_p5, %p17858_p4 }
 0x116   :  { %p17861_p7 = pnand %p17860_p6, %p17854_p3 }
 0x118   :  { %17864 = shalt.err (!%p17861_p7)
}
 0x119   :  { %182 = dma.hbm_to_vmem [thread:$0]  %s19059_s14, 2048, %s177_s25, [#allocation20], %s17967_s6, %s17967_s6, %s17968_s17  }
 0x11a   :  { %s17865_s29 = scalar_lea.hbm %s19061_s16, 3072 }
 0x11b   :  { %p17866_p8 = scmp.ne.s32.totalorder %s19061_s16, %s17865_s29  ;;  %p17869_p9 = scmp.lt.u32.totalorder %s17865_s29, %s19061_s16 }
 0x11d   :  { %p17871_p10 = pnand %p17869_p9, %p17866_p8 }
 0x11f   :  { %17874 = shalt.err (!%p17871_p10)
}
 0x120   :  { %s17875_s3 = scalar_lea.vmem %s18279_s2, 3072  ;;  %p17880_p12 = scmp.lt.s32.totalorder %s18279_s2, %s18279_s2 }
 0x121   :  { %p17876_p11 = scmp.ne.s32.totalorder %s18279_s2, %s17875_s3  ;;  %p17881_p13 = scmp.lt.s32.totalorder %s17875_s3, %s17875_s3 }
 0x123   :  { %p17882_p0 = por %p17881_p13, %p17880_p12 }
 0x125   :  { %p17883_p1 = pnand %p17882_p0, %p17876_p11 }
 0x127   :  { %17886 = shalt.err (!%p17883_p1)
}
 0x128   :  { %204 = dma.hbm_to_vmem [thread:$0]  %s19061_s16, 3072, %s18279_s2, [#allocation23], %s17967_s6, %s17967_s6, %s17968_s17  }
 0x129   :  { %s17973_s11 = smov [#allocation27]   ;;  %s17974_s25 = smov [#allocation28]  }
 0x12a   :  { %s220_s5 = sshll.u32 %s17973_s11, 4  ;;  %s233_s15 = sshll.u32 %s17974_s25, 4  ;;  %s221_s5 = int_to_ptr.vmem [resolvable:$true] %s220_s5  ;;  %s234_s15 = int_to_ptr.vmem [resolvable:$true] %s233_s15 }
 0x12b   :  { %s17887_s27 = scalar_lea.hbm %s19063_s18, 4096 }
 0x12c   :  { %p17888_p2 = scmp.ne.s32.totalorder %s19063_s18, %s17887_s27  ;;  %p17891_p3 = scmp.lt.u32.totalorder %s17887_s27, %s19063_s18 }
 0x12e   :  { %p17893_p4 = pnand %p17891_p3, %p17888_p2 }
 0x130   :  { %17896 = shalt.err (!%p17893_p4)
}
 0x131   :  { %s17897_s16 = scalar_lea.vmem %s221_s5, 4096  ;;  %p17902_p6 = scmp.lt.s32.totalorder %s221_s5, %s221_s5 }
 0x132   :  { %p17898_p5 = scmp.ne.s32.totalorder %s221_s5, %s17897_s16  ;;  %p17903_p7 = scmp.lt.s32.totalorder %s17897_s16, %s17897_s16 }
 0x134   :  { %p17904_p8 = por %p17903_p7, %p17902_p6 }
 0x136   :  { %p17905_p9 = pnand %p17904_p8, %p17898_p5 }
 0x138   :  { %17908 = shalt.err (!%p17905_p9)
}
 0x139   :  { %226 = dma.hbm_to_vmem [thread:$0]  %s19063_s18, 4096, %s221_s5, [#allocation26], %s17967_s6, %s17967_s6, %s17968_s17  }
 0x13a   :  { %s17909_s28 = scalar_lea.hbm %s19064_s19, 16 }
 0x13b   :  { %p17910_p10 = scmp.ne.s32.totalorder %s19064_s19, %s17909_s28  ;;  %p17913_p11 = scmp.lt.u32.totalorder %s17909_s28, %s19064_s19 }
 0x13d   :  { %p17915_p12 = pnand %p17913_p11, %p17910_p10 }
 0x13f   :  { %17918 = shalt.err (!%p17915_p12)
}
 0x140   :  { %s17919_s30 = scalar_lea.vmem %s234_s15, 16  ;;  %s17923_s9 = scalar_lea.vmem %s234_s15, 32 }
 0x141   :  { %p17920_p13 = scmp.ne.s32.totalorder %s234_s15, %s17919_s30  ;;  %p17924_p0 = scmp.lt.s32.totalorder %s234_s15, %s234_s15 }
 0x142   :  { %p17925_p1 = scmp.lt.s32.totalorder %s17923_s9, %s17919_s30 }
 0x144   :  { %p17926_p2 = por %p17925_p1, %p17924_p0 }
 0x146   :  { %p17927_p3 = pnand %p17926_p2, %p17920_p13 }
 0x148   :  { %17930 = shalt.err (!%p17927_p3)
}
 0x149   :  { %236 = dma.hbm_to_vmem [thread:$0]  %s19064_s19, 16, %s234_s15, [#allocation29]  }
 0x14a   :  { %17931 = dma.done.wait [#allocation3], 100352  }
 0x14b   :  { %17932 = vsyncadd [#allocation3], 4294866944 }
 0x14c   :  { %17933 = dma.done.wait [#allocation5], 36976  }
 0x14d   :  { %17934 = vsyncadd [#allocation5], 4294930320 }
 0x14e   :  { %17935 = dma.done.wait [#allocation8], 43104  }
 0x14f   :  { %17936 = vsyncadd [#allocation8], 4294924192 }
 0x150   :  { %17937 = dma.done.wait [#allocation11], 1136  }
 0x151   :  { %17938 = vsyncadd [#allocation11], 4294966160 }
 0x152   :  { %17939 = dma.done.wait [#allocation14], 2064  }
 0x153   :  { %17940 = vsyncadd [#allocation14], 4294965232 }
 0x154   :  { %17941 = dma.done.wait [#allocation17], 4112  }
 0x155   :  { %17942 = vsyncadd [#allocation17], 4294963184 }
 0x156   :  { %17943 = dma.done.wait [#allocation20], 2064  }
 0x157   :  { %17944 = vsyncadd [#allocation20], 4294965232 }
 0x158   :  { %17945 = dma.done.wait [#allocation23], 3088  }
 0x159   :  { %17946 = vsyncadd [#allocation23], 4294964208 }
 0x15a   :  { %17947 = dma.done.wait [#allocation26], 4112  }
 0x15b   :  { %17948 = vsyncadd [#allocation26], 4294963184 }
 0x15c   :  { %17949 = dma.done.wait [#allocation29], 16  }
 0x15d   :  { %17950 = vsyncadd [#allocation29], 4294967280  ;;  %v15317_v0 = vld [vmem:[#allocation2 + $0x4] ss:$28 sps:$4 sm:$0xff]   ;;  %v15319_v1 = vld [vmem:[#allocation2 + $0xc] ss:$28 sps:$4 sm:$0xff]  }
 0x15e   :  { %5341 = vmatprep.subr.bf16.mxu0 %v15317_v0  ;;  %v15321_v2 = vld [vmem:[#allocation2] ss:$28 sps:$4 sm:$0xff]   ;;  %v15322_v3 = vld [vmem:[#allocation2 + $0x8] ss:$28 sps:$4 sm:$0xff]   ;;  %5642 = vmatprep.subr.bf16.mxu1 %v15319_v1  ;;  %v15327_v6 = vld [vmem:[#allocation2 + $0x38] ss:$28 sps:$4 sm:$0xff]  }
 0x15f   :  { %v15323_v4 = vld [vmem:[#allocation2 + $0x3c] ss:$28 sps:$4 sm:$0xff]   ;;  %5342 = vmatpush1.bf16.msra.mxu0 %v15321_v2  ;;  %5643 = vmatpush1.bf16.msra.mxu1 %v15322_v3  ;;  %v15325_v5 = vld [vmem:[#allocation2 + $0x44] ss:$28 sps:$4 sm:$0xff]   ;;  %v15329_v8 = vld [vmem:[#allocation2 + $0x74] ss:$28 sps:$4 sm:$0xff]  }
 0x160   :  { %5343 = vmatprep.subr.bf16.mxu0 %v15323_v4  ;;  %v15328_v7 = vld [vmem:[#allocation2 + $0x40] ss:$28 sps:$4 sm:$0xff]   ;;  %5644 = vmatprep.subr.bf16.mxu1 %v15325_v5  ;;  %v15333_v10 = vld [vmem:[#allocation2 + $0x70] ss:$28 sps:$4 sm:$0xff]   ;;  %v15334_v11 = vld [vmem:[#allocation2 + $0x78] ss:$28 sps:$4 sm:$0xff]  }
 0x161   :  { %v15331_v9 = vld [vmem:[#allocation2 + $0x7c] ss:$28 sps:$4 sm:$0xff]   ;;  %v15335_v12 = vld [vmem:[#allocation2 + $0xac] ss:$28 sps:$4 sm:$0xff]   ;;  %v15337_v13 = vld [vmem:[#allocation2 + $0xb4] ss:$28 sps:$4 sm:$0xff]  }
 0x162   :  { %v15339_v14 = vld [vmem:[#allocation2 + $0xa8] ss:$28 sps:$4 sm:$0xff]   ;;  %v15340_v15 = vld [vmem:[#allocation2 + $0xb0] ss:$28 sps:$4 sm:$0xff]   ;;  %v15345_v18 = vld [vmem:[#allocation2 + $0xe0] ss:$28 sps:$4 sm:$0xff]  }
 0x163   :  { %5344 = vmatpush1.bf16.msra.mxu0 %v15327_v6  ;;  %5645 = vmatpush1.bf16.msra.mxu1 %v15328_v7  ;;  %v15341_v16 = vld [vmem:[#allocation2 + $0xe4] ss:$28 sps:$4 sm:$0xff]   ;;  %v15343_v17 = vld [vmem:[#allocation2 + $0xec] ss:$28 sps:$4 sm:$0xff]   ;;  %v15347_v20 = vld [vmem:[#allocation2 + $0x11c] ss:$28 sps:$4 sm:$0xff]  }
 0x164   :  { %5345 = vmatprep.subr.bf16.mxu0 %v15329_v8  ;;  %5646 = vmatprep.subr.bf16.mxu1 %v15331_v9  ;;  %v15346_v19 = vld [vmem:[#allocation2 + $0xe8] ss:$28 sps:$4 sm:$0xff]   ;;  %v15351_v22 = vld [vmem:[#allocation2 + $0x118] ss:$28 sps:$4 sm:$0xff]   ;;  %v15352_v23 = vld [vmem:[#allocation2 + $0x120] ss:$28 sps:$4 sm:$0xff]  }
 0x165   :  { %v15349_v21 = vld [vmem:[#allocation2 + $0x124] ss:$28 sps:$4 sm:$0xff]   ;;  %v15353_v24 = vld [vmem:[#allocation2 + $0x154] ss:$28 sps:$4 sm:$0xff]   ;;  %v15355_v25 = vld [vmem:[#allocation2 + $0x15c] ss:$28 sps:$4 sm:$0xff]  }
 0x166   :  { %v15357_v26 = vld [vmem:[#allocation2 + $0x150] ss:$28 sps:$4 sm:$0xff]   ;;  %v15358_v27 = vld [vmem:[#allocation2 + $0x158] ss:$28 sps:$4 sm:$0xff]   ;;  %v15363_v30 = vld [vmem:[#allocation2 + $0x188] ss:$28 sps:$4 sm:$0xff]  }
 0x167   :  { %5346 = vmatpush1.bf16.msra.mxu0 %v15333_v10  ;;  %5647 = vmatpush1.bf16.msra.mxu1 %v15334_v11  ;;  %v15359_v28 = vld [vmem:[#allocation2 + $0x18c] ss:$28 sps:$4 sm:$0xff]   ;;  %v15361_v29 = vld [vmem:[#allocation2 + $0x194] ss:$28 sps:$4 sm:$0xff]   ;;  %v15365_v32 = vld [vmem:[#allocation2 + $0x1c4] ss:$28 sps:$4 sm:$0xff]  }
 0x168   :  { %5347 = vmatprep.subr.bf16.mxu0 %v15335_v12  ;;  %5648 = vmatprep.subr.bf16.mxu1 %v15337_v13  ;;  %v15364_v31 = vld [vmem:[#allocation2 + $0x190] ss:$28 sps:$4 sm:$0xff]   ;;  %v15369_v34 = vld [vmem:[#allocation2 + $0x1c0] ss:$28 sps:$4 sm:$0xff]   ;;  %v15370_v35 = vld [vmem:[#allocation2 + $0x1c8] ss:$28 sps:$4 sm:$0xff]  }
 0x169   :  { %v15367_v33 = vld [vmem:[#allocation2 + $0x1cc] ss:$28 sps:$4 sm:$0xff]   ;;  %v15371_v36 = vld [vmem:[#allocation2 + $0x1fc] ss:$28 sps:$4 sm:$0xff]   ;;  %v15373_v37 = vld [vmem:[#allocation2 + $0x204] ss:$28 sps:$4 sm:$0xff]  }
 0x16a   :  { %v15375_v38 = vld [vmem:[#allocation2 + $0x1f8] ss:$28 sps:$4 sm:$0xff]   ;;  %v15376_v39 = vld [vmem:[#allocation2 + $0x200] ss:$28 sps:$4 sm:$0xff]   ;;  %v15381_v42 = vld [vmem:[#allocation2 + $0x230] ss:$28 sps:$4 sm:$0xff]  }
 0x16b   :  { %5348 = vmatpush1.bf16.msra.mxu0 %v15339_v14  ;;  %5649 = vmatpush1.bf16.msra.mxu1 %v15340_v15  ;;  %v15377_v40 = vld [vmem:[#allocation2 + $0x234] ss:$28 sps:$4 sm:$0xff]   ;;  %v15379_v41 = vld [vmem:[#allocation2 + $0x23c] ss:$28 sps:$4 sm:$0xff]   ;;  %v15383_v44 = vld [vmem:[#allocation2 + $0x26c] ss:$28 sps:$4 sm:$0xff]  }
 0x16c   :  { %5349 = vmatprep.subr.bf16.mxu0 %v15341_v16  ;;  %5650 = vmatprep.subr.bf16.mxu1 %v15343_v17  ;;  %v15382_v43 = vld [vmem:[#allocation2 + $0x238] ss:$28 sps:$4 sm:$0xff]   ;;  %v15387_v46 = vld [vmem:[#allocation2 + $0x268] ss:$28 sps:$4 sm:$0xff]   ;;  %s19098_s3 = sld [smem:[#allocation55_spill]]  ;;  %s19100_s18 = sld [smem:[#allocation56_spill]] }
 0x16d   :  { %v15385_v45 = vld [vmem:[#allocation2 + $0x274] ss:$28 sps:$4 sm:$0xff]   ;;  %v15389_v49 = vld [vmem:[#allocation2 + $0x2a4] ss:$28 sps:$4 sm:$0xff]   ;;  %v15391_v50 = vld [vmem:[#allocation2 + $0x2ac] ss:$28 sps:$4 sm:$0xff]  }
 0x16e   :  { %v15388_v48 = vld [vmem:[#allocation2 + $0x270] ss:$28 sps:$4 sm:$0xff]   ;;  %v15393_v51 = vld [vmem:[#allocation2 + $0x2a0] ss:$28 sps:$4 sm:$0xff]   ;;  %v15394_v52 = vld [vmem:[#allocation2 + $0x2a8] ss:$28 sps:$4 sm:$0xff]  }
 0x16f   :  { %5350 = vmatpush1.bf16.msra.mxu0 %v15345_v18  ;;  %5651 = vmatpush1.bf16.msra.mxu1 %v15346_v19  ;;  %v15395_v53 = vld [vmem:[#allocation2 + $0x2dc] ss:$28 sps:$4 sm:$0xff]   ;;  %v15397_v54 = vld [vmem:[#allocation2 + $0x2e4] ss:$28 sps:$4 sm:$0xff]   ;;  %v15401_v57 = vld [vmem:[#allocation2 + $0x314] ss:$28 sps:$4 sm:$0xff]  }
 0x170   :  { %5351 = vmatprep.subr.bf16.mxu0 %v15347_v20  ;;  %5652 = vmatprep.subr.bf16.mxu1 %v15349_v21  ;;  %v15399_v55 = vld [vmem:[#allocation2 + $0x2d8] ss:$28 sps:$4 sm:$0xff]   ;;  %v15400_v56 = vld [vmem:[#allocation2 + $0x2e0] ss:$28 sps:$4 sm:$0xff]   ;;  %v15405_v59 = vld [vmem:[#allocation2 + $0x310] ss:$28 sps:$4 sm:$0xff]  }
 0x171   :  { %v15403_v58 = vld [vmem:[#allocation2 + $0x31c] ss:$28 sps:$4 sm:$0xff]   ;;  %v15407_v61 = vld [vmem:[#allocation2 + $0x34c] ss:$28 sps:$4 sm:$0xff]   ;;  %v15409_v62 = vld [vmem:[#allocation2 + $0x354] ss:$28 sps:$4 sm:$0xff]  }
 0x172   :  { %v15413_v47 = vld [vmem:[%s19098_s3 + $0x4] ss:$56 sps:$4 sm:$0xff]   ;;  %v15406_v60 = vld [vmem:[#allocation2 + $0x318] ss:$28 sps:$4 sm:$0xff]   ;;  %v15412_v0 = vld [vmem:[#allocation2 + $0x350] ss:$28 sps:$4 sm:$0xff]  }
 0x173   :  { %5352 = vmatpush1.bf16.msra.mxu0 %v15351_v22  ;;  %5653 = vmatpush1.bf16.msra.mxu1 %v15352_v23  ;;  %v15411_v63 = vld [vmem:[#allocation2 + $0x348] ss:$28 sps:$4 sm:$0xff]   ;;  %v15415_v3 = vld [vmem:[#allocation2 + $0x380] ss:$28 sps:$4 sm:$0xff]   ;;  %v15422_v8 = vld [vmem:[#allocation2 + $0x3b8] ss:$28 sps:$4 sm:$0xff]  }
 0x174   :  { %5353 = vmatprep.subr.bf16.mxu0 %v15353_v24  ;;  %5654 = vmatprep.subr.bf16.mxu1 %v15355_v25  ;;  %v15417_v1 = vld [vmem:[#allocation2 + $0x384] ss:$28 sps:$4 sm:$0xff]   ;;  %v15420_v2 = vld [vmem:[#allocation2 + $0x38c] ss:$28 sps:$4 sm:$0xff]   ;;  %v15424_v6 = vld [vmem:[#allocation2 + $0x3bc] ss:$28 sps:$4 sm:$0xff]  }
 0x175   :  { %5373 = vmatprep.mubr.bf16.mxu0 %v15413_v47  ;;  %5674 = vmatprep.mubr.bf16.mxu1 %v15413_v47  ;;  %v15418_v4 = vld [vmem:[#allocation2 + $0x388] ss:$28 sps:$4 sm:$0xff]   ;;  %v15421_v5 = vld [vmem:[%s19098_s3] ss:$56 sps:$4 sm:$0xff]   ;;  %v15430_v10 = vld [vmem:[#allocation2 + $0x3f4] ss:$28 sps:$4 sm:$0xff]  }
 0x176   :  { %v15427_v7 = vld [vmem:[#allocation2 + $0x3c4] ss:$28 sps:$4 sm:$0xff]   ;;  %v15433_v11 = vld [vmem:[#allocation2 + $0x3fc] ss:$28 sps:$4 sm:$0xff]   ;;  %v15428_v12 = vld [vmem:[#allocation2 + $0x3f0] ss:$28 sps:$4 sm:$0xff]  }
 0x177   :  { %5354 = vmatpush1.bf16.msra.mxu0 %v15357_v26  ;;  %5655 = vmatpush1.bf16.msra.mxu1 %v15358_v27  ;;  %v15425_v9 = vld [vmem:[#allocation2 + $0x3c0] ss:$28 sps:$4 sm:$0xff]   ;;  %v15431_v13 = vld [vmem:[#allocation2 + $0x3f8] ss:$28 sps:$4 sm:$0xff]   ;;  %v15436_v14 = vld [vmem:[#allocation2 + $0x42c] ss:$28 sps:$4 sm:$0xff]  }
 0x178   :  { %5355 = vmatprep.subr.bf16.mxu0 %v15359_v28  ;;  %5656 = vmatprep.subr.bf16.mxu1 %v15361_v29  ;;  %v15439_v15 = vld [vmem:[#allocation2 + $0x434] ss:$28 sps:$4 sm:$0xff]   ;;  %v15434_v16 = vld [vmem:[#allocation2 + $0x428] ss:$28 sps:$4 sm:$0xff]   ;;  %v15440_v20 = vld [vmem:[#allocation2 + $0x460] ss:$28 sps:$4 sm:$0xff]  }
 0x179   :  { %v15437_v17 = vld [vmem:[#allocation2 + $0x430] ss:$28 sps:$4 sm:$0xff]   ;;  %v15442_v18 = vld [vmem:[#allocation2 + $0x464] ss:$28 sps:$4 sm:$0xff]   ;;  %v15448_v22 = vld [vmem:[#allocation2 + $0x49c] ss:$28 sps:$4 sm:$0xff]  }
 0x17a   :  { %v15445_v19 = vld [vmem:[#allocation2 + $0x46c] ss:$28 sps:$4 sm:$0xff]   ;;  %v15451_v23 = vld [vmem:[#allocation2 + $0x4a4] ss:$28 sps:$4 sm:$0xff]   ;;  %v15446_v24 = vld [vmem:[#allocation2 + $0x498] ss:$28 sps:$4 sm:$0xff]  }
 0x17b   :  { %5356 = vmatpush1.bf16.msra.mxu0 %v15363_v30  ;;  %5657 = vmatpush1.bf16.msra.mxu1 %v15364_v31  ;;  %v15443_v21 = vld [vmem:[#allocation2 + $0x468] ss:$28 sps:$4 sm:$0xff]   ;;  %v15449_v25 = vld [vmem:[#allocation2 + $0x4a0] ss:$28 sps:$4 sm:$0xff]   ;;  %v15454_v26 = vld [vmem:[#allocation2 + $0x4d4] ss:$28 sps:$4 sm:$0xff]  }
 0x17c   :  { %5357 = vmatprep.subr.bf16.mxu0 %v15365_v32  ;;  %5658 = vmatprep.subr.bf16.mxu1 %v15367_v33  ;;  %v15457_v27 = vld [vmem:[#allocation2 + $0x4dc] ss:$28 sps:$4 sm:$0xff]   ;;  %v15452_v28 = vld [vmem:[#allocation2 + $0x4d0] ss:$28 sps:$4 sm:$0xff]   ;;  %v15458_v33 = vld [vmem:[#allocation2 + $0x508] ss:$28 sps:$4 sm:$0xff]  }
 0x17d   :  { %v15512_v29 = vld [vmem:[%s19098_s3 + $0xc] ss:$56 sps:$4 sm:$0xff]   ;;  %v15455_v30 = vld [vmem:[#allocation2 + $0x4d8] ss:$28 sps:$4 sm:$0xff]   ;;  %vm17976_vm0 = vmmov 0  }
 0x17e   :  { %v15460_v31 = vld [vmem:[#allocation2 + $0x50c] ss:$28 sps:$4 sm:$0xff]   ;;  %v15463_v32 = vld [vmem:[#allocation2 + $0x514] ss:$28 sps:$4 sm:$0xff]  }
 0x17f   :  { %5358 = vmatpush1.bf16.msra.mxu0 %v15369_v34  ;;  %5659 = vmatpush1.bf16.msra.mxu1 %v15370_v35  ;;  %v15461_v34 = vld [vmem:[#allocation2 + $0x510] ss:$28 sps:$4 sm:$0xff]   ;;  %v15466_v35 = vld [vmem:[#allocation2 + $0x544] ss:$28 sps:$4 sm:$0xff]  }
 0x180   :  { %5359 = vmatprep.subr.bf16.mxu0 %v15371_v36  ;;  %5660 = vmatprep.subr.bf16.mxu1 %v15373_v37  ;;  %v15469_v36 = vld [vmem:[#allocation2 + $0x54c] ss:$28 sps:$4 sm:$0xff]   ;;  %v15464_v37 = vld [vmem:[#allocation2 + $0x540] ss:$28 sps:$4 sm:$0xff]  }
 0x181   :  { %v15484_v47 = vld [vmem:[#allocation2 + $0x5ec] ss:$28 sps:$4 sm:$0xff]  }
 0x183   :  { %5360 = vmatpush1.bf16.msra.mxu0 %v15375_v38  ;;  %5661 = vmatpush1.bf16.msra.mxu1 %v15376_v39  ;;  %v15467_v38 = vld [vmem:[#allocation2 + $0x548] ss:$28 sps:$4 sm:$0xff]   ;;  %v15472_v39 = vld [vmem:[#allocation2 + $0x57c] ss:$28 sps:$4 sm:$0xff]  }
 0x184   :  { %5361 = vmatprep.subr.bf16.mxu0 %v15377_v40  ;;  %5662 = vmatprep.subr.bf16.mxu1 %v15379_v41  ;;  %v15475_v40 = vld [vmem:[#allocation2 + $0x584] ss:$28 sps:$4 sm:$0xff]   ;;  %v15470_v41 = vld [vmem:[#allocation2 + $0x578] ss:$28 sps:$4 sm:$0xff]  }
 0x187   :  { %5362 = vmatpush1.bf16.msra.mxu0 %v15381_v42  ;;  %5663 = vmatpush1.bf16.msra.mxu1 %v15382_v43  ;;  %v15473_v42 = vld [vmem:[#allocation2 + $0x580] ss:$28 sps:$4 sm:$0xff]   ;;  %v15478_v43 = vld [vmem:[#allocation2 + $0x5b4] ss:$28 sps:$4 sm:$0xff]  }
 0x188   :  { %5363 = vmatprep.subr.bf16.mxu0 %v15383_v44  ;;  %5664 = vmatprep.subr.bf16.mxu1 %v15385_v45  ;;  %v15481_v44 = vld [vmem:[#allocation2 + $0x5bc] ss:$28 sps:$4 sm:$0xff]   ;;  %v15476_v45 = vld [vmem:[#allocation2 + $0x5b0] ss:$28 sps:$4 sm:$0xff]  }
 0x18b   :  { %5364 = vmatpush1.bf16.msra.mxu0 %v15387_v46  ;;  %5665 = vmatpush1.bf16.msra.mxu1 %v15388_v48  ;;  %v15479_v46 = vld [vmem:[#allocation2 + $0x5b8] ss:$28 sps:$4 sm:$0xff]  }
 0x18c   :  { %5365 = vmatprep.subr.bf16.mxu0 %v15389_v49  ;;  %5666 = vmatprep.subr.bf16.mxu1 %v15391_v50  ;;  %v15487_v48 = vld [vmem:[#allocation2 + $0x5f4] ss:$28 sps:$4 sm:$0xff]   ;;  %v15482_v49 = vld [vmem:[#allocation2 + $0x5e8] ss:$28 sps:$4 sm:$0xff]  }
 0x18d   :  { %v15485_v50 = vld [vmem:[#allocation2 + $0x5f0] ss:$28 sps:$4 sm:$0xff]  }
 0x18f   :  { %5366 = vmatpush1.bf16.msra.mxu0 %v15393_v51  ;;  %5667 = vmatpush1.bf16.msra.mxu1 %v15394_v52  ;;  %v15490_v51 = vld [vmem:[#allocation2 + $0x624] ss:$28 sps:$4 sm:$0xff]   ;;  %v15493_v52 = vld [vmem:[#allocation2 + $0x62c] ss:$28 sps:$4 sm:$0xff]  }
 0x190   :  { %5367 = vmatprep.subr.bf16.mxu0 %v15395_v53  ;;  %5668 = vmatprep.subr.bf16.mxu1 %v15397_v54  ;;  %v15488_v53 = vld [vmem:[#allocation2 + $0x620] ss:$28 sps:$4 sm:$0xff]   ;;  %v15491_v54 = vld [vmem:[#allocation2 + $0x628] ss:$28 sps:$4 sm:$0xff]  }
 0x193   :  { %5368 = vmatpush1.bf16.msra.mxu0 %v15399_v55  ;;  %5669 = vmatpush1.bf16.msra.mxu1 %v15400_v56  ;;  %v15496_v55 = vld [vmem:[#allocation2 + $0x65c] ss:$28 sps:$4 sm:$0xff]   ;;  %v15499_v56 = vld [vmem:[#allocation2 + $0x664] ss:$28 sps:$4 sm:$0xff]  }
 0x194   :  { %5369 = vmatprep.subr.bf16.mxu0 %v15401_v57  ;;  %5670 = vmatprep.subr.bf16.mxu1 %v15403_v58  ;;  %v15494_v57 = vld [vmem:[#allocation2 + $0x658] ss:$28 sps:$4 sm:$0xff]   ;;  %v15497_v58 = vld [vmem:[#allocation2 + $0x660] ss:$28 sps:$4 sm:$0xff]  }
 0x197   :  { %5370 = vmatpush1.bf16.msra.mxu0 %v15405_v59  ;;  %5671 = vmatpush1.bf16.msra.mxu1 %v15406_v60  ;;  %v15502_v59 = vld [vmem:[#allocation2 + $0x694] ss:$28 sps:$4 sm:$0xff]   ;;  %v15505_v60 = vld [vmem:[#allocation2 + $0x69c] ss:$28 sps:$4 sm:$0xff]  }
 0x198   :  { %5371 = vmatprep.subr.bf16.mxu0 %v15407_v61  ;;  %5672 = vmatprep.subr.bf16.mxu1 %v15409_v62  ;;  %v15500_v61 = vld [vmem:[#allocation2 + $0x690] ss:$28 sps:$4 sm:$0xff]   ;;  %v15503_v62 = vld [vmem:[#allocation2 + $0x698] ss:$28 sps:$4 sm:$0xff]  }
 0x19b   :  { %5372 = vmatpush1.bf16.msra.mxu0 %v15411_v63  ;;  %5673 = vmatpush1.bf16.msra.mxu1 %v15412_v0  ;;  %v15508_v63 = vld [vmem:[#allocation2 + $0x6cc] ss:$28 sps:$4 sm:$0xff]   ;;  %v15511_v0 = vld [vmem:[#allocation2 + $0x6d4] ss:$28 sps:$4 sm:$0xff]  }
 0x19c   :  { %5384 = vmatprep.subr.bf16.mxu0 %v15417_v1  ;;  %5685 = vmatprep.subr.bf16.mxu1 %v15420_v2  ;;  %v15506_v1 = vld [vmem:[#allocation2 + $0x6c8] ss:$28 sps:$4 sm:$0xff]   ;;  %v15509_v2 = vld [vmem:[#allocation2 + $0x6d0] ss:$28 sps:$4 sm:$0xff]  }
 0x19e   :  { %5374 = vmatmul.mubr.bf16.vlgmr.msra.gmra.mrb[0].mxu0 %v15421_v5  ;;  %5675 = vmatmul.mubr.bf16.vlgmr.msra.gmra.mrb[0].mxu1 %v15421_v5  ;;  %v15514_v5 = vld [vmem:[#allocation2 + $0x700] ss:$28 sps:$4 sm:$0xff]  }
 0x19f   :  { %5385 = vmatpush1.bf16.msra.mxu0 %v15415_v3  ;;  %5686 = vmatpush1.bf16.msra.mxu1 %v15418_v4  ;;  %v15516_v3 = vld [vmem:[#allocation2 + $0x704] ss:$28 sps:$4 sm:$0xff]   ;;  %v15519_v4 = vld [vmem:[#allocation2 + $0x70c] ss:$28 sps:$4 sm:$0xff]  }
 0x1a0   :  { %5386 = vmatprep.subr.bf16.mxu0 %v15424_v6  ;;  %5687 = vmatprep.subr.bf16.mxu1 %v15427_v7  ;;  %v15517_v6 = vld [vmem:[#allocation2 + $0x708] ss:$28 sps:$4 sm:$0xff]  }
 0x1a1   :  { %5416 = vmatprep.mubr.bf16.mxu0 %v15512_v29  ;;  %5717 = vmatprep.mubr.bf16.mxu1 %v15512_v29  ;;  %v15520_v7 = vld [vmem:[%s19098_s3 + $0x8] ss:$56 sps:$4 sm:$0xff]   ;;  %v15553_v29 = vld [vmem:[#allocation2 + $0x854] ss:$28 sps:$4 sm:$0xff]  }
 0x1a3   :  { %5387 = vmatpush1.bf16.msra.mxu0 %v15422_v8  ;;  %5688 = vmatpush1.bf16.msra.mxu1 %v15425_v9  ;;  %v15523_v8 = vld [vmem:[#allocation2 + $0x73c] ss:$28 sps:$4 sm:$0xff]   ;;  %v15526_v9 = vld [vmem:[#allocation2 + $0x744] ss:$28 sps:$4 sm:$0xff]  }
 0x1a4   :  { %5388 = vmatprep.subr.bf16.mxu0 %v15430_v10  ;;  %5689 = vmatprep.subr.bf16.mxu1 %v15433_v11  ;;  %v15521_v10 = vld [vmem:[#allocation2 + $0x738] ss:$28 sps:$4 sm:$0xff]  }
 0x1a5   :  { %v15611_v11 = vld [vmem:[%s19098_s3 + $0x14] ss:$56 sps:$4 sm:$0xff]  }
 0x1a7   :  { %5389 = vmatpush1.bf16.msra.mxu0 %v15428_v12  ;;  %5690 = vmatpush1.bf16.msra.mxu1 %v15431_v13  ;;  %v15524_v12 = vld [vmem:[#allocation2 + $0x740] ss:$28 sps:$4 sm:$0xff]   ;;  %v15529_v13 = vld [vmem:[#allocation2 + $0x774] ss:$28 sps:$4 sm:$0xff]  }
 0x1a8   :  { %5390 = vmatprep.subr.bf16.mxu0 %v15436_v14  ;;  %5691 = vmatprep.subr.bf16.mxu1 %v15439_v15  ;;  %v15532_v14 = vld [vmem:[#allocation2 + $0x77c] ss:$28 sps:$4 sm:$0xff]   ;;  %v15527_v15 = vld [vmem:[#allocation2 + $0x770] ss:$28 sps:$4 sm:$0xff]  }
 0x1ab   :  { %5391 = vmatpush1.bf16.msra.mxu0 %v15434_v16  ;;  %5692 = vmatpush1.bf16.msra.mxu1 %v15437_v17  ;;  %v15530_v16 = vld [vmem:[#allocation2 + $0x778] ss:$28 sps:$4 sm:$0xff]   ;;  %v15535_v17 = vld [vmem:[#allocation2 + $0x7ac] ss:$28 sps:$4 sm:$0xff]  }
 0x1ac   :  { %5392 = vmatprep.subr.bf16.mxu0 %v15442_v18  ;;  %5693 = vmatprep.subr.bf16.mxu1 %v15445_v19  ;;  %v15538_v18 = vld [vmem:[#allocation2 + $0x7b4] ss:$28 sps:$4 sm:$0xff]   ;;  %v15533_v19 = vld [vmem:[#allocation2 + $0x7a8] ss:$28 sps:$4 sm:$0xff]  }
 0x1af   :  { %5393 = vmatpush1.bf16.msra.mxu0 %v15440_v20  ;;  %5694 = vmatpush1.bf16.msra.mxu1 %v15443_v21  ;;  %v15536_v20 = vld [vmem:[#allocation2 + $0x7b0] ss:$28 sps:$4 sm:$0xff]   ;;  %v15541_v21 = vld [vmem:[#allocation2 + $0x7e4] ss:$28 sps:$4 sm:$0xff]  }
 0x1b0   :  { %5394 = vmatprep.subr.bf16.mxu0 %v15448_v22  ;;  %5695 = vmatprep.subr.bf16.mxu1 %v15451_v23  ;;  %v15544_v22 = vld [vmem:[#allocation2 + $0x7ec] ss:$28 sps:$4 sm:$0xff]   ;;  %v15539_v23 = vld [vmem:[#allocation2 + $0x7e0] ss:$28 sps:$4 sm:$0xff]  }
 0x1b3   :  { %5395 = vmatpush1.bf16.msra.mxu0 %v15446_v24  ;;  %5696 = vmatpush1.bf16.msra.mxu1 %v15449_v25  ;;  %v15542_v24 = vld [vmem:[#allocation2 + $0x7e8] ss:$28 sps:$4 sm:$0xff]   ;;  %v15547_v25 = vld [vmem:[#allocation2 + $0x81c] ss:$28 sps:$4 sm:$0xff]  }
 0x1b4   :  { %5396 = vmatprep.subr.bf16.mxu0 %v15454_v26  ;;  %5697 = vmatprep.subr.bf16.mxu1 %v15457_v27  ;;  %v15550_v26 = vld [vmem:[#allocation2 + $0x824] ss:$28 sps:$4 sm:$0xff]   ;;  %v15545_v27 = vld [vmem:[#allocation2 + $0x818] ss:$28 sps:$4 sm:$0xff]  }
 0x1b7   :  { %5397 = vmatpush1.bf16.msra.mxu0 %v15452_v28  ;;  %5698 = vmatpush1.bf16.msra.mxu1 %v15455_v30  ;;  %v15548_v28 = vld [vmem:[#allocation2 + $0x820] ss:$28 sps:$4 sm:$0xff]  }
 0x1b8   :  { %5398 = vmatprep.subr.bf16.mxu0 %v15460_v31  ;;  %5699 = vmatprep.subr.bf16.mxu1 %v15463_v32  ;;  %v15556_v30 = vld [vmem:[#allocation2 + $0x85c] ss:$28 sps:$4 sm:$0xff]   ;;  %v15551_v31 = vld [vmem:[#allocation2 + $0x850] ss:$28 sps:$4 sm:$0xff]  }
 0x1b9   :  { %v15554_v32 = vld [vmem:[#allocation2 + $0x858] ss:$28 sps:$4 sm:$0xff]  }
 0x1bb   :  { %5399 = vmatpush1.bf16.msra.mxu0 %v15458_v33  ;;  %5700 = vmatpush1.bf16.msra.mxu1 %v15461_v34  ;;  %v15559_v33 = vld [vmem:[#allocation2 + $0x88c] ss:$28 sps:$4 sm:$0xff]   ;;  %v15562_v34 = vld [vmem:[#allocation2 + $0x894] ss:$28 sps:$4 sm:$0xff]  }
 0x1bc   :  { %5400 = vmatprep.subr.bf16.mxu0 %v15466_v35  ;;  %5701 = vmatprep.subr.bf16.mxu1 %v15469_v36  ;;  %v15557_v35 = vld [vmem:[#allocation2 + $0x888] ss:$28 sps:$4 sm:$0xff]   ;;  %v15560_v36 = vld [vmem:[#allocation2 + $0x890] ss:$28 sps:$4 sm:$0xff]  }
 0x1bf   :  { %5401 = vmatpush1.bf16.msra.mxu0 %v15464_v37  ;;  %5702 = vmatpush1.bf16.msra.mxu1 %v15467_v38  ;;  %v15565_v37 = vld [vmem:[#allocation2 + $0x8c4] ss:$28 sps:$4 sm:$0xff]   ;;  %v15568_v38 = vld [vmem:[#allocation2 + $0x8cc] ss:$28 sps:$4 sm:$0xff]  }
 0x1c0   :  { %5402 = vmatprep.subr.bf16.mxu0 %v15472_v39  ;;  %5703 = vmatprep.subr.bf16.mxu1 %v15475_v40  ;;  %v15563_v39 = vld [vmem:[#allocation2 + $0x8c0] ss:$28 sps:$4 sm:$0xff]   ;;  %v15566_v40 = vld [vmem:[#allocation2 + $0x8c8] ss:$28 sps:$4 sm:$0xff]  }
 0x1c3   :  { %5403 = vmatpush1.bf16.msra.mxu0 %v15470_v41  ;;  %5704 = vmatpush1.bf16.msra.mxu1 %v15473_v42  ;;  %v15571_v41 = vld [vmem:[#allocation2 + $0x8fc] ss:$28 sps:$4 sm:$0xff]   ;;  %v15574_v42 = vld [vmem:[#allocation2 + $0x904] ss:$28 sps:$4 sm:$0xff]  }
 0x1c4   :  { %5404 = vmatprep.subr.bf16.mxu0 %v15478_v43  ;;  %5705 = vmatprep.subr.bf16.mxu1 %v15481_v44  ;;  %v15569_v43 = vld [vmem:[#allocation2 + $0x8f8] ss:$28 sps:$4 sm:$0xff]   ;;  %v15572_v44 = vld [vmem:[#allocation2 + $0x900] ss:$28 sps:$4 sm:$0xff]  }
 0x1c7   :  { %5405 = vmatpush1.bf16.msra.mxu0 %v15476_v45  ;;  %5706 = vmatpush1.bf16.msra.mxu1 %v15479_v46  ;;  %v15577_v45 = vld [vmem:[#allocation2 + $0x934] ss:$28 sps:$4 sm:$0xff]   ;;  %v15580_v46 = vld [vmem:[#allocation2 + $0x93c] ss:$28 sps:$4 sm:$0xff]  }
 0x1c8   :  { %5406 = vmatprep.subr.bf16.mxu0 %v15484_v47  ;;  %5707 = vmatprep.subr.bf16.mxu1 %v15487_v48  ;;  %v15575_v47 = vld [vmem:[#allocation2 + $0x930] ss:$28 sps:$4 sm:$0xff]   ;;  %v15578_v48 = vld [vmem:[#allocation2 + $0x938] ss:$28 sps:$4 sm:$0xff]  }
 0x1cb   :  { %5407 = vmatpush1.bf16.msra.mxu0 %v15482_v49  ;;  %5708 = vmatpush1.bf16.msra.mxu1 %v15485_v50  ;;  %v15583_v49 = vld [vmem:[#allocation2 + $0x96c] ss:$28 sps:$4 sm:$0xff]   ;;  %v15586_v50 = vld [vmem:[#allocation2 + $0x974] ss:$28 sps:$4 sm:$0xff]  }
 0x1cc   :  { %5408 = vmatprep.subr.bf16.mxu0 %v15490_v51  ;;  %5709 = vmatprep.subr.bf16.mxu1 %v15493_v52  ;;  %v15581_v51 = vld [vmem:[#allocation2 + $0x968] ss:$28 sps:$4 sm:$0xff]   ;;  %v15584_v52 = vld [vmem:[#allocation2 + $0x970] ss:$28 sps:$4 sm:$0xff]  }
 0x1cf   :  { %5409 = vmatpush1.bf16.msra.mxu0 %v15488_v53  ;;  %5710 = vmatpush1.bf16.msra.mxu1 %v15491_v54  ;;  %v15589_v53 = vld [vmem:[#allocation2 + $0x9a4] ss:$28 sps:$4 sm:$0xff]   ;;  %v15592_v54 = vld [vmem:[#allocation2 + $0x9ac] ss:$28 sps:$4 sm:$0xff]  }
 0x1d0   :  { %5410 = vmatprep.subr.bf16.mxu0 %v15496_v55  ;;  %5711 = vmatprep.subr.bf16.mxu1 %v15499_v56  ;;  %v15587_v55 = vld [vmem:[#allocation2 + $0x9a0] ss:$28 sps:$4 sm:$0xff]   ;;  %v15590_v56 = vld [vmem:[#allocation2 + $0x9a8] ss:$28 sps:$4 sm:$0xff]  }
 0x1d3   :  { %5411 = vmatpush1.bf16.msra.mxu0 %v15494_v57  ;;  %5712 = vmatpush1.bf16.msra.mxu1 %v15497_v58  ;;  %v15595_v57 = vld [vmem:[#allocation2 + $0x9dc] ss:$28 sps:$4 sm:$0xff]   ;;  %v15598_v58 = vld [vmem:[#allocation2 + $0x9e4] ss:$28 sps:$4 sm:$0xff]  }
 0x1d4   :  { %5412 = vmatprep.subr.bf16.mxu0 %v15502_v59  ;;  %5713 = vmatprep.subr.bf16.mxu1 %v15505_v60  ;;  %v15593_v59 = vld [vmem:[#allocation2 + $0x9d8] ss:$28 sps:$4 sm:$0xff]   ;;  %v15596_v60 = vld [vmem:[#allocation2 + $0x9e0] ss:$28 sps:$4 sm:$0xff]  }
 0x1d7   :  { %5413 = vmatpush1.bf16.msra.mxu0 %v15500_v61  ;;  %5714 = vmatpush1.bf16.msra.mxu1 %v15503_v62  ;;  %v15601_v61 = vld [vmem:[#allocation2 + $0xa14] ss:$28 sps:$4 sm:$0xff]   ;;  %v15604_v62 = vld [vmem:[#allocation2 + $0xa1c] ss:$28 sps:$4 sm:$0xff]  }
 0x1d8   :  { %5414 = vmatprep.subr.bf16.mxu0 %v15508_v63  ;;  %5715 = vmatprep.subr.bf16.mxu1 %v15511_v0  ;;  %v15599_v63 = vld [vmem:[#allocation2 + $0xa10] ss:$28 sps:$4 sm:$0xff]   ;;  %v15602_v0 = vld [vmem:[#allocation2 + $0xa18] ss:$28 sps:$4 sm:$0xff]  }
 0x1db   :  { %5415 = vmatpush1.bf16.msra.mxu0 %v15506_v1  ;;  %5716 = vmatpush1.bf16.msra.mxu1 %v15509_v2  ;;  %v15607_v1 = vld [vmem:[#allocation2 + $0xa4c] ss:$28 sps:$4 sm:$0xff]   ;;  %v15610_v2 = vld [vmem:[#allocation2 + $0xa54] ss:$28 sps:$4 sm:$0xff]  }
 0x1dc   :  { %5427 = vmatprep.subr.bf16.mxu0 %v15516_v3  ;;  %5728 = vmatprep.subr.bf16.mxu1 %v15519_v4  ;;  %v15605_v3 = vld [vmem:[#allocation2 + $0xa48] ss:$28 sps:$4 sm:$0xff]   ;;  %v15608_v4 = vld [vmem:[#allocation2 + $0xa50] ss:$28 sps:$4 sm:$0xff]  }
 0x1de   :  { %5417 = vmatmul.mubr.bf16.vlgmr.msra.gmra.mrb[0].mxu0 %v15520_v7  ;;  %5718 = vmatmul.mubr.bf16.vlgmr.msra.gmra.mrb[0].mxu1 %v15520_v7  ;;  %v15613_v7 = vld [vmem:[#allocation2 + $0xa80] ss:$28 sps:$4 sm:$0xff]  }
 0x1df   :  { %5428 = vmatpush1.bf16.msra.mxu0 %v15514_v5  ;;  %5729 = vmatpush1.bf16.msra.mxu1 %v15517_v6  ;;  %v15615_v5 = vld [vmem:[#allocation2 + $0xa84] ss:$28 sps:$4 sm:$0xff]   ;;  %v15618_v6 = vld [vmem:[#allocation2 + $0xa8c] ss:$28 sps:$4 sm:$0xff]  }
 0x1e0   :  { %5429 = vmatprep.subr.bf16.mxu0 %v15523_v8  ;;  %5730 = vmatprep.subr.bf16.mxu1 %v15526_v9  ;;  %v15616_v8 = vld [vmem:[#allocation2 + $0xa88] ss:$28 sps:$4 sm:$0xff]  }
 0x1e1   :  { %5459 = vmatprep.mubr.bf16.mxu0 %v15611_v11  ;;  %5760 = vmatprep.mubr.bf16.mxu1 %v15611_v11  ;;  %v15619_v9 = vld [vmem:[%s19098_s3 + $0x10] ss:$56 sps:$4 sm:$0xff]   ;;  %v15625_v11 = vld [vmem:[#allocation2 + $0xac4] ss:$28 sps:$4 sm:$0xff]  }
 0x1e3   :  { %5430 = vmatpush1.bf16.msra.mxu0 %v15521_v10  ;;  %5731 = vmatpush1.bf16.msra.mxu1 %v15524_v12  ;;  %v15622_v10 = vld [vmem:[#allocation2 + $0xabc] ss:$28 sps:$4 sm:$0xff]  }
 0x1e4   :  { %5431 = vmatprep.subr.bf16.mxu0 %v15529_v13  ;;  %5732 = vmatprep.subr.bf16.mxu1 %v15532_v14  ;;  %v15710_v12 = vld [vmem:[%s19098_s3 + $0x1c] ss:$56 sps:$4 sm:$0xff]  }
 0x1e5   :  { %v15620_v13 = vld [vmem:[#allocation2 + $0xab8] ss:$28 sps:$4 sm:$0xff]   ;;  %v15623_v14 = vld [vmem:[#allocation2 + $0xac0] ss:$28 sps:$4 sm:$0xff]  }
 0x1e7   :  { %5432 = vmatpush1.bf16.msra.mxu0 %v15527_v15  ;;  %5733 = vmatpush1.bf16.msra.mxu1 %v15530_v16  ;;  %v15628_v15 = vld [vmem:[#allocation2 + $0xaf4] ss:$28 sps:$4 sm:$0xff]   ;;  %v15631_v16 = vld [vmem:[#allocation2 + $0xafc] ss:$28 sps:$4 sm:$0xff]  }
 0x1e8   :  { %5433 = vmatprep.subr.bf16.mxu0 %v15535_v17  ;;  %5734 = vmatprep.subr.bf16.mxu1 %v15538_v18  ;;  %v15626_v17 = vld [vmem:[#allocation2 + $0xaf0] ss:$28 sps:$4 sm:$0xff]   ;;  %v15629_v18 = vld [vmem:[#allocation2 + $0xaf8] ss:$28 sps:$4 sm:$0xff]  }
 0x1eb   :  { %5434 = vmatpush1.bf16.msra.mxu0 %v15533_v19  ;;  %5735 = vmatpush1.bf16.msra.mxu1 %v15536_v20  ;;  %v15634_v19 = vld [vmem:[#allocation2 + $0xb2c] ss:$28 sps:$4 sm:$0xff]   ;;  %v15637_v20 = vld [vmem:[#allocation2 + $0xb34] ss:$28 sps:$4 sm:$0xff]  }
 0x1ec   :  { %5435 = vmatprep.subr.bf16.mxu0 %v15541_v21  ;;  %5736 = vmatprep.subr.bf16.mxu1 %v15544_v22  ;;  %v15632_v21 = vld [vmem:[#allocation2 + $0xb28] ss:$28 sps:$4 sm:$0xff]   ;;  %v15635_v22 = vld [vmem:[#allocation2 + $0xb30] ss:$28 sps:$4 sm:$0xff]  }
 0x1ef   :  { %5436 = vmatpush1.bf16.msra.mxu0 %v15539_v23  ;;  %5737 = vmatpush1.bf16.msra.mxu1 %v15542_v24  ;;  %v15640_v23 = vld [vmem:[#allocation2 + $0xb64] ss:$28 sps:$4 sm:$0xff]   ;;  %v15643_v24 = vld [vmem:[#allocation2 + $0xb6c] ss:$28 sps:$4 sm:$0xff]  }
 0x1f0   :  { %5437 = vmatprep.subr.bf16.mxu0 %v15547_v25  ;;  %5738 = vmatprep.subr.bf16.mxu1 %v15550_v26  ;;  %v15638_v25 = vld [vmem:[#allocation2 + $0xb60] ss:$28 sps:$4 sm:$0xff]   ;;  %v15641_v26 = vld [vmem:[#allocation2 + $0xb68] ss:$28 sps:$4 sm:$0xff]  }
 0x1f3   :  { %5438 = vmatpush1.bf16.msra.mxu0 %v15545_v27  ;;  %5739 = vmatpush1.bf16.msra.mxu1 %v15548_v28  ;;  %v15646_v27 = vld [vmem:[#allocation2 + $0xb9c] ss:$28 sps:$4 sm:$0xff]   ;;  %v15649_v28 = vld [vmem:[#allocation2 + $0xba4] ss:$28 sps:$4 sm:$0xff]  }
 0x1f4   :  { %5439 = vmatprep.subr.bf16.mxu0 %v15553_v29  ;;  %5740 = vmatprep.subr.bf16.mxu1 %v15556_v30  ;;  %v15644_v29 = vld [vmem:[#allocation2 + $0xb98] ss:$28 sps:$4 sm:$0xff]   ;;  %v15647_v30 = vld [vmem:[#allocation2 + $0xba0] ss:$28 sps:$4 sm:$0xff]  }
 0x1f7   :  { %5440 = vmatpush1.bf16.msra.mxu0 %v15551_v31  ;;  %5741 = vmatpush1.bf16.msra.mxu1 %v15554_v32  ;;  %v15652_v31 = vld [vmem:[#allocation2 + $0xbd4] ss:$28 sps:$4 sm:$0xff]   ;;  %v15655_v32 = vld [vmem:[#allocation2 + $0xbdc] ss:$28 sps:$4 sm:$0xff]  }
 0x1f8   :  { %5441 = vmatprep.subr.bf16.mxu0 %v15559_v33  ;;  %5742 = vmatprep.subr.bf16.mxu1 %v15562_v34  ;;  %v15650_v33 = vld [vmem:[#allocation2 + $0xbd0] ss:$28 sps:$4 sm:$0xff]   ;;  %v15653_v34 = vld [vmem:[#allocation2 + $0xbd8] ss:$28 sps:$4 sm:$0xff]  }
 0x1fb   :  { %5442 = vmatpush1.bf16.msra.mxu0 %v15557_v35  ;;  %5743 = vmatpush1.bf16.msra.mxu1 %v15560_v36  ;;  %v15658_v35 = vld [vmem:[#allocation2 + $0xc0c] ss:$28 sps:$4 sm:$0xff]   ;;  %v15661_v36 = vld [vmem:[#allocation2 + $0xc14] ss:$28 sps:$4 sm:$0xff]  }
 0x1fc   :  { %5443 = vmatprep.subr.bf16.mxu0 %v15565_v37  ;;  %5744 = vmatprep.subr.bf16.mxu1 %v15568_v38  ;;  %v15656_v37 = vld [vmem:[#allocation2 + $0xc08] ss:$28 sps:$4 sm:$0xff]   ;;  %v15659_v38 = vld [vmem:[#allocation2 + $0xc10] ss:$28 sps:$4 sm:$0xff]  }
 0x1ff   :  { %5444 = vmatpush1.bf16.msra.mxu0 %v15563_v39  ;;  %5745 = vmatpush1.bf16.msra.mxu1 %v15566_v40  ;;  %v15664_v39 = vld [vmem:[#allocation2 + $0xc44] ss:$28 sps:$4 sm:$0xff]   ;;  %v15667_v40 = vld [vmem:[#allocation2 + $0xc4c] ss:$28 sps:$4 sm:$0xff]  }
 0x200   :  { %5445 = vmatprep.subr.bf16.mxu0 %v15571_v41  ;;  %5746 = vmatprep.subr.bf16.mxu1 %v15574_v42  ;;  %v15662_v41 = vld [vmem:[#allocation2 + $0xc40] ss:$28 sps:$4 sm:$0xff]   ;;  %v15665_v42 = vld [vmem:[#allocation2 + $0xc48] ss:$28 sps:$4 sm:$0xff]  }
 0x203   :  { %5446 = vmatpush1.bf16.msra.mxu0 %v15569_v43  ;;  %5747 = vmatpush1.bf16.msra.mxu1 %v15572_v44  ;;  %v15670_v43 = vld [vmem:[#allocation2 + $0xc7c] ss:$28 sps:$4 sm:$0xff]   ;;  %v15673_v44 = vld [vmem:[#allocation2 + $0xc84] ss:$28 sps:$4 sm:$0xff]  }
 0x204   :  { %5447 = vmatprep.subr.bf16.mxu0 %v15577_v45  ;;  %5748 = vmatprep.subr.bf16.mxu1 %v15580_v46  ;;  %v15668_v45 = vld [vmem:[#allocation2 + $0xc78] ss:$28 sps:$4 sm:$0xff]   ;;  %v15671_v46 = vld [vmem:[#allocation2 + $0xc80] ss:$28 sps:$4 sm:$0xff]  }
 0x207   :  { %5448 = vmatpush1.bf16.msra.mxu0 %v15575_v47  ;;  %5749 = vmatpush1.bf16.msra.mxu1 %v15578_v48  ;;  %v15676_v47 = vld [vmem:[#allocation2 + $0xcb4] ss:$28 sps:$4 sm:$0xff]   ;;  %v15679_v48 = vld [vmem:[#allocation2 + $0xcbc] ss:$28 sps:$4 sm:$0xff]  }
 0x208   :  { %5449 = vmatprep.subr.bf16.mxu0 %v15583_v49  ;;  %5750 = vmatprep.subr.bf16.mxu1 %v15586_v50  ;;  %v15674_v49 = vld [vmem:[#allocation2 + $0xcb0] ss:$28 sps:$4 sm:$0xff]   ;;  %v15677_v50 = vld [vmem:[#allocation2 + $0xcb8] ss:$28 sps:$4 sm:$0xff]  }
 0x20b   :  { %5450 = vmatpush1.bf16.msra.mxu0 %v15581_v51  ;;  %5751 = vmatpush1.bf16.msra.mxu1 %v15584_v52  ;;  %v15682_v51 = vld [vmem:[#allocation2 + $0xcec] ss:$28 sps:$4 sm:$0xff]   ;;  %v15685_v52 = vld [vmem:[#allocation2 + $0xcf4] ss:$28 sps:$4 sm:$0xff]  }
 0x20c   :  { %5451 = vmatprep.subr.bf16.mxu0 %v15589_v53  ;;  %5752 = vmatprep.subr.bf16.mxu1 %v15592_v54  ;;  %v15680_v53 = vld [vmem:[#allocation2 + $0xce8] ss:$28 sps:$4 sm:$0xff]   ;;  %v15683_v54 = vld [vmem:[#allocation2 + $0xcf0] ss:$28 sps:$4 sm:$0xff]  }
 0x20f   :  { %5452 = vmatpush1.bf16.msra.mxu0 %v15587_v55  ;;  %5753 = vmatpush1.bf16.msra.mxu1 %v15590_v56  ;;  %v15688_v55 = vld [vmem:[#allocation2 + $0xd24] ss:$28 sps:$4 sm:$0xff]   ;;  %v15691_v56 = vld [vmem:[#allocation2 + $0xd2c] ss:$28 sps:$4 sm:$0xff]  }
 0x210   :  { %5453 = vmatprep.subr.bf16.mxu0 %v15595_v57  ;;  %5754 = vmatprep.subr.bf16.mxu1 %v15598_v58  ;;  %v15686_v57 = vld [vmem:[#allocation2 + $0xd20] ss:$28 sps:$4 sm:$0xff]   ;;  %v15689_v58 = vld [vmem:[#allocation2 + $0xd28] ss:$28 sps:$4 sm:$0xff]  }
 0x213   :  { %5454 = vmatpush1.bf16.msra.mxu0 %v15593_v59  ;;  %5755 = vmatpush1.bf16.msra.mxu1 %v15596_v60  ;;  %v15694_v59 = vld [vmem:[#allocation2 + $0xd5c] ss:$28 sps:$4 sm:$0xff]   ;;  %v15697_v60 = vld [vmem:[#allocation2 + $0xd64] ss:$28 sps:$4 sm:$0xff]  }
 0x214   :  { %5455 = vmatprep.subr.bf16.mxu0 %v15601_v61  ;;  %5756 = vmatprep.subr.bf16.mxu1 %v15604_v62  ;;  %v15692_v61 = vld [vmem:[#allocation2 + $0xd58] ss:$28 sps:$4 sm:$0xff]   ;;  %v15695_v62 = vld [vmem:[#allocation2 + $0xd60] ss:$28 sps:$4 sm:$0xff]  }
 0x217   :  { %5456 = vmatpush1.bf16.msra.mxu0 %v15599_v63  ;;  %5757 = vmatpush1.bf16.msra.mxu1 %v15602_v0  ;;  %v15700_v63 = vld [vmem:[#allocation2 + $0xd94] ss:$28 sps:$4 sm:$0xff]   ;;  %v15703_v0 = vld [vmem:[#allocation2 + $0xd9c] ss:$28 sps:$4 sm:$0xff]  }
 0x218   :  { %5457 = vmatprep.subr.bf16.mxu0 %v15607_v1  ;;  %5758 = vmatprep.subr.bf16.mxu1 %v15610_v2  ;;  %v15698_v1 = vld [vmem:[#allocation2 + $0xd90] ss:$28 sps:$4 sm:$0xff]   ;;  %v15701_v2 = vld [vmem:[#allocation2 + $0xd98] ss:$28 sps:$4 sm:$0xff]  }
 0x21b   :  { %5458 = vmatpush1.bf16.msra.mxu0 %v15605_v3  ;;  %5759 = vmatpush1.bf16.msra.mxu1 %v15608_v4  ;;  %v15706_v3 = vld [vmem:[#allocation2 + $0xdcc] ss:$28 sps:$4 sm:$0xff]   ;;  %v15709_v4 = vld [vmem:[#allocation2 + $0xdd4] ss:$28 sps:$4 sm:$0xff]  }
 0x21c   :  { %5470 = vmatprep.subr.bf16.mxu0 %v15615_v5  ;;  %5771 = vmatprep.subr.bf16.mxu1 %v15618_v6  ;;  %v15704_v5 = vld [vmem:[#allocation2 + $0xdc8] ss:$28 sps:$4 sm:$0xff]   ;;  %v15707_v6 = vld [vmem:[#allocation2 + $0xdd0] ss:$28 sps:$4 sm:$0xff]  }
 0x21e   :  { %5460 = vmatmul.mubr.bf16.vlgmr.msra.gmra.mrb[0].mxu0 %v15619_v9  ;;  %5761 = vmatmul.mubr.bf16.vlgmr.msra.gmra.mrb[0].mxu1 %v15619_v9  ;;  %v15712_v9 = vld [vmem:[#allocation2 + $0xe00] ss:$28 sps:$4 sm:$0xff]  }
 0x21f   :  { %5471 = vmatpush1.bf16.msra.mxu0 %v15613_v7  ;;  %5772 = vmatpush1.bf16.msra.mxu1 %v15616_v8  ;;  %v15714_v7 = vld [vmem:[#allocation2 + $0xe04] ss:$28 sps:$4 sm:$0xff]   ;;  %v15717_v8 = vld [vmem:[#allocation2 + $0xe0c] ss:$28 sps:$4 sm:$0xff]  }
 0x220   :  { %5472 = vmatprep.subr.bf16.mxu0 %v15622_v10  ;;  %5773 = vmatprep.subr.bf16.mxu1 %v15625_v11  ;;  %v15715_v10 = vld [vmem:[#allocation2 + $0xe08] ss:$28 sps:$4 sm:$0xff]   ;;  %v15718_v11 = vld [vmem:[%s19098_s3 + $0x18] ss:$56 sps:$4 sm:$0xff]  }
 0x221   :  { %5502 = vmatprep.mubr.bf16.mxu0 %v15710_v12  ;;  %5803 = vmatprep.mubr.bf16.mxu1 %v15710_v12  ;;  %v15721_v12 = vld [vmem:[#allocation2 + $0xe3c] ss:$28 sps:$4 sm:$0xff]  }
 0x223   :  { %5473 = vmatpush1.bf16.msra.mxu0 %v15620_v13  ;;  %5774 = vmatpush1.bf16.msra.mxu1 %v15623_v14  ;;  %v15724_v13 = vld [vmem:[#allocation2 + $0xe44] ss:$28 sps:$4 sm:$0xff]  }
 0x224   :  { %5474 = vmatprep.subr.bf16.mxu0 %v15628_v15  ;;  %5775 = vmatprep.subr.bf16.mxu1 %v15631_v16  ;;  %v15809_v14 = vld [vmem:[%s19098_s3 + $0x24] ss:$56 sps:$4 sm:$0xff]   ;;  %v15719_v15 = vld [vmem:[#allocation2 + $0xe38] ss:$28 sps:$4 sm:$0xff]  }
 0x225   :  { %v15722_v16 = vld [vmem:[#allocation2 + $0xe40] ss:$28 sps:$4 sm:$0xff]  }
 0x227   :  { %5475 = vmatpush1.bf16.msra.mxu0 %v15626_v17  ;;  %5776 = vmatpush1.bf16.msra.mxu1 %v15629_v18  ;;  %v15727_v17 = vld [vmem:[#allocation2 + $0xe74] ss:$28 sps:$4 sm:$0xff]   ;;  %v15730_v18 = vld [vmem:[#allocation2 + $0xe7c] ss:$28 sps:$4 sm:$0xff]  }
 0x228   :  { %5476 = vmatprep.subr.bf16.mxu0 %v15634_v19  ;;  %5777 = vmatprep.subr.bf16.mxu1 %v15637_v20  ;;  %v15725_v19 = vld [vmem:[#allocation2 + $0xe70] ss:$28 sps:$4 sm:$0xff]   ;;  %v15728_v20 = vld [vmem:[#allocation2 + $0xe78] ss:$28 sps:$4 sm:$0xff]  }
 0x22b   :  { %5477 = vmatpush1.bf16.msra.mxu0 %v15632_v21  ;;  %5778 = vmatpush1.bf16.msra.mxu1 %v15635_v22  ;;  %v15733_v21 = vld [vmem:[#allocation2 + $0xeac] ss:$28 sps:$4 sm:$0xff]   ;;  %v15736_v22 = vld [vmem:[#allocation2 + $0xeb4] ss:$28 sps:$4 sm:$0xff]  }
 0x22c   :  { %5478 = vmatprep.subr.bf16.mxu0 %v15640_v23  ;;  %5779 = vmatprep.subr.bf16.mxu1 %v15643_v24  ;;  %v15731_v23 = vld [vmem:[#allocation2 + $0xea8] ss:$28 sps:$4 sm:$0xff]   ;;  %v15734_v24 = vld [vmem:[#allocation2 + $0xeb0] ss:$28 sps:$4 sm:$0xff]  }
 0x22f   :  { %5479 = vmatpush1.bf16.msra.mxu0 %v15638_v25  ;;  %5780 = vmatpush1.bf16.msra.mxu1 %v15641_v26  ;;  %v15739_v25 = vld [vmem:[#allocation2 + $0xee4] ss:$28 sps:$4 sm:$0xff]   ;;  %v15742_v26 = vld [vmem:[#allocation2 + $0xeec] ss:$28 sps:$4 sm:$0xff]  }
 0x230   :  { %5480 = vmatprep.subr.bf16.mxu0 %v15646_v27  ;;  %5781 = vmatprep.subr.bf16.mxu1 %v15649_v28  ;;  %v15737_v27 = vld [vmem:[#allocation2 + $0xee0] ss:$28 sps:$4 sm:$0xff]   ;;  %v15740_v28 = vld [vmem:[#allocation2 + $0xee8] ss:$28 sps:$4 sm:$0xff]  }
 0x233   :  { %5481 = vmatpush1.bf16.msra.mxu0 %v15644_v29  ;;  %5782 = vmatpush1.bf16.msra.mxu1 %v15647_v30  ;;  %v15745_v29 = vld [vmem:[#allocation2 + $0xf1c] ss:$28 sps:$4 sm:$0xff]   ;;  %v15748_v30 = vld [vmem:[#allocation2 + $0xf24] ss:$28 sps:$4 sm:$0xff]  }
 0x234   :  { %5482 = vmatprep.subr.bf16.mxu0 %v15652_v31  ;;  %5783 = vmatprep.subr.bf16.mxu1 %v15655_v32  ;;  %v15743_v31 = vld [vmem:[#allocation2 + $0xf18] ss:$28 sps:$4 sm:$0xff]   ;;  %v15746_v32 = vld [vmem:[#allocation2 + $0xf20] ss:$28 sps:$4 sm:$0xff]  }
 0x237   :  { %5483 = vmatpush1.bf16.msra.mxu0 %v15650_v33  ;;  %5784 = vmatpush1.bf16.msra.mxu1 %v15653_v34  ;;  %v15751_v33 = vld [vmem:[#allocation2 + $0xf54] ss:$28 sps:$4 sm:$0xff]   ;;  %v15754_v34 = vld [vmem:[#allocation2 + $0xf5c] ss:$28 sps:$4 sm:$0xff]  }
 0x238   :  { %5484 = vmatprep.subr.bf16.mxu0 %v15658_v35  ;;  %5785 = vmatprep.subr.bf16.mxu1 %v15661_v36  ;;  %v15749_v35 = vld [vmem:[#allocation2 + $0xf50] ss:$28 sps:$4 sm:$0xff]   ;;  %v15752_v36 = vld [vmem:[#allocation2 + $0xf58] ss:$28 sps:$4 sm:$0xff]  }
 0x23b   :  { %5485 = vmatpush1.bf16.msra.mxu0 %v15656_v37  ;;  %5786 = vmatpush1.bf16.msra.mxu1 %v15659_v38  ;;  %v15757_v37 = vld [vmem:[#allocation2 + $0xf8c] ss:$28 sps:$4 sm:$0xff]   ;;  %v15760_v38 = vld [vmem:[#allocation2 + $0xf94] ss:$28 sps:$4 sm:$0xff]  }
 0x23c   :  { %5486 = vmatprep.subr.bf16.mxu0 %v15664_v39  ;;  %5787 = vmatprep.subr.bf16.mxu1 %v15667_v40  ;;  %v15755_v39 = vld [vmem:[#allocation2 + $0xf88] ss:$28 sps:$4 sm:$0xff]   ;;  %v15758_v40 = vld [vmem:[#allocation2 + $0xf90] ss:$28 sps:$4 sm:$0xff]  }
 0x23f   :  { %5487 = vmatpush1.bf16.msra.mxu0 %v15662_v41  ;;  %5788 = vmatpush1.bf16.msra.mxu1 %v15665_v42  ;;  %v15763_v41 = vld [vmem:[#allocation2 + $0xfc4] ss:$28 sps:$4 sm:$0xff]   ;;  %v15766_v42 = vld [vmem:[#allocation2 + $0xfcc] ss:$28 sps:$4 sm:$0xff]  }
 0x240   :  { %5488 = vmatprep.subr.bf16.mxu0 %v15670_v43  ;;  %5789 = vmatprep.subr.bf16.mxu1 %v15673_v44  ;;  %v15761_v43 = vld [vmem:[#allocation2 + $0xfc0] ss:$28 sps:$4 sm:$0xff]   ;;  %v15764_v44 = vld [vmem:[#allocation2 + $0xfc8] ss:$28 sps:$4 sm:$0xff]  }
 0x243   :  { %5489 = vmatpush1.bf16.msra.mxu0 %v15668_v45  ;;  %5790 = vmatpush1.bf16.msra.mxu1 %v15671_v46  ;;  %v15769_v45 = vld [vmem:[#allocation2 + $0xffc] ss:$28 sps:$4 sm:$0xff]   ;;  %v15772_v46 = vld [vmem:[#allocation2 + $0x1004] ss:$28 sps:$4 sm:$0xff]  }
 0x244   :  { %5490 = vmatprep.subr.bf16.mxu0 %v15676_v47  ;;  %5791 = vmatprep.subr.bf16.mxu1 %v15679_v48  ;;  %v15767_v47 = vld [vmem:[#allocation2 + $0xff8] ss:$28 sps:$4 sm:$0xff]   ;;  %v15770_v48 = vld [vmem:[#allocation2 + $0x1000] ss:$28 sps:$4 sm:$0xff]  }
 0x247   :  { %5491 = vmatpush1.bf16.msra.mxu0 %v15674_v49  ;;  %5792 = vmatpush1.bf16.msra.mxu1 %v15677_v50  ;;  %v15775_v49 = vld [vmem:[#allocation2 + $0x1034] ss:$28 sps:$4 sm:$0xff]   ;;  %v15778_v50 = vld [vmem:[#allocation2 + $0x103c] ss:$28 sps:$4 sm:$0xff]  }
 0x248   :  { %5492 = vmatprep.subr.bf16.mxu0 %v15682_v51  ;;  %5793 = vmatprep.subr.bf16.mxu1 %v15685_v52  ;;  %v15773_v51 = vld [vmem:[#allocation2 + $0x1030] ss:$28 sps:$4 sm:$0xff]   ;;  %v15776_v52 = vld [vmem:[#allocation2 + $0x1038] ss:$28 sps:$4 sm:$0xff]  }
 0x24b   :  { %5493 = vmatpush1.bf16.msra.mxu0 %v15680_v53  ;;  %5794 = vmatpush1.bf16.msra.mxu1 %v15683_v54  ;;  %v15781_v53 = vld [vmem:[#allocation2 + $0x106c] ss:$28 sps:$4 sm:$0xff]   ;;  %v15784_v54 = vld [vmem:[#allocation2 + $0x1074] ss:$28 sps:$4 sm:$0xff]  }
 0x24c   :  { %5494 = vmatprep.subr.bf16.mxu0 %v15688_v55  ;;  %5795 = vmatprep.subr.bf16.mxu1 %v15691_v56  ;;  %v15779_v55 = vld [vmem:[#allocation2 + $0x1068] ss:$28 sps:$4 sm:$0xff]   ;;  %v15782_v56 = vld [vmem:[#allocation2 + $0x1070] ss:$28 sps:$4 sm:$0xff]  }
 0x24f   :  { %5495 = vmatpush1.bf16.msra.mxu0 %v15686_v57  ;;  %5796 = vmatpush1.bf16.msra.mxu1 %v15689_v58  ;;  %v15787_v57 = vld [vmem:[#allocation2 + $0x10a4] ss:$28 sps:$4 sm:$0xff]   ;;  %v15790_v58 = vld [vmem:[#allocation2 + $0x10ac] ss:$28 sps:$4 sm:$0xff]  }
 0x250   :  { %5496 = vmatprep.subr.bf16.mxu0 %v15694_v59  ;;  %5797 = vmatprep.subr.bf16.mxu1 %v15697_v60  ;;  %v15785_v59 = vld [vmem:[#allocation2 + $0x10a0] ss:$28 sps:$4 sm:$0xff]   ;;  %v15788_v60 = vld [vmem:[#allocation2 + $0x10a8] ss:$28 sps:$4 sm:$0xff]  }
 0x253   :  { %5497 = vmatpush1.bf16.msra.mxu0 %v15692_v61  ;;  %5798 = vmatpush1.bf16.msra.mxu1 %v15695_v62  ;;  %v15793_v61 = vld [vmem:[#allocation2 + $0x10dc] ss:$28 sps:$4 sm:$0xff]   ;;  %v15796_v62 = vld [vmem:[#allocation2 + $0x10e4] ss:$28 sps:$4 sm:$0xff]  }
 0x254   :  { %5498 = vmatprep.subr.bf16.mxu0 %v15700_v63  ;;  %5799 = vmatprep.subr.bf16.mxu1 %v15703_v0  ;;  %v15791_v63 = vld [vmem:[#allocation2 + $0x10d8] ss:$28 sps:$4 sm:$0xff]   ;;  %v15794_v0 = vld [vmem:[#allocation2 + $0x10e0] ss:$28 sps:$4 sm:$0xff]  }
 0x257   :  { %5499 = vmatpush1.bf16.msra.mxu0 %v15698_v1  ;;  %5800 = vmatpush1.bf16.msra.mxu1 %v15701_v2  ;;  %v15799_v1 = vld [vmem:[#allocation2 + $0x1114] ss:$28 sps:$4 sm:$0xff]   ;;  %v15802_v2 = vld [vmem:[#allocation2 + $0x111c] ss:$28 sps:$4 sm:$0xff]  }
 0x258   :  { %5500 = vmatprep.subr.bf16.mxu0 %v15706_v3  ;;  %5801 = vmatprep.subr.bf16.mxu1 %v15709_v4  ;;  %v15797_v3 = vld [vmem:[#allocation2 + $0x1110] ss:$28 sps:$4 sm:$0xff]   ;;  %v15800_v4 = vld [vmem:[#allocation2 + $0x1118] ss:$28 sps:$4 sm:$0xff]  }
 0x25b   :  { %5501 = vmatpush1.bf16.msra.mxu0 %v15704_v5  ;;  %5802 = vmatpush1.bf16.msra.mxu1 %v15707_v6  ;;  %v15805_v5 = vld [vmem:[#allocation2 + $0x114c] ss:$28 sps:$4 sm:$0xff]   ;;  %v15808_v6 = vld [vmem:[#allocation2 + $0x1154] ss:$28 sps:$4 sm:$0xff]  }
 0x25c   :  { %5513 = vmatprep.subr.bf16.mxu0 %v15714_v7  ;;  %5814 = vmatprep.subr.bf16.mxu1 %v15717_v8  ;;  %v15803_v7 = vld [vmem:[#allocation2 + $0x1148] ss:$28 sps:$4 sm:$0xff]   ;;  %v15806_v8 = vld [vmem:[#allocation2 + $0x1150] ss:$28 sps:$4 sm:$0xff]  }
 0x25e   :  { %5503 = vmatmul.mubr.bf16.vlgmr.msra.gmra.mrb[0].mxu0 %v15718_v11  ;;  %5804 = vmatmul.mubr.bf16.vlgmr.msra.gmra.mrb[0].mxu1 %v15718_v11  ;;  %v15817_v11 = vld [vmem:[%s19098_s3 + $0x20] ss:$56 sps:$4 sm:$0xff]  }
 0x25f   :  { %5514 = vmatpush1.bf16.msra.mxu0 %v15712_v9  ;;  %5815 = vmatpush1.bf16.msra.mxu1 %v15715_v10  ;;  %v15813_v9 = vld [vmem:[#allocation2 + $0x1184] ss:$28 sps:$4 sm:$0xff]   ;;  %v15816_v10 = vld [vmem:[#allocation2 + $0x118c] ss:$28 sps:$4 sm:$0xff]  }
 0x260   :  { %5515 = vmatprep.subr.bf16.mxu0 %v15721_v12  ;;  %5816 = vmatprep.subr.bf16.mxu1 %v15724_v13  ;;  %v15811_v12 = vld [vmem:[#allocation2 + $0x1180] ss:$28 sps:$4 sm:$0xff]   ;;  %v15814_v13 = vld [vmem:[#allocation2 + $0x1188] ss:$28 sps:$4 sm:$0xff]  }
 0x261   :  { %5545 = vmatprep.mubr.bf16.mxu0 %v15809_v14  ;;  %5846 = vmatprep.mubr.bf16.mxu1 %v15809_v14  ;;  %v15820_v14 = vld [vmem:[#allocation2 + $0x11bc] ss:$28 sps:$4 sm:$0xff]  }
 0x263   :  { %5516 = vmatpush1.bf16.msra.mxu0 %v15719_v15  ;;  %5817 = vmatpush1.bf16.msra.mxu1 %v15722_v16  ;;  %v15823_v15 = vld [vmem:[#allocation2 + $0x11c4] ss:$28 sps:$4 sm:$0xff]   ;;  %v15818_v16 = vld [vmem:[#allocation2 + $0x11b8] ss:$28 sps:$4 sm:$0xff]  }
 0x264   :  { %5517 = vmatprep.subr.bf16.mxu0 %v15727_v17  ;;  %5818 = vmatprep.subr.bf16.mxu1 %v15730_v18  ;;  %v15908_v17 = vld [vmem:[%s19098_s3 + $0x2c] ss:$56 sps:$4 sm:$0xff]   ;;  %v15821_v18 = vld [vmem:[#allocation2 + $0x11c0] ss:$28 sps:$4 sm:$0xff]  }
 0x267   :  { %5518 = vmatpush1.bf16.msra.mxu0 %v15725_v19  ;;  %5819 = vmatpush1.bf16.msra.mxu1 %v15728_v20  ;;  %v15826_v19 = vld [vmem:[#allocation2 + $0x11f4] ss:$28 sps:$4 sm:$0xff]   ;;  %v15829_v20 = vld [vmem:[#allocation2 + $0x11fc] ss:$28 sps:$4 sm:$0xff]  }
 0x268   :  { %5519 = vmatprep.subr.bf16.mxu0 %v15733_v21  ;;  %5820 = vmatprep.subr.bf16.mxu1 %v15736_v22  ;;  %v15824_v21 = vld [vmem:[#allocation2 + $0x11f0] ss:$28 sps:$4 sm:$0xff]   ;;  %v15827_v22 = vld [vmem:[#allocation2 + $0x11f8] ss:$28 sps:$4 sm:$0xff]  }
 0x26b   :  { %5520 = vmatpush1.bf16.msra.mxu0 %v15731_v23  ;;  %5821 = vmatpush1.bf16.msra.mxu1 %v15734_v24  ;;  %v15832_v23 = vld [vmem:[#allocation2 + $0x122c] ss:$28 sps:$4 sm:$0xff]   ;;  %v15835_v24 = vld [vmem:[#allocation2 + $0x1234] ss:$28 sps:$4 sm:$0xff]  }
 0x26c   :  { %5521 = vmatprep.subr.bf16.mxu0 %v15739_v25  ;;  %5822 = vmatprep.subr.bf16.mxu1 %v15742_v26  ;;  %v15830_v25 = vld [vmem:[#allocation2 + $0x1228] ss:$28 sps:$4 sm:$0xff]   ;;  %v15833_v26 = vld [vmem:[#allocation2 + $0x1230] ss:$28 sps:$4 sm:$0xff]  }
 0x26f   :  { %5522 = vmatpush1.bf16.msra.mxu0 %v15737_v27  ;;  %5823 = vmatpush1.bf16.msra.mxu1 %v15740_v28  ;;  %v15838_v27 = vld [vmem:[#allocation2 + $0x1264] ss:$28 sps:$4 sm:$0xff]   ;;  %v15841_v28 = vld [vmem:[#allocation2 + $0x126c] ss:$28 sps:$4 sm:$0xff]  }
 0x270   :  { %5523 = vmatprep.subr.bf16.mxu0 %v15745_v29  ;;  %5824 = vmatprep.subr.bf16.mxu1 %v15748_v30  ;;  %v15836_v29 = vld [vmem:[#allocation2 + $0x1260] ss:$28 sps:$4 sm:$0xff]   ;;  %v15839_v30 = vld [vmem:[#allocation2 + $0x1268] ss:$28 sps:$4 sm:$0xff]  }
 0x273   :  { %5524 = vmatpush1.bf16.msra.mxu0 %v15743_v31  ;;  %5825 = vmatpush1.bf16.msra.mxu1 %v15746_v32  ;;  %v15844_v31 = vld [vmem:[#allocation2 + $0x129c] ss:$28 sps:$4 sm:$0xff]   ;;  %v15847_v32 = vld [vmem:[#allocation2 + $0x12a4] ss:$28 sps:$4 sm:$0xff]  }
 0x274   :  { %5525 = vmatprep.subr.bf16.mxu0 %v15751_v33  ;;  %5826 = vmatprep.subr.bf16.mxu1 %v15754_v34  ;;  %v15842_v33 = vld [vmem:[#allocation2 + $0x1298] ss:$28 sps:$4 sm:$0xff]   ;;  %v15845_v34 = vld [vmem:[#allocation2 + $0x12a0] ss:$28 sps:$4 sm:$0xff]  }
 0x277   :  { %5526 = vmatpush1.bf16.msra.mxu0 %v15749_v35  ;;  %5827 = vmatpush1.bf16.msra.mxu1 %v15752_v36  ;;  %v15850_v35 = vld [vmem:[#allocation2 + $0x12d4] ss:$28 sps:$4 sm:$0xff]   ;;  %v15853_v36 = vld [vmem:[#allocation2 + $0x12dc] ss:$28 sps:$4 sm:$0xff]  }
 0x278   :  { %5527 = vmatprep.subr.bf16.mxu0 %v15757_v37  ;;  %5828 = vmatprep.subr.bf16.mxu1 %v15760_v38  ;;  %v15848_v37 = vld [vmem:[#allocation2 + $0x12d0] ss:$28 sps:$4 sm:$0xff]   ;;  %v15851_v38 = vld [vmem:[#allocation2 + $0x12d8] ss:$28 sps:$4 sm:$0xff]  }
 0x27b   :  { %5528 = vmatpush1.bf16.msra.mxu0 %v15755_v39  ;;  %5829 = vmatpush1.bf16.msra.mxu1 %v15758_v40  ;;  %v15856_v39 = vld [vmem:[#allocation2 + $0x130c] ss:$28 sps:$4 sm:$0xff]   ;;  %v15859_v40 = vld [vmem:[#allocation2 + $0x1314] ss:$28 sps:$4 sm:$0xff]  }
 0x27c   :  { %5529 = vmatprep.subr.bf16.mxu0 %v15763_v41  ;;  %5830 = vmatprep.subr.bf16.mxu1 %v15766_v42  ;;  %v15854_v41 = vld [vmem:[#allocation2 + $0x1308] ss:$28 sps:$4 sm:$0xff]   ;;  %v15857_v42 = vld [vmem:[#allocation2 + $0x1310] ss:$28 sps:$4 sm:$0xff]  }
 0x27f   :  { %5530 = vmatpush1.bf16.msra.mxu0 %v15761_v43  ;;  %5831 = vmatpush1.bf16.msra.mxu1 %v15764_v44  ;;  %v15862_v43 = vld [vmem:[#allocation2 + $0x1344] ss:$28 sps:$4 sm:$0xff]   ;;  %v15865_v44 = vld [vmem:[#allocation2 + $0x134c] ss:$28 sps:$4 sm:$0xff]  }
 0x280   :  { %5531 = vmatprep.subr.bf16.mxu0 %v15769_v45  ;;  %5832 = vmatprep.subr.bf16.mxu1 %v15772_v46  ;;  %v15860_v45 = vld [vmem:[#allocation2 + $0x1340] ss:$28 sps:$4 sm:$0xff]   ;;  %v15863_v46 = vld [vmem:[#allocation2 + $0x1348] ss:$28 sps:$4 sm:$0xff]  }
 0x283   :  { %5532 = vmatpush1.bf16.msra.mxu0 %v15767_v47  ;;  %5833 = vmatpush1.bf16.msra.mxu1 %v15770_v48  ;;  %v15868_v47 = vld [vmem:[#allocation2 + $0x137c] ss:$28 sps:$4 sm:$0xff]   ;;  %v15871_v48 = vld [vmem:[#allocation2 + $0x1384] ss:$28 sps:$4 sm:$0xff]  }
 0x284   :  { %5533 = vmatprep.subr.bf16.mxu0 %v15775_v49  ;;  %5834 = vmatprep.subr.bf16.mxu1 %v15778_v50  ;;  %v15866_v49 = vld [vmem:[#allocation2 + $0x1378] ss:$28 sps:$4 sm:$0xff]   ;;  %v15869_v50 = vld [vmem:[#allocation2 + $0x1380] ss:$28 sps:$4 sm:$0xff]  }
 0x287   :  { %5534 = vmatpush1.bf16.msra.mxu0 %v15773_v51  ;;  %5835 = vmatpush1.bf16.msra.mxu1 %v15776_v52  ;;  %v15874_v51 = vld [vmem:[#allocation2 + $0x13b4] ss:$28 sps:$4 sm:$0xff]   ;;  %v15877_v52 = vld [vmem:[#allocation2 + $0x13bc] ss:$28 sps:$4 sm:$0xff]  }
 0x288   :  { %5535 = vmatprep.subr.bf16.mxu0 %v15781_v53  ;;  %5836 = vmatprep.subr.bf16.mxu1 %v15784_v54  ;;  %v15872_v53 = vld [vmem:[#allocation2 + $0x13b0] ss:$28 sps:$4 sm:$0xff]   ;;  %v15875_v54 = vld [vmem:[#allocation2 + $0x13b8] ss:$28 sps:$4 sm:$0xff]  }
 0x28b   :  { %5536 = vmatpush1.bf16.msra.mxu0 %v15779_v55  ;;  %5837 = vmatpush1.bf16.msra.mxu1 %v15782_v56  ;;  %v15880_v55 = vld [vmem:[#allocation2 + $0x13ec] ss:$28 sps:$4 sm:$0xff]   ;;  %v15883_v56 = vld [vmem:[#allocation2 + $0x13f4] ss:$28 sps:$4 sm:$0xff]  }
 0x28c   :  { %5537 = vmatprep.subr.bf16.mxu0 %v15787_v57  ;;  %5838 = vmatprep.subr.bf16.mxu1 %v15790_v58  ;;  %v15878_v57 = vld [vmem:[#allocation2 + $0x13e8] ss:$28 sps:$4 sm:$0xff]   ;;  %v15881_v58 = vld [vmem:[#allocation2 + $0x13f0] ss:$28 sps:$4 sm:$0xff]  }
 0x28f   :  { %5538 = vmatpush1.bf16.msra.mxu0 %v15785_v59  ;;  %5839 = vmatpush1.bf16.msra.mxu1 %v15788_v60  ;;  %v15886_v59 = vld [vmem:[#allocation2 + $0x1424] ss:$28 sps:$4 sm:$0xff]   ;;  %v15889_v60 = vld [vmem:[#allocation2 + $0x142c] ss:$28 sps:$4 sm:$0xff]  }
 0x290   :  { %5539 = vmatprep.subr.bf16.mxu0 %v15793_v61  ;;  %5840 = vmatprep.subr.bf16.mxu1 %v15796_v62  ;;  %v15884_v61 = vld [vmem:[#allocation2 + $0x1420] ss:$28 sps:$4 sm:$0xff]   ;;  %v15887_v62 = vld [vmem:[#allocation2 + $0x1428] ss:$28 sps:$4 sm:$0xff]  }
 0x293   :  { %5540 = vmatpush1.bf16.msra.mxu0 %v15791_v63  ;;  %5841 = vmatpush1.bf16.msra.mxu1 %v15794_v0  ;;  %v15892_v63 = vld [vmem:[#allocation2 + $0x145c] ss:$28 sps:$4 sm:$0xff]   ;;  %v15895_v0 = vld [vmem:[#allocation2 + $0x1464] ss:$28 sps:$4 sm:$0xff]  }
 0x294   :  { %5541 = vmatprep.subr.bf16.mxu0 %v15799_v1  ;;  %5842 = vmatprep.subr.bf16.mxu1 %v15802_v2  ;;  %v15890_v1 = vld [vmem:[#allocation2 + $0x1458] ss:$28 sps:$4 sm:$0xff]   ;;  %v15893_v2 = vld [vmem:[#allocation2 + $0x1460] ss:$28 sps:$4 sm:$0xff]  }
 0x297   :  { %5542 = vmatpush1.bf16.msra.mxu0 %v15797_v3  ;;  %5843 = vmatpush1.bf16.msra.mxu1 %v15800_v4  ;;  %v15898_v3 = vld [vmem:[#allocation2 + $0x1494] ss:$28 sps:$4 sm:$0xff]   ;;  %v15901_v4 = vld [vmem:[#allocation2 + $0x149c] ss:$28 sps:$4 sm:$0xff]  }
 0x298   :  { %5543 = vmatprep.subr.bf16.mxu0 %v15805_v5  ;;  %5844 = vmatprep.subr.bf16.mxu1 %v15808_v6  ;;  %v15896_v5 = vld [vmem:[#allocation2 + $0x1490] ss:$28 sps:$4 sm:$0xff]   ;;  %v15899_v6 = vld [vmem:[#allocation2 + $0x1498] ss:$28 sps:$4 sm:$0xff]  }
 0x29b   :  { %5544 = vmatpush1.bf16.msra.mxu0 %v15803_v7  ;;  %5845 = vmatpush1.bf16.msra.mxu1 %v15806_v8  ;;  %v15904_v7 = vld [vmem:[#allocation2 + $0x14cc] ss:$28 sps:$4 sm:$0xff]   ;;  %v15907_v8 = vld [vmem:[#allocation2 + $0x14d4] ss:$28 sps:$4 sm:$0xff]  }
 0x29c   :  { %5556 = vmatprep.subr.bf16.mxu0 %v15813_v9  ;;  %5857 = vmatprep.subr.bf16.mxu1 %v15816_v10  ;;  %v15902_v9 = vld [vmem:[#allocation2 + $0x14c8] ss:$28 sps:$4 sm:$0xff]   ;;  %v15905_v10 = vld [vmem:[#allocation2 + $0x14d0] ss:$28 sps:$4 sm:$0xff]  }
 0x29e   :  { %5546 = vmatmul.mubr.bf16.vlgmr.msra.gmra.mrb[0].mxu0 %v15817_v11  ;;  %5847 = vmatmul.mubr.bf16.vlgmr.msra.gmra.mrb[0].mxu1 %v15817_v11  ;;  %v15912_v11 = vld [vmem:[#allocation2 + $0x1504] ss:$28 sps:$4 sm:$0xff]  }
 0x29f   :  { %5557 = vmatpush1.bf16.msra.mxu0 %v15811_v12  ;;  %5858 = vmatpush1.bf16.msra.mxu1 %v15814_v13  ;;  %v15915_v12 = vld [vmem:[#allocation2 + $0x150c] ss:$28 sps:$4 sm:$0xff]   ;;  %v15910_v13 = vld [vmem:[#allocation2 + $0x1500] ss:$28 sps:$4 sm:$0xff]  }
 0x2a0   :  { %5558 = vmatprep.subr.bf16.mxu0 %v15820_v14  ;;  %5859 = vmatprep.subr.bf16.mxu1 %v15823_v15  ;;  %v15916_v14 = vld [vmem:[%s19098_s3 + $0x28] ss:$56 sps:$4 sm:$0xff]  }
 0x2a1   :  { %5588 = vmatprep.mubr.bf16.mxu0 %v15908_v17  ;;  %5889 = vmatprep.mubr.bf16.mxu1 %v15908_v17  ;;  %v15913_v15 = vld [vmem:[#allocation2 + $0x1508] ss:$28 sps:$4 sm:$0xff]  }
 0x2a2   :  { %v15922_v17 = vld [vmem:[#allocation2 + $0x1544] ss:$28 sps:$4 sm:$0xff]  }
 0x2a3   :  { %5559 = vmatpush1.bf16.msra.mxu0 %v15818_v16  ;;  %5860 = vmatpush1.bf16.msra.mxu1 %v15821_v18  ;;  %v15919_v16 = vld [vmem:[#allocation2 + $0x153c] ss:$28 sps:$4 sm:$0xff]  }
 0x2a4   :  { %5560 = vmatprep.subr.bf16.mxu0 %v15826_v19  ;;  %5861 = vmatprep.subr.bf16.mxu1 %v15829_v20  ;;  %v15917_v18 = vld [vmem:[#allocation2 + $0x1538] ss:$28 sps:$4 sm:$0xff]   ;;  %v15920_v20 = vld [vmem:[#allocation2 + $0x1540] ss:$28 sps:$4 sm:$0xff]  }
 0x2a5   :  { %v16007_v19 = vld [vmem:[%s19098_s3 + $0x34] ss:$56 sps:$4 sm:$0xff]  }
 0x2a7   :  { %5561 = vmatpush1.bf16.msra.mxu0 %v15824_v21  ;;  %5862 = vmatpush1.bf16.msra.mxu1 %v15827_v22  ;;  %v15925_v21 = vld [vmem:[#allocation2 + $0x1574] ss:$28 sps:$4 sm:$0xff]   ;;  %v15928_v22 = vld [vmem:[#allocation2 + $0x157c] ss:$28 sps:$4 sm:$0xff]  }
 0x2a8   :  { %5562 = vmatprep.subr.bf16.mxu0 %v15832_v23  ;;  %5863 = vmatprep.subr.bf16.mxu1 %v15835_v24  ;;  %v15923_v23 = vld [vmem:[#allocation2 + $0x1570] ss:$28 sps:$4 sm:$0xff]   ;;  %v15926_v24 = vld [vmem:[#allocation2 + $0x1578] ss:$28 sps:$4 sm:$0xff]  }
 0x2ab   :  { %5563 = vmatpush1.bf16.msra.mxu0 %v15830_v25  ;;  %5864 = vmatpush1.bf16.msra.mxu1 %v15833_v26  ;;  %v15931_v25 = vld [vmem:[#allocation2 + $0x15ac] ss:$28 sps:$4 sm:$0xff]   ;;  %v15934_v26 = vld [vmem:[#allocation2 + $0x15b4] ss:$28 sps:$4 sm:$0xff]  }
 0x2ac   :  { %5564 = vmatprep.subr.bf16.mxu0 %v15838_v27  ;;  %5865 = vmatprep.subr.bf16.mxu1 %v15841_v28  ;;  %v15929_v27 = vld [vmem:[#allocation2 + $0x15a8] ss:$28 sps:$4 sm:$0xff]   ;;  %v15932_v28 = vld [vmem:[#allocation2 + $0x15b0] ss:$28 sps:$4 sm:$0xff]  }
 0x2af   :  { %5565 = vmatpush1.bf16.msra.mxu0 %v15836_v29  ;;  %5866 = vmatpush1.bf16.msra.mxu1 %v15839_v30  ;;  %v15937_v29 = vld [vmem:[#allocation2 + $0x15e4] ss:$28 sps:$4 sm:$0xff]   ;;  %v15940_v30 = vld [vmem:[#allocation2 + $0x15ec] ss:$28 sps:$4 sm:$0xff]  }
 0x2b0   :  { %5566 = vmatprep.subr.bf16.mxu0 %v15844_v31  ;;  %5867 = vmatprep.subr.bf16.mxu1 %v15847_v32  ;;  %v15935_v31 = vld [vmem:[#allocation2 + $0x15e0] ss:$28 sps:$4 sm:$0xff]   ;;  %v15938_v32 = vld [vmem:[#allocation2 + $0x15e8] ss:$28 sps:$4 sm:$0xff]  }
 0x2b3   :  { %5567 = vmatpush1.bf16.msra.mxu0 %v15842_v33  ;;  %5868 = vmatpush1.bf16.msra.mxu1 %v15845_v34  ;;  %v15943_v33 = vld [vmem:[#allocation2 + $0x161c] ss:$28 sps:$4 sm:$0xff]   ;;  %v15946_v34 = vld [vmem:[#allocation2 + $0x1624] ss:$28 sps:$4 sm:$0xff]  }
 0x2b4   :  { %5568 = vmatprep.subr.bf16.mxu0 %v15850_v35  ;;  %5869 = vmatprep.subr.bf16.mxu1 %v15853_v36  ;;  %v15941_v35 = vld [vmem:[#allocation2 + $0x1618] ss:$28 sps:$4 sm:$0xff]   ;;  %v15944_v36 = vld [vmem:[#allocation2 + $0x1620] ss:$28 sps:$4 sm:$0xff]  }
 0x2b7   :  { %5569 = vmatpush1.bf16.msra.mxu0 %v15848_v37  ;;  %5870 = vmatpush1.bf16.msra.mxu1 %v15851_v38  ;;  %v15949_v37 = vld [vmem:[#allocation2 + $0x1654] ss:$28 sps:$4 sm:$0xff]   ;;  %v15952_v38 = vld [vmem:[#allocation2 + $0x165c] ss:$28 sps:$4 sm:$0xff]  }
 0x2b8   :  { %5570 = vmatprep.subr.bf16.mxu0 %v15856_v39  ;;  %5871 = vmatprep.subr.bf16.mxu1 %v15859_v40  ;;  %v15947_v39 = vld [vmem:[#allocation2 + $0x1650] ss:$28 sps:$4 sm:$0xff]   ;;  %v15950_v40 = vld [vmem:[#allocation2 + $0x1658] ss:$28 sps:$4 sm:$0xff]  }
 0x2bb   :  { %5571 = vmatpush1.bf16.msra.mxu0 %v15854_v41  ;;  %5872 = vmatpush1.bf16.msra.mxu1 %v15857_v42  ;;  %v15955_v41 = vld [vmem:[#allocation2 + $0x168c] ss:$28 sps:$4 sm:$0xff]   ;;  %v15958_v42 = vld [vmem:[#allocation2 + $0x1694] ss:$28 sps:$4 sm:$0xff]  }
 0x2bc   :  { %5572 = vmatprep.subr.bf16.mxu0 %v15862_v43  ;;  %5873 = vmatprep.subr.bf16.mxu1 %v15865_v44  ;;  %v15953_v43 = vld [vmem:[#allocation2 + $0x1688] ss:$28 sps:$4 sm:$0xff]   ;;  %v15956_v44 = vld [vmem:[#allocation2 + $0x1690] ss:$28 sps:$4 sm:$0xff]  }
 0x2bf   :  { %5573 = vmatpush1.bf16.msra.mxu0 %v15860_v45  ;;  %5874 = vmatpush1.bf16.msra.mxu1 %v15863_v46  ;;  %v15961_v45 = vld [vmem:[#allocation2 + $0x16c4] ss:$28 sps:$4 sm:$0xff]   ;;  %v15964_v46 = vld [vmem:[#allocation2 + $0x16cc] ss:$28 sps:$4 sm:$0xff]  }
 0x2c0   :  { %5574 = vmatprep.subr.bf16.mxu0 %v15868_v47  ;;  %5875 = vmatprep.subr.bf16.mxu1 %v15871_v48  ;;  %v15959_v47 = vld [vmem:[#allocation2 + $0x16c0] ss:$28 sps:$4 sm:$0xff]   ;;  %v15962_v48 = vld [vmem:[#allocation2 + $0x16c8] ss:$28 sps:$4 sm:$0xff]  }
 0x2c3   :  { %5575 = vmatpush1.bf16.msra.mxu0 %v15866_v49  ;;  %5876 = vmatpush1.bf16.msra.mxu1 %v15869_v50  ;;  %v15967_v49 = vld [vmem:[#allocation2 + $0x16fc] ss:$28 sps:$4 sm:$0xff]   ;;  %v15970_v50 = vld [vmem:[#allocation2 + $0x1704] ss:$28 sps:$4 sm:$0xff]  }
 0x2c4   :  { %5576 = vmatprep.subr.bf16.mxu0 %v15874_v51  ;;  %5877 = vmatprep.subr.bf16.mxu1 %v15877_v52  ;;  %v15965_v51 = vld [vmem:[#allocation2 + $0x16f8] ss:$28 sps:$4 sm:$0xff]   ;;  %v15968_v52 = vld [vmem:[#allocation2 + $0x1700] ss:$28 sps:$4 sm:$0xff]  }
 0x2c7   :  { %5577 = vmatpush1.bf16.msra.mxu0 %v15872_v53  ;;  %5878 = vmatpush1.bf16.msra.mxu1 %v15875_v54  ;;  %v15973_v53 = vld [vmem:[#allocation2 + $0x1734] ss:$28 sps:$4 sm:$0xff]   ;;  %v15976_v54 = vld [vmem:[#allocation2 + $0x173c] ss:$28 sps:$4 sm:$0xff]  }
 0x2c8   :  { %5578 = vmatprep.subr.bf16.mxu0 %v15880_v55  ;;  %5879 = vmatprep.subr.bf16.mxu1 %v15883_v56  ;;  %v15971_v55 = vld [vmem:[#allocation2 + $0x1730] ss:$28 sps:$4 sm:$0xff]   ;;  %v15974_v56 = vld [vmem:[#allocation2 + $0x1738] ss:$28 sps:$4 sm:$0xff]  }
 0x2cb   :  { %5579 = vmatpush1.bf16.msra.mxu0 %v15878_v57  ;;  %5880 = vmatpush1.bf16.msra.mxu1 %v15881_v58  ;;  %v15979_v57 = vld [vmem:[#allocation2 + $0x176c] ss:$28 sps:$4 sm:$0xff]   ;;  %v15982_v58 = vld [vmem:[#allocation2 + $0x1774] ss:$28 sps:$4 sm:$0xff]  }
 0x2cc   :  { %5580 = vmatprep.subr.bf16.mxu0 %v15886_v59  ;;  %5881 = vmatprep.subr.bf16.mxu1 %v15889_v60  ;;  %v15977_v59 = vld [vmem:[#allocation2 + $0x1768] ss:$28 sps:$4 sm:$0xff]   ;;  %v15980_v60 = vld [vmem:[#allocation2 + $0x1770] ss:$28 sps:$4 sm:$0xff]  }
 0x2cf   :  { %5581 = vmatpush1.bf16.msra.mxu0 %v15884_v61  ;;  %5882 = vmatpush1.bf16.msra.mxu1 %v15887_v62  ;;  %v15985_v61 = vld [vmem:[#allocation2 + $0x17a4] ss:$28 sps:$4 sm:$0xff]   ;;  %v15988_v62 = vld [vmem:[#allocation2 + $0x17ac] ss:$28 sps:$4 sm:$0xff]  }
 0x2d0   :  { %5582 = vmatprep.subr.bf16.mxu0 %v15892_v63  ;;  %5883 = vmatprep.subr.bf16.mxu1 %v15895_v0  ;;  %v15983_v63 = vld [vmem:[#allocation2 + $0x17a0] ss:$28 sps:$4 sm:$0xff]   ;;  %v15986_v0 = vld [vmem:[#allocation2 + $0x17a8] ss:$28 sps:$4 sm:$0xff]  }
 0x2d3   :  { %5583 = vmatpush1.bf16.msra.mxu0 %v15890_v1  ;;  %5884 = vmatpush1.bf16.msra.mxu1 %v15893_v2  ;;  %v15991_v1 = vld [vmem:[#allocation2 + $0x17dc] ss:$28 sps:$4 sm:$0xff]   ;;  %v15994_v2 = vld [vmem:[#allocation2 + $0x17e4] ss:$28 sps:$4 sm:$0xff]  }
 0x2d4   :  { %5584 = vmatprep.subr.bf16.mxu0 %v15898_v3  ;;  %5885 = vmatprep.subr.bf16.mxu1 %v15901_v4  ;;  %v15989_v3 = vld [vmem:[#allocation2 + $0x17d8] ss:$28 sps:$4 sm:$0xff]   ;;  %v15992_v4 = vld [vmem:[#allocation2 + $0x17e0] ss:$28 sps:$4 sm:$0xff]  }
 0x2d7   :  { %5585 = vmatpush1.bf16.msra.mxu0 %v15896_v5  ;;  %5886 = vmatpush1.bf16.msra.mxu1 %v15899_v6  ;;  %v15997_v5 = vld [vmem:[#allocation2 + $0x1814] ss:$28 sps:$4 sm:$0xff]   ;;  %v16000_v6 = vld [vmem:[#allocation2 + $0x181c] ss:$28 sps:$4 sm:$0xff]  }
 0x2d8   :  { %5586 = vmatprep.subr.bf16.mxu0 %v15904_v7  ;;  %5887 = vmatprep.subr.bf16.mxu1 %v15907_v8  ;;  %v15995_v7 = vld [vmem:[#allocation2 + $0x1810] ss:$28 sps:$4 sm:$0xff]   ;;  %v15998_v8 = vld [vmem:[#allocation2 + $0x1818] ss:$28 sps:$4 sm:$0xff]  }
 0x2db   :  { %5587 = vmatpush1.bf16.msra.mxu0 %v15902_v9  ;;  %5888 = vmatpush1.bf16.msra.mxu1 %v15905_v10  ;;  %v16003_v9 = vld [vmem:[#allocation2 + $0x184c] ss:$28 sps:$4 sm:$0xff]   ;;  %v16006_v10 = vld [vmem:[#allocation2 + $0x1854] ss:$28 sps:$4 sm:$0xff]  }
 0x2dc   :  { %5599 = vmatprep.subr.bf16.mxu0 %v15912_v11  ;;  %5900 = vmatprep.subr.bf16.mxu1 %v15915_v12  ;;  %v16001_v11 = vld [vmem:[#allocation2 + $0x1848] ss:$28 sps:$4 sm:$0xff]   ;;  %v16004_v12 = vld [vmem:[#allocation2 + $0x1850] ss:$28 sps:$4 sm:$0xff]  }
 0x2de   :  { %5589 = vmatmul.mubr.bf16.vlgmr.msra.gmra.mrb[0].mxu0 %v15916_v14  ;;  %5890 = vmatmul.mubr.bf16.vlgmr.msra.gmra.mrb[0].mxu1 %v15916_v14  ;;  %v16009_v14 = vld [vmem:[%s19098_s3 + $0x30] ss:$56 sps:$4 sm:$0xff]  }
 0x2df   :  { %5600 = vmatpush1.bf16.msra.mxu0 %v15910_v13  ;;  %5901 = vmatpush1.bf16.msra.mxu1 %v15913_v15  ;;  %v16012_v13 = vld [vmem:[#allocation2 + $0x14] ss:$28 sps:$4 sm:$0xff]  }
 0x2e0   :  { %5601 = vmatprep.subr.bf16.mxu0 %v15919_v16  ;;  %5902 = vmatprep.subr.bf16.mxu1 %v15922_v17  ;;  %v16013_v15 = vld [vmem:[#allocation2 + $0x1d8] ss:$28 sps:$4 sm:$0xff]   ;;  %v16010_v16 = vld [vmem:[#allocation2 + $0x10] ss:$28 sps:$4 sm:$0xff]  }
 0x2e1   :  { %5631 = vmatprep.mubr.bf16.mxu0 %v16007_v19  ;;  %5932 = vmatprep.mubr.bf16.mxu1 %v16007_v19  ;;  %v16014_v17 = vld [vmem:[#allocation2 + $0x18] ss:$28 sps:$4 sm:$0xff]   ;;  %v16018_v19 = vld [vmem:[#allocation2 + $0x210] ss:$28 sps:$4 sm:$0xff]  }
 0x2e3   :  { %5602 = vmatpush1.bf16.msra.mxu0 %v15917_v18  ;;  %5903 = vmatpush1.bf16.msra.mxu1 %v15920_v20  ;;  %v16017_v18 = vld [vmem:[#allocation2 + $0x4c] ss:$28 sps:$4 sm:$0xff]  }
 0x2e4   :  { %5603 = vmatprep.subr.bf16.mxu0 %v15925_v21  ;;  %5904 = vmatprep.subr.bf16.mxu1 %v15928_v22  ;;  %v16015_v20 = vld [vmem:[#allocation2 + $0x48] ss:$28 sps:$4 sm:$0xff]   ;;  %v16019_v21 = vld [vmem:[#allocation2 + $0x50] ss:$28 sps:$4 sm:$0xff]  }
 0x2e5   :  { %v16022_v22 = vld [vmem:[#allocation2 + $0x84] ss:$28 sps:$4 sm:$0xff]  }
 0x2e7   :  { %5604 = vmatpush1.bf16.msra.mxu0 %v15923_v23  ;;  %5905 = vmatpush1.bf16.msra.mxu1 %v15926_v24  ;;  %v16023_v23 = vld [vmem:[#allocation2 + $0x248] ss:$28 sps:$4 sm:$0xff]   ;;  %v16020_v24 = vld [vmem:[#allocation2 + $0x80] ss:$28 sps:$4 sm:$0xff]  }
 0x2e8   :  { %5605 = vmatprep.subr.bf16.mxu0 %v15931_v25  ;;  %5906 = vmatprep.subr.bf16.mxu1 %v15934_v26  ;;  %v17507_v25 = vld [vmem:[%s19098_s3 + $0x4] ss:$56 sps:$4 sm:$0xff]  }
 0x2e9   :  { %v16024_v26 = vld [vmem:[#allocation2 + $0x88] ss:$28 sps:$4 sm:$0xff]  }
 0x2eb   :  { %5606 = vmatpush1.bf16.msra.mxu0 %v15929_v27  ;;  %5907 = vmatpush1.bf16.msra.mxu1 %v15932_v28  ;;  %v16027_v27 = vld [vmem:[#allocation2 + $0xbc] ss:$28 sps:$4 sm:$0xff]  }
 0x2ec   :  { %5607 = vmatprep.subr.bf16.mxu0 %v15937_v29  ;;  %5908 = vmatprep.subr.bf16.mxu1 %v15940_v30  ;;  %v16028_v28 = vld [vmem:[#allocation2 + $0x280] ss:$28 sps:$4 sm:$0xff]   ;;  %v16025_v29 = vld [vmem:[#allocation2 + $0xb8] ss:$28 sps:$4 sm:$0xff]  }
 0x2ed   :  { %v16029_v30 = vld [vmem:[#allocation2 + $0xc0] ss:$28 sps:$4 sm:$0xff]  }
 0x2ef   :  { %5608 = vmatpush1.bf16.msra.mxu0 %v15935_v31  ;;  %5909 = vmatpush1.bf16.msra.mxu1 %v15938_v32  ;;  %v16032_v31 = vld [vmem:[#allocation2 + $0xf4] ss:$28 sps:$4 sm:$0xff]  }
 0x2f0   :  { %5609 = vmatprep.subr.bf16.mxu0 %v15943_v33  ;;  %5910 = vmatprep.subr.bf16.mxu1 %v15946_v34  ;;  %v16033_v32 = vld [vmem:[#allocation2 + $0x2b8] ss:$28 sps:$4 sm:$0xff]   ;;  %v16030_v33 = vld [vmem:[#allocation2 + $0xf0] ss:$28 sps:$4 sm:$0xff]  }
 0x2f1   :  { %v16034_v34 = vld [vmem:[#allocation2 + $0xf8] ss:$28 sps:$4 sm:$0xff]  }
 0x2f3   :  { %5610 = vmatpush1.bf16.msra.mxu0 %v15941_v35  ;;  %5911 = vmatpush1.bf16.msra.mxu1 %v15944_v36  ;;  %v16037_v35 = vld [vmem:[#allocation2 + $0x12c] ss:$28 sps:$4 sm:$0xff]  }
 0x2f4   :  { %5611 = vmatprep.subr.bf16.mxu0 %v15949_v37  ;;  %5912 = vmatprep.subr.bf16.mxu1 %v15952_v38  ;;  %v16038_v36 = vld [vmem:[#allocation2 + $0x2f0] ss:$28 sps:$4 sm:$0xff]   ;;  %v16035_v37 = vld [vmem:[#allocation2 + $0x128] ss:$28 sps:$4 sm:$0xff]  }
 0x2f5   :  { %v16039_v38 = vld [vmem:[#allocation2 + $0x130] ss:$28 sps:$4 sm:$0xff]  }
 0x2f7   :  { %5612 = vmatpush1.bf16.msra.mxu0 %v15947_v39  ;;  %5913 = vmatpush1.bf16.msra.mxu1 %v15950_v40  ;;  %v16042_v39 = vld [vmem:[#allocation2 + $0x164] ss:$28 sps:$4 sm:$0xff]  }
 0x2f8   :  { %5613 = vmatprep.subr.bf16.mxu0 %v15955_v41  ;;  %5914 = vmatprep.subr.bf16.mxu1 %v15958_v42  ;;  %v16043_v40 = vld [vmem:[#allocation2 + $0x328] ss:$28 sps:$4 sm:$0xff]   ;;  %v16040_v41 = vld [vmem:[#allocation2 + $0x160] ss:$28 sps:$4 sm:$0xff]  }
 0x2f9   :  { %v16044_v42 = vld [vmem:[#allocation2 + $0x168] ss:$28 sps:$4 sm:$0xff]  }
 0x2fb   :  { %5614 = vmatpush1.bf16.msra.mxu0 %v15953_v43  ;;  %5915 = vmatpush1.bf16.msra.mxu1 %v15956_v44  ;;  %v16047_v43 = vld [vmem:[#allocation2 + $0x19c] ss:$28 sps:$4 sm:$0xff]  }
 0x2fc   :  { %5615 = vmatprep.subr.bf16.mxu0 %v15961_v45  ;;  %5916 = vmatprep.subr.bf16.mxu1 %v15964_v46  ;;  %v16048_v44 = vld [vmem:[#allocation2 + $0x360] ss:$28 sps:$4 sm:$0xff]   ;;  %v16045_v45 = vld [vmem:[#allocation2 + $0x198] ss:$28 sps:$4 sm:$0xff]  }
 0x2fd   :  { %v16049_v46 = vld [vmem:[#allocation2 + $0x1a0] ss:$28 sps:$4 sm:$0xff]  }
 0x2ff   :  { %5616 = vmatpush1.bf16.msra.mxu0 %v15959_v47  ;;  %5917 = vmatpush1.bf16.msra.mxu1 %v15962_v48  ;;  %v16052_v47 = vld [vmem:[#allocation2 + $0x1d4] ss:$28 sps:$4 sm:$0xff]  }
 0x300   :  { %5617 = vmatprep.subr.bf16.mxu0 %v15967_v49  ;;  %5918 = vmatprep.subr.bf16.mxu1 %v15970_v50  ;;  %v16053_v48 = vld [vmem:[#allocation2 + $0x558] ss:$28 sps:$4 sm:$0xff]   ;;  %v16050_v49 = vld [vmem:[#allocation2 + $0x1d0] ss:$28 sps:$4 sm:$0xff]  }
 0x301   :  { %v16054_v50 = vld [vmem:[#allocation2 + $0x398] ss:$28 sps:$4 sm:$0xff]  }
 0x303   :  { %5618 = vmatpush1.bf16.msra.mxu0 %v15965_v51  ;;  %5919 = vmatpush1.bf16.msra.mxu1 %v15968_v52  ;;  %v16057_v51 = vld [vmem:[#allocation2 + $0x20c] ss:$28 sps:$4 sm:$0xff]  }
 0x304   :  { %5619 = vmatprep.subr.bf16.mxu0 %v15973_v53  ;;  %5920 = vmatprep.subr.bf16.mxu1 %v15976_v54  ;;  %v16058_v52 = vld [vmem:[#allocation2 + $0x590] ss:$28 sps:$4 sm:$0xff]   ;;  %v16055_v53 = vld [vmem:[#allocation2 + $0x208] ss:$28 sps:$4 sm:$0xff]   ;;  %v18391_v54 = vld [vmem:[%s19098_s3] ss:$56 sps:$4 sm:$0xff]  }
 0x307   :  { %5620 = vmatpush1.bf16.msra.mxu0 %v15971_v55  ;;  %5921 = vmatpush1.bf16.msra.mxu1 %v15974_v56  ;;  %v16059_v55 = vld [vmem:[#allocation2 + $0x3d0] ss:$28 sps:$4 sm:$0xff]   ;;  %v16062_v56 = vld [vmem:[#allocation2 + $0x244] ss:$28 sps:$4 sm:$0xff]  }
 0x308   :  { %5621 = vmatprep.subr.bf16.mxu0 %v15979_v57  ;;  %5922 = vmatprep.subr.bf16.mxu1 %v15982_v58  ;;  %v16063_v57 = vld [vmem:[#allocation2 + $0x5c8] ss:$28 sps:$4 sm:$0xff]   ;;  %v16060_v58 = vld [vmem:[#allocation2 + $0x240] ss:$28 sps:$4 sm:$0xff]  }
 0x30b   :  { %5622 = vmatpush1.bf16.msra.mxu0 %v15977_v59  ;;  %5923 = vmatpush1.bf16.msra.mxu1 %v15980_v60  ;;  %v18397_v59 = vld [vmem:[%s19098_s3 + $0xc] ss:$56 sps:$4 sm:$0xff]  }
 0x30c   :  { %5623 = vmatprep.subr.bf16.mxu0 %v15985_v61  ;;  %5924 = vmatprep.subr.bf16.mxu1 %v15988_v62  ;;  %v16064_v60 = vld [vmem:[#allocation2 + $0x408] ss:$28 sps:$4 sm:$0xff]   ;;  %v16067_v61 = vld [vmem:[#allocation2 + $0x27c] ss:$28 sps:$4 sm:$0xff]  }
 0x30d   :  { %v16068_v62 = vld [vmem:[#allocation2 + $0x600] ss:$28 sps:$4 sm:$0xff]  }
 0x30f   :  { %5624 = vmatpush1.bf16.msra.mxu0 %v15983_v63  ;;  %5925 = vmatpush1.bf16.msra.mxu1 %v15986_v0  ;;  %v16065_v63 = vld [vmem:[#allocation2 + $0x278] ss:$28 sps:$4 sm:$0xff]   ;;  %v16069_v0 = vld [vmem:[#allocation2 + $0x440] ss:$28 sps:$4 sm:$0xff]  }
 0x310   :  { %5625 = vmatprep.subr.bf16.mxu0 %v15991_v1  ;;  %5926 = vmatprep.subr.bf16.mxu1 %v15994_v2  ;;  %v16072_v1 = vld [vmem:[#allocation2 + $0x2b4] ss:$28 sps:$4 sm:$0xff]  }
 0x311   :  { %v16073_v2 = vld [vmem:[#allocation2 + $0x638] ss:$28 sps:$4 sm:$0xff]  }
 0x313   :  { %5626 = vmatpush1.bf16.msra.mxu0 %v15989_v3  ;;  %5927 = vmatpush1.bf16.msra.mxu1 %v15992_v4  ;;  %v16070_v3 = vld [vmem:[#allocation2 + $0x2b0] ss:$28 sps:$4 sm:$0xff]   ;;  %v16074_v4 = vld [vmem:[#allocation2 + $0x478] ss:$28 sps:$4 sm:$0xff]  }
 0x314   :  { %5627 = vmatprep.subr.bf16.mxu0 %v15997_v5  ;;  %5928 = vmatprep.subr.bf16.mxu1 %v16000_v6  ;;  %v16077_v5 = vld [vmem:[#allocation2 + $0x2ec] ss:$28 sps:$4 sm:$0xff]  }
 0x315   :  { %v16078_v6 = vld [vmem:[#allocation2 + $0x670] ss:$28 sps:$4 sm:$0xff]  }
 0x317   :  { %5628 = vmatpush1.bf16.msra.mxu0 %v15995_v7  ;;  %5929 = vmatpush1.bf16.msra.mxu1 %v15998_v8  ;;  %v16075_v7 = vld [vmem:[#allocation2 + $0x2e8] ss:$28 sps:$4 sm:$0xff]   ;;  %v16079_v8 = vld [vmem:[#allocation2 + $0x4b0] ss:$28 sps:$4 sm:$0xff]  }
 0x318   :  { %5629 = vmatprep.subr.bf16.mxu0 %v16003_v9  ;;  %5930 = vmatprep.subr.bf16.mxu1 %v16006_v10  ;;  %v16082_v9 = vld [vmem:[#allocation2 + $0x324] ss:$28 sps:$4 sm:$0xff]  }
 0x319   :  { %v16083_v10 = vld [vmem:[#allocation2 + $0x6a8] ss:$28 sps:$4 sm:$0xff]  }
 0x31b   :  { %5630 = vmatpush1.bf16.msra.mxu0 %v16001_v11  ;;  %5931 = vmatpush1.bf16.msra.mxu1 %v16004_v12  ;;  %v16080_v11 = vld [vmem:[#allocation2 + $0x320] ss:$28 sps:$4 sm:$0xff]   ;;  %v16084_v12 = vld [vmem:[#allocation2 + $0x4e8] ss:$28 sps:$4 sm:$0xff]  }
 0x31c   :  { %5943 = vmatprep.subr.bf16.mxu0 %v16012_v13  ;;  %14608 = vmatprep.subr.bf16.mxu1 %v16013_v15  ;;  %v16087_v13 = vld [vmem:[#allocation2 + $0x35c] ss:$28 sps:$4 sm:$0xff]  }
 0x31d   :  { %v16085_v15 = vld [vmem:[#allocation2 + $0x358] ss:$28 sps:$4 sm:$0xff]  }
 0x31e   :  { %5632 = vmatmul.mubr.bf16.vlgmr.msra.gmra.mrb[0].mxu0 %v16009_v14  ;;  %5933 = vmatmul.mubr.bf16.vlgmr.msra.gmra.mrb[0].mxu1 %v16009_v14  ;;  %v16088_v14 = vld [vmem:[#allocation2 + $0x6e0] ss:$28 sps:$4 sm:$0xff]  }
 0x31f   :  { %5944 = vmatpush1.bf16.msra.mxu0 %v16010_v16  ;;  %14609 = vmatpush3.bf16.msra.mxu1 %v16014_v17  ;;  %v16089_v16 = vld [vmem:[#allocation2 + $0x520] ss:$28 sps:$4 sm:$0xff]   ;;  %v16092_v17 = vld [vmem:[#allocation2 + $0x394] ss:$28 sps:$4 sm:$0xff]  }
 0x320   :  { %5945 = vmatprep.subr.bf16.mxu0 %v16017_v18  ;;  %14610 = vmatprep.subr.bf16.mxu1 %v16018_v19  ;;  %v16093_v18 = vld [vmem:[#allocation2 + $0x8d8] ss:$28 sps:$4 sm:$0xff]   ;;  %v16090_v19 = vld [vmem:[#allocation2 + $0x390] ss:$28 sps:$4 sm:$0xff]  }
 0x321   :  { %6276 = vmatprep.mubr.bf16.mxu1 %v17507_v25  ;;  %5975 = vmatprep.mubr.bf16.mxu0 %v17507_v25  ;;  %v16099_v25 = vld [vmem:[#allocation2 + $0x750] ss:$28 sps:$4 sm:$0xff]  }
 0x323   :  { %5946 = vmatpush1.bf16.msra.mxu0 %v16015_v20  ;;  %14611 = vmatpush3.bf16.msra.mxu1 %v16019_v21  ;;  %v16094_v20 = vld [vmem:[#allocation2 + $0x718] ss:$28 sps:$4 sm:$0xff]   ;;  %v16097_v21 = vld [vmem:[#allocation2 + $0x3cc] ss:$28 sps:$4 sm:$0xff]  }
 0x324   :  { %5947 = vmatprep.subr.bf16.mxu0 %v16022_v22  ;;  %14612 = vmatprep.subr.bf16.mxu1 %v16023_v23  ;;  %v16098_v22 = vld [vmem:[#allocation2 + $0x910] ss:$28 sps:$4 sm:$0xff]   ;;  %v16095_v23 = vld [vmem:[#allocation2 + $0x3c8] ss:$28 sps:$4 sm:$0xff]  }
 0x327   :  { %5948 = vmatpush1.bf16.msra.mxu0 %v16020_v24  ;;  %14613 = vmatpush3.bf16.msra.mxu1 %v16024_v26  ;;  %v18403_v24 = vld [vmem:[%s19098_s3 + $0x8] ss:$56 sps:$4 sm:$0xff]  }
 0x328   :  { %5949 = vmatprep.subr.bf16.mxu0 %v16027_v27  ;;  %14614 = vmatprep.subr.bf16.mxu1 %v16028_v28  ;;  %v16102_v26 = vld [vmem:[#allocation2 + $0x404] ss:$28 sps:$4 sm:$0xff]  }
 0x329   :  { %v16103_v27 = vld [vmem:[#allocation2 + $0x948] ss:$28 sps:$4 sm:$0xff]   ;;  %v16100_v28 = vld [vmem:[#allocation2 + $0x400] ss:$28 sps:$4 sm:$0xff]  }
 0x32b   :  { %5950 = vmatpush1.bf16.msra.mxu0 %v16025_v29  ;;  %14615 = vmatpush3.bf16.msra.mxu1 %v16029_v30  ;;  %v18410_v29 = vld [vmem:[%s19098_s3 + $0x14] ss:$56 sps:$4 sm:$0xff]   ;;  %v16104_v30 = vld [vmem:[#allocation2 + $0x788] ss:$28 sps:$4 sm:$0xff]  }
 0x32c   :  { %5951 = vmatprep.subr.bf16.mxu0 %v16032_v31  ;;  %14616 = vmatprep.subr.bf16.mxu1 %v16033_v32  ;;  %v16107_v31 = vld [vmem:[#allocation2 + $0x43c] ss:$28 sps:$4 sm:$0xff]  }
 0x32d   :  { %v16108_v32 = vld [vmem:[#allocation2 + $0x980] ss:$28 sps:$4 sm:$0xff]  }
 0x32f   :  { %5952 = vmatpush1.bf16.msra.mxu0 %v16030_v33  ;;  %14617 = vmatpush3.bf16.msra.mxu1 %v16034_v34  ;;  %v16105_v33 = vld [vmem:[#allocation2 + $0x438] ss:$28 sps:$4 sm:$0xff]   ;;  %v16109_v34 = vld [vmem:[#allocation2 + $0x7c0] ss:$28 sps:$4 sm:$0xff]  }
 0x330   :  { %5953 = vmatprep.subr.bf16.mxu0 %v16037_v35  ;;  %14618 = vmatprep.subr.bf16.mxu1 %v16038_v36  ;;  %v16112_v35 = vld [vmem:[#allocation2 + $0x474] ss:$28 sps:$4 sm:$0xff]  }
 0x331   :  { %v16113_v36 = vld [vmem:[#allocation2 + $0x9b8] ss:$28 sps:$4 sm:$0xff]  }
 0x333   :  { %5954 = vmatpush1.bf16.msra.mxu0 %v16035_v37  ;;  %14619 = vmatpush3.bf16.msra.mxu1 %v16039_v38  ;;  %v16110_v37 = vld [vmem:[#allocation2 + $0x470] ss:$28 sps:$4 sm:$0xff]   ;;  %v16114_v38 = vld [vmem:[#allocation2 + $0x7f8] ss:$28 sps:$4 sm:$0xff]  }
 0x334   :  { %5955 = vmatprep.subr.bf16.mxu0 %v16042_v39  ;;  %14620 = vmatprep.subr.bf16.mxu1 %v16043_v40  ;;  %v16117_v39 = vld [vmem:[#allocation2 + $0x4ac] ss:$28 sps:$4 sm:$0xff]  }
 0x335   :  { %v16118_v40 = vld [vmem:[#allocation2 + $0x9f0] ss:$28 sps:$4 sm:$0xff]  }
 0x337   :  { %5956 = vmatpush1.bf16.msra.mxu0 %v16040_v41  ;;  %14621 = vmatpush3.bf16.msra.mxu1 %v16044_v42  ;;  %v16115_v41 = vld [vmem:[#allocation2 + $0x4a8] ss:$28 sps:$4 sm:$0xff]   ;;  %v16119_v42 = vld [vmem:[#allocation2 + $0x830] ss:$28 sps:$4 sm:$0xff]  }
 0x338   :  { %5957 = vmatprep.subr.bf16.mxu0 %v16047_v43  ;;  %14622 = vmatprep.subr.bf16.mxu1 %v16048_v44  ;;  %v16122_v43 = vld [vmem:[#allocation2 + $0x4e4] ss:$28 sps:$4 sm:$0xff]  }
 0x339   :  { %v16123_v44 = vld [vmem:[#allocation2 + $0xa28] ss:$28 sps:$4 sm:$0xff]  }
 0x33b   :  { %5958 = vmatpush1.bf16.msra.mxu0 %v16045_v45  ;;  %14623 = vmatpush3.bf16.msra.mxu1 %v16049_v46  ;;  %v16120_v45 = vld [vmem:[#allocation2 + $0x4e0] ss:$28 sps:$4 sm:$0xff]   ;;  %v16124_v46 = vld [vmem:[#allocation2 + $0x868] ss:$28 sps:$4 sm:$0xff]  }
 0x33c   :  { %5959 = vmatprep.subr.bf16.mxu0 %v16052_v47  ;;  %14630 = vmatprep.subr.bf16.mxu1 %v16053_v48  ;;  %v16127_v47 = vld [vmem:[#allocation2 + $0x51c] ss:$28 sps:$4 sm:$0xff]  }
 0x33d   :  { %v16128_v48 = vld [vmem:[#allocation2 + $0xa60] ss:$28 sps:$4 sm:$0xff]  }
 0x33e   :  { %6277 = vmatmul.mubr.bf16.vlgmr.msra.gmra.mrb[4].mxu1 %v18391_v54 }
 0x33f   :  { %5960 = vmatpush1.bf16.msra.mxu0 %v16050_v49  ;;  %14631 = vmatpush3.bf16.msra.mxu1 %v16054_v50  ;;  %v16125_v49 = vld [vmem:[#allocation2 + $0x518] ss:$28 sps:$4 sm:$0xff]   ;;  %v16129_v50 = vld [vmem:[#allocation2 + $0x8a0] ss:$28 sps:$4 sm:$0xff]  }
 0x340   :  { %5961 = vmatprep.subr.bf16.mxu0 %v16057_v51  ;;  %14632 = vmatprep.subr.bf16.mxu1 %v16058_v52  ;;  %v16132_v51 = vld [vmem:[#allocation2 + $0x554] ss:$28 sps:$4 sm:$0xff]  }
 0x341   :  { %6317 = vmatprep.mubr.bf16.mxu1 %v18397_v59  ;;  %v16133_v52 = vld [vmem:[#allocation2 + $0xc58] ss:$28 sps:$4 sm:$0xff]  }
 0x343   :  { %5962 = vmatpush1.bf16.msra.mxu0 %v16055_v53  ;;  %14633 = vmatpush3.bf16.msra.mxu1 %v16059_v55  ;;  %v16130_v53 = vld [vmem:[#allocation2 + $0x550] ss:$28 sps:$4 sm:$0xff]  }
 0x344   :  { %5963 = vmatprep.subr.bf16.mxu0 %v16062_v56  ;;  %14634 = vmatprep.subr.bf16.mxu1 %v16063_v57  ;;  %v16137_v55 = vld [vmem:[#allocation2 + $0x58c] ss:$28 sps:$4 sm:$0xff]  }
 0x345   :  { %v16138_v56 = vld [vmem:[#allocation2 + $0xc90] ss:$28 sps:$4 sm:$0xff]  }
 0x346   :  { %v18417_v57 = vld [vmem:[%s19098_s3 + $0x10] ss:$56 sps:$4 sm:$0xff]  }
 0x347   :  { %5964 = vmatpush1.bf16.msra.mxu0 %v16060_v58  ;;  %14635 = vmatpush3.bf16.msra.mxu1 %v16064_v60  ;;  %v16135_v58 = vld [vmem:[#allocation2 + $0x588] ss:$28 sps:$4 sm:$0xff]  }
 0x348   :  { %5965 = vmatprep.subr.bf16.mxu0 %v16067_v61  ;;  %14636 = vmatprep.subr.bf16.mxu1 %v16068_v62  ;;  %v16142_v60 = vld [vmem:[#allocation2 + $0x5c4] ss:$28 sps:$4 sm:$0xff]   ;;  %v18423_v62 = vld [vmem:[%s19098_s3 + $0x1c] ss:$56 sps:$4 sm:$0xff]  }
 0x349   :  { %v16143_v61 = vld [vmem:[#allocation2 + $0xcc8] ss:$28 sps:$4 sm:$0xff]  }
 0x34b   :  { %5966 = vmatpush1.bf16.msra.mxu0 %v16065_v63  ;;  %14637 = vmatpush3.bf16.msra.mxu1 %v16069_v0  ;;  %v16140_v63 = vld [vmem:[#allocation2 + $0x5c0] ss:$28 sps:$4 sm:$0xff]   ;;  %v16144_v0 = vld [vmem:[#allocation2 + $0xb08] ss:$28 sps:$4 sm:$0xff]  }
 0x34c   :  { %5967 = vmatprep.subr.bf16.mxu0 %v16072_v1  ;;  %14638 = vmatprep.subr.bf16.mxu1 %v16073_v2  ;;  %v16147_v1 = vld [vmem:[#allocation2 + $0x5fc] ss:$28 sps:$4 sm:$0xff]  }
 0x34d   :  { %v16148_v2 = vld [vmem:[#allocation2 + $0xd00] ss:$28 sps:$4 sm:$0xff]  }
 0x34f   :  { %5968 = vmatpush1.bf16.msra.mxu0 %v16070_v3  ;;  %14639 = vmatpush3.bf16.msra.mxu1 %v16074_v4  ;;  %v16145_v3 = vld [vmem:[#allocation2 + $0x5f8] ss:$28 sps:$4 sm:$0xff]   ;;  %v16149_v4 = vld [vmem:[#allocation2 + $0xb40] ss:$28 sps:$4 sm:$0xff]  }
 0x350   :  { %5969 = vmatprep.subr.bf16.mxu0 %v16077_v5  ;;  %14640 = vmatprep.subr.bf16.mxu1 %v16078_v6  ;;  %v16152_v5 = vld [vmem:[#allocation2 + $0x634] ss:$28 sps:$4 sm:$0xff]  }
 0x351   :  { %v16153_v6 = vld [vmem:[#allocation2 + $0xd38] ss:$28 sps:$4 sm:$0xff]  }
 0x353   :  { %5970 = vmatpush1.bf16.msra.mxu0 %v16075_v7  ;;  %14641 = vmatpush3.bf16.msra.mxu1 %v16079_v8  ;;  %v16150_v7 = vld [vmem:[#allocation2 + $0x630] ss:$28 sps:$4 sm:$0xff]   ;;  %v16154_v8 = vld [vmem:[#allocation2 + $0xb78] ss:$28 sps:$4 sm:$0xff]  }
 0x354   :  { %5971 = vmatprep.subr.bf16.mxu0 %v16082_v9  ;;  %14642 = vmatprep.subr.bf16.mxu1 %v16083_v10  ;;  %v16157_v9 = vld [vmem:[#allocation2 + $0x66c] ss:$28 sps:$4 sm:$0xff]  }
 0x355   :  { %v16158_v10 = vld [vmem:[#allocation2 + $0xd70] ss:$28 sps:$4 sm:$0xff]  }
 0x357   :  { %5972 = vmatpush1.bf16.msra.mxu0 %v16080_v11  ;;  %14643 = vmatpush3.bf16.msra.mxu1 %v16084_v12  ;;  %v16155_v11 = vld [vmem:[#allocation2 + $0x668] ss:$28 sps:$4 sm:$0xff]   ;;  %v16159_v12 = vld [vmem:[#allocation2 + $0xbb0] ss:$28 sps:$4 sm:$0xff]  }
 0x358   :  { %5973 = vmatprep.subr.bf16.mxu0 %v16087_v13  ;;  %14644 = vmatprep.subr.bf16.mxu1 %v16088_v14  ;;  %v16162_v13 = vld [vmem:[#allocation2 + $0x6a4] ss:$28 sps:$4 sm:$0xff]  }
 0x359   :  { %v16163_v14 = vld [vmem:[#allocation2 + $0xda8] ss:$28 sps:$4 sm:$0xff]  }
 0x35b   :  { %5974 = vmatpush1.bf16.msra.mxu0 %v16085_v15  ;;  %14645 = vmatpush3.bf16.msra.mxu1 %v16089_v16  ;;  %v16160_v15 = vld [vmem:[#allocation2 + $0x6a0] ss:$28 sps:$4 sm:$0xff]   ;;  %v16164_v16 = vld [vmem:[#allocation2 + $0xbe8] ss:$28 sps:$4 sm:$0xff]  }
 0x35c   :  { %5986 = vmatprep.subr.bf16.mxu0 %v16092_v17  ;;  %14652 = vmatprep.subr.bf16.mxu1 %v16093_v18  ;;  %v16167_v17 = vld [vmem:[#allocation2 + $0x6dc] ss:$28 sps:$4 sm:$0xff]  }
 0x35d   :  { %v16168_v18 = vld [vmem:[#allocation2 + $0xde0] ss:$28 sps:$4 sm:$0xff]  }
 0x35e   :  { %6318 = vmatmul.mubr.bf16.vlgmr.msra.gmra.mrb[8].mxu1 %v18403_v24  ;;  %5976 = vmatmul.mubr.bf16.vlgmr.msra.gmra.mrb[4].mxu0 %v18391_v54  ;;  %v16134_v54 = vld [vmem:[#allocation2 + $0xa98] ss:$28 sps:$4 sm:$0xff]  }
 0x35f   :  { %5987 = vmatpush1.bf16.msra.mxu0 %v16090_v19  ;;  %14653 = vmatpush3.bf16.msra.mxu1 %v16094_v20  ;;  %v16165_v19 = vld [vmem:[#allocation2 + $0x6d8] ss:$28 sps:$4 sm:$0xff]   ;;  %v16169_v20 = vld [vmem:[#allocation2 + $0xc20] ss:$28 sps:$4 sm:$0xff]  }
 0x360   :  { %5988 = vmatprep.subr.bf16.mxu0 %v16097_v21  ;;  %14654 = vmatprep.subr.bf16.mxu1 %v16098_v22  ;;  %v16172_v21 = vld [vmem:[#allocation2 + $0x714] ss:$28 sps:$4 sm:$0xff]  }
 0x361   :  { %6358 = vmatprep.mubr.bf16.mxu1 %v18410_v29  ;;  %6018 = vmatprep.mubr.bf16.mxu0 %v18397_v59  ;;  %v16139_v59 = vld [vmem:[#allocation2 + $0xad0] ss:$28 sps:$4 sm:$0xff]   ;;  %v16173_v22 = vld [vmem:[#allocation2 + $0xfd8] ss:$28 sps:$4 sm:$0xff]  }
 0x363   :  { %5989 = vmatpush1.bf16.msra.mxu0 %v16095_v23  ;;  %14655 = vmatpush3.bf16.msra.mxu1 %v16099_v25  ;;  %v16170_v23 = vld [vmem:[#allocation2 + $0x710] ss:$28 sps:$4 sm:$0xff]   ;;  %v16174_v25 = vld [vmem:[#allocation2 + $0xe18] ss:$28 sps:$4 sm:$0xff]  }
 0x364   :  { %5990 = vmatprep.subr.bf16.mxu0 %v16102_v26  ;;  %14656 = vmatprep.subr.bf16.mxu1 %v16103_v27  ;;  %v16177_v26 = vld [vmem:[#allocation2 + $0x74c] ss:$28 sps:$4 sm:$0xff]  }
 0x365   :  { %v16178_v27 = vld [vmem:[#allocation2 + $0x1010] ss:$28 sps:$4 sm:$0xff]  }
 0x367   :  { %5991 = vmatpush1.bf16.msra.mxu0 %v16100_v28  ;;  %14657 = vmatpush3.bf16.msra.mxu1 %v16104_v30  ;;  %v17514_v28 = vld [vmem:[%s19098_s3 + $0x18] ss:$56 sps:$4 sm:$0xff]   ;;  %v16175_v30 = vld [vmem:[#allocation2 + $0x748] ss:$28 sps:$4 sm:$0xff]  }
 0x368   :  { %5992 = vmatprep.subr.bf16.mxu0 %v16107_v31  ;;  %14658 = vmatprep.subr.bf16.mxu1 %v16108_v32  ;;  %v16179_v31 = vld [vmem:[#allocation2 + $0xe50] ss:$28 sps:$4 sm:$0xff]   ;;  %v16182_v32 = vld [vmem:[#allocation2 + $0x784] ss:$28 sps:$4 sm:$0xff]  }
 0x36b   :  { %5993 = vmatpush1.bf16.msra.mxu0 %v16105_v33  ;;  %14659 = vmatpush3.bf16.msra.mxu1 %v16109_v34  ;;  %v16183_v33 = vld [vmem:[#allocation2 + $0x1048] ss:$28 sps:$4 sm:$0xff]  }
 0x36c   :  { %5994 = vmatprep.subr.bf16.mxu0 %v16112_v35  ;;  %14660 = vmatprep.subr.bf16.mxu1 %v16113_v36  ;;  %v17515_v34 = vld [vmem:[%s19098_s3 + $0x24] ss:$56 sps:$4 sm:$0xff]  }
 0x36d   :  { %v16180_v35 = vld [vmem:[#allocation2 + $0x780] ss:$28 sps:$4 sm:$0xff]   ;;  %v16184_v36 = vld [vmem:[#allocation2 + $0xe88] ss:$28 sps:$4 sm:$0xff]  }
 0x36f   :  { %5995 = vmatpush1.bf16.msra.mxu0 %v16110_v37  ;;  %14661 = vmatpush3.bf16.msra.mxu1 %v16114_v38  ;;  %v16188_v37 = vld [vmem:[#allocation2 + $0x1080] ss:$28 sps:$4 sm:$0xff]   ;;  %v16185_v38 = vld [vmem:[#allocation2 + $0x7b8] ss:$28 sps:$4 sm:$0xff]  }
 0x370   :  { %5996 = vmatprep.subr.bf16.mxu0 %v16117_v39  ;;  %14662 = vmatprep.subr.bf16.mxu1 %v16118_v40  ;;  %v16189_v39 = vld [vmem:[#allocation2 + $0xec0] ss:$28 sps:$4 sm:$0xff]   ;;  %v16192_v40 = vld [vmem:[#allocation2 + $0x7f4] ss:$28 sps:$4 sm:$0xff]  }
 0x373   :  { %5997 = vmatpush1.bf16.msra.mxu0 %v16115_v41  ;;  %14663 = vmatpush3.bf16.msra.mxu1 %v16119_v42  ;;  %v16193_v41 = vld [vmem:[#allocation2 + $0x10b8] ss:$28 sps:$4 sm:$0xff]   ;;  %v16190_v42 = vld [vmem:[#allocation2 + $0x7f0] ss:$28 sps:$4 sm:$0xff]  }
 0x374   :  { %5998 = vmatprep.subr.bf16.mxu0 %v16122_v43  ;;  %14664 = vmatprep.subr.bf16.mxu1 %v16123_v44  ;;  %v16197_v43 = vld [vmem:[#allocation2 + $0x82c] ss:$28 sps:$4 sm:$0xff]  }
 0x375   :  { %v16198_v44 = vld [vmem:[#allocation2 + $0x10f0] ss:$28 sps:$4 sm:$0xff]  }
 0x377   :  { %5999 = vmatpush1.bf16.msra.mxu0 %v16120_v45  ;;  %14665 = vmatpush3.bf16.msra.mxu1 %v16124_v46  ;;  %v16195_v45 = vld [vmem:[#allocation2 + $0x828] ss:$28 sps:$4 sm:$0xff]   ;;  %v16199_v46 = vld [vmem:[#allocation2 + $0xf30] ss:$28 sps:$4 sm:$0xff]  }
 0x378   :  { %6000 = vmatprep.subr.bf16.mxu0 %v16127_v47  ;;  %14666 = vmatprep.subr.bf16.mxu1 %v16128_v48  ;;  %v16202_v47 = vld [vmem:[#allocation2 + $0x864] ss:$28 sps:$4 sm:$0xff]  }
 0x379   :  { %v16203_v48 = vld [vmem:[#allocation2 + $0x1128] ss:$28 sps:$4 sm:$0xff]  }
 0x37b   :  { %6001 = vmatpush1.bf16.msra.mxu0 %v16125_v49  ;;  %14667 = vmatpush3.bf16.msra.mxu1 %v16129_v50  ;;  %v16200_v49 = vld [vmem:[#allocation2 + $0x860] ss:$28 sps:$4 sm:$0xff]   ;;  %v16204_v50 = vld [vmem:[#allocation2 + $0xf68] ss:$28 sps:$4 sm:$0xff]  }
 0x37c   :  { %6002 = vmatprep.subr.bf16.mxu0 %v16132_v51  ;;  %14674 = vmatprep.subr.bf16.mxu1 %v16133_v52  ;;  %v16207_v51 = vld [vmem:[#allocation2 + $0x89c] ss:$28 sps:$4 sm:$0xff]  }
 0x37d   :  { %v16208_v52 = vld [vmem:[#allocation2 + $0x1160] ss:$28 sps:$4 sm:$0xff]  }
 0x37e   :  { %6359 = vmatmul.mubr.bf16.vlgmr.msra.gmra.mrb[12].mxu1 %v18417_v57 }
 0x37f   :  { %6003 = vmatpush1.bf16.msra.mxu0 %v16130_v53  ;;  %14675 = vmatpush3.bf16.msra.mxu1 %v16134_v54  ;;  %v16205_v53 = vld [vmem:[#allocation2 + $0x898] ss:$28 sps:$4 sm:$0xff]   ;;  %v16209_v54 = vld [vmem:[#allocation2 + $0xfa0] ss:$28 sps:$4 sm:$0xff]  }
 0x380   :  { %6004 = vmatprep.subr.bf16.mxu0 %v16137_v55  ;;  %14676 = vmatprep.subr.bf16.mxu1 %v16138_v56  ;;  %v16212_v55 = vld [vmem:[#allocation2 + $0x8d4] ss:$28 sps:$4 sm:$0xff]  }
 0x381   :  { %6399 = vmatprep.mubr.bf16.mxu1 %v18423_v62  ;;  %v16213_v56 = vld [vmem:[#allocation2 + $0x1358] ss:$28 sps:$4 sm:$0xff]  }
 0x383   :  { %6005 = vmatpush1.bf16.msra.mxu0 %v16135_v58  ;;  %14677 = vmatpush3.bf16.msra.mxu1 %v16139_v59  ;;  %v16210_v58 = vld [vmem:[#allocation2 + $0x8d0] ss:$28 sps:$4 sm:$0xff]   ;;  %v16214_v59 = vld [vmem:[#allocation2 + $0x1198] ss:$28 sps:$4 sm:$0xff]  }
 0x384   :  { %6006 = vmatprep.subr.bf16.mxu0 %v16142_v60  ;;  %14678 = vmatprep.subr.bf16.mxu1 %v16143_v61  ;;  %v16217_v60 = vld [vmem:[#allocation2 + $0x90c] ss:$28 sps:$4 sm:$0xff]  }
 0x385   :  { %v16218_v61 = vld [vmem:[#allocation2 + $0x1390] ss:$28 sps:$4 sm:$0xff]  }
 0x387   :  { %6007 = vmatpush1.bf16.msra.mxu0 %v16140_v63  ;;  %14679 = vmatpush3.bf16.msra.mxu1 %v16144_v0  ;;  %v17516_v63 = vld [vmem:[%s19098_s3 + $0x20] ss:$56 sps:$4 sm:$0xff]   ;;  %v16215_v0 = vld [vmem:[#allocation2 + $0x908] ss:$28 sps:$4 sm:$0xff]  }
 0x388   :  { %6008 = vmatprep.subr.bf16.mxu0 %v16147_v1  ;;  %14680 = vmatprep.subr.bf16.mxu1 %v16148_v2  ;;  %v16219_v1 = vld [vmem:[#allocation2 + $0x11d0] ss:$28 sps:$4 sm:$0xff]   ;;  %v16222_v2 = vld [vmem:[#allocation2 + $0x944] ss:$28 sps:$4 sm:$0xff]  }
 0x38b   :  { %6009 = vmatpush1.bf16.msra.mxu0 %v16145_v3  ;;  %14681 = vmatpush3.bf16.msra.mxu1 %v16149_v4  ;;  %v16223_v3 = vld [vmem:[#allocation2 + $0x13c8] ss:$28 sps:$4 sm:$0xff]  }
 0x38c   :  { %6010 = vmatprep.subr.bf16.mxu0 %v16152_v5  ;;  %14682 = vmatprep.subr.bf16.mxu1 %v16153_v6  ;;  %v17517_v4 = vld [vmem:[%s19098_s3 + $0x2c] ss:$56 sps:$4 sm:$0xff]   ;;  %v16220_v5 = vld [vmem:[#allocation2 + $0x940] ss:$28 sps:$4 sm:$0xff]  }
 0x38d   :  { %v16224_v6 = vld [vmem:[#allocation2 + $0x1208] ss:$28 sps:$4 sm:$0xff]  }
 0x38f   :  { %6011 = vmatpush1.bf16.msra.mxu0 %v16150_v7  ;;  %14683 = vmatpush3.bf16.msra.mxu1 %v16154_v8  ;;  %v16227_v7 = vld [vmem:[#allocation2 + $0x97c] ss:$28 sps:$4 sm:$0xff]  }
 0x390   :  { %6012 = vmatprep.subr.bf16.mxu0 %v16157_v9  ;;  %14684 = vmatprep.subr.bf16.mxu1 %v16158_v10  ;;  %v16228_v8 = vld [vmem:[#allocation2 + $0x1400] ss:$28 sps:$4 sm:$0xff]   ;;  %v16225_v9 = vld [vmem:[#allocation2 + $0x978] ss:$28 sps:$4 sm:$0xff]  }
 0x391   :  { %v16229_v10 = vld [vmem:[#allocation2 + $0x1240] ss:$28 sps:$4 sm:$0xff]  }
 0x393   :  { %6013 = vmatpush1.bf16.msra.mxu0 %v16155_v11  ;;  %14685 = vmatpush3.bf16.msra.mxu1 %v16159_v12  ;;  %v16232_v11 = vld [vmem:[#allocation2 + $0x9b4] ss:$28 sps:$4 sm:$0xff]  }
 0x394   :  { %6014 = vmatprep.subr.bf16.mxu0 %v16162_v13  ;;  %14686 = vmatprep.subr.bf16.mxu1 %v16163_v14  ;;  %v16233_v12 = vld [vmem:[#allocation2 + $0x1438] ss:$28 sps:$4 sm:$0xff]   ;;  %v16230_v13 = vld [vmem:[#allocation2 + $0x9b0] ss:$28 sps:$4 sm:$0xff]  }
 0x395   :  { %v16234_v14 = vld [vmem:[#allocation2 + $0x1278] ss:$28 sps:$4 sm:$0xff]  }
 0x397   :  { %6015 = vmatpush1.bf16.msra.mxu0 %v16160_v15  ;;  %14687 = vmatpush3.bf16.msra.mxu1 %v16164_v16  ;;  %v16237_v15 = vld [vmem:[#allocation2 + $0x9ec] ss:$28 sps:$4 sm:$0xff]  }
 0x398   :  { %6016 = vmatprep.subr.bf16.mxu0 %v16167_v17  ;;  %14688 = vmatprep.subr.bf16.mxu1 %v16168_v18  ;;  %v16238_v16 = vld [vmem:[#allocation2 + $0x1470] ss:$28 sps:$4 sm:$0xff]   ;;  %v16235_v17 = vld [vmem:[#allocation2 + $0x9e8] ss:$28 sps:$4 sm:$0xff]  }
 0x399   :  { %v16239_v18 = vld [vmem:[#allocation2 + $0x12b0] ss:$28 sps:$4 sm:$0xff]  }
 0x39b   :  { %6017 = vmatpush1.bf16.msra.mxu0 %v16165_v19  ;;  %14689 = vmatpush3.bf16.msra.mxu1 %v16169_v20  ;;  %v16242_v19 = vld [vmem:[#allocation2 + $0xa24] ss:$28 sps:$4 sm:$0xff]  }
 0x39c   :  { %6029 = vmatprep.subr.bf16.mxu0 %v16172_v21  ;;  %14696 = vmatprep.subr.bf16.mxu1 %v16173_v22  ;;  %v16243_v20 = vld [vmem:[#allocation2 + $0x14a8] ss:$28 sps:$4 sm:$0xff]   ;;  %v16240_v21 = vld [vmem:[#allocation2 + $0xa20] ss:$28 sps:$4 sm:$0xff]  }
 0x39d   :  { %v16244_v22 = vld [vmem:[#allocation2 + $0x12e8] ss:$28 sps:$4 sm:$0xff]  }
 0x39e   :  { %6400 = vmatmul.mubr.bf16.vlgmr.msra.gmra.mrb[16].mxu1 %v17514_v28  ;;  %6019 = vmatmul.mubr.bf16.vlgmr.msra.gmra.mrb[4].mxu0 %v18403_v24  ;;  %v16187_v24 = vld [vmem:[#allocation2 + $0x7bc] ss:$28 sps:$4 sm:$0xff]   ;;  %v16252_v28 = vld [vmem:[#allocation2 + $0xa94] ss:$28 sps:$4 sm:$0xff]  }
 0x39f   :  { %6030 = vmatpush1.bf16.msra.mxu0 %v16170_v23  ;;  %14697 = vmatpush3.bf16.msra.mxu1 %v16174_v25  ;;  %v16247_v23 = vld [vmem:[#allocation2 + $0xa5c] ss:$28 sps:$4 sm:$0xff]  }
 0x3a0   :  { %6031 = vmatprep.subr.bf16.mxu0 %v16177_v26  ;;  %14698 = vmatprep.subr.bf16.mxu1 %v16178_v27  ;;  %v16248_v25 = vld [vmem:[#allocation2 + $0x14e0] ss:$28 sps:$4 sm:$0xff]   ;;  %v16245_v26 = vld [vmem:[#allocation2 + $0xa58] ss:$28 sps:$4 sm:$0xff]  }
 0x3a1   :  { %6440 = vmatprep.mubr.bf16.mxu1 %v17515_v34  ;;  %6061 = vmatprep.mubr.bf16.mxu0 %v18410_v29  ;;  %v16194_v29 = vld [vmem:[#allocation2 + $0xef8] ss:$28 sps:$4 sm:$0xff]   ;;  %v16249_v27 = vld [vmem:[#allocation2 + $0x1320] ss:$28 sps:$4 sm:$0xff]   ;;  %v16258_v34 = vld [vmem:[#allocation2 + $0x1710] ss:$28 sps:$4 sm:$0xff]  }
 0x3a3   :  { %6032 = vmatpush1.bf16.msra.mxu0 %v16175_v30  ;;  %14699 = vmatpush3.bf16.msra.mxu1 %v16179_v31  ;;  %v16253_v30 = vld [vmem:[#allocation2 + $0x16d8] ss:$28 sps:$4 sm:$0xff]   ;;  %v16250_v31 = vld [vmem:[#allocation2 + $0xa90] ss:$28 sps:$4 sm:$0xff]  }
 0x3a4   :  { %6033 = vmatprep.subr.bf16.mxu0 %v16182_v32  ;;  %14700 = vmatprep.subr.bf16.mxu1 %v16183_v33  ;;  %v16254_v32 = vld [vmem:[#allocation2 + $0x1518] ss:$28 sps:$4 sm:$0xff]   ;;  %v16257_v33 = vld [vmem:[#allocation2 + $0xacc] ss:$28 sps:$4 sm:$0xff]  }
 0x3a7   :  { %6034 = vmatpush1.bf16.msra.mxu0 %v16180_v35  ;;  %14701 = vmatpush3.bf16.msra.mxu1 %v16184_v36  ;;  %v17518_v35 = vld [vmem:[%s19098_s3 + $0x28] ss:$56 sps:$4 sm:$0xff]  }
 0x3a8   :  { %6035 = vmatprep.subr.bf16.mxu0 %v16187_v24  ;;  %14702 = vmatprep.subr.bf16.mxu1 %v16188_v37  ;;  %v16255_v36 = vld [vmem:[#allocation2 + $0xac8] ss:$28 sps:$4 sm:$0xff]   ;;  %v16259_v24 = vld [vmem:[#allocation2 + $0x1550] ss:$28 sps:$4 sm:$0xff]  }
 0x3a9   :  { %v16262_v37 = vld [vmem:[#allocation2 + $0xb04] ss:$28 sps:$4 sm:$0xff]  }
 0x3ab   :  { %6036 = vmatpush1.bf16.msra.mxu0 %v16185_v38  ;;  %14703 = vmatpush3.bf16.msra.mxu1 %v16189_v39  ;;  %v16263_v38 = vld [vmem:[#allocation2 + $0x1748] ss:$28 sps:$4 sm:$0xff]   ;;  %v17519_v39 = vld [vmem:[%s19098_s3 + $0x34] ss:$56 sps:$4 sm:$0xff]  }
 0x3ac   :  { %6037 = vmatprep.subr.bf16.mxu0 %v16192_v40  ;;  %14704 = vmatprep.subr.bf16.mxu1 %v16193_v41  ;;  %v16260_v40 = vld [vmem:[#allocation2 + $0xb00] ss:$28 sps:$4 sm:$0xff]   ;;  %v16264_v41 = vld [vmem:[#allocation2 + $0x1588] ss:$28 sps:$4 sm:$0xff]  }
 0x3af   :  { %6038 = vmatpush1.bf16.msra.mxu0 %v16190_v42  ;;  %14705 = vmatpush3.bf16.msra.mxu1 %v16194_v29  ;;  %v16267_v42 = vld [vmem:[#allocation2 + $0xb3c] ss:$28 sps:$4 sm:$0xff]  }
 0x3b0   :  { %6039 = vmatprep.subr.bf16.mxu0 %v16197_v43  ;;  %14706 = vmatprep.subr.bf16.mxu1 %v16198_v44  ;;  %v16268_v29 = vld [vmem:[#allocation2 + $0x1780] ss:$28 sps:$4 sm:$0xff]   ;;  %v16265_v43 = vld [vmem:[#allocation2 + $0xb38] ss:$28 sps:$4 sm:$0xff]  }
 0x3b1   :  { %v16269_v44 = vld [vmem:[#allocation2 + $0x15c0] ss:$28 sps:$4 sm:$0xff]  }
 0x3b3   :  { %6040 = vmatpush1.bf16.msra.mxu0 %v16195_v45  ;;  %14707 = vmatpush3.bf16.msra.mxu1 %v16199_v46  ;;  %v16272_v46 = vld [vmem:[#allocation2 + $0xb74] ss:$28 sps:$4 sm:$0xff]  }
 0x3b4   :  { %6041 = vmatprep.subr.bf16.mxu0 %v16202_v47  ;;  %14708 = vmatprep.subr.bf16.mxu1 %v16203_v48  ;;  %v16273_v47 = vld [vmem:[#allocation2 + $0x17b8] ss:$28 sps:$4 sm:$0xff]  }
 0x3b5   :  { %v16274_v48 = vld [vmem:[#allocation2 + $0x15f8] ss:$28 sps:$4 sm:$0xff]  }
 0x3b7   :  { %6042 = vmatpush1.bf16.msra.mxu0 %v16200_v49  ;;  %14709 = vmatpush3.bf16.msra.mxu1 %v16204_v50  ;;  %v18450_v49 = vld [vmem:[#allocation4] sm:$0xff] }
 0x3b8   :  { %6043 = vmatprep.subr.bf16.mxu0 %v16207_v51  ;;  %14710 = vmatprep.subr.bf16.mxu1 %v16208_v52  ;;  %v16277_v52 = vld [vmem:[#allocation2 + $0xbac] ss:$28 sps:$4 sm:$0xff]  }
 0x3bb   :  { %6044 = vmatpush1.bf16.msra.mxu0 %v16205_v53  ;;  %14711 = vmatpush3.bf16.msra.mxu1 %v16209_v54  ;;  %v16278_v53 = vld [vmem:[#allocation2 + $0x17f0] ss:$28 sps:$4 sm:$0xff]  }
 0x3bc   :  { %6045 = vmatprep.subr.bf16.mxu0 %v16212_v55  ;;  %14718 = vmatprep.subr.bf16.mxu1 %v16213_v56  ;;  %v16275_v56 = vld [vmem:[#allocation2 + $0xba8] ss:$28 sps:$4 sm:$0xff]  }
 0x3be   :  { %6441 = vmatmul.mubr.bf16.vlgmr.msra.gmra.mrb[20].mxu1 %v17516_v63  ;;  %v16283_v63 = vld [vmem:[#allocation2 + $0x1828] ss:$28 sps:$4 sm:$0xff]  }
 0x3bf   :  { %6046 = vmatpush1.bf16.msra.mxu0 %v16210_v58  ;;  %14719 = vmatpush3.bf16.msra.mxu1 %v16214_v59  ;;  %v16279_v58 = vld [vmem:[#allocation2 + $0x1630] ss:$28 sps:$4 sm:$0xff]  }
 0x3c0   :  { %6047 = vmatprep.subr.bf16.mxu0 %v16217_v60  ;;  %14720 = vmatprep.subr.bf16.mxu1 %v16218_v61  ;;  %v16282_v61 = vld [vmem:[#allocation2 + $0xbe4] ss:$28 sps:$4 sm:$0xff]  }
 0x3c1   :  { %6481 = vmatprep.mubr.bf16.mxu1 %v17517_v4  ;;  %v16280_v4 = vld [vmem:[#allocation2 + $0xbe0] ss:$28 sps:$4 sm:$0xff]  }
 0x3c3   :  { %6048 = vmatpush1.bf16.msra.mxu0 %v16215_v0  ;;  %14721 = vmatpush3.bf16.msra.mxu1 %v16219_v1 }
 0x3c4   :  { %6049 = vmatprep.subr.bf16.mxu0 %v16222_v2  ;;  %14722 = vmatprep.subr.bf16.mxu1 %v16223_v3 }
 0x3c7   :  { %6050 = vmatpush1.bf16.msra.mxu0 %v16220_v5  ;;  %14723 = vmatpush3.bf16.msra.mxu1 %v16224_v6  ;;  %v16284_v5 = vld [vmem:[#allocation2 + $0x1668] ss:$28 sps:$4 sm:$0xff]  }
 0x3c8   :  { %6051 = vmatprep.subr.bf16.mxu0 %v16227_v7  ;;  %14724 = vmatprep.subr.bf16.mxu1 %v16228_v8 }
 0x3cb   :  { %6052 = vmatpush1.bf16.msra.mxu0 %v16225_v9  ;;  %14725 = vmatpush3.bf16.msra.mxu1 %v16229_v10 }
 0x3cc   :  { %6053 = vmatprep.subr.bf16.mxu0 %v16232_v11  ;;  %14726 = vmatprep.subr.bf16.mxu1 %v16233_v12 }
 0x3cf   :  { %6054 = vmatpush1.bf16.msra.mxu0 %v16230_v13  ;;  %14727 = vmatpush3.bf16.msra.mxu1 %v16234_v14 }
 0x3d0   :  { %6055 = vmatprep.subr.bf16.mxu0 %v16237_v15  ;;  %14728 = vmatprep.subr.bf16.mxu1 %v16238_v16  ;;  %v16287_v16 = vld [vmem:[#allocation2 + $0xc1c] ss:$28 sps:$4 sm:$0xff]  }
 0x3d3   :  { %6056 = vmatpush1.bf16.msra.mxu0 %v16235_v17  ;;  %14729 = vmatpush3.bf16.msra.mxu1 %v16239_v18  ;;  %v16288_v17 = vld [vmem:[#allocation2 + $0x1860] ss:$28 sps:$4 sm:$0xff]  }
 0x3d4   :  { %6057 = vmatprep.subr.bf16.mxu0 %v16242_v19  ;;  %14730 = vmatprep.subr.bf16.mxu1 %v16243_v20 }
 0x3d7   :  { %6058 = vmatpush1.bf16.msra.mxu0 %v16240_v21  ;;  %14731 = vmatpush3.bf16.msra.mxu1 %v16244_v22 }
 0x3d8   :  { %6059 = vmatprep.subr.bf16.mxu0 %v16247_v23  ;;  %14732 = vmatprep.subr.bf16.mxu1 %v16248_v25 }
 0x3db   :  { %6060 = vmatpush1.bf16.msra.mxu0 %v16245_v26  ;;  %14733 = vmatpush3.bf16.msra.mxu1 %v16249_v27  ;;  %v16285_v27 = vld [vmem:[#allocation2 + $0xc18] ss:$28 sps:$4 sm:$0xff]  }
 0x3dc   :  { %6072 = vmatprep.subr.bf16.mxu0 %v16252_v28  ;;  %14740 = vmatprep.subr.bf16.mxu1 %v16253_v30  ;;  %v16289_v28 = vld [vmem:[#allocation2 + $0x16a0] ss:$28 sps:$4 sm:$0xff]   ;;  %v16292_v30 = vld [vmem:[#allocation2 + $0xc54] ss:$28 sps:$4 sm:$0xff]  }
 0x3de   :  { %6482 = vmatmul.mubr.bf16.vlgmr.msra.gmra.mrb[24].mxu1 %v17518_v35  ;;  %6062 = vmatmul.mubr.bf16.vlgmr.msra.gmra.mrb[4].mxu0 %v18417_v57  ;;  %v1204_v57 = vlaneseq  ;;  %v16301_v35 = vld [vmem:[#allocation6 + $0x34] ss:$24 sps:$4 sm:$0xff]  }
 0x3df   :  { %6073 = vmatpush1.bf16.msra.mxu0 %v16250_v31  ;;  %14741 = vmatpush3.bf16.msra.mxu1 %v16254_v32  ;;  %v16295_v31 = vld [vmem:[#allocation6 + $0x4] ss:$24 sps:$4 sm:$0xff]  }
 0x3e0   :  { %6074 = vmatprep.subr.bf16.mxu0 %v16257_v33  ;;  %14742 = vmatprep.subr.bf16.mxu1 %v16258_v34  ;;  %v18448_v45 = vshrl.u32 %v1204_v57, 7  ;;  %v16290_v32 = vld [vmem:[#allocation2 + $0xc50] ss:$28 sps:$4 sm:$0xff]   ;;  %v16293_v33 = vld [vmem:[#allocation6] ss:$24 sps:$4 sm:$0xff]  }
 0x3e1   :  { %6522 = vmatprep.mubr.bf16.mxu1 %v17519_v39  ;;  %6104 = vmatprep.mubr.bf16.mxu0 %v18423_v62  ;;  %v16270_v62 = vld [vmem:[#allocation2 + $0xb70] ss:$28 sps:$4 sm:$0xff]   ;;  %v16304_v39 = vld [vmem:[#allocation2 + $0xcc4] ss:$28 sps:$4 sm:$0xff]  }
 0x3e2   :  { %19099 = vst [vmem:[#allocation40_spill] sm:$0xff] %v18448_v45  ;;  %v18453_v50 = vsub.s32 0, %v18448_v45  ;;  %v18456_v51 = vsub.s32 2, %v18448_v45  ;;  %v18459_v54 = vsub.s32 1, %v18448_v45  ;;  %v18462_v55 = vsub.s32 3, %v18448_v45 }
 0x3e3   :  { %6075 = vmatpush1.bf16.msra.mxu0 %v16255_v36  ;;  %14743 = vmatpush3.bf16.msra.mxu1 %v16259_v24  ;;  %v16298_v34 = vld [vmem:[#allocation2 + $0xc8c] ss:$28 sps:$4 sm:$0xff]   ;;  %v16391_v36 = vld [vmem:[%s19100_s18 + $0x4] ss:$24 sps:$4 sm:$0xff]  }
 0x3e4   :  { %6076 = vmatprep.subr.bf16.mxu0 %v16262_v37  ;;  %14744 = vmatprep.subr.bf16.mxu1 %v16263_v38  ;;  %v1207_v59 = vrot.slane %v18450_v49, %v18453_v50  ;;  %v1215_v60 = vrot.slane %v18450_v49, %v18456_v51  ;;  %v1211_v2 = vrot.slane %v18450_v49, %v18459_v54  ;;  %v17520_v24 = vld [vmem:[%s19098_s3 + $0x30] ss:$56 sps:$4 sm:$0xff]  }
 0x3e5   :  { %v1219_v3 = vrot.slane %v18450_v49, %v18462_v55  ;;  %v16296_v37 = vld [vmem:[#allocation2 + $0xc88] ss:$28 sps:$4 sm:$0xff]   ;;  %v16299_v38 = vld [vmem:[#allocation6 + $0x30] ss:$24 sps:$4 sm:$0xff]  }
 0x3e6   :  { %v16305_v57 = vld [vmem:[#allocation6 + $0x60] ss:$24 sps:$4 sm:$0xff]  }
 0x3e7   :  { %6077 = vmatpush1.bf16.msra.mxu0 %v16260_v40  ;;  %14745 = vmatpush3.bf16.msra.mxu1 %v16264_v41  ;;  %v16307_v40 = vld [vmem:[#allocation6 + $0x64] ss:$24 sps:$4 sm:$0xff]   ;;  %v16302_v41 = vld [vmem:[#allocation2 + $0xcc0] ss:$28 sps:$4 sm:$0xff]  }
 0x3e8   :  { %6078 = vmatprep.subr.bf16.mxu0 %v16267_v42  ;;  %14746 = vmatprep.subr.bf16.mxu1 %v16268_v29  ;;  %v16310_v42 = vld [vmem:[#allocation2 + $0xcfc] ss:$28 sps:$4 sm:$0xff]  }
 0x3e9   :  { %v16313_v29 = vld [vmem:[#allocation6 + $0x94] ss:$24 sps:$4 sm:$0xff]  }
 0x3eb   :  { %6079 = vmatpush1.bf16.msra.mxu0 %v16265_v43  ;;  %14747 = vmatpush3.bf16.msra.mxu1 %v16269_v44  ;;  %v16308_v43 = vld [vmem:[#allocation2 + $0xcf8] ss:$28 sps:$4 sm:$0xff]  }
 0x3ec   :  { %6080 = vmatprep.subr.bf16.mxu0 %v16272_v46  ;;  %14748 = vmatprep.subr.bf16.mxu1 %v16273_v47  ;;  %v16311_v44 = vld [vmem:[#allocation6 + $0x90] ss:$24 sps:$4 sm:$0xff]   ;;  %v16319_v47 = vld [vmem:[#allocation6 + $0xc4] ss:$24 sps:$4 sm:$0xff]  }
 0x3ed   :  { %v16316_v46 = vld [vmem:[#allocation2 + $0xd34] ss:$28 sps:$4 sm:$0xff]  }
 0x3ef   :  { %6081 = vmatpush1.bf16.msra.mxu0 %v16270_v62  ;;  %14749 = vmatpush3.bf16.msra.mxu1 %v16274_v48  ;;  %v16314_v62 = vld [vmem:[#allocation2 + $0xd30] ss:$28 sps:$4 sm:$0xff]   ;;  %v16317_v48 = vld [vmem:[#allocation6 + $0xc0] ss:$24 sps:$4 sm:$0xff]  }
 0x3f0   :  { %6082 = vmatprep.subr.bf16.mxu0 %v16277_v52  ;;  %14750 = vmatprep.subr.bf16.mxu1 %v16278_v53  ;;  %v16322_v52 = vld [vmem:[#allocation2 + $0xd6c] ss:$28 sps:$4 sm:$0xff]   ;;  %v16325_v53 = vld [vmem:[#allocation6 + $0xf4] ss:$24 sps:$4 sm:$0xff]  }
 0x3f1   :  { %v5633_v0 = vpop.f32.mrb[0].mxu0  ;;  %v5934_v1 = vpop.f32.mrb[0].mxu1 }
 0x3f2   :  { %v5635_v6 = vpop.f32.mrb[1].mxu0  ;;  %v5936_v7 = vpop.f32.mrb[1].mxu1  ;;  %v18472_v8 = vadd.f32 %v5633_v0, %v1207_v59  ;;  %v18474_v11 = vadd.f32 %v5934_v1, %v1215_v60  ;;  %v16329_v0 = vld [vmem:[#allocation6 + $0x120] ss:$24 sps:$4 sm:$0xff]  }
 0x3f3   :  { %v5637_v9 = vpop.f32.mrb[2].mxu0  ;;  %v5938_v10 = vpop.f32.mrb[2].mxu1  ;;  %6083 = vmatpush1.bf16.msra.mxu0 %v16275_v56  ;;  %14751 = vmatpush3.bf16.msra.mxu1 %v16279_v58  ;;  %v18480_v18 = vadd.f32 %v5635_v6, %v1211_v2  ;;  %v18482_v19 = vadd.f32 %v5936_v7, %v1219_v3  ;;  %v16320_v56 = vld [vmem:[#allocation2 + $0xd68] ss:$28 sps:$4 sm:$0xff]   ;;  %v16323_v58 = vld [vmem:[#allocation6 + $0xf0] ss:$24 sps:$4 sm:$0xff]  }
 0x3f4   :  { %v18476_v12 = vadd.f32 %v5637_v9, %v1207_v59  ;;  %v18478_v13 = vadd.f32 %v5938_v10, %v1215_v60  ;;  %v5639_v14 = vpop.f32.mrb[3].mxu0  ;;  %v5940_v15 = vpop.f32.mrb[3].mxu1  ;;  %6084 = vmatprep.subr.bf16.mxu0 %v16282_v61  ;;  %14752 = vmatprep.subr.bf16.mxu1 %v16283_v63  ;;  %v16328_v59 = vld [vmem:[#allocation2 + $0xda4] ss:$28 sps:$4 sm:$0xff]   ;;  %v16337_v6 = vld [vmem:[#allocation6 + $0x154] ss:$24 sps:$4 sm:$0xff]  }
 0x3f5   :  { %v18484_v20 = vadd.f32 %v5639_v14, %v1211_v2  ;;  %v18486_v21 = vadd.f32 %v5940_v15, %v1219_v3  ;;  %v16331_v60 = vld [vmem:[#allocation6 + $0x124] ss:$24 sps:$4 sm:$0xff]   ;;  %v16326_v63 = vld [vmem:[#allocation2 + $0xda0] ss:$28 sps:$4 sm:$0xff]   ;;  %v16332_v9 = vld [vmem:[#allocation2 + $0xdd8] ss:$28 sps:$4 sm:$0xff]  }
 0x3f6   :  { %v11405_v22 = vpack.c.bf16 %v18476_v12, %v18472_v8  ;;  %v11520_v23 = vpack.c.bf16 %v18478_v13, %v18474_v11  ;;  %v16335_v10 = vld [vmem:[#allocation6 + $0x150] ss:$24 sps:$4 sm:$0xff]   ;;  %v16343_v15 = vld [vmem:[#allocation6 + $0x184] ss:$24 sps:$4 sm:$0xff]  }
 0x3f7   :  { %v11519_v25 = vpack.c.bf16 %v18484_v20, %v18480_v18  ;;  %v11698_v26 = vpack.c.bf16 %v18486_v21, %v18482_v19  ;;  %6085 = vmatpush1.bf16.msra.mxu0 %v16280_v4  ;;  %14753 = vmatpush3.bf16.msra.mxu1 %v16284_v5  ;;  %v16334_v5 = vld [vmem:[#allocation2 + $0xddc] ss:$28 sps:$4 sm:$0xff]   ;;  %v16340_v14 = vld [vmem:[#allocation2 + $0xe14] ss:$28 sps:$4 sm:$0xff]   ;;  %v18749_v12 = vld [vmem:[#allocation15 + $0x10] sm:$0xff]  }
 0x3f8   :  { %6086 = vmatprep.subr.bf16.mxu0 %v16287_v16  ;;  %14754 = vmatprep.subr.bf16.mxu1 %v16288_v17  ;;  %v16338_v16 = vld [vmem:[#allocation2 + $0xe10] ss:$28 sps:$4 sm:$0xff]   ;;  %v16341_v17 = vld [vmem:[#allocation6 + $0x180] ss:$24 sps:$4 sm:$0xff]  }
 0x3f9   :  { %v17349_v8 = vld [vmem:[#allocation9 + $0x780] ss:$28 sps:$4 sm:$0xff]   ;;  %v17354_v11 = vld [vmem:[#allocation9 + $0x7b8] ss:$28 sps:$4 sm:$0xff]   ;;  %v18867_v21 = vld [vmem:[#allocation18 + $0xd8] sm:$0xff]  }
 0x3fa   :  { %v18755_v13 = vld [vmem:[#allocation15 + $0x18] sm:$0xff]   ;;  %v17396_v20 = vld [vmem:[#allocation9 + $0x97c] ss:$28 sps:$4 sm:$0xff]   ;;  %19108 = vst [vmem:[#allocation48_spill] sm:$0xff] %v18867_v21 }
 0x3fb   :  { %6087 = vmatpush1.bf16.msra.mxu0 %v16285_v27  ;;  %14755 = vmatpush3.bf16.msra.mxu1 %v16289_v28  ;;  %v16346_v27 = vld [vmem:[#allocation2 + $0xe4c] ss:$28 sps:$4 sm:$0xff]   ;;  %v16349_v28 = vld [vmem:[#allocation6 + $0x1b4] ss:$24 sps:$4 sm:$0xff]  }
 0x3fc   :  { %6088 = vmatprep.subr.bf16.mxu0 %v16292_v30  ;;  %8327 = vmatprep.subr.bf16.mxu1 %v16295_v31  ;;  %v17521_v30 = vld [vmem:[%s19098_s3 + $0x18] ss:$56 sps:$4 sm:$0xff]   ;;  %v16344_v31 = vld [vmem:[#allocation2 + $0xe48] ss:$28 sps:$4 sm:$0xff]  }
 0x3fd   :  { %v18803_v18 = vld [vmem:[#allocation18 + $0x10] sm:$0xff]  }
 0x3fe   :  { %6523 = vmatmul.mubr.bf16.vlgmr.msra.gmra.mrb[28].mxu1 %v17520_v24  ;;  %v16353_v24 = vld [vmem:[#allocation6 + $0x1e0] ss:$24 sps:$4 sm:$0xff]  }
 0x3ff   :  { %6089 = vmatpush1.bf16.msra.mxu0 %v16290_v32  ;;  %8328 = vmatpush1.bf16.msra.mxu1 %v16293_v33  ;;  %v16347_v32 = vld [vmem:[#allocation6 + $0x1b0] ss:$24 sps:$4 sm:$0xff]   ;;  %v16352_v33 = vld [vmem:[#allocation2 + $0xe84] ss:$28 sps:$4 sm:$0xff]  }
 0x400   :  { %6090 = vmatprep.subr.bf16.mxu0 %v16298_v34  ;;  %8329 = vmatprep.subr.bf16.mxu1 %v16301_v35  ;;  %v16355_v34 = vld [vmem:[#allocation6 + $0x1e4] ss:$24 sps:$4 sm:$0xff]  }
 0x401   :  { %8359 = vmatprep.mubr.bf16.mxu1 %v16391_v36  ;;  %v17522_v35 = vld [vmem:[%s19098_s3 + $0x24] ss:$56 sps:$4 sm:$0xff]   ;;  %v18863_v19 = vld [vmem:[#allocation18 + $0x90] sm:$0xff]  }
 0x402   :  { %v16350_v36 = vld [vmem:[#allocation2 + $0xe80] ss:$28 sps:$4 sm:$0xff]   ;;  %19107 = vst [vmem:[#allocation47_spill] sm:$0xff] %v18863_v19 }
 0x403   :  { %6091 = vmatpush1.bf16.msra.mxu0 %v16296_v37  ;;  %8330 = vmatpush1.bf16.msra.mxu1 %v16299_v38  ;;  %v16358_v37 = vld [vmem:[#allocation2 + $0xebc] ss:$28 sps:$4 sm:$0xff]  }
 0x404   :  { %6092 = vmatprep.subr.bf16.mxu0 %v16304_v39  ;;  %8331 = vmatprep.subr.bf16.mxu1 %v16307_v40  ;;  %v16361_v38 = vld [vmem:[#allocation6 + $0x214] ss:$24 sps:$4 sm:$0xff]   ;;  %v16359_v40 = vld [vmem:[#allocation6 + $0x210] ss:$24 sps:$4 sm:$0xff]  }
 0x405   :  { %v16356_v39 = vld [vmem:[#allocation2 + $0xeb8] ss:$28 sps:$4 sm:$0xff]  }
 0x407   :  { %6093 = vmatpush1.bf16.msra.mxu0 %v16302_v41  ;;  %8332 = vmatpush1.bf16.msra.mxu1 %v16305_v57  ;;  %v16364_v41 = vld [vmem:[#allocation2 + $0xef4] ss:$28 sps:$4 sm:$0xff]   ;;  %v16367_v57 = vld [vmem:[#allocation6 + $0x244] ss:$24 sps:$4 sm:$0xff]  }
 0x408   :  { %6094 = vmatprep.subr.bf16.mxu0 %v16310_v42  ;;  %8333 = vmatprep.subr.bf16.mxu1 %v16313_v29  ;;  %v19071_v42 = vsub.s32 6, %v18448_v45  ;;  %v16362_v29 = vld [vmem:[#allocation2 + $0xef0] ss:$28 sps:$4 sm:$0xff]  }
 0x40b   :  { %6095 = vmatpush1.bf16.msra.mxu0 %v16308_v43  ;;  %8334 = vmatpush1.bf16.msra.mxu1 %v16311_v44  ;;  %v16365_v43 = vld [vmem:[#allocation6 + $0x240] ss:$24 sps:$4 sm:$0xff]  }
 0x40c   :  { %6096 = vmatprep.subr.bf16.mxu0 %v16316_v46  ;;  %8335 = vmatprep.subr.bf16.mxu1 %v16319_v47  ;;  %v16370_v44 = vld [vmem:[#allocation2 + $0xf2c] ss:$28 sps:$4 sm:$0xff]   ;;  %v16373_v46 = vld [vmem:[#allocation6 + $0x274] ss:$24 sps:$4 sm:$0xff]  }
 0x40d   :  { %v16368_v47 = vld [vmem:[#allocation2 + $0xf28] ss:$28 sps:$4 sm:$0xff]  }
 0x40f   :  { %6097 = vmatpush1.bf16.msra.mxu0 %v16314_v62  ;;  %8336 = vmatpush1.bf16.msra.mxu1 %v16317_v48  ;;  %v16371_v62 = vld [vmem:[#allocation6 + $0x270] ss:$24 sps:$4 sm:$0xff]   ;;  %v1231_v48 = vrot.slane %v18450_v49, %v19071_v42 }
 0x410   :  { %6098 = vmatprep.subr.bf16.mxu0 %v16322_v52  ;;  %8337 = vmatprep.subr.bf16.mxu1 %v16325_v53  ;;  %v16376_v52 = vld [vmem:[#allocation2 + $0xf64] ss:$28 sps:$4 sm:$0xff]   ;;  %v16382_v49 = vld [vmem:[#allocation2 + $0xf9c] ss:$28 sps:$4 sm:$0xff]  }
 0x411   :  { %v14624_v61 = vpop.f32.mrb[4].mxu1  ;;  %v16379_v53 = vld [vmem:[#allocation6 + $0x2a4] ss:$24 sps:$4 sm:$0xff]   ;;  %v18835_v42 = vld [vmem:[#allocation18 + $0xc0] sm:$0xff]  }
 0x412   :  { %v14625_v1 = vpop.f32.mrb[5].mxu1 }
 0x413   :  { %v18502_v2 = vadd.f32 %v14625_v1, %v14624_v61  ;;  %6099 = vmatpush1.bf16.msra.mxu0 %v16320_v56  ;;  %v14627_v3 = vpop.f32.mrb[6].mxu1  ;;  %8338 = vmatpush1.bf16.msra.mxu1 %v16323_v58  ;;  %v16374_v58 = vld [vmem:[#allocation2 + $0xf60] ss:$28 sps:$4 sm:$0xff]  }
 0x414   :  { %v14628_v4 = vpop.f32.mrb[7].mxu1  ;;  %6100 = vmatprep.subr.bf16.mxu0 %v16328_v59  ;;  %8339 = vmatprep.subr.bf16.mxu1 %v16331_v60  ;;  %v16377_v59 = vld [vmem:[#allocation6 + $0x2a0] ss:$24 sps:$4 sm:$0xff]  }
 0x415   :  { %v18504_v7 = vadd.f32 %v14628_v4, %v14627_v3  ;;  %v6279_v61 = vadd.f32 %v18502_v2, %v1231_v48  ;;  %v16385_v3 = vld [vmem:[#allocation6 + $0x2d4] ss:$24 sps:$4 sm:$0xff]   ;;  %v16383_v2 = vld [vmem:[#allocation6 + $0x2d0] ss:$24 sps:$4 sm:$0xff]  }
 0x417   :  { %6101 = vmatpush1.bf16.msra.mxu0 %v16326_v63  ;;  %8340 = vmatpush1.bf16.msra.mxu1 %v16329_v0  ;;  %v6282_v4 = vadd.f32 %v18504_v7, %v1231_v48  ;;  %v16386_v7 = vld [vmem:[#allocation2 + $0xfd0] ss:$28 sps:$4 sm:$0xff]  }
 0x418   :  { %6102 = vmatprep.subr.bf16.mxu0 %v16334_v5  ;;  %8341 = vmatprep.subr.bf16.mxu1 %v16337_v6  ;;  %v16430_v48 = vld [vmem:[#allocation6 + $0x424] ss:$24 sps:$4 sm:$0xff]  }
 0x41b   :  { %6103 = vmatpush1.bf16.msra.mxu0 %v16332_v9  ;;  %8342 = vmatpush1.bf16.msra.mxu1 %v16335_v10  ;;  %v16380_v9 = vld [vmem:[#allocation2 + $0xf98] ss:$28 sps:$4 sm:$0xff]  }
 0x41c   :  { %6115 = vmatprep.subr.bf16.mxu0 %v16340_v14  ;;  %8343 = vmatprep.subr.bf16.mxu1 %v16343_v15  ;;  %v16388_v14 = vld [vmem:[#allocation2 + $0xfd4] ss:$28 sps:$4 sm:$0xff]   ;;  %v16389_v15 = vld [vmem:[%s19100_s18] ss:$24 sps:$4 sm:$0xff]  }
 0x41e   :  { %6105 = vmatmul.mubr.bf16.vlgmr.msra.gmra.mrb[4].mxu0 %v17521_v30  ;;  %v16490_v30 = vld [vmem:[%s19100_s18 + $0xc] ss:$24 sps:$4 sm:$0xff]  }
 0x41f   :  { %6116 = vmatpush1.bf16.msra.mxu0 %v16338_v16  ;;  %8344 = vmatpush1.bf16.msra.mxu1 %v16341_v17  ;;  %v16394_v16 = vld [vmem:[#allocation6 + $0x304] ss:$24 sps:$4 sm:$0xff]   ;;  %v16392_v17 = vld [vmem:[#allocation6 + $0x300] ss:$24 sps:$4 sm:$0xff]  }
 0x420   :  { %6117 = vmatprep.subr.bf16.mxu0 %v16346_v27  ;;  %8345 = vmatprep.subr.bf16.mxu1 %v16349_v28  ;;  %v16397_v27 = vld [vmem:[#allocation2 + $0x100c] ss:$28 sps:$4 sm:$0xff]   ;;  %v16400_v28 = vld [vmem:[#allocation6 + $0x334] ss:$24 sps:$4 sm:$0xff]  }
 0x421   :  { %6147 = vmatprep.mubr.bf16.mxu0 %v17522_v35  ;;  %v16401_v35 = vld [vmem:[#allocation2 + $0x1040] ss:$28 sps:$4 sm:$0xff]  }
 0x423   :  { %6118 = vmatpush1.bf16.msra.mxu0 %v16344_v31  ;;  %8346 = vmatpush1.bf16.msra.mxu1 %v16347_v32  ;;  %v16395_v31 = vld [vmem:[#allocation2 + $0x1008] ss:$28 sps:$4 sm:$0xff]   ;;  %v16398_v32 = vld [vmem:[#allocation6 + $0x330] ss:$24 sps:$4 sm:$0xff]  }
 0x424   :  { %6119 = vmatprep.subr.bf16.mxu0 %v16352_v33  ;;  %8347 = vmatprep.subr.bf16.mxu1 %v16355_v34  ;;  %v16403_v33 = vld [vmem:[#allocation2 + $0x1044] ss:$28 sps:$4 sm:$0xff]  }
 0x425   :  { %v16406_v34 = vld [vmem:[#allocation6 + $0x364] ss:$24 sps:$4 sm:$0xff]  }
 0x427   :  { %6120 = vmatpush1.bf16.msra.mxu0 %v16350_v36  ;;  %8348 = vmatpush1.bf16.msra.mxu1 %v16353_v24  ;;  %v16404_v36 = vld [vmem:[#allocation6 + $0x360] ss:$24 sps:$4 sm:$0xff]   ;;  %v16409_v24 = vld [vmem:[#allocation2 + $0x107c] ss:$28 sps:$4 sm:$0xff]  }
 0x428   :  { %6121 = vmatprep.subr.bf16.mxu0 %v16358_v37  ;;  %8349 = vmatprep.subr.bf16.mxu1 %v16361_v38  ;;  %v16412_v37 = vld [vmem:[#allocation6 + $0x394] ss:$24 sps:$4 sm:$0xff]  }
 0x429   :  { %v16407_v38 = vld [vmem:[#allocation2 + $0x1078] ss:$28 sps:$4 sm:$0xff]  }
 0x42b   :  { %6122 = vmatpush1.bf16.msra.mxu0 %v16356_v39  ;;  %8350 = vmatpush1.bf16.msra.mxu1 %v16359_v40  ;;  %v16410_v39 = vld [vmem:[#allocation6 + $0x390] ss:$24 sps:$4 sm:$0xff]  }
 0x42c   :  { %6123 = vmatprep.subr.bf16.mxu0 %v16364_v41  ;;  %8351 = vmatprep.subr.bf16.mxu1 %v16367_v57  ;;  %v16415_v40 = vld [vmem:[#allocation2 + $0x10b4] ss:$28 sps:$4 sm:$0xff]   ;;  %v16418_v41 = vld [vmem:[#allocation6 + $0x3c4] ss:$24 sps:$4 sm:$0xff]  }
 0x42d   :  { %v16413_v57 = vld [vmem:[#allocation2 + $0x10b0] ss:$28 sps:$4 sm:$0xff]  }
 0x42f   :  { %6124 = vmatpush1.bf16.msra.mxu0 %v16362_v29  ;;  %8352 = vmatpush1.bf16.msra.mxu1 %v16365_v43  ;;  %v16416_v29 = vld [vmem:[#allocation6 + $0x3c0] ss:$24 sps:$4 sm:$0xff]  }
 0x430   :  { %6125 = vmatprep.subr.bf16.mxu0 %v16370_v44  ;;  %8353 = vmatprep.subr.bf16.mxu1 %v16373_v46  ;;  %v16421_v43 = vld [vmem:[#allocation2 + $0x10ec] ss:$28 sps:$4 sm:$0xff]   ;;  %v16424_v44 = vld [vmem:[#allocation6 + $0x3f4] ss:$24 sps:$4 sm:$0xff]  }
 0x431   :  { %v14646_v56 = vpop.f32.mrb[8].mxu1  ;;  %v16419_v46 = vld [vmem:[#allocation2 + $0x10e8] ss:$28 sps:$4 sm:$0xff]  }
 0x432   :  { %v14647_v60 = vpop.f32.mrb[9].mxu1 }
 0x433   :  { %v14648_v63 = vadd.f32 %v14647_v60, %v14646_v56  ;;  %6126 = vmatpush1.bf16.msra.mxu0 %v16368_v47  ;;  %v14649_v0 = vpop.f32.mrb[10].mxu1  ;;  %8354 = vmatpush1.bf16.msra.mxu1 %v16371_v62  ;;  %v16422_v47 = vld [vmem:[#allocation6 + $0x3f0] ss:$24 sps:$4 sm:$0xff]   ;;  %v16427_v62 = vld [vmem:[#allocation2 + $0x1124] ss:$28 sps:$4 sm:$0xff]  }
 0x434   :  { %v14650_v1 = vpop.f32.mrb[11].mxu1  ;;  %6127 = vmatprep.subr.bf16.mxu0 %v16376_v52  ;;  %8355 = vmatprep.subr.bf16.mxu1 %v16379_v53  ;;  %v16425_v53 = vld [vmem:[#allocation2 + $0x1120] ss:$28 sps:$4 sm:$0xff]  }
 0x435   :  { %v18518_v5 = vadd.f32 %v14648_v63, %v6279_v61  ;;  %v14651_v6 = vadd.f32 %v14650_v1, %v14649_v0  ;;  %v16428_v56 = vld [vmem:[#allocation6 + $0x420] ss:$24 sps:$4 sm:$0xff]   ;;  %v16433_v63 = vld [vmem:[#allocation2 + $0x115c] ss:$28 sps:$4 sm:$0xff]  }
 0x436   :  { %v16436_v0 = vld [vmem:[#allocation6 + $0x454] ss:$24 sps:$4 sm:$0xff]  }
 0x437   :  { %v18520_v10 = vadd.f32 %v14651_v6, %v6282_v4  ;;  %6128 = vmatpush1.bf16.msra.mxu0 %v16374_v58  ;;  %8356 = vmatpush1.bf16.msra.mxu1 %v16377_v59  ;;  %v16431_v4 = vld [vmem:[#allocation2 + $0x1158] ss:$28 sps:$4 sm:$0xff]  }
 0x438   :  { %6129 = vmatprep.subr.bf16.mxu0 %v16382_v49  ;;  %8357 = vmatprep.subr.bf16.mxu1 %v16385_v3  ;;  %v16434_v6 = vld [vmem:[#allocation6 + $0x450] ss:$24 sps:$4 sm:$0xff]  }
 0x43b   :  { %6130 = vmatpush1.bf16.msra.mxu0 %v16380_v9  ;;  %8358 = vmatpush1.bf16.msra.mxu1 %v16383_v2  ;;  %v16439_v9 = vld [vmem:[#allocation2 + $0x1194] ss:$28 sps:$4 sm:$0xff]   ;;  %v16442_v2 = vld [vmem:[#allocation6 + $0x484] ss:$24 sps:$4 sm:$0xff]  }
 0x43c   :  { %6131 = vmatprep.subr.bf16.mxu0 %v16388_v14  ;;  %8370 = vmatprep.subr.bf16.mxu1 %v16394_v16  ;;  %v16437_v14 = vld [vmem:[#allocation2 + $0x1190] ss:$28 sps:$4 sm:$0xff]   ;;  %v16448_v16 = vld [vmem:[#allocation6 + $0x4b4] ss:$24 sps:$4 sm:$0xff]  }
 0x43e   :  { %8360 = vmatmul.mubr.bf16.vlgmr.msra.gmra.mrb[32].mxu1 %v16389_v15  ;;  %v16440_v15 = vld [vmem:[#allocation6 + $0x480] ss:$24 sps:$4 sm:$0xff]  }
 0x43f   :  { %6132 = vmatpush1.bf16.msra.mxu0 %v16386_v7  ;;  %8371 = vmatpush1.bf16.msra.mxu1 %v16392_v17  ;;  %v16443_v7 = vld [vmem:[#allocation2 + $0x11c8] ss:$28 sps:$4 sm:$0xff]   ;;  %v16446_v17 = vld [vmem:[#allocation6 + $0x4b0] ss:$24 sps:$4 sm:$0xff]  }
 0x440   :  { %6133 = vmatprep.subr.bf16.mxu0 %v16397_v27  ;;  %8372 = vmatprep.subr.bf16.mxu1 %v16400_v28  ;;  %v16451_v27 = vld [vmem:[#allocation2 + $0x1204] ss:$28 sps:$4 sm:$0xff]  }
 0x441   :  { %8402 = vmatprep.mubr.bf16.mxu1 %v16490_v30  ;;  %v16454_v28 = vld [vmem:[#allocation6 + $0x4e4] ss:$24 sps:$4 sm:$0xff]  }
 0x442   :  { %v17524_v30 = vld [vmem:[%s19098_s3 + $0x2c] ss:$56 sps:$4 sm:$0xff]  }
 0x443   :  { %6134 = vmatpush1.bf16.msra.mxu0 %v16395_v31  ;;  %8373 = vmatpush1.bf16.msra.mxu1 %v16398_v32  ;;  %v16449_v31 = vld [vmem:[#allocation2 + $0x1200] ss:$28 sps:$4 sm:$0xff]  }
 0x444   :  { %6135 = vmatprep.subr.bf16.mxu0 %v16403_v33  ;;  %8374 = vmatprep.subr.bf16.mxu1 %v16406_v34  ;;  %v16452_v32 = vld [vmem:[#allocation6 + $0x4e0] ss:$24 sps:$4 sm:$0xff]   ;;  %v16457_v33 = vld [vmem:[#allocation2 + $0x123c] ss:$28 sps:$4 sm:$0xff]  }
 0x445   :  { %v16460_v34 = vld [vmem:[#allocation6 + $0x514] ss:$24 sps:$4 sm:$0xff]  }
 0x447   :  { %6136 = vmatpush1.bf16.msra.mxu0 %v16401_v35  ;;  %8375 = vmatpush1.bf16.msra.mxu1 %v16404_v36  ;;  %v16455_v35 = vld [vmem:[#allocation2 + $0x1238] ss:$28 sps:$4 sm:$0xff]  }
 0x448   :  { %6137 = vmatprep.subr.bf16.mxu0 %v16409_v24  ;;  %8376 = vmatprep.subr.bf16.mxu1 %v16412_v37  ;;  %v16458_v36 = vld [vmem:[#allocation6 + $0x510] ss:$24 sps:$4 sm:$0xff]   ;;  %v16466_v37 = vld [vmem:[#allocation6 + $0x544] ss:$24 sps:$4 sm:$0xff]  }
 0x449   :  { %v16463_v24 = vld [vmem:[#allocation2 + $0x1274] ss:$28 sps:$4 sm:$0xff]  }
 0x44b   :  { %6138 = vmatpush1.bf16.msra.mxu0 %v16407_v38  ;;  %8377 = vmatpush1.bf16.msra.mxu1 %v16410_v39  ;;  %v16461_v38 = vld [vmem:[#allocation2 + $0x1270] ss:$28 sps:$4 sm:$0xff]   ;;  %v16464_v39 = vld [vmem:[#allocation6 + $0x540] ss:$24 sps:$4 sm:$0xff]  }
 0x44c   :  { %6139 = vmatprep.subr.bf16.mxu0 %v16415_v40  ;;  %8378 = vmatprep.subr.bf16.mxu1 %v16418_v41  ;;  %v16469_v40 = vld [vmem:[#allocation2 + $0x12ac] ss:$28 sps:$4 sm:$0xff]   ;;  %v16472_v41 = vld [vmem:[#allocation6 + $0x574] ss:$24 sps:$4 sm:$0xff]  }
 0x44f   :  { %6140 = vmatpush1.bf16.msra.mxu0 %v16413_v57  ;;  %8379 = vmatpush1.bf16.msra.mxu1 %v16416_v29  ;;  %v16467_v57 = vld [vmem:[#allocation2 + $0x12a8] ss:$28 sps:$4 sm:$0xff]   ;;  %v16470_v29 = vld [vmem:[#allocation6 + $0x570] ss:$24 sps:$4 sm:$0xff]  }
 0x450   :  { %6141 = vmatprep.subr.bf16.mxu0 %v16421_v43  ;;  %8380 = vmatprep.subr.bf16.mxu1 %v16424_v44  ;;  %v16475_v43 = vld [vmem:[#allocation2 + $0x12e4] ss:$28 sps:$4 sm:$0xff]  }
 0x451   :  { %v14668_v52 = vpop.f32.mrb[12].mxu1  ;;  %v16478_v44 = vld [vmem:[#allocation6 + $0x5a4] ss:$24 sps:$4 sm:$0xff]  }
 0x452   :  { %v14669_v58 = vpop.f32.mrb[13].mxu1 }
 0x453   :  { %v14670_v59 = vadd.f32 %v14669_v58, %v14668_v52  ;;  %6142 = vmatpush1.bf16.msra.mxu0 %v16419_v46  ;;  %v14671_v60 = vpop.f32.mrb[14].mxu1  ;;  %8381 = vmatpush1.bf16.msra.mxu1 %v16422_v47  ;;  %v16473_v52 = vld [vmem:[#allocation2 + $0x12e0] ss:$28 sps:$4 sm:$0xff]  }
 0x454   :  { %v14672_v61 = vpop.f32.mrb[15].mxu1  ;;  %6143 = vmatprep.subr.bf16.mxu0 %v16427_v62  ;;  %8382 = vmatprep.subr.bf16.mxu1 %v16430_v48  ;;  %v16481_v58 = vld [vmem:[#allocation2 + $0x131c] ss:$28 sps:$4 sm:$0xff]  }
 0x455   :  { %v18529_v1 = vadd.f32 %v14670_v59, %v18518_v5  ;;  %v14673_v49 = vadd.f32 %v14672_v61, %v14671_v60  ;;  %v16445_v5 = vld [vmem:[#allocation2 + $0x11cc] ss:$28 sps:$4 sm:$0xff]   ;;  %v16484_v59 = vld [vmem:[#allocation6 + $0x5d4] ss:$24 sps:$4 sm:$0xff]  }
 0x457   :  { %v18532_v3 = vadd.f32 %v14673_v49, %v18520_v10  ;;  %6144 = vmatpush1.bf16.msra.mxu0 %v16425_v53  ;;  %8383 = vmatpush1.bf16.msra.mxu1 %v16428_v56  ;;  %v17523_v10 = vld [vmem:[%s19098_s3 + $0x20] ss:$56 sps:$4 sm:$0xff]  }
 0x458   :  { %6145 = vmatprep.subr.bf16.mxu0 %v16433_v63  ;;  %8384 = vmatprep.subr.bf16.mxu1 %v16436_v0  ;;  %v16476_v53 = vld [vmem:[#allocation6 + $0x5a0] ss:$24 sps:$4 sm:$0xff]   ;;  %v16479_v63 = vld [vmem:[#allocation2 + $0x1318] ss:$28 sps:$4 sm:$0xff]  }
 0x459   :  { %v16482_v49 = vld [vmem:[#allocation6 + $0x5d0] ss:$24 sps:$4 sm:$0xff]  }
 0x45b   :  { %6146 = vmatpush1.bf16.msra.mxu0 %v16431_v4  ;;  %8385 = vmatpush1.bf16.msra.mxu1 %v16434_v6  ;;  %v16487_v4 = vld [vmem:[#allocation2 + $0x1354] ss:$28 sps:$4 sm:$0xff]   ;;  %v16488_v6 = vld [vmem:[%s19100_s18 + $0x8] ss:$24 sps:$4 sm:$0xff]  }
 0x45c   :  { %6158 = vmatprep.subr.bf16.mxu0 %v16439_v9  ;;  %8386 = vmatprep.subr.bf16.mxu1 %v16442_v2  ;;  %v16493_v9 = vld [vmem:[#allocation6 + $0x604] ss:$24 sps:$4 sm:$0xff]  }
 0x45d   :  { %v16485_v2 = vld [vmem:[#allocation2 + $0x1350] ss:$28 sps:$4 sm:$0xff]  }
 0x45e   :  { %6148 = vmatmul.mubr.bf16.vlgmr.msra.gmra.mrb[4].mxu0 %v17523_v10  ;;  %v16502_v10 = vld [vmem:[#allocation2 + $0x13c4] ss:$28 sps:$4 sm:$0xff]  }
 0x45f   :  { %6159 = vmatpush1.bf16.msra.mxu0 %v16437_v14  ;;  %8387 = vmatpush1.bf16.msra.mxu1 %v16440_v15  ;;  %v16496_v14 = vld [vmem:[#allocation2 + $0x138c] ss:$28 sps:$4 sm:$0xff]  }
 0x460   :  { %6160 = vmatprep.subr.bf16.mxu0 %v16445_v5  ;;  %8388 = vmatprep.subr.bf16.mxu1 %v16448_v16  ;;  %v16586_v15 = vld [vmem:[%s19100_s18 + $0x14] ss:$24 sps:$4 sm:$0xff]   ;;  %v16494_v5 = vld [vmem:[#allocation2 + $0x1388] ss:$28 sps:$4 sm:$0xff]   ;;  %v16497_v16 = vld [vmem:[#allocation6 + $0x630] ss:$24 sps:$4 sm:$0xff]  }
 0x461   :  { %6190 = vmatprep.mubr.bf16.mxu0 %v17524_v30  ;;  %v16511_v30 = vld [vmem:[#allocation6 + $0x694] ss:$24 sps:$4 sm:$0xff]  }
 0x463   :  { %6161 = vmatpush1.bf16.msra.mxu0 %v16443_v7  ;;  %8389 = vmatpush1.bf16.msra.mxu1 %v16446_v17  ;;  %v16505_v7 = vld [vmem:[#allocation6 + $0x664] ss:$24 sps:$4 sm:$0xff]   ;;  %v16500_v17 = vld [vmem:[#allocation2 + $0x13c0] ss:$28 sps:$4 sm:$0xff]  }
 0x464   :  { %6162 = vmatprep.subr.bf16.mxu0 %v16451_v27  ;;  %8390 = vmatprep.subr.bf16.mxu1 %v16454_v28  ;;  %v16503_v27 = vld [vmem:[#allocation6 + $0x660] ss:$24 sps:$4 sm:$0xff]   ;;  %v16508_v28 = vld [vmem:[#allocation2 + $0x13fc] ss:$28 sps:$4 sm:$0xff]  }
 0x467   :  { %6163 = vmatpush1.bf16.msra.mxu0 %v16449_v31  ;;  %8391 = vmatpush1.bf16.msra.mxu1 %v16452_v32  ;;  %v16506_v31 = vld [vmem:[#allocation2 + $0x13f8] ss:$28 sps:$4 sm:$0xff]  }
 0x468   :  { %6164 = vmatprep.subr.bf16.mxu0 %v16457_v33  ;;  %8392 = vmatprep.subr.bf16.mxu1 %v16460_v34  ;;  %v16509_v32 = vld [vmem:[#allocation6 + $0x690] ss:$24 sps:$4 sm:$0xff]   ;;  %v16517_v34 = vld [vmem:[#allocation6 + $0x6c4] ss:$24 sps:$4 sm:$0xff]  }
 0x469   :  { %v16514_v33 = vld [vmem:[#allocation2 + $0x1434] ss:$28 sps:$4 sm:$0xff]  }
 0x46b   :  { %6165 = vmatpush1.bf16.msra.mxu0 %v16455_v35  ;;  %8393 = vmatpush1.bf16.msra.mxu1 %v16458_v36  ;;  %v16512_v35 = vld [vmem:[#allocation2 + $0x1430] ss:$28 sps:$4 sm:$0xff]   ;;  %v16515_v36 = vld [vmem:[#allocation6 + $0x6c0] ss:$24 sps:$4 sm:$0xff]  }
 0x46c   :  { %6166 = vmatprep.subr.bf16.mxu0 %v16463_v24  ;;  %8394 = vmatprep.subr.bf16.mxu1 %v16466_v37  ;;  %v16520_v24 = vld [vmem:[#allocation2 + $0x146c] ss:$28 sps:$4 sm:$0xff]   ;;  %v16523_v37 = vld [vmem:[#allocation6 + $0x6f4] ss:$24 sps:$4 sm:$0xff]  }
 0x46f   :  { %6167 = vmatpush1.bf16.msra.mxu0 %v16461_v38  ;;  %8395 = vmatpush1.bf16.msra.mxu1 %v16464_v39  ;;  %v16518_v38 = vld [vmem:[#allocation2 + $0x1468] ss:$28 sps:$4 sm:$0xff]   ;;  %v16521_v39 = vld [vmem:[#allocation6 + $0x6f0] ss:$24 sps:$4 sm:$0xff]  }
 0x470   :  { %6168 = vmatprep.subr.bf16.mxu0 %v16469_v40  ;;  %8396 = vmatprep.subr.bf16.mxu1 %v16472_v41  ;;  %v16526_v40 = vld [vmem:[#allocation2 + $0x14a4] ss:$28 sps:$4 sm:$0xff]  }
 0x471   :  { %v14690_v46 = vpop.f32.mrb[16].mxu1  ;;  %v16529_v41 = vld [vmem:[#allocation6 + $0x724] ss:$24 sps:$4 sm:$0xff]  }
 0x472   :  { %v14691_v47 = vpop.f32.mrb[17].mxu1 }
 0x473   :  { %v14692_v62 = vadd.f32 %v14691_v47, %v14690_v46  ;;  %6169 = vmatpush1.bf16.msra.mxu0 %v16467_v57  ;;  %v14693_v48 = vpop.f32.mrb[18].mxu1  ;;  %8397 = vmatpush1.bf16.msra.mxu1 %v16470_v29  ;;  %v16524_v46 = vld [vmem:[#allocation2 + $0x14a0] ss:$28 sps:$4 sm:$0xff]  }
 0x474   :  { %v14694_v56 = vpop.f32.mrb[19].mxu1  ;;  %6170 = vmatprep.subr.bf16.mxu0 %v16475_v43  ;;  %8398 = vmatprep.subr.bf16.mxu1 %v16478_v44  ;;  %v16527_v47 = vld [vmem:[#allocation6 + $0x720] ss:$24 sps:$4 sm:$0xff]  }
 0x475   :  { %v18541_v60 = vadd.f32 %v14692_v62, %v18529_v1  ;;  %v14695_v61 = vadd.f32 %v14694_v56, %v14693_v48  ;;  %v16491_v1 = vld [vmem:[#allocation6 + $0x600] ss:$24 sps:$4 sm:$0xff]   ;;  %v16532_v48 = vld [vmem:[#allocation2 + $0x14dc] ss:$28 sps:$4 sm:$0xff]  }
 0x477   :  { %v18544_v0 = vadd.f32 %v14695_v61, %v18532_v3  ;;  %6171 = vmatpush1.bf16.msra.mxu0 %v16473_v52  ;;  %8399 = vmatpush1.bf16.msra.mxu1 %v16476_v53  ;;  %v16499_v3 = vld [vmem:[#allocation6 + $0x634] ss:$24 sps:$4 sm:$0xff]   ;;  %v16533_v61 = vld [vmem:[#allocation6 + $0x750] ss:$24 sps:$4 sm:$0xff]  }
 0x478   :  { %6172 = vmatprep.subr.bf16.mxu0 %v16481_v58  ;;  %8400 = vmatprep.subr.bf16.mxu1 %v16484_v59  ;;  %v16535_v52 = vld [vmem:[#allocation6 + $0x754] ss:$24 sps:$4 sm:$0xff]  }
 0x479   :  { %v16530_v59 = vld [vmem:[#allocation2 + $0x14d8] ss:$28 sps:$4 sm:$0xff]  }
 0x47b   :  { %6173 = vmatpush1.bf16.msra.mxu0 %v16479_v63  ;;  %8401 = vmatpush1.bf16.msra.mxu1 %v16482_v49  ;;  %v16538_v63 = vld [vmem:[#allocation2 + $0x1514] ss:$28 sps:$4 sm:$0xff]   ;;  %v16541_v49 = vld [vmem:[#allocation6 + $0x784] ss:$24 sps:$4 sm:$0xff]  }
 0x47c   :  { %6174 = vmatprep.subr.bf16.mxu0 %v16487_v4  ;;  %8413 = vmatprep.subr.bf16.mxu1 %v16493_v9  ;;  %v16536_v4 = vld [vmem:[#allocation2 + $0x1510] ss:$28 sps:$4 sm:$0xff]   ;;  %v16547_v9 = vld [vmem:[#allocation6 + $0x7b4] ss:$24 sps:$4 sm:$0xff]  }
 0x47e   :  { %8403 = vmatmul.mubr.bf16.vlgmr.msra.gmra.mrb[32].mxu1 %v16488_v6  ;;  %v16539_v6 = vld [vmem:[#allocation6 + $0x780] ss:$24 sps:$4 sm:$0xff]  }
 0x47f   :  { %6175 = vmatpush1.bf16.msra.mxu0 %v16485_v2  ;;  %8414 = vmatpush1.bf16.msra.mxu1 %v16491_v1  ;;  %v16542_v2 = vld [vmem:[#allocation2 + $0x1548] ss:$28 sps:$4 sm:$0xff]   ;;  %v16545_v1 = vld [vmem:[#allocation6 + $0x7b0] ss:$24 sps:$4 sm:$0xff]  }
 0x480   :  { %6176 = vmatprep.subr.bf16.mxu0 %v16496_v14  ;;  %8415 = vmatprep.subr.bf16.mxu1 %v16499_v3  ;;  %v16550_v14 = vld [vmem:[#allocation2 + $0x1584] ss:$28 sps:$4 sm:$0xff]  }
 0x481   :  { %8445 = vmatprep.mubr.bf16.mxu1 %v16586_v15  ;;  %v16553_v3 = vld [vmem:[#allocation6 + $0x7e4] ss:$24 sps:$4 sm:$0xff]  }
 0x482   :  { %v17526_v15 = vld [vmem:[%s19098_s3 + $0x34] ss:$56 sps:$4 sm:$0xff]  }
 0x483   :  { %6177 = vmatpush1.bf16.msra.mxu0 %v16494_v5  ;;  %8416 = vmatpush1.bf16.msra.mxu1 %v16497_v16  ;;  %v16548_v5 = vld [vmem:[#allocation2 + $0x1580] ss:$28 sps:$4 sm:$0xff]  }
 0x484   :  { %6178 = vmatprep.subr.bf16.mxu0 %v16502_v10  ;;  %8417 = vmatprep.subr.bf16.mxu1 %v16505_v7  ;;  %v16551_v16 = vld [vmem:[#allocation6 + $0x7e0] ss:$24 sps:$4 sm:$0xff]   ;;  %v16556_v10 = vld [vmem:[#allocation2 + $0x15bc] ss:$28 sps:$4 sm:$0xff]  }
 0x485   :  { %v16559_v7 = vld [vmem:[#allocation6 + $0x814] ss:$24 sps:$4 sm:$0xff]  }
 0x487   :  { %6179 = vmatpush1.bf16.msra.mxu0 %v16500_v17  ;;  %8418 = vmatpush1.bf16.msra.mxu1 %v16503_v27  ;;  %v16554_v17 = vld [vmem:[#allocation2 + $0x15b8] ss:$28 sps:$4 sm:$0xff]  }
 0x488   :  { %6180 = vmatprep.subr.bf16.mxu0 %v16508_v28  ;;  %8419 = vmatprep.subr.bf16.mxu1 %v16511_v30  ;;  %v16557_v27 = vld [vmem:[#allocation6 + $0x810] ss:$24 sps:$4 sm:$0xff]   ;;  %v16565_v30 = vld [vmem:[#allocation6 + $0x844] ss:$24 sps:$4 sm:$0xff]  }
 0x489   :  { %v16562_v28 = vld [vmem:[#allocation2 + $0x15f4] ss:$28 sps:$4 sm:$0xff]  }
 0x48b   :  { %6181 = vmatpush1.bf16.msra.mxu0 %v16506_v31  ;;  %8420 = vmatpush1.bf16.msra.mxu1 %v16509_v32  ;;  %v16560_v31 = vld [vmem:[#allocation2 + $0x15f0] ss:$28 sps:$4 sm:$0xff]   ;;  %v16563_v32 = vld [vmem:[#allocation6 + $0x840] ss:$24 sps:$4 sm:$0xff]  }
 0x48c   :  { %6182 = vmatprep.subr.bf16.mxu0 %v16514_v33  ;;  %8421 = vmatprep.subr.bf16.mxu1 %v16517_v34  ;;  %v16568_v33 = vld [vmem:[#allocation2 + $0x162c] ss:$28 sps:$4 sm:$0xff]   ;;  %v16571_v34 = vld [vmem:[#allocation6 + $0x874] ss:$24 sps:$4 sm:$0xff]  }
 0x48f   :  { %6183 = vmatpush1.bf16.msra.mxu0 %v16512_v35  ;;  %8422 = vmatpush1.bf16.msra.mxu1 %v16515_v36  ;;  %v16566_v35 = vld [vmem:[#allocation2 + $0x1628] ss:$28 sps:$4 sm:$0xff]   ;;  %v16569_v36 = vld [vmem:[#allocation6 + $0x870] ss:$24 sps:$4 sm:$0xff]  }
 0x490   :  { %6184 = vmatprep.subr.bf16.mxu0 %v16520_v24  ;;  %8423 = vmatprep.subr.bf16.mxu1 %v16523_v37  ;;  %v16574_v24 = vld [vmem:[#allocation2 + $0x1664] ss:$28 sps:$4 sm:$0xff]  }
 0x491   :  { %v14712_v57 = vpop.f32.mrb[20].mxu1  ;;  %v16577_v37 = vld [vmem:[#allocation6 + $0x8a4] ss:$24 sps:$4 sm:$0xff]  }
 0x492   :  { %v14713_v29 = vpop.f32.mrb[21].mxu1 }
 0x493   :  { %v14714_v43 = vadd.f32 %v14713_v29, %v14712_v57  ;;  %6185 = vmatpush1.bf16.msra.mxu0 %v16518_v38  ;;  %v14715_v44 = vpop.f32.mrb[22].mxu1  ;;  %8424 = vmatpush1.bf16.msra.mxu1 %v16521_v39  ;;  %v16572_v57 = vld [vmem:[#allocation2 + $0x1660] ss:$28 sps:$4 sm:$0xff]  }
 0x494   :  { %v14716_v62 = vpop.f32.mrb[23].mxu1  ;;  %6186 = vmatprep.subr.bf16.mxu0 %v16526_v40  ;;  %8425 = vmatprep.subr.bf16.mxu1 %v16529_v41  ;;  %v16575_v29 = vld [vmem:[#allocation6 + $0x8a0] ss:$24 sps:$4 sm:$0xff]  }
 0x495   :  { %v18553_v53 = vadd.f32 %v14714_v43, %v18541_v60  ;;  %v14717_v56 = vadd.f32 %v14716_v62, %v14715_v44  ;;  %v16544_v60 = vld [vmem:[#allocation2 + $0x154c] ss:$28 sps:$4 sm:$0xff]   ;;  %v16580_v44 = vld [vmem:[#allocation2 + $0x169c] ss:$28 sps:$4 sm:$0xff]  }
 0x497   :  { %v18556_v58 = vadd.f32 %v14717_v56, %v18544_v0  ;;  %6187 = vmatpush1.bf16.msra.mxu0 %v16524_v46  ;;  %8426 = vmatpush1.bf16.msra.mxu1 %v16527_v47  ;;  %v17525_v0 = vld [vmem:[%s19098_s3 + $0x28] ss:$56 sps:$4 sm:$0xff]   ;;  %v16583_v46 = vld [vmem:[#allocation6 + $0x8d4] ss:$24 sps:$4 sm:$0xff]   ;;  %v16581_v56 = vld [vmem:[#allocation6 + $0x8d0] ss:$24 sps:$4 sm:$0xff]  }
 0x498   :  { %6188 = vmatprep.subr.bf16.mxu0 %v16532_v48  ;;  %8427 = vmatprep.subr.bf16.mxu1 %v16535_v52  ;;  %v16578_v52 = vld [vmem:[#allocation2 + $0x1698] ss:$28 sps:$4 sm:$0xff]  }
 0x49b   :  { %6189 = vmatpush1.bf16.msra.mxu0 %v16530_v59  ;;  %8428 = vmatpush1.bf16.msra.mxu1 %v16533_v61  ;;  %v16584_v59 = vld [vmem:[%s19100_s18 + $0x10] ss:$24 sps:$4 sm:$0xff]  }
 0x49c   :  { %6201 = vmatprep.subr.bf16.mxu0 %v16538_v63  ;;  %8429 = vmatprep.subr.bf16.mxu1 %v16541_v49  ;;  %v16589_v61 = vld [vmem:[#allocation2 + $0x16d4] ss:$28 sps:$4 sm:$0xff]  }
 0x49d   :  { %v16592_v63 = vld [vmem:[#allocation6 + $0xc] ss:$24 sps:$4 sm:$0xff]   ;;  %v16590_v49 = vld [vmem:[#allocation6 + $0x8] ss:$24 sps:$4 sm:$0xff]  }
 0x49e   :  { %6191 = vmatmul.mubr.bf16.vlgmr.msra.gmra.mrb[4].mxu0 %v17525_v0  ;;  %v16604_v0 = vld [vmem:[#allocation6 + $0x6c] ss:$24 sps:$4 sm:$0xff]  }
 0x49f   :  { %6202 = vmatpush1.bf16.msra.mxu0 %v16536_v4  ;;  %8430 = vmatpush1.bf16.msra.mxu1 %v16539_v6  ;;  %v16598_v4 = vld [vmem:[#allocation6 + $0x3c] ss:$24 sps:$4 sm:$0xff]  }
 0x4a0   :  { %6203 = vmatprep.subr.bf16.mxu0 %v16544_v60  ;;  %8431 = vmatprep.subr.bf16.mxu1 %v16547_v9  ;;  %v16593_v6 = vld [vmem:[#allocation2 + $0x1708] ss:$28 sps:$4 sm:$0xff]   ;;  %v16596_v60 = vld [vmem:[#allocation6 + $0x38] ss:$24 sps:$4 sm:$0xff]  }
 0x4a1   :  { %6233 = vmatprep.mubr.bf16.mxu0 %v17526_v15  ;;  %v16601_v9 = vld [vmem:[#allocation2 + $0x1744] ss:$28 sps:$4 sm:$0xff]  }
 0x4a2   :  { %v16610_v15 = vld [vmem:[#allocation6 + $0x9c] ss:$24 sps:$4 sm:$0xff]  }
 0x4a3   :  { %6204 = vmatpush1.bf16.msra.mxu0 %v16542_v2  ;;  %8432 = vmatpush1.bf16.msra.mxu1 %v16545_v1  ;;  %v18576_v2 = vld [vmem:[%s19100_s18 + $0x4] ss:$24 sps:$4 sm:$0xff]  }
 0x4a4   :  { %6205 = vmatprep.subr.bf16.mxu0 %v16550_v14  ;;  %8433 = vmatprep.subr.bf16.mxu1 %v16553_v3  ;;  %v16599_v1 = vld [vmem:[#allocation2 + $0x1740] ss:$28 sps:$4 sm:$0xff]   ;;  %v16602_v14 = vld [vmem:[#allocation6 + $0x68] ss:$24 sps:$4 sm:$0xff]  }
 0x4a5   :  { %v16607_v3 = vld [vmem:[#allocation2 + $0x177c] ss:$28 sps:$4 sm:$0xff]  }
 0x4a7   :  { %6206 = vmatpush1.bf16.msra.mxu0 %v16548_v5  ;;  %8434 = vmatpush1.bf16.msra.mxu1 %v16551_v16  ;;  %v16605_v5 = vld [vmem:[#allocation2 + $0x1778] ss:$28 sps:$4 sm:$0xff]  }
 0x4a8   :  { %6207 = vmatprep.subr.bf16.mxu0 %v16556_v10  ;;  %8435 = vmatprep.subr.bf16.mxu1 %v16559_v7  ;;  %v16608_v16 = vld [vmem:[#allocation6 + $0x98] ss:$24 sps:$4 sm:$0xff]   ;;  %v16613_v10 = vld [vmem:[#allocation2 + $0x17b4] ss:$28 sps:$4 sm:$0xff]  }
 0x4a9   :  { %v16616_v7 = vld [vmem:[#allocation6 + $0xcc] ss:$24 sps:$4 sm:$0xff]  }
 0x4ab   :  { %6208 = vmatpush1.bf16.msra.mxu0 %v16554_v17  ;;  %8436 = vmatpush1.bf16.msra.mxu1 %v16557_v27  ;;  %v16611_v17 = vld [vmem:[#allocation2 + $0x17b0] ss:$28 sps:$4 sm:$0xff]  }
 0x4ac   :  { %6209 = vmatprep.subr.bf16.mxu0 %v16562_v28  ;;  %8437 = vmatprep.subr.bf16.mxu1 %v16565_v30  ;;  %v16614_v27 = vld [vmem:[#allocation6 + $0xc8] ss:$24 sps:$4 sm:$0xff]   ;;  %v16622_v30 = vld [vmem:[#allocation6 + $0xfc] ss:$24 sps:$4 sm:$0xff]  }
 0x4ad   :  { %v16619_v28 = vld [vmem:[#allocation2 + $0x17ec] ss:$28 sps:$4 sm:$0xff]  }
 0x4af   :  { %6210 = vmatpush1.bf16.msra.mxu0 %v16560_v31  ;;  %8438 = vmatpush1.bf16.msra.mxu1 %v16563_v32  ;;  %v16617_v31 = vld [vmem:[#allocation2 + $0x17e8] ss:$28 sps:$4 sm:$0xff]   ;;  %v16620_v32 = vld [vmem:[#allocation6 + $0xf8] ss:$24 sps:$4 sm:$0xff]  }
 0x4b0   :  { %6211 = vmatprep.subr.bf16.mxu0 %v16568_v33  ;;  %8439 = vmatprep.subr.bf16.mxu1 %v16571_v34  ;;  %v16625_v33 = vld [vmem:[#allocation2 + $0x1824] ss:$28 sps:$4 sm:$0xff]   ;;  %v16628_v34 = vld [vmem:[#allocation6 + $0x12c] ss:$24 sps:$4 sm:$0xff]  }
 0x4b1   :  { %v14734_v38 = vpop.f32.mrb[24].mxu1 }
 0x4b2   :  { %v14735_v39 = vpop.f32.mrb[25].mxu1 }
 0x4b3   :  { %v14736_v40 = vadd.f32 %v14735_v39, %v14734_v38  ;;  %6212 = vmatpush1.bf16.msra.mxu0 %v16566_v35  ;;  %v14737_v41 = vpop.f32.mrb[26].mxu1  ;;  %8440 = vmatpush1.bf16.msra.mxu1 %v16569_v36  ;;  %v16623_v38 = vld [vmem:[#allocation2 + $0x1820] ss:$28 sps:$4 sm:$0xff]   ;;  %v16626_v39 = vld [vmem:[#allocation6 + $0x128] ss:$24 sps:$4 sm:$0xff]  }
 0x4b4   :  { %v14738_v43 = vpop.f32.mrb[27].mxu1  ;;  %6213 = vmatprep.subr.bf16.mxu0 %v16574_v24  ;;  %8441 = vmatprep.subr.bf16.mxu1 %v16577_v37 }
 0x4b5   :  { %v18565_v47 = vadd.f32 %v14736_v40, %v18553_v53  ;;  %v14739_v62 = vadd.f32 %v14738_v43, %v14737_v41  ;;  %v16587_v53 = vld [vmem:[#allocation2 + $0x16d0] ss:$28 sps:$4 sm:$0xff]   ;;  %v16631_v41 = vld [vmem:[#allocation2 + $0x185c] ss:$28 sps:$4 sm:$0xff]  }
 0x4b7   :  { %v18568_v48 = vadd.f32 %v14739_v62, %v18556_v58  ;;  %6214 = vmatpush1.bf16.msra.mxu0 %v16572_v57  ;;  %8442 = vmatpush1.bf16.msra.mxu1 %v16575_v29  ;;  %v16595_v58 = vld [vmem:[#allocation2 + $0x170c] ss:$28 sps:$4 sm:$0xff]   ;;  %v16634_v57 = vld [vmem:[#allocation6 + $0x15c] ss:$24 sps:$4 sm:$0xff]   ;;  %v16632_v62 = vld [vmem:[#allocation6 + $0x158] ss:$24 sps:$4 sm:$0xff]  }
 0x4b8   :  { %6215 = vmatprep.subr.bf16.mxu0 %v16580_v44  ;;  %8443 = vmatprep.subr.bf16.mxu1 %v16583_v46  ;;  %v16629_v46 = vld [vmem:[#allocation2 + $0x1858] ss:$28 sps:$4 sm:$0xff]  }
 0x4bb   :  { %6216 = vmatpush1.bf16.msra.mxu0 %v16578_v52  ;;  %8444 = vmatpush1.bf16.msra.mxu1 %v16581_v56  ;;  %v16637_v52 = vld [vmem:[#allocation6 + $0x18c] ss:$24 sps:$4 sm:$0xff]  }
 0x4bc   :  { %6217 = vmatprep.subr.bf16.mxu0 %v16589_v61  ;;  %8456 = vmatprep.subr.bf16.mxu1 %v16592_v63  ;;  %v16640_v56 = vld [vmem:[#allocation6 + $0x14] ss:$24 sps:$4 sm:$0xff]   ;;  %v16635_v61 = vld [vmem:[#allocation6 + $0x188] ss:$24 sps:$4 sm:$0xff]  }
 0x4bd   :  { %v16643_v63 = vld [vmem:[#allocation6 + $0x1bc] ss:$24 sps:$4 sm:$0xff]  }
 0x4be   :  { %8446 = vmatmul.mubr.bf16.vlgmr.msra.gmra.mrb[32].mxu1 %v16584_v59 }
 0x4bf   :  { %6218 = vmatpush1.bf16.msra.mxu0 %v16587_v53  ;;  %8457 = vmatpush1.bf16.msra.mxu1 %v16590_v49  ;;  %v17528_v53 = vld [vmem:[%s19098_s3 + $0x30] ss:$56 sps:$4 sm:$0xff]   ;;  %v16641_v49 = vld [vmem:[#allocation6 + $0x1b8] ss:$24 sps:$4 sm:$0xff]  }
 0x4c0   :  { %6219 = vmatprep.subr.bf16.mxu0 %v16595_v58  ;;  %8458 = vmatprep.subr.bf16.mxu1 %v16598_v4  ;;  %v16644_v58 = vld [vmem:[#allocation6 + $0x40] ss:$24 sps:$4 sm:$0xff]   ;;  %v16649_v4 = vld [vmem:[#allocation6 + $0x1ec] ss:$24 sps:$4 sm:$0xff]  }
 0x4c1   :  { %8488 = vmatprep.mubr.bf16.mxu1 %v18576_v2 }
 0x4c3   :  { %6220 = vmatpush1.bf16.msra.mxu0 %v16593_v6  ;;  %8459 = vmatpush1.bf16.msra.mxu1 %v16596_v60  ;;  %v16652_v6 = vld [vmem:[#allocation6 + $0x74] ss:$24 sps:$4 sm:$0xff]   ;;  %v16647_v60 = vld [vmem:[#allocation6 + $0x1e8] ss:$24 sps:$4 sm:$0xff]  }
 0x4c4   :  { %6221 = vmatprep.subr.bf16.mxu0 %v16601_v9  ;;  %8460 = vmatprep.subr.bf16.mxu1 %v16604_v0  ;;  %v16650_v9 = vld [vmem:[#allocation6 + $0x70] ss:$24 sps:$4 sm:$0xff]   ;;  %v16655_v0 = vld [vmem:[#allocation6 + $0x21c] ss:$24 sps:$4 sm:$0xff]  }
 0x4c7   :  { %6222 = vmatpush1.bf16.msra.mxu0 %v16599_v1  ;;  %8461 = vmatpush1.bf16.msra.mxu1 %v16602_v14  ;;  %v16658_v1 = vld [vmem:[#allocation6 + $0xa4] ss:$24 sps:$4 sm:$0xff]   ;;  %v16653_v14 = vld [vmem:[#allocation6 + $0x218] ss:$24 sps:$4 sm:$0xff]  }
 0x4c8   :  { %6223 = vmatprep.subr.bf16.mxu0 %v16607_v3  ;;  %8462 = vmatprep.subr.bf16.mxu1 %v16610_v15  ;;  %v16656_v3 = vld [vmem:[#allocation6 + $0xa0] ss:$24 sps:$4 sm:$0xff]   ;;  %v16661_v15 = vld [vmem:[#allocation6 + $0x24c] ss:$24 sps:$4 sm:$0xff]  }
 0x4cb   :  { %6224 = vmatpush1.bf16.msra.mxu0 %v16605_v5  ;;  %8463 = vmatpush1.bf16.msra.mxu1 %v16608_v16  ;;  %v16664_v5 = vld [vmem:[#allocation6 + $0xd4] ss:$24 sps:$4 sm:$0xff]   ;;  %v16659_v16 = vld [vmem:[#allocation6 + $0x248] ss:$24 sps:$4 sm:$0xff]  }
 0x4cc   :  { %6225 = vmatprep.subr.bf16.mxu0 %v16613_v10  ;;  %8464 = vmatprep.subr.bf16.mxu1 %v16616_v7  ;;  %v16667_v10 = vld [vmem:[#allocation6 + $0x27c] ss:$24 sps:$4 sm:$0xff]  }
 0x4cd   :  { %v16670_v7 = vld [vmem:[#allocation6 + $0x104] ss:$24 sps:$4 sm:$0xff]  }
 0x4cf   :  { %6226 = vmatpush1.bf16.msra.mxu0 %v16611_v17  ;;  %8465 = vmatpush1.bf16.msra.mxu1 %v16614_v27  ;;  %v16665_v17 = vld [vmem:[#allocation6 + $0x278] ss:$24 sps:$4 sm:$0xff]  }
 0x4d0   :  { %6227 = vmatprep.subr.bf16.mxu0 %v16619_v28  ;;  %8466 = vmatprep.subr.bf16.mxu1 %v16622_v30  ;;  %v16668_v27 = vld [vmem:[#allocation6 + $0x100] ss:$24 sps:$4 sm:$0xff]   ;;  %v16673_v28 = vld [vmem:[#allocation6 + $0x2ac] ss:$24 sps:$4 sm:$0xff]  }
 0x4d1   :  { %v14756_v35 = vpop.f32.mrb[28].mxu1  ;;  %v16676_v30 = vld [vmem:[#allocation6 + $0x134] ss:$24 sps:$4 sm:$0xff]  }
 0x4d2   :  { %v14757_v36 = vpop.f32.mrb[29].mxu1 }
 0x4d3   :  { %v14758_v24 = vadd.f32 %v14757_v36, %v14756_v35  ;;  %6228 = vmatpush1.bf16.msra.mxu0 %v16617_v31  ;;  %v14759_v37 = vpop.f32.mrb[30].mxu1  ;;  %8467 = vmatpush1.bf16.msra.mxu1 %v16620_v32  ;;  %v16671_v31 = vld [vmem:[#allocation6 + $0x2a8] ss:$24 sps:$4 sm:$0xff]   ;;  %v16677_v35 = vld [vmem:[#allocation6 + $0x2d8] ss:$24 sps:$4 sm:$0xff]  }
 0x4d4   :  { %v14760_v40 = vpop.f32.mrb[31].mxu1  ;;  %6229 = vmatprep.subr.bf16.mxu0 %v16625_v33  ;;  %8468 = vmatprep.subr.bf16.mxu1 %v16628_v34  ;;  %v16674_v32 = vld [vmem:[#allocation6 + $0x130] ss:$24 sps:$4 sm:$0xff]   ;;  %v16679_v33 = vld [vmem:[#allocation6 + $0x2dc] ss:$24 sps:$4 sm:$0xff]  }
 0x4d5   :  { %v18580_v29 = vadd.f32 %v14758_v24, %v18565_v47  ;;  %v14761_v43 = vadd.f32 %v14760_v40, %v14759_v37  ;;  %v16638_v47 = vld [vmem:[#allocation6 + $0x10] ss:$24 sps:$4 sm:$0xff]   ;;  %v16682_v34 = vld [vmem:[#allocation6 + $0x164] ss:$24 sps:$4 sm:$0xff]   ;;  %v16680_v36 = vld [vmem:[#allocation6 + $0x160] ss:$24 sps:$4 sm:$0xff]  }
 0x4d6   :  { %v16685_v24 = vld [vmem:[#allocation6 + $0x30c] ss:$24 sps:$4 sm:$0xff]   ;;  %v16691_v40 = vld [vmem:[#allocation6 + $0x33c] ss:$24 sps:$4 sm:$0xff]  }
 0x4d7   :  { %v18583_v44 = vadd.f32 %v14761_v43, %v18568_v48  ;;  %6230 = vmatpush1.bf16.msra.mxu0 %v16623_v38  ;;  %8469 = vmatpush1.bf16.msra.mxu1 %v16626_v39  ;;  %v16646_v48 = vld [vmem:[#allocation6 + $0x44] ss:$24 sps:$4 sm:$0xff]   ;;  %v16688_v37 = vld [vmem:[#allocation6 + $0x194] ss:$24 sps:$4 sm:$0xff]   ;;  %v16683_v38 = vld [vmem:[#allocation6 + $0x308] ss:$24 sps:$4 sm:$0xff]  }
 0x4d8   :  { %6231 = vmatprep.subr.bf16.mxu0 %v16631_v41  ;;  %8470 = vmatprep.subr.bf16.mxu1 %v16634_v57  ;;  %v16686_v39 = vld [vmem:[#allocation6 + $0x190] ss:$24 sps:$4 sm:$0xff]   ;;  %v16694_v41 = vld [vmem:[#allocation6 + $0x1c4] ss:$24 sps:$4 sm:$0xff]  }
 0x4d9   :  { %v11701_v59 = vpack.c.bf16 %v18583_v44, %v18580_v29  ;;  %v18594_v57 = vld [vmem:[%s19100_s18] ss:$24 sps:$4 sm:$0xff]  }
 0x4da   :  { %v16689_v43 = vld [vmem:[#allocation6 + $0x338] ss:$24 sps:$4 sm:$0xff]  }
 0x4db   :  { %6232 = vmatpush1.bf16.msra.mxu0 %v16629_v46  ;;  %8471 = vmatpush1.bf16.msra.mxu1 %v16632_v62  ;;  %v16692_v46 = vld [vmem:[#allocation6 + $0x1c0] ss:$24 sps:$4 sm:$0xff]   ;;  %v16697_v62 = vld [vmem:[#allocation6 + $0x36c] ss:$24 sps:$4 sm:$0xff]  }
 0x4dc   :  { %8472 = vmatprep.subr.bf16.mxu1 %v16637_v52  ;;  %8585 = vmatprep.subr.bf16.mxu0 %v16640_v56  ;;  %v16700_v52 = vld [vmem:[#allocation6 + $0x1f4] ss:$24 sps:$4 sm:$0xff]   ;;  %v18600_v56 = vld [vmem:[%s19100_s18 + $0xc] ss:$24 sps:$4 sm:$0xff]  }
 0x4dd   :  { %v18875_v29 = vld [vmem:[#allocation18 + $0xe0] sm:$0xff]  }
 0x4de   :  { %6234 = vmatmul.mubr.bf16.vlgmr.msra.gmra.mrb[4].mxu0 %v17528_v53  ;;  %v16701_v53 = vld [vmem:[#allocation6 + $0x398] ss:$24 sps:$4 sm:$0xff]   ;;  %19110 = vst [vmem:[#allocation50_spill] sm:$0xff] %v18875_v29 }
 0x4df   :  { %8473 = vmatpush1.bf16.msra.mxu1 %v16635_v61  ;;  %8586 = vmatpush1.bf16.msra.mxu0 %v16638_v47  ;;  %v16695_v61 = vld [vmem:[#allocation6 + $0x368] ss:$24 sps:$4 sm:$0xff]   ;;  %v18879_v44 = vld [vmem:[#allocation18 + $0xa0] sm:$0xff]  }
 0x4e0   :  { %8474 = vmatprep.subr.bf16.mxu1 %v16643_v63  ;;  %8587 = vmatprep.subr.bf16.mxu0 %v16646_v48  ;;  %v16698_v47 = vld [vmem:[#allocation6 + $0x1f0] ss:$24 sps:$4 sm:$0xff]   ;;  %v16703_v63 = vld [vmem:[#allocation6 + $0x39c] ss:$24 sps:$4 sm:$0xff]   ;;  %19111 = vst [vmem:[#allocation51_spill] sm:$0xff] %v18879_v44 }
 0x4e1   :  { %8617 = vmatprep.mubr.bf16.mxu0 %v18576_v2  ;;  %v16662_v2 = vld [vmem:[#allocation6 + $0xd0] ss:$24 sps:$4 sm:$0xff]   ;;  %v16706_v48 = vld [vmem:[#allocation6 + $0x224] ss:$24 sps:$4 sm:$0xff]  }
 0x4e3   :  { %8475 = vmatpush1.bf16.msra.mxu1 %v16641_v49  ;;  %8588 = vmatpush1.bf16.msra.mxu0 %v16644_v58  ;;  %v16704_v49 = vld [vmem:[#allocation6 + $0x220] ss:$24 sps:$4 sm:$0xff]   ;;  %v16709_v58 = vld [vmem:[#allocation6 + $0x3cc] ss:$24 sps:$4 sm:$0xff]  }
 0x4e4   :  { %8476 = vmatprep.subr.bf16.mxu1 %v16649_v4  ;;  %8589 = vmatprep.subr.bf16.mxu0 %v16652_v6  ;;  %v16712_v4 = vld [vmem:[#allocation6 + $0x254] ss:$24 sps:$4 sm:$0xff]   ;;  %v16707_v6 = vld [vmem:[#allocation6 + $0x3c8] ss:$24 sps:$4 sm:$0xff]  }
 0x4e7   :  { %8477 = vmatpush1.bf16.msra.mxu1 %v16647_v60  ;;  %8590 = vmatpush1.bf16.msra.mxu0 %v16650_v9  ;;  %v16710_v60 = vld [vmem:[#allocation6 + $0x250] ss:$24 sps:$4 sm:$0xff]   ;;  %v16715_v9 = vld [vmem:[#allocation6 + $0x3fc] ss:$24 sps:$4 sm:$0xff]  }
 0x4e8   :  { %8478 = vmatprep.subr.bf16.mxu1 %v16655_v0  ;;  %8591 = vmatprep.subr.bf16.mxu0 %v16658_v1  ;;  %v16718_v0 = vld [vmem:[#allocation6 + $0x284] ss:$24 sps:$4 sm:$0xff]   ;;  %v16713_v1 = vld [vmem:[#allocation6 + $0x3f8] ss:$24 sps:$4 sm:$0xff]  }
 0x4eb   :  { %8479 = vmatpush1.bf16.msra.mxu1 %v16653_v14  ;;  %8592 = vmatpush1.bf16.msra.mxu0 %v16656_v3  ;;  %v16716_v14 = vld [vmem:[#allocation6 + $0x280] ss:$24 sps:$4 sm:$0xff]   ;;  %v16721_v3 = vld [vmem:[#allocation6 + $0x42c] ss:$24 sps:$4 sm:$0xff]  }
 0x4ec   :  { %8480 = vmatprep.subr.bf16.mxu1 %v16661_v15  ;;  %8593 = vmatprep.subr.bf16.mxu0 %v16664_v5  ;;  %v16724_v15 = vld [vmem:[#allocation6 + $0x2b4] ss:$24 sps:$4 sm:$0xff]   ;;  %v16719_v5 = vld [vmem:[#allocation6 + $0x428] ss:$24 sps:$4 sm:$0xff]  }
 0x4ef   :  { %8481 = vmatpush1.bf16.msra.mxu1 %v16659_v16  ;;  %8594 = vmatpush1.bf16.msra.mxu0 %v16662_v2  ;;  %v16722_v16 = vld [vmem:[#allocation6 + $0x2b0] ss:$24 sps:$4 sm:$0xff]   ;;  %v16727_v2 = vld [vmem:[#allocation6 + $0x45c] ss:$24 sps:$4 sm:$0xff]  }
 0x4f0   :  { %8482 = vmatprep.subr.bf16.mxu1 %v16667_v10  ;;  %8595 = vmatprep.subr.bf16.mxu0 %v16670_v7  ;;  %v16730_v10 = vld [vmem:[#allocation6 + $0x2e4] ss:$24 sps:$4 sm:$0xff]   ;;  %v16725_v7 = vld [vmem:[#allocation6 + $0x458] ss:$24 sps:$4 sm:$0xff]  }
 0x4f3   :  { %8483 = vmatpush1.bf16.msra.mxu1 %v16665_v17  ;;  %8596 = vmatpush1.bf16.msra.mxu0 %v16668_v27  ;;  %v16728_v17 = vld [vmem:[#allocation6 + $0x2e0] ss:$24 sps:$4 sm:$0xff]   ;;  %v16733_v27 = vld [vmem:[#allocation6 + $0x48c] ss:$24 sps:$4 sm:$0xff]  }
 0x4f4   :  { %8484 = vmatprep.subr.bf16.mxu1 %v16673_v28  ;;  %8597 = vmatprep.subr.bf16.mxu0 %v16676_v30  ;;  %v16736_v28 = vld [vmem:[#allocation6 + $0x314] ss:$24 sps:$4 sm:$0xff]   ;;  %v16731_v30 = vld [vmem:[#allocation6 + $0x488] ss:$24 sps:$4 sm:$0xff]  }
 0x4f7   :  { %8485 = vmatpush1.bf16.msra.mxu1 %v16671_v31  ;;  %8598 = vmatpush1.bf16.msra.mxu0 %v16674_v32  ;;  %v16734_v31 = vld [vmem:[#allocation6 + $0x310] ss:$24 sps:$4 sm:$0xff]   ;;  %v16739_v32 = vld [vmem:[#allocation6 + $0x4bc] ss:$24 sps:$4 sm:$0xff]  }
 0x4f8   :  { %8486 = vmatprep.subr.bf16.mxu1 %v16679_v33  ;;  %8599 = vmatprep.subr.bf16.mxu0 %v16682_v34  ;;  %v16742_v33 = vld [vmem:[#allocation6 + $0x344] ss:$24 sps:$4 sm:$0xff]   ;;  %v16737_v34 = vld [vmem:[#allocation6 + $0x4b8] ss:$24 sps:$4 sm:$0xff]  }
 0x4fb   :  { %8487 = vmatpush1.bf16.msra.mxu1 %v16677_v35  ;;  %8600 = vmatpush1.bf16.msra.mxu0 %v16680_v36  ;;  %v16740_v35 = vld [vmem:[#allocation6 + $0x340] ss:$24 sps:$4 sm:$0xff]   ;;  %v16745_v36 = vld [vmem:[#allocation6 + $0x4ec] ss:$24 sps:$4 sm:$0xff]  }
 0x4fc   :  { %8499 = vmatprep.subr.bf16.mxu1 %v16685_v24  ;;  %8601 = vmatprep.subr.bf16.mxu0 %v16688_v37  ;;  %v16748_v24 = vld [vmem:[#allocation6 + $0x374] ss:$24 sps:$4 sm:$0xff]   ;;  %v16743_v37 = vld [vmem:[#allocation6 + $0x4e8] ss:$24 sps:$4 sm:$0xff]  }
 0x4fe   :  { %8489 = vmatmul.mubr.bf16.vlgmr.msra.gmra.mrb[36].mxu1 %v18594_v57 }
 0x4ff   :  { %8500 = vmatpush1.bf16.msra.mxu1 %v16683_v38  ;;  %8602 = vmatpush1.bf16.msra.mxu0 %v16686_v39  ;;  %v16746_v38 = vld [vmem:[#allocation6 + $0x370] ss:$24 sps:$4 sm:$0xff]   ;;  %v16751_v39 = vld [vmem:[#allocation6 + $0x51c] ss:$24 sps:$4 sm:$0xff]  }
 0x500   :  { %8501 = vmatprep.subr.bf16.mxu1 %v16691_v40  ;;  %8603 = vmatprep.subr.bf16.mxu0 %v16694_v41  ;;  %v16754_v40 = vld [vmem:[#allocation6 + $0x3a4] ss:$24 sps:$4 sm:$0xff]   ;;  %v16749_v41 = vld [vmem:[#allocation6 + $0x518] ss:$24 sps:$4 sm:$0xff]  }
 0x501   :  { %8531 = vmatprep.mubr.bf16.mxu1 %v18600_v56 }
 0x503   :  { %8502 = vmatpush1.bf16.msra.mxu1 %v16689_v43  ;;  %8604 = vmatpush1.bf16.msra.mxu0 %v16692_v46  ;;  %v16757_v43 = vld [vmem:[#allocation6 + $0x54c] ss:$24 sps:$4 sm:$0xff]  }
 0x504   :  { %8503 = vmatprep.subr.bf16.mxu1 %v16697_v62  ;;  %8605 = vmatprep.subr.bf16.mxu0 %v16700_v52  ;;  %v16760_v46 = vld [vmem:[#allocation6 + $0x3d4] ss:$24 sps:$4 sm:$0xff]   ;;  %v16755_v62 = vld [vmem:[#allocation6 + $0x548] ss:$24 sps:$4 sm:$0xff]  }
 0x505   :  { %v16758_v52 = vld [vmem:[#allocation6 + $0x3d0] ss:$24 sps:$4 sm:$0xff]  }
 0x507   :  { %8504 = vmatpush1.bf16.msra.mxu1 %v16695_v61  ;;  %8606 = vmatpush1.bf16.msra.mxu0 %v16698_v47  ;;  %v16766_v61 = vld [vmem:[#allocation6 + $0x404] ss:$24 sps:$4 sm:$0xff]   ;;  %v16761_v47 = vld [vmem:[#allocation6 + $0x578] ss:$24 sps:$4 sm:$0xff]  }
 0x508   :  { %8505 = vmatprep.subr.bf16.mxu1 %v16703_v63  ;;  %8607 = vmatprep.subr.bf16.mxu0 %v16706_v48  ;;  %v16764_v63 = vld [vmem:[#allocation6 + $0x400] ss:$24 sps:$4 sm:$0xff]   ;;  %v16769_v48 = vld [vmem:[#allocation6 + $0x5ac] ss:$24 sps:$4 sm:$0xff]  }
 0x50b   :  { %8506 = vmatpush1.bf16.msra.mxu1 %v16701_v53  ;;  %8608 = vmatpush1.bf16.msra.mxu0 %v16704_v49  ;;  %v16772_v53 = vld [vmem:[#allocation6 + $0x434] ss:$24 sps:$4 sm:$0xff]   ;;  %v16767_v49 = vld [vmem:[#allocation6 + $0x5a8] ss:$24 sps:$4 sm:$0xff]  }
 0x50c   :  { %8507 = vmatprep.subr.bf16.mxu1 %v16709_v58  ;;  %8609 = vmatprep.subr.bf16.mxu0 %v16712_v4  ;;  %v16770_v58 = vld [vmem:[#allocation6 + $0x430] ss:$24 sps:$4 sm:$0xff]   ;;  %v16775_v4 = vld [vmem:[#allocation6 + $0x5dc] ss:$24 sps:$4 sm:$0xff]  }
 0x50f   :  { %8508 = vmatpush1.bf16.msra.mxu1 %v16707_v6  ;;  %8610 = vmatpush1.bf16.msra.mxu0 %v16710_v60  ;;  %v16778_v6 = vld [vmem:[#allocation6 + $0x464] ss:$24 sps:$4 sm:$0xff]   ;;  %v16773_v60 = vld [vmem:[#allocation6 + $0x5d8] ss:$24 sps:$4 sm:$0xff]  }
 0x510   :  { %8509 = vmatprep.subr.bf16.mxu1 %v16715_v9  ;;  %8611 = vmatprep.subr.bf16.mxu0 %v16718_v0  ;;  %v16776_v9 = vld [vmem:[#allocation6 + $0x460] ss:$24 sps:$4 sm:$0xff]   ;;  %v16781_v0 = vld [vmem:[#allocation6 + $0x60c] ss:$24 sps:$4 sm:$0xff]  }
 0x513   :  { %8510 = vmatpush1.bf16.msra.mxu1 %v16713_v1  ;;  %8612 = vmatpush1.bf16.msra.mxu0 %v16716_v14  ;;  %v16784_v1 = vld [vmem:[#allocation6 + $0x494] ss:$24 sps:$4 sm:$0xff]   ;;  %v16779_v14 = vld [vmem:[#allocation6 + $0x608] ss:$24 sps:$4 sm:$0xff]  }
 0x514   :  { %8511 = vmatprep.subr.bf16.mxu1 %v16721_v3  ;;  %8613 = vmatprep.subr.bf16.mxu0 %v16724_v15  ;;  %v16782_v3 = vld [vmem:[#allocation6 + $0x490] ss:$24 sps:$4 sm:$0xff]   ;;  %v16787_v15 = vld [vmem:[#allocation6 + $0x63c] ss:$24 sps:$4 sm:$0xff]  }
 0x517   :  { %8512 = vmatpush1.bf16.msra.mxu1 %v16719_v5  ;;  %8614 = vmatpush1.bf16.msra.mxu0 %v16722_v16  ;;  %v16790_v5 = vld [vmem:[#allocation6 + $0x4c4] ss:$24 sps:$4 sm:$0xff]   ;;  %v16785_v16 = vld [vmem:[#allocation6 + $0x638] ss:$24 sps:$4 sm:$0xff]  }
 0x518   :  { %8513 = vmatprep.subr.bf16.mxu1 %v16727_v2  ;;  %8615 = vmatprep.subr.bf16.mxu0 %v16730_v10  ;;  %v18608_v2 = vld [vmem:[%s19100_s18 + $0x8] ss:$24 sps:$4 sm:$0xff]  }
 0x519   :  { %v16788_v10 = vld [vmem:[#allocation6 + $0x4c0] ss:$24 sps:$4 sm:$0xff]  }
 0x51b   :  { %8514 = vmatpush1.bf16.msra.mxu1 %v16725_v7  ;;  %8616 = vmatpush1.bf16.msra.mxu0 %v16728_v17  ;;  %v16793_v7 = vld [vmem:[#allocation6 + $0x66c] ss:$24 sps:$4 sm:$0xff]  }
 0x51c   :  { %8515 = vmatprep.subr.bf16.mxu1 %v16733_v27  ;;  %8628 = vmatprep.subr.bf16.mxu0 %v16736_v28  ;;  %v16796_v17 = vld [vmem:[#allocation6 + $0x4f4] ss:$24 sps:$4 sm:$0xff]   ;;  %v16791_v28 = vld [vmem:[#allocation6 + $0x668] ss:$24 sps:$4 sm:$0xff]  }
 0x51d   :  { %v18614_v27 = vld [vmem:[%s19100_s18 + $0x14] ss:$24 sps:$4 sm:$0xff]  }
 0x51e   :  { %8618 = vmatmul.mubr.bf16.vlgmr.msra.gmra.mrb[8].mxu0 %v18594_v57  ;;  %v16752_v57 = vld [vmem:[#allocation6 + $0x3a0] ss:$24 sps:$4 sm:$0xff]  }
 0x51f   :  { %8516 = vmatpush1.bf16.msra.mxu1 %v16731_v30  ;;  %8629 = vmatpush1.bf16.msra.mxu0 %v16734_v31  ;;  %v16794_v30 = vld [vmem:[#allocation6 + $0x4f0] ss:$24 sps:$4 sm:$0xff]   ;;  %v16799_v31 = vld [vmem:[#allocation6 + $0x69c] ss:$24 sps:$4 sm:$0xff]  }
 0x520   :  { %8517 = vmatprep.subr.bf16.mxu1 %v16739_v32  ;;  %8630 = vmatprep.subr.bf16.mxu0 %v16742_v33  ;;  %v16802_v32 = vld [vmem:[#allocation6 + $0x524] ss:$24 sps:$4 sm:$0xff]   ;;  %v16797_v33 = vld [vmem:[#allocation6 + $0x698] ss:$24 sps:$4 sm:$0xff]  }
 0x521   :  { %8660 = vmatprep.mubr.bf16.mxu0 %v18600_v56  ;;  %v16763_v56 = vld [vmem:[#allocation6 + $0x57c] ss:$24 sps:$4 sm:$0xff]  }
 0x523   :  { %8518 = vmatpush1.bf16.msra.mxu1 %v16737_v34  ;;  %8631 = vmatpush1.bf16.msra.mxu0 %v16740_v35  ;;  %v16800_v34 = vld [vmem:[#allocation6 + $0x520] ss:$24 sps:$4 sm:$0xff]   ;;  %v16805_v35 = vld [vmem:[#allocation6 + $0x6cc] ss:$24 sps:$4 sm:$0xff]  }
 0x524   :  { %8519 = vmatprep.subr.bf16.mxu1 %v16745_v36  ;;  %8632 = vmatprep.subr.bf16.mxu0 %v16748_v24  ;;  %v16808_v36 = vld [vmem:[#allocation6 + $0x554] ss:$24 sps:$4 sm:$0xff]   ;;  %v16803_v24 = vld [vmem:[#allocation6 + $0x6c8] ss:$24 sps:$4 sm:$0xff]  }
 0x527   :  { %8520 = vmatpush1.bf16.msra.mxu1 %v16743_v37  ;;  %8633 = vmatpush1.bf16.msra.mxu0 %v16746_v38  ;;  %v16806_v37 = vld [vmem:[#allocation6 + $0x550] ss:$24 sps:$4 sm:$0xff]   ;;  %v16811_v38 = vld [vmem:[#allocation6 + $0x6fc] ss:$24 sps:$4 sm:$0xff]  }
 0x528   :  { %8521 = vmatprep.subr.bf16.mxu1 %v16751_v39  ;;  %8634 = vmatprep.subr.bf16.mxu0 %v16754_v40  ;;  %v16814_v39 = vld [vmem:[#allocation6 + $0x584] ss:$24 sps:$4 sm:$0xff]   ;;  %v16809_v40 = vld [vmem:[#allocation6 + $0x6f8] ss:$24 sps:$4 sm:$0xff]  }
 0x52b   :  { %8522 = vmatpush1.bf16.msra.mxu1 %v16749_v41  ;;  %8635 = vmatpush1.bf16.msra.mxu0 %v16752_v57  ;;  %v16812_v41 = vld [vmem:[#allocation6 + $0x580] ss:$24 sps:$4 sm:$0xff]   ;;  %v16817_v57 = vld [vmem:[#allocation6 + $0x72c] ss:$24 sps:$4 sm:$0xff]  }
 0x52c   :  { %8523 = vmatprep.subr.bf16.mxu1 %v16757_v43  ;;  %8636 = vmatprep.subr.bf16.mxu0 %v16760_v46  ;;  %v16820_v43 = vld [vmem:[#allocation6 + $0x5b4] ss:$24 sps:$4 sm:$0xff]   ;;  %v16815_v46 = vld [vmem:[#allocation6 + $0x728] ss:$24 sps:$4 sm:$0xff]  }
 0x52f   :  { %8524 = vmatpush1.bf16.msra.mxu1 %v16755_v62  ;;  %8637 = vmatpush1.bf16.msra.mxu0 %v16758_v52  ;;  %v16818_v62 = vld [vmem:[#allocation6 + $0x5b0] ss:$24 sps:$4 sm:$0xff]   ;;  %v16823_v52 = vld [vmem:[#allocation6 + $0x75c] ss:$24 sps:$4 sm:$0xff]  }
 0x530   :  { %8525 = vmatprep.subr.bf16.mxu1 %v16763_v56  ;;  %8638 = vmatprep.subr.bf16.mxu0 %v16766_v61  ;;  %v16826_v56 = vld [vmem:[#allocation6 + $0x5e4] ss:$24 sps:$4 sm:$0xff]   ;;  %v16821_v61 = vld [vmem:[#allocation6 + $0x758] ss:$24 sps:$4 sm:$0xff]  }
 0x533   :  { %8526 = vmatpush1.bf16.msra.mxu1 %v16761_v47  ;;  %8639 = vmatpush1.bf16.msra.mxu0 %v16764_v63  ;;  %v16824_v47 = vld [vmem:[#allocation6 + $0x5e0] ss:$24 sps:$4 sm:$0xff]   ;;  %v16829_v63 = vld [vmem:[#allocation6 + $0x78c] ss:$24 sps:$4 sm:$0xff]  }
 0x534   :  { %8527 = vmatprep.subr.bf16.mxu1 %v16769_v48  ;;  %8640 = vmatprep.subr.bf16.mxu0 %v16772_v53  ;;  %v16832_v48 = vld [vmem:[#allocation6 + $0x614] ss:$24 sps:$4 sm:$0xff]   ;;  %v16827_v53 = vld [vmem:[#allocation6 + $0x788] ss:$24 sps:$4 sm:$0xff]  }
 0x537   :  { %8528 = vmatpush1.bf16.msra.mxu1 %v16767_v49  ;;  %8641 = vmatpush1.bf16.msra.mxu0 %v16770_v58  ;;  %v16830_v49 = vld [vmem:[#allocation6 + $0x610] ss:$24 sps:$4 sm:$0xff]   ;;  %v16835_v58 = vld [vmem:[#allocation6 + $0x7bc] ss:$24 sps:$4 sm:$0xff]  }
 0x538   :  { %8529 = vmatprep.subr.bf16.mxu1 %v16775_v4  ;;  %8642 = vmatprep.subr.bf16.mxu0 %v16778_v6  ;;  %v16838_v4 = vld [vmem:[#allocation6 + $0x644] ss:$24 sps:$4 sm:$0xff]   ;;  %v16833_v6 = vld [vmem:[#allocation6 + $0x7b8] ss:$24 sps:$4 sm:$0xff]  }
 0x53b   :  { %8530 = vmatpush1.bf16.msra.mxu1 %v16773_v60  ;;  %8643 = vmatpush1.bf16.msra.mxu0 %v16776_v9  ;;  %v16836_v60 = vld [vmem:[#allocation6 + $0x640] ss:$24 sps:$4 sm:$0xff]   ;;  %v16841_v9 = vld [vmem:[#allocation6 + $0x7ec] ss:$24 sps:$4 sm:$0xff]  }
 0x53c   :  { %8542 = vmatprep.subr.bf16.mxu1 %v16781_v0  ;;  %8644 = vmatprep.subr.bf16.mxu0 %v16784_v1  ;;  %v16844_v0 = vld [vmem:[#allocation6 + $0x674] ss:$24 sps:$4 sm:$0xff]   ;;  %v16839_v1 = vld [vmem:[#allocation6 + $0x7e8] ss:$24 sps:$4 sm:$0xff]  }
 0x53e   :  { %8532 = vmatmul.mubr.bf16.vlgmr.msra.gmra.mrb[36].mxu1 %v18608_v2 }
 0x53f   :  { %8543 = vmatpush1.bf16.msra.mxu1 %v16779_v14  ;;  %8645 = vmatpush1.bf16.msra.mxu0 %v16782_v3  ;;  %v16842_v14 = vld [vmem:[#allocation6 + $0x670] ss:$24 sps:$4 sm:$0xff]   ;;  %v16847_v3 = vld [vmem:[#allocation6 + $0x81c] ss:$24 sps:$4 sm:$0xff]  }
 0x540   :  { %8544 = vmatprep.subr.bf16.mxu1 %v16787_v15  ;;  %8646 = vmatprep.subr.bf16.mxu0 %v16790_v5  ;;  %v16850_v15 = vld [vmem:[#allocation6 + $0x6a4] ss:$24 sps:$4 sm:$0xff]   ;;  %v16845_v5 = vld [vmem:[#allocation6 + $0x818] ss:$24 sps:$4 sm:$0xff]  }
 0x541   :  { %8574 = vmatprep.mubr.bf16.mxu1 %v18614_v27 }
 0x543   :  { %8545 = vmatpush1.bf16.msra.mxu1 %v16785_v16  ;;  %8647 = vmatpush1.bf16.msra.mxu0 %v16788_v10  ;;  %v16848_v16 = vld [vmem:[#allocation6 + $0x6a0] ss:$24 sps:$4 sm:$0xff]   ;;  %v16856_v10 = vld [vmem:[#allocation6 + $0x6d4] ss:$24 sps:$4 sm:$0xff]  }
 0x544   :  { %8546 = vmatprep.subr.bf16.mxu1 %v16793_v7  ;;  %8648 = vmatprep.subr.bf16.mxu0 %v16796_v17  ;;  %v16851_v7 = vld [vmem:[#allocation6 + $0x848] ss:$24 sps:$4 sm:$0xff]  }
 0x545   :  { %v16854_v17 = vld [vmem:[#allocation6 + $0x6d0] ss:$24 sps:$4 sm:$0xff]  }
 0x547   :  { %8547 = vmatpush1.bf16.msra.mxu1 %v16791_v28  ;;  %8649 = vmatpush1.bf16.msra.mxu0 %v16794_v30  ;;  %v16862_v28 = vld [vmem:[#allocation6 + $0x704] ss:$24 sps:$4 sm:$0xff]   ;;  %v16857_v30 = vld [vmem:[#allocation6 + $0x878] ss:$24 sps:$4 sm:$0xff]  }
 0x548   :  { %8548 = vmatprep.subr.bf16.mxu1 %v16799_v31  ;;  %8650 = vmatprep.subr.bf16.mxu0 %v16802_v32  ;;  %v16860_v31 = vld [vmem:[#allocation6 + $0x700] ss:$24 sps:$4 sm:$0xff]   ;;  %v16865_v32 = vld [vmem:[#allocation6 + $0x8ac] ss:$24 sps:$4 sm:$0xff]  }
 0x54b   :  { %8549 = vmatpush1.bf16.msra.mxu1 %v16797_v33  ;;  %8651 = vmatpush1.bf16.msra.mxu0 %v16800_v34  ;;  %v16868_v33 = vld [vmem:[#allocation6 + $0x734] ss:$24 sps:$4 sm:$0xff]   ;;  %v16863_v34 = vld [vmem:[#allocation6 + $0x8a8] ss:$24 sps:$4 sm:$0xff]  }
 0x54c   :  { %8550 = vmatprep.subr.bf16.mxu1 %v16805_v35  ;;  %8652 = vmatprep.subr.bf16.mxu0 %v16808_v36  ;;  %v16866_v35 = vld [vmem:[#allocation6 + $0x730] ss:$24 sps:$4 sm:$0xff]   ;;  %v16871_v36 = vld [vmem:[#allocation6 + $0x8dc] ss:$24 sps:$4 sm:$0xff]  }
 0x54f   :  { %8551 = vmatpush1.bf16.msra.mxu1 %v16803_v24  ;;  %8653 = vmatpush1.bf16.msra.mxu0 %v16806_v37  ;;  %v16874_v24 = vld [vmem:[#allocation6 + $0x764] ss:$24 sps:$4 sm:$0xff]   ;;  %v16869_v37 = vld [vmem:[#allocation6 + $0x8d8] ss:$24 sps:$4 sm:$0xff]  }
 0x550   :  { %8552 = vmatprep.subr.bf16.mxu1 %v16811_v38  ;;  %8654 = vmatprep.subr.bf16.mxu0 %v16814_v39  ;;  %v16872_v38 = vld [vmem:[#allocation6 + $0x760] ss:$24 sps:$4 sm:$0xff]   ;;  %v16877_v39 = vld [vmem:[#allocation6 + $0x794] ss:$24 sps:$4 sm:$0xff]  }
 0x553   :  { %8553 = vmatpush1.bf16.msra.mxu1 %v16809_v40  ;;  %8655 = vmatpush1.bf16.msra.mxu0 %v16812_v41  ;;  %v16880_v40 = vld [vmem:[#allocation9 + $0x4] ss:$28 sps:$4 sm:$0xff]  }
 0x554   :  { %8554 = vmatprep.subr.bf16.mxu1 %v16817_v57  ;;  %8656 = vmatprep.subr.bf16.mxu0 %v16820_v43  ;;  %v16875_v41 = vld [vmem:[#allocation6 + $0x790] ss:$24 sps:$4 sm:$0xff]   ;;  %v16883_v43 = vld [vmem:[#allocation6 + $0x7c4] ss:$24 sps:$4 sm:$0xff]  }
 0x555   :  { %v16878_v57 = vld [vmem:[#allocation9] ss:$28 sps:$4 sm:$0xff]  }
 0x557   :  { %8555 = vmatpush1.bf16.msra.mxu1 %v16815_v46  ;;  %8657 = vmatpush1.bf16.msra.mxu0 %v16818_v62  ;;  %v16886_v46 = vld [vmem:[#allocation9 + $0x3c] ss:$28 sps:$4 sm:$0xff]  }
 0x558   :  { %8556 = vmatprep.subr.bf16.mxu1 %v16823_v52  ;;  %8658 = vmatprep.subr.bf16.mxu0 %v16826_v56  ;;  %v18622_v62 = vld [vmem:[%s19100_s18 + $0x10] ss:$24 sps:$4 sm:$0xff]  }
 0x559   :  { %v16881_v52 = vld [vmem:[#allocation6 + $0x7c0] ss:$24 sps:$4 sm:$0xff]  }
 0x55a   :  { %v16884_v56 = vld [vmem:[#allocation9 + $0x38] ss:$28 sps:$4 sm:$0xff]  }
 0x55b   :  { %8557 = vmatpush1.bf16.msra.mxu1 %v16821_v61  ;;  %8659 = vmatpush1.bf16.msra.mxu0 %v16824_v47  ;;  %v16889_v61 = vld [vmem:[#allocation6 + $0x7f4] ss:$24 sps:$4 sm:$0xff]  }
 0x55c   :  { %8558 = vmatprep.subr.bf16.mxu1 %v16829_v63  ;;  %8671 = vmatprep.subr.bf16.mxu0 %v16832_v48  ;;  %v16892_v47 = vld [vmem:[#allocation9 + $0x74] ss:$28 sps:$4 sm:$0xff]   ;;  %v16887_v63 = vld [vmem:[#allocation6 + $0x7f0] ss:$24 sps:$4 sm:$0xff]  }
 0x55d   :  { %v16890_v48 = vld [vmem:[#allocation9 + $0x70] ss:$28 sps:$4 sm:$0xff]  }
 0x55e   :  { %8661 = vmatmul.mubr.bf16.vlgmr.msra.gmra.mrb[8].mxu0 %v18608_v2  ;;  %v16853_v2 = vld [vmem:[#allocation6 + $0x84c] ss:$24 sps:$4 sm:$0xff]  }
 0x55f   :  { %8559 = vmatpush1.bf16.msra.mxu1 %v16827_v53  ;;  %8672 = vmatpush1.bf16.msra.mxu0 %v16830_v49  ;;  %v16895_v53 = vld [vmem:[#allocation6 + $0x824] ss:$24 sps:$4 sm:$0xff]   ;;  %v16898_v49 = vld [vmem:[#allocation9 + $0xac] ss:$28 sps:$4 sm:$0xff]  }
 0x560   :  { %8560 = vmatprep.subr.bf16.mxu1 %v16835_v58  ;;  %8673 = vmatprep.subr.bf16.mxu0 %v16838_v4  ;;  %v16893_v58 = vld [vmem:[#allocation6 + $0x820] ss:$24 sps:$4 sm:$0xff]   ;;  %v16896_v4 = vld [vmem:[#allocation9 + $0xa8] ss:$28 sps:$4 sm:$0xff]  }
 0x561   :  { %8703 = vmatprep.mubr.bf16.mxu0 %v18614_v27  ;;  %v16859_v27 = vld [vmem:[#allocation6 + $0x87c] ss:$24 sps:$4 sm:$0xff]  }
 0x563   :  { %8561 = vmatpush1.bf16.msra.mxu1 %v16833_v6  ;;  %8674 = vmatpush1.bf16.msra.mxu0 %v16836_v60  ;;  %v16901_v6 = vld [vmem:[#allocation6 + $0x854] ss:$24 sps:$4 sm:$0xff]  }
 0x564   :  { %8562 = vmatprep.subr.bf16.mxu1 %v16841_v9  ;;  %8675 = vmatprep.subr.bf16.mxu0 %v16844_v0  ;;  %v16904_v60 = vld [vmem:[#allocation9 + $0xe4] ss:$28 sps:$4 sm:$0xff]  }
 0x565   :  { %v16899_v9 = vld [vmem:[#allocation6 + $0x850] ss:$24 sps:$4 sm:$0xff]  }
 0x566   :  { %v16902_v0 = vld [vmem:[#allocation9 + $0xe0] ss:$28 sps:$4 sm:$0xff]  }
 0x567   :  { %8563 = vmatpush1.bf16.msra.mxu1 %v16839_v1  ;;  %8676 = vmatpush1.bf16.msra.mxu0 %v16842_v14  ;;  %v18625_v1 = vld [vmem:[#allocation7] sm:$0x3f] }
 0x568   :  { %8564 = vmatprep.subr.bf16.mxu1 %v16847_v3  ;;  %8677 = vmatprep.subr.bf16.mxu0 %v16850_v15  ;;  %v16907_v14 = vld [vmem:[#allocation6 + $0x884] ss:$24 sps:$4 sm:$0xff]   ;;  %v6830_v15 = vrot.slane %v18625_v1, %v18453_v50 }
 0x569   :  { %v16910_v3 = vld [vmem:[#allocation9 + $0x11c] ss:$28 sps:$4 sm:$0xff]  }
 0x56b   :  { %8565 = vmatpush1.bf16.msra.mxu1 %v16845_v5  ;;  %8678 = vmatpush1.bf16.msra.mxu0 %v16848_v16  ;;  %v6834_v5 = vrot.slane %v18625_v1, %v18459_v54  ;;  %v16905_v16 = vld [vmem:[#allocation6 + $0x880] ss:$24 sps:$4 sm:$0xff]  }
 0x56c   :  { %8566 = vmatprep.subr.bf16.mxu1 %v16853_v2  ;;  %8679 = vmatprep.subr.bf16.mxu0 %v16856_v10  ;;  %v16908_v2 = vld [vmem:[#allocation9 + $0x118] ss:$28 sps:$4 sm:$0xff]   ;;  %v16913_v10 = vld [vmem:[#allocation6 + $0x8b4] ss:$24 sps:$4 sm:$0xff]  }
 0x56f   :  { %8567 = vmatpush1.bf16.msra.mxu1 %v16851_v7  ;;  %8680 = vmatpush1.bf16.msra.mxu0 %v16854_v17  ;;  %v16916_v7 = vld [vmem:[#allocation9 + $0x154] ss:$28 sps:$4 sm:$0xff]  }
 0x570   :  { %8568 = vmatprep.subr.bf16.mxu1 %v16859_v27  ;;  %8681 = vmatprep.subr.bf16.mxu0 %v16862_v28 }
 0x573   :  { %8569 = vmatpush1.bf16.msra.mxu1 %v16857_v30  ;;  %8682 = vmatpush1.bf16.msra.mxu0 %v16860_v31 }
 0x574   :  { %8570 = vmatprep.subr.bf16.mxu1 %v16865_v32  ;;  %8683 = vmatprep.subr.bf16.mxu0 %v16868_v33  ;;  %v16911_v32 = vld [vmem:[#allocation6 + $0x8b0] ss:$24 sps:$4 sm:$0xff]  }
 0x575   :  { %v16914_v33 = vld [vmem:[#allocation9 + $0x150] ss:$28 sps:$4 sm:$0xff]  }
 0x577   :  { %8571 = vmatpush1.bf16.msra.mxu1 %v16863_v34  ;;  %8684 = vmatpush1.bf16.msra.mxu0 %v16866_v35 }
 0x578   :  { %8572 = vmatprep.subr.bf16.mxu1 %v16871_v36  ;;  %8685 = vmatprep.subr.bf16.mxu0 %v16874_v24  ;;  %v16919_v36 = vld [vmem:[#allocation6 + $0x8e4] ss:$24 sps:$4 sm:$0xff]   ;;  %v16922_v24 = vld [vmem:[#allocation9 + $0x18c] ss:$28 sps:$4 sm:$0xff]  }
 0x57b   :  { %8573 = vmatpush1.bf16.msra.mxu1 %v16869_v37  ;;  %8686 = vmatpush1.bf16.msra.mxu0 %v16872_v38 }
 0x57c   :  { %8687 = vmatprep.subr.bf16.mxu0 %v16877_v39  ;;  %10881 = vmatprep.subr.bf16.mxu1 %v16880_v40 }
 0x57e   :  { %8575 = vmatmul.mubr.bf16.vlgmr.msra.gmra.mrb[36].mxu1 %v18622_v62 }
 0x57f   :  { %8688 = vmatpush1.bf16.msra.mxu0 %v16875_v41  ;;  %10882 = vmatpush1.bf16.msra.mxu1 %v16878_v57  ;;  %v16917_v57 = vld [vmem:[#allocation6 + $0x8e0] ss:$24 sps:$4 sm:$0xff]  }
 0x580   :  { %8689 = vmatprep.subr.bf16.mxu0 %v16883_v43  ;;  %10883 = vmatprep.subr.bf16.mxu1 %v16886_v46  ;;  %v16920_v43 = vld [vmem:[#allocation9 + $0x188] ss:$28 sps:$4 sm:$0xff]  }
 0x583   :  { %8690 = vmatpush1.bf16.msra.mxu0 %v16881_v52  ;;  %10884 = vmatpush1.bf16.msra.mxu1 %v16884_v56  ;;  %v16925_v52 = vld [vmem:[#allocation9 + $0x1c4] ss:$28 sps:$4 sm:$0xff]  }
 0x584   :  { %8691 = vmatprep.subr.bf16.mxu0 %v16889_v61  ;;  %10885 = vmatprep.subr.bf16.mxu1 %v16892_v47  ;;  %v16928_v61 = vld [vmem:[#allocation9 + $0xc] ss:$28 sps:$4 sm:$0xff]   ;;  %v16923_v47 = vld [vmem:[#allocation9 + $0x1c0] ss:$28 sps:$4 sm:$0xff]  }
 0x587   :  { %8692 = vmatpush1.bf16.msra.mxu0 %v16887_v63  ;;  %10886 = vmatpush1.bf16.msra.mxu1 %v16890_v48  ;;  %v16926_v63 = vld [vmem:[#allocation9 + $0x8] ss:$28 sps:$4 sm:$0xff]   ;;  %v16931_v48 = vld [vmem:[#allocation9 + $0x1fc] ss:$28 sps:$4 sm:$0xff]  }
 0x588   :  { %8693 = vmatprep.subr.bf16.mxu0 %v16895_v53  ;;  %10887 = vmatprep.subr.bf16.mxu1 %v16898_v49  ;;  %v16934_v53 = vld [vmem:[#allocation9 + $0x44] ss:$28 sps:$4 sm:$0xff]   ;;  %v16929_v49 = vld [vmem:[#allocation9 + $0x1f8] ss:$28 sps:$4 sm:$0xff]  }
 0x58b   :  { %8694 = vmatpush1.bf16.msra.mxu0 %v16893_v58  ;;  %10888 = vmatpush1.bf16.msra.mxu1 %v16896_v4  ;;  %v16932_v58 = vld [vmem:[#allocation9 + $0x40] ss:$28 sps:$4 sm:$0xff]   ;;  %v16937_v4 = vld [vmem:[#allocation9 + $0x234] ss:$28 sps:$4 sm:$0xff]  }
 0x58c   :  { %8695 = vmatprep.subr.bf16.mxu0 %v16901_v6  ;;  %10889 = vmatprep.subr.bf16.mxu1 %v16904_v60  ;;  %v16940_v6 = vld [vmem:[#allocation9 + $0x7c] ss:$28 sps:$4 sm:$0xff]   ;;  %v16935_v60 = vld [vmem:[#allocation9 + $0x230] ss:$28 sps:$4 sm:$0xff]  }
 0x58f   :  { %8696 = vmatpush1.bf16.msra.mxu0 %v16899_v9  ;;  %10890 = vmatpush1.bf16.msra.mxu1 %v16902_v0  ;;  %v16938_v9 = vld [vmem:[#allocation9 + $0x78] ss:$28 sps:$4 sm:$0xff]   ;;  %v16943_v0 = vld [vmem:[#allocation9 + $0x26c] ss:$28 sps:$4 sm:$0xff]  }
 0x590   :  { %8697 = vmatprep.subr.bf16.mxu0 %v16907_v14  ;;  %10891 = vmatprep.subr.bf16.mxu1 %v16910_v3  ;;  %v16946_v14 = vld [vmem:[#allocation9 + $0xb4] ss:$28 sps:$4 sm:$0xff]  }
 0x591   :  { %v8447_v17 = vpop.f32.mrb[32].mxu1  ;;  %v16944_v3 = vld [vmem:[#allocation9 + $0xb0] ss:$28 sps:$4 sm:$0xff]  }
 0x592   :  { %v15147_v27 = vadd.f32 %v8447_v17, %v6830_v15  ;;  %v8449_v28 = vpop.f32.mrb[33].mxu1  ;;  %v16958_v17 = vld [vmem:[#allocation9 + $0x124] ss:$28 sps:$4 sm:$0xff]  }
 0x593   :  { %v15148_v30 = vadd.f32 %v8449_v28, %v6834_v5  ;;  %v8451_v31 = vpop.f32.mrb[34].mxu1  ;;  %8698 = vmatpush1.bf16.msra.mxu0 %v16905_v16  ;;  %10892 = vmatpush1.bf16.msra.mxu1 %v16908_v2  ;;  %v16947_v16 = vld [vmem:[#allocation9 + $0x2a0] ss:$28 sps:$4 sm:$0xff]   ;;  %v16950_v2 = vld [vmem:[#allocation9 + $0xe8] ss:$28 sps:$4 sm:$0xff]  }
 0x594   :  { %v15149_v34 = vadd.f32 %v8451_v31, %v6830_v15  ;;  %v8453_v35 = vpop.f32.mrb[35].mxu1  ;;  %8699 = vmatprep.subr.bf16.mxu0 %v16913_v10  ;;  %10893 = vmatprep.subr.bf16.mxu1 %v16916_v7  ;;  %v8714_v38 = vmax.f32 %v15147_v27, 0.0  ;;  %v16949_v15 = vld [vmem:[#allocation9 + $0x2a4] ss:$28 sps:$4 sm:$0xff]   ;;  %v18639_v10 = vsub.s32 4, %v18448_v45  ;;  %v18642_v27 = vsub.s32 5, %v18448_v45 }
 0x595   :  { %v15150_v37 = vadd.f32 %v8453_v35, %v6834_v5  ;;  %v8715_v40 = vmax.f32 %v15148_v30, 0.0  ;;  %v16952_v5 = vld [vmem:[#allocation9 + $0xec] ss:$28 sps:$4 sm:$0xff]   ;;  %v16955_v7 = vld [vmem:[#allocation9 + $0x2dc] ss:$28 sps:$4 sm:$0xff]  }
 0x596   :  { %v8720_v39 = vmax.f32 %v15149_v34, 0.0  ;;  %19101 = vst [vmem:[#allocation41_spill] sm:$0xff] %v18639_v10  ;;  %19102 = vst [vmem:[#allocation42_spill] sm:$0xff] %v18642_v27  ;;  %v16953_v28 = vld [vmem:[#allocation9 + $0x2d8] ss:$28 sps:$4 sm:$0xff]  }
 0x597   :  { %v8721_v41 = vmax.f32 %v15150_v37, 0.0  ;;  %8700 = vmatpush1.bf16.msra.mxu0 %v16911_v32  ;;  %10894 = vmatpush1.bf16.msra.mxu1 %v16914_v33  ;;  %v16956_v30 = vld [vmem:[#allocation9 + $0x120] ss:$28 sps:$4 sm:$0xff]   ;;  %v17534_v31 = vld [vmem:[#allocation4] sm:$0xff] }
 0x598   :  { %v18631_v46 = vpack.c.bf16 %v8720_v39, %v8714_v38  ;;  %8701 = vmatprep.subr.bf16.mxu0 %v16919_v36  ;;  %10895 = vmatprep.subr.bf16.mxu1 %v16922_v24  ;;  %v1223_v32 = vrot.slane %v17534_v31, %v18639_v10  ;;  %v16961_v33 = vld [vmem:[#allocation9 + $0x314] ss:$28 sps:$4 sm:$0xff]   ;;  %v16964_v34 = vld [vmem:[#allocation9 + $0x15c] ss:$28 sps:$4 sm:$0xff]   ;;  %v1227_v36 = vrot.slane %v17534_v31, %v18642_v27  ;;  %v17021_v31 = vld [vmem:[#allocation9 + $0x464] ss:$28 sps:$4 sm:$0xff]  }
 0x599   :  { %v18633_v56 = vpack.c.bf16 %v8721_v41, %v8715_v40  ;;  %v16959_v38 = vld [vmem:[#allocation9 + $0x310] ss:$28 sps:$4 sm:$0xff]   ;;  %v16962_v39 = vld [vmem:[#allocation9 + $0x158] ss:$28 sps:$4 sm:$0xff]  }
 0x59b   :  { %8702 = vmatpush1.bf16.msra.mxu0 %v16917_v57  ;;  %10896 = vmatpush1.bf16.msra.mxu1 %v16920_v43  ;;  %v16967_v43 = vld [vmem:[#allocation9 + $0x34c] ss:$28 sps:$4 sm:$0xff]  }
 0x59c   :  { %10913 = vmatprep.mubr.bf16.mxu1 %v18633_v56  ;;  %10897 = vmatprep.subr.bf16.mxu1 %v16925_v52  ;;  %v16970_v52 = vld [vmem:[#allocation9 + $0x194] ss:$28 sps:$4 sm:$0xff]  }
 0x59d   :  { %11010 = vmatprep.subr.bf16.mxu0 %v16928_v61 }
 0x59e   :  { %8704 = vmatmul.mubr.bf16.vlgmr.msra.gmra.mrb[8].mxu0 %v18622_v62  ;;  %v16941_v62 = vld [vmem:[#allocation9 + $0x268] ss:$28 sps:$4 sm:$0xff]  }
 0x59f   :  { %10898 = vmatpush1.bf16.msra.mxu1 %v16923_v47  ;;  %11011 = vmatpush1.bf16.msra.mxu0 %v16926_v63 }
 0x5a0   :  { %11042 = vmatprep.mubr.bf16.mxu0 %v18633_v56  ;;  %10899 = vmatprep.subr.bf16.mxu1 %v16931_v48  ;;  %v18901_v48 = vld [vmem:[#allocation18 + $0xf0] sm:$0xff]  }
 0x5a1   :  { %11012 = vmatprep.subr.bf16.mxu0 %v16934_v53  ;;  %v16965_v53 = vld [vmem:[#allocation9 + $0x348] ss:$28 sps:$4 sm:$0xff]  }
 0x5a3   :  { %10900 = vmatpush1.bf16.msra.mxu1 %v16929_v49  ;;  %11013 = vmatpush1.bf16.msra.mxu0 %v16932_v58  ;;  %v16968_v49 = vld [vmem:[#allocation9 + $0x190] ss:$28 sps:$4 sm:$0xff]  }
 0x5a4   :  { %10901 = vmatprep.subr.bf16.mxu1 %v16937_v4  ;;  %11014 = vmatprep.subr.bf16.mxu0 %v16940_v6  ;;  %v16973_v58 = vld [vmem:[#allocation9 + $0x1cc] ss:$28 sps:$4 sm:$0xff]   ;;  %v16997_v4 = vld [vmem:[#allocation9 + $0x384] ss:$28 sps:$4 sm:$0xff]  }
 0x5a5   :  { %v16971_v6 = vld [vmem:[#allocation9 + $0x1c8] ss:$28 sps:$4 sm:$0xff]  }
 0x5a7   :  { %10902 = vmatpush1.bf16.msra.mxu1 %v16935_v60  ;;  %11015 = vmatpush1.bf16.msra.mxu0 %v16938_v9  ;;  %v16995_v60 = vld [vmem:[#allocation9 + $0x380] ss:$28 sps:$4 sm:$0xff]  }
 0x5a8   :  { %10903 = vmatprep.subr.bf16.mxu1 %v16943_v0  ;;  %11016 = vmatprep.subr.bf16.mxu0 %v16946_v14  ;;  %v16976_v9 = vld [vmem:[#allocation9 + $0x204] ss:$28 sps:$4 sm:$0xff]   ;;  %v17003_v0 = vld [vmem:[#allocation9 + $0x3bc] ss:$28 sps:$4 sm:$0xff]  }
 0x5a9   :  { %v16974_v14 = vld [vmem:[#allocation9 + $0x200] ss:$28 sps:$4 sm:$0xff]  }
 0x5ab   :  { %10904 = vmatpush1.bf16.msra.mxu1 %v16941_v62  ;;  %11017 = vmatpush1.bf16.msra.mxu0 %v16944_v3  ;;  %v17001_v62 = vld [vmem:[#allocation9 + $0x3b8] ss:$28 sps:$4 sm:$0xff]  }
 0x5ac   :  { %10905 = vmatprep.subr.bf16.mxu1 %v16949_v15  ;;  %11018 = vmatprep.subr.bf16.mxu0 %v16952_v5  ;;  %v16979_v3 = vld [vmem:[#allocation9 + $0x23c] ss:$28 sps:$4 sm:$0xff]   ;;  %v17009_v15 = vld [vmem:[#allocation9 + $0x3f4] ss:$28 sps:$4 sm:$0xff]  }
 0x5ad   :  { %v16977_v5 = vld [vmem:[#allocation9 + $0x238] ss:$28 sps:$4 sm:$0xff]  }
 0x5af   :  { %10906 = vmatpush1.bf16.msra.mxu1 %v16947_v16  ;;  %11019 = vmatpush1.bf16.msra.mxu0 %v16950_v2  ;;  %v17007_v16 = vld [vmem:[#allocation9 + $0x3f0] ss:$28 sps:$4 sm:$0xff]  }
 0x5b0   :  { %10907 = vmatprep.subr.bf16.mxu1 %v16955_v7  ;;  %11020 = vmatprep.subr.bf16.mxu0 %v16958_v17  ;;  %v16982_v2 = vld [vmem:[#allocation9 + $0x274] ss:$28 sps:$4 sm:$0xff]   ;;  %v17015_v7 = vld [vmem:[#allocation9 + $0x42c] ss:$28 sps:$4 sm:$0xff]  }
 0x5b1   :  { %v6235_v35 = vpop.f32.mrb[4].mxu0  ;;  %v16980_v17 = vld [vmem:[#allocation9 + $0x270] ss:$28 sps:$4 sm:$0xff]  }
 0x5b2   :  { %v6237_v24 = vpop.f32.mrb[5].mxu0  ;;  %v18646_v40 = vadd.f32 %v6235_v35, %v1223_v32  ;;  %v17027_v35 = vld [vmem:[#allocation9 + $0x49c] ss:$28 sps:$4 sm:$0xff]  }
 0x5b3   :  { %v6239_v37 = vpop.f32.mrb[6].mxu0  ;;  %10908 = vmatpush1.bf16.msra.mxu1 %v16953_v28  ;;  %11021 = vmatpush1.bf16.msra.mxu0 %v16956_v30  ;;  %v18650_v61 = vadd.f32 %v6237_v24, %v1227_v36  ;;  %v17013_v28 = vld [vmem:[#allocation9 + $0x428] ss:$28 sps:$4 sm:$0xff]   ;;  %v17025_v24 = vld [vmem:[#allocation9 + $0x498] ss:$28 sps:$4 sm:$0xff]  }
 0x5b4   :  { %v18648_v41 = vadd.f32 %v6239_v37, %v1223_v32  ;;  %v6241_v57 = vpop.f32.mrb[7].mxu0  ;;  %10909 = vmatprep.subr.bf16.mxu1 %v16961_v33  ;;  %11022 = vmatprep.subr.bf16.mxu0 %v16964_v34  ;;  %v16985_v30 = vld [vmem:[#allocation9 + $0x2ac] ss:$28 sps:$4 sm:$0xff]   ;;  %v17019_v33 = vld [vmem:[#allocation9 + $0x460] ss:$28 sps:$4 sm:$0xff]  }
 0x5b5   :  { %v18652_v47 = vadd.f32 %v6241_v57, %v1227_v36  ;;  %v16983_v32 = vld [vmem:[#allocation9 + $0x2a8] ss:$28 sps:$4 sm:$0xff]   ;;  %v16986_v36 = vld [vmem:[#allocation9 + $0x2e0] ss:$28 sps:$4 sm:$0xff]   ;;  %v17031_v57 = vld [vmem:[#allocation9 + $0x4d0] ss:$28 sps:$4 sm:$0xff]  }
 0x5b6   :  { %v11699_v63 = vpack.c.bf16 %v18648_v41, %v18646_v40  ;;  %v16988_v34 = vld [vmem:[#allocation9 + $0x2e4] ss:$28 sps:$4 sm:$0xff]   ;;  %v16991_v37 = vld [vmem:[#allocation9 + $0x31c] ss:$28 sps:$4 sm:$0xff]  }
 0x5b7   :  { %10910 = vmatpush1.bf16.msra.mxu1 %v16959_v38  ;;  %11023 = vmatpush1.bf16.msra.mxu0 %v16962_v39  ;;  %v17033_v38 = vld [vmem:[#allocation9 + $0x4d4] ss:$28 sps:$4 sm:$0xff]   ;;  %v18809_v41 = vld [vmem:[#allocation18 + $0x18] sm:$0xff]  }
 0x5b8   :  { %10911 = vmatprep.subr.bf16.mxu1 %v16967_v43  ;;  %11024 = vmatprep.subr.bf16.mxu0 %v16970_v52  ;;  %v16989_v39 = vld [vmem:[#allocation9 + $0x318] ss:$28 sps:$4 sm:$0xff]   ;;  %v17039_v52 = vld [vmem:[#allocation9 + $0x50c] ss:$28 sps:$4 sm:$0xff]  }
 0x5b9   :  { %v16994_v43 = vld [vmem:[#allocation9 + $0x354] ss:$28 sps:$4 sm:$0xff]  }
 0x5ba   :  { %v17394_v40 = vld [vmem:[#allocation9 + $0x978] ss:$28 sps:$4 sm:$0xff]  }
 0x5bb   :  { %10912 = vmatpush1.bf16.msra.mxu1 %v16965_v53  ;;  %11025 = vmatpush1.bf16.msra.mxu0 %v16968_v49  ;;  %v16992_v53 = vld [vmem:[#allocation9 + $0x350] ss:$28 sps:$4 sm:$0xff]   ;;  %v17037_v49 = vld [vmem:[#allocation9 + $0x508] ss:$28 sps:$4 sm:$0xff]  }
 0x5bc   :  { %11026 = vmatprep.subr.bf16.mxu0 %v16973_v58  ;;  %10924 = vmatprep.subr.bf16.mxu1 %v16997_v4  ;;  %v17000_v58 = vld [vmem:[#allocation9 + $0x38c] ss:$28 sps:$4 sm:$0xff]   ;;  %v17045_v4 = vld [vmem:[#allocation9 + $0x544] ss:$28 sps:$4 sm:$0xff]  }
 0x5be   :  { %10914 = vmatmul.mubr.bf16.vlgmr.msra.gmra.mrb[40].mxu1 %v18631_v46 }
 0x5bf   :  { %11027 = vmatpush1.bf16.msra.mxu0 %v16971_v6  ;;  %10925 = vmatpush1.bf16.msra.mxu1 %v16995_v60  ;;  %v16998_v6 = vld [vmem:[#allocation9 + $0x388] ss:$28 sps:$4 sm:$0xff]   ;;  %v17043_v60 = vld [vmem:[#allocation9 + $0x540] ss:$28 sps:$4 sm:$0xff]  }
 0x5c0   :  { %11028 = vmatprep.subr.bf16.mxu0 %v16976_v9  ;;  %10926 = vmatprep.subr.bf16.mxu1 %v17003_v0  ;;  %v17006_v9 = vld [vmem:[#allocation9 + $0x3c4] ss:$28 sps:$4 sm:$0xff]   ;;  %v17051_v0 = vld [vmem:[#allocation9 + $0x57c] ss:$28 sps:$4 sm:$0xff]  }
 0x5c3   :  { %11029 = vmatpush1.bf16.msra.mxu0 %v16974_v14  ;;  %10927 = vmatpush1.bf16.msra.mxu1 %v17001_v62  ;;  %v17004_v14 = vld [vmem:[#allocation9 + $0x3c0] ss:$28 sps:$4 sm:$0xff]   ;;  %v17049_v62 = vld [vmem:[#allocation9 + $0x578] ss:$28 sps:$4 sm:$0xff]  }
 0x5c4   :  { %11030 = vmatprep.subr.bf16.mxu0 %v16979_v3  ;;  %10928 = vmatprep.subr.bf16.mxu1 %v17009_v15  ;;  %v17012_v3 = vld [vmem:[#allocation9 + $0x3fc] ss:$28 sps:$4 sm:$0xff]   ;;  %v17057_v15 = vld [vmem:[#allocation9 + $0x5b4] ss:$28 sps:$4 sm:$0xff]  }
 0x5c7   :  { %11031 = vmatpush1.bf16.msra.mxu0 %v16977_v5  ;;  %10929 = vmatpush1.bf16.msra.mxu1 %v17007_v16  ;;  %v17010_v5 = vld [vmem:[#allocation9 + $0x3f8] ss:$28 sps:$4 sm:$0xff]   ;;  %v17055_v16 = vld [vmem:[#allocation9 + $0x5b0] ss:$28 sps:$4 sm:$0xff]  }
 0x5c8   :  { %11032 = vmatprep.subr.bf16.mxu0 %v16982_v2  ;;  %10930 = vmatprep.subr.bf16.mxu1 %v17015_v7  ;;  %v17018_v2 = vld [vmem:[#allocation9 + $0x434] ss:$28 sps:$4 sm:$0xff]   ;;  %v17063_v7 = vld [vmem:[#allocation9 + $0x5ec] ss:$28 sps:$4 sm:$0xff]  }
 0x5cb   :  { %11033 = vmatpush1.bf16.msra.mxu0 %v16980_v17  ;;  %10931 = vmatpush1.bf16.msra.mxu1 %v17013_v28  ;;  %v17016_v17 = vld [vmem:[#allocation9 + $0x430] ss:$28 sps:$4 sm:$0xff]   ;;  %v17061_v28 = vld [vmem:[#allocation9 + $0x5e8] ss:$28 sps:$4 sm:$0xff]  }
 0x5cc   :  { %11034 = vmatprep.subr.bf16.mxu0 %v16985_v30  ;;  %10932 = vmatprep.subr.bf16.mxu1 %v17021_v31  ;;  %v17024_v30 = vld [vmem:[#allocation9 + $0x46c] ss:$28 sps:$4 sm:$0xff]   ;;  %v17069_v31 = vld [vmem:[#allocation9 + $0x624] ss:$28 sps:$4 sm:$0xff]  }
 0x5cf   :  { %11035 = vmatpush1.bf16.msra.mxu0 %v16983_v32  ;;  %10933 = vmatpush1.bf16.msra.mxu1 %v17019_v33  ;;  %v17022_v32 = vld [vmem:[#allocation9 + $0x468] ss:$28 sps:$4 sm:$0xff]   ;;  %v17067_v33 = vld [vmem:[#allocation9 + $0x620] ss:$28 sps:$4 sm:$0xff]  }
 0x5d0   :  { %11036 = vmatprep.subr.bf16.mxu0 %v16988_v34  ;;  %10934 = vmatprep.subr.bf16.mxu1 %v17027_v35  ;;  %v17030_v34 = vld [vmem:[#allocation9 + $0x4a4] ss:$28 sps:$4 sm:$0xff]   ;;  %v17075_v35 = vld [vmem:[#allocation9 + $0x65c] ss:$28 sps:$4 sm:$0xff]  }
 0x5d3   :  { %11037 = vmatpush1.bf16.msra.mxu0 %v16986_v36  ;;  %10935 = vmatpush1.bf16.msra.mxu1 %v17025_v24  ;;  %v17028_v36 = vld [vmem:[#allocation9 + $0x4a0] ss:$28 sps:$4 sm:$0xff]   ;;  %v17073_v24 = vld [vmem:[#allocation9 + $0x658] ss:$28 sps:$4 sm:$0xff]  }
 0x5d4   :  { %11038 = vmatprep.subr.bf16.mxu0 %v16991_v37  ;;  %10936 = vmatprep.subr.bf16.mxu1 %v17033_v38  ;;  %v17036_v37 = vld [vmem:[#allocation9 + $0x4dc] ss:$28 sps:$4 sm:$0xff]   ;;  %v17081_v38 = vld [vmem:[#allocation9 + $0x694] ss:$28 sps:$4 sm:$0xff]  }
 0x5d7   :  { %11039 = vmatpush1.bf16.msra.mxu0 %v16989_v39  ;;  %10937 = vmatpush1.bf16.msra.mxu1 %v17031_v57  ;;  %v17034_v39 = vld [vmem:[#allocation9 + $0x4d8] ss:$28 sps:$4 sm:$0xff]   ;;  %v17079_v57 = vld [vmem:[#allocation9 + $0x690] ss:$28 sps:$4 sm:$0xff]  }
 0x5d8   :  { %11040 = vmatprep.subr.bf16.mxu0 %v16994_v43  ;;  %10938 = vmatprep.subr.bf16.mxu1 %v17039_v52  ;;  %v17042_v43 = vld [vmem:[#allocation9 + $0x514] ss:$28 sps:$4 sm:$0xff]   ;;  %v17087_v52 = vld [vmem:[#allocation9 + $0x6cc] ss:$28 sps:$4 sm:$0xff]  }
 0x5db   :  { %11041 = vmatpush1.bf16.msra.mxu0 %v16992_v53  ;;  %10939 = vmatpush1.bf16.msra.mxu1 %v17037_v49  ;;  %v17040_v53 = vld [vmem:[#allocation9 + $0x510] ss:$28 sps:$4 sm:$0xff]   ;;  %v17085_v49 = vld [vmem:[#allocation9 + $0x6c8] ss:$28 sps:$4 sm:$0xff]  }
 0x5dc   :  { %11053 = vmatprep.subr.bf16.mxu0 %v17000_v58  ;;  %10940 = vmatprep.subr.bf16.mxu1 %v17045_v4  ;;  %v17048_v58 = vld [vmem:[#allocation9 + $0x54c] ss:$28 sps:$4 sm:$0xff]   ;;  %v17093_v4 = vld [vmem:[#allocation9 + $0x704] ss:$28 sps:$4 sm:$0xff]  }
 0x5de   :  { %11043 = vmatmul.mubr.bf16.vlgmr.msra.gmra.mrb[12].mxu0 %v18631_v46 }
 0x5df   :  { %11054 = vmatpush1.bf16.msra.mxu0 %v16998_v6  ;;  %10941 = vmatpush1.bf16.msra.mxu1 %v17043_v60  ;;  %v17046_v6 = vld [vmem:[#allocation9 + $0x548] ss:$28 sps:$4 sm:$0xff]  }
 0x5e0   :  { %11055 = vmatprep.subr.bf16.mxu0 %v17006_v9  ;;  %10942 = vmatprep.subr.bf16.mxu1 %v17051_v0  ;;  %v17054_v60 = vld [vmem:[#allocation9 + $0x584] ss:$28 sps:$4 sm:$0xff]   ;;  %v17060_v0 = vld [vmem:[#allocation9 + $0x5bc] ss:$28 sps:$4 sm:$0xff]  }
 0x5e1   :  { %v17052_v9 = vld [vmem:[#allocation9 + $0x580] ss:$28 sps:$4 sm:$0xff]  }
 0x5e3   :  { %11056 = vmatpush1.bf16.msra.mxu0 %v17004_v14  ;;  %10943 = vmatpush1.bf16.msra.mxu1 %v17049_v62  ;;  %v17058_v14 = vld [vmem:[#allocation9 + $0x5b8] ss:$28 sps:$4 sm:$0xff]  }
 0x5e4   :  { %11057 = vmatprep.subr.bf16.mxu0 %v17012_v3  ;;  %10944 = vmatprep.subr.bf16.mxu1 %v17057_v15  ;;  %v17066_v62 = vld [vmem:[#allocation9 + $0x5f4] ss:$28 sps:$4 sm:$0xff]   ;;  %v17072_v15 = vld [vmem:[#allocation9 + $0x62c] ss:$28 sps:$4 sm:$0xff]  }
 0x5e5   :  { %v17064_v3 = vld [vmem:[#allocation9 + $0x5f0] ss:$28 sps:$4 sm:$0xff]  }
 0x5e7   :  { %11058 = vmatpush1.bf16.msra.mxu0 %v17010_v5  ;;  %10945 = vmatpush1.bf16.msra.mxu1 %v17055_v16  ;;  %v17070_v5 = vld [vmem:[#allocation9 + $0x628] ss:$28 sps:$4 sm:$0xff]  }
 0x5e8   :  { %11059 = vmatprep.subr.bf16.mxu0 %v17018_v2  ;;  %10946 = vmatprep.subr.bf16.mxu1 %v17063_v7  ;;  %v17078_v16 = vld [vmem:[#allocation9 + $0x664] ss:$28 sps:$4 sm:$0xff]   ;;  %v17084_v7 = vld [vmem:[#allocation9 + $0x69c] ss:$28 sps:$4 sm:$0xff]  }
 0x5e9   :  { %v17076_v2 = vld [vmem:[#allocation9 + $0x660] ss:$28 sps:$4 sm:$0xff]  }
 0x5eb   :  { %11060 = vmatpush1.bf16.msra.mxu0 %v17016_v17  ;;  %10947 = vmatpush1.bf16.msra.mxu1 %v17061_v28  ;;  %v17082_v17 = vld [vmem:[#allocation9 + $0x698] ss:$28 sps:$4 sm:$0xff]  }
 0x5ec   :  { %11061 = vmatprep.subr.bf16.mxu0 %v17024_v30  ;;  %10948 = vmatprep.subr.bf16.mxu1 %v17069_v31  ;;  %v17090_v28 = vld [vmem:[#allocation9 + $0x6d4] ss:$28 sps:$4 sm:$0xff]   ;;  %v17096_v31 = vld [vmem:[#allocation9 + $0x70c] ss:$28 sps:$4 sm:$0xff]  }
 0x5ed   :  { %v17088_v30 = vld [vmem:[#allocation9 + $0x6d0] ss:$28 sps:$4 sm:$0xff]  }
 0x5ef   :  { %11062 = vmatpush1.bf16.msra.mxu0 %v17022_v32  ;;  %10949 = vmatpush1.bf16.msra.mxu1 %v17067_v33  ;;  %v6838_v32 = vrot.slane %v18625_v1, %v18456_v51  ;;  %v6842_v33 = vrot.slane %v18625_v1, %v18462_v55 }
 0x5f0   :  { %11063 = vmatprep.subr.bf16.mxu0 %v17030_v34  ;;  %10950 = vmatprep.subr.bf16.mxu1 %v17075_v35 }
 0x5f3   :  { %11064 = vmatpush1.bf16.msra.mxu0 %v17028_v36  ;;  %10951 = vmatpush1.bf16.msra.mxu1 %v17073_v24 }
 0x5f4   :  { %11065 = vmatprep.subr.bf16.mxu0 %v17036_v37  ;;  %10952 = vmatprep.subr.bf16.mxu1 %v17081_v38 }
 0x5f7   :  { %11066 = vmatpush1.bf16.msra.mxu0 %v17034_v39  ;;  %10953 = vmatpush1.bf16.msra.mxu1 %v17079_v57 }
 0x5f8   :  { %11067 = vmatprep.subr.bf16.mxu0 %v17042_v43  ;;  %10954 = vmatprep.subr.bf16.mxu1 %v17087_v52 }
 0x5fb   :  { %11068 = vmatpush1.bf16.msra.mxu0 %v17040_v53  ;;  %10955 = vmatpush1.bf16.msra.mxu1 %v17085_v49 }
 0x5fc   :  { %11069 = vmatprep.subr.bf16.mxu0 %v17048_v58  ;;  %10967 = vmatprep.subr.bf16.mxu1 %v17093_v4 }
 0x5ff   :  { %11070 = vmatpush1.bf16.msra.mxu0 %v17046_v6  ;;  %v17091_v6 = vld [vmem:[#allocation9 + $0x700] ss:$28 sps:$4 sm:$0xff]  }
 0x600   :  { %11071 = vmatprep.subr.bf16.mxu0 %v17054_v60  ;;  %v17094_v60 = vld [vmem:[#allocation9 + $0x708] ss:$28 sps:$4 sm:$0xff]  }
 0x603   :  { %11072 = vmatpush1.bf16.msra.mxu0 %v17052_v9  ;;  %v17099_v9 = vld [vmem:[#allocation9 + $0x73c] ss:$28 sps:$4 sm:$0xff]  }
 0x604   :  { %11073 = vmatprep.subr.bf16.mxu0 %v17060_v0  ;;  %v17102_v0 = vld [vmem:[#allocation9 + $0x744] ss:$28 sps:$4 sm:$0xff]  }
 0x607   :  { %11074 = vmatpush1.bf16.msra.mxu0 %v17058_v14  ;;  %v17097_v14 = vld [vmem:[#allocation9 + $0x738] ss:$28 sps:$4 sm:$0xff]  }
 0x608   :  { %11075 = vmatprep.subr.bf16.mxu0 %v17066_v62  ;;  %v17100_v62 = vld [vmem:[#allocation9 + $0x740] ss:$28 sps:$4 sm:$0xff]  }
 0x60b   :  { %11076 = vmatpush1.bf16.msra.mxu0 %v17064_v3  ;;  %v17105_v3 = vld [vmem:[#allocation9 + $0x774] ss:$28 sps:$4 sm:$0xff]  }
 0x60c   :  { %11077 = vmatprep.subr.bf16.mxu0 %v17072_v15  ;;  %v17108_v15 = vld [vmem:[#allocation9 + $0x77c] ss:$28 sps:$4 sm:$0xff]  }
 0x60f   :  { %11078 = vmatpush1.bf16.msra.mxu0 %v17070_v5  ;;  %v17103_v5 = vld [vmem:[#allocation9 + $0x770] ss:$28 sps:$4 sm:$0xff]  }
 0x610   :  { %11079 = vmatprep.subr.bf16.mxu0 %v17078_v16  ;;  %v17106_v16 = vld [vmem:[#allocation9 + $0x778] ss:$28 sps:$4 sm:$0xff]  }
 0x613   :  { %11080 = vmatpush1.bf16.msra.mxu0 %v17076_v2  ;;  %v17111_v2 = vld [vmem:[#allocation9 + $0x7ac] ss:$28 sps:$4 sm:$0xff]  }
 0x614   :  { %11081 = vmatprep.subr.bf16.mxu0 %v17084_v7  ;;  %v17114_v7 = vld [vmem:[#allocation9 + $0x7b4] ss:$28 sps:$4 sm:$0xff]  }
 0x617   :  { %11082 = vmatpush1.bf16.msra.mxu0 %v17082_v17  ;;  %v17109_v17 = vld [vmem:[#allocation9 + $0x7a8] ss:$28 sps:$4 sm:$0xff]  }
 0x618   :  { %11083 = vmatprep.subr.bf16.mxu0 %v17090_v28  ;;  %v17112_v28 = vld [vmem:[#allocation9 + $0x7b0] ss:$28 sps:$4 sm:$0xff]  }
 0x61b   :  { %11084 = vmatpush1.bf16.msra.mxu0 %v17088_v30  ;;  %v17117_v30 = vld [vmem:[#allocation9 + $0x7e4] ss:$28 sps:$4 sm:$0xff]  }
 0x61c   :  { %11096 = vmatprep.subr.bf16.mxu0 %v17096_v31  ;;  %v17120_v31 = vld [vmem:[#allocation9 + $0x7ec] ss:$28 sps:$4 sm:$0xff]  }
 0x651   :  { %v8576_v34 = vpop.f32.mrb[36].mxu1 }
 0x652   :  { %v15151_v35 = vadd.f32 %v8576_v34, %v6838_v32  ;;  %v8578_v36 = vpop.f32.mrb[37].mxu1  ;;  %v17123_v34 = vld [vmem:[#allocation9 + $0x81c] ss:$28 sps:$4 sm:$0xff]  }
 0x653   :  { %v15152_v24 = vadd.f32 %v8578_v36, %v6842_v33  ;;  %v8580_v37 = vpop.f32.mrb[38].mxu1  ;;  %v17121_v36 = vld [vmem:[#allocation9 + $0x818] ss:$28 sps:$4 sm:$0xff]  }
 0x654   :  { %v15153_v38 = vadd.f32 %v8580_v37, %v6838_v32  ;;  %v8582_v39 = vpop.f32.mrb[39].mxu1  ;;  %v8716_v43 = vmax.f32 %v15151_v35, 0.0  ;;  %v17115_v32 = vld [vmem:[#allocation9 + $0x7e0] ss:$28 sps:$4 sm:$0xff]   ;;  %v6846_v37 = vrot.slane %v18625_v1, %v18639_v10 }
 0x655   :  { %v15154_v57 = vadd.f32 %v8582_v39, %v6842_v33  ;;  %v8717_v53 = vmax.f32 %v15152_v24, 0.0  ;;  %v17118_v33 = vld [vmem:[#allocation9 + $0x7e8] ss:$28 sps:$4 sm:$0xff]   ;;  %v17124_v24 = vld [vmem:[#allocation9 + $0x820] ss:$28 sps:$4 sm:$0xff]  }
 0x656   :  { %v8722_v52 = vmax.f32 %v15153_v38, 0.0  ;;  %v17126_v35 = vld [vmem:[#allocation9 + $0x824] ss:$28 sps:$4 sm:$0xff]   ;;  %v17129_v38 = vld [vmem:[#allocation9 + $0x854] ss:$28 sps:$4 sm:$0xff]  }
 0x657   :  { %v8723_v49 = vmax.f32 %v15154_v57, 0.0  ;;  %v17132_v39 = vld [vmem:[#allocation9 + $0x85c] ss:$28 sps:$4 sm:$0xff]   ;;  %v6850_v57 = vrot.slane %v18625_v1, %v18642_v27  ;;  %v17136_v1 = vld [vmem:[#allocation9 + $0x890] ss:$28 sps:$4 sm:$0xff]   ;;  %v19115_v27 = vmov 0.0  }
 0x658   :  { %v18664_v58 = vpack.c.bf16 %v8722_v52, %v8716_v43  ;;  %v17127_v52 = vld [vmem:[#allocation9 + $0x850] ss:$28 sps:$4 sm:$0xff]  }
 0x659   :  { %v18666_v4 = vpack.c.bf16 %v8723_v49, %v8717_v53  ;;  %v17130_v53 = vld [vmem:[#allocation9 + $0x858] ss:$28 sps:$4 sm:$0xff]  }
 0x65b   :  { %10956 = vmatprep.mubr.bf16.mxu1 %v18666_v4  ;;  %11085 = vmatprep.mubr.bf16.mxu0 %v18666_v4 }
 0x65c   :  { %10957 = vmatmul.mubr.bf16.vlgmr.msra.gmra.mrb[40].mxu1 %v18664_v58  ;;  %11086 = vmatmul.mubr.bf16.vlgmr.msra.gmra.mrb[12].mxu0 %v18664_v58 }
 0x65d   :  { %10968 = vmatpush1.bf16.msra.mxu1 %v17091_v6  ;;  %11097 = vmatpush1.bf16.msra.mxu0 %v17094_v60  ;;  %v17135_v60 = vld [vmem:[#allocation9 + $0x88c] ss:$28 sps:$4 sm:$0xff]  }
 0x65e   :  { %10969 = vmatprep.subr.bf16.mxu1 %v17099_v9  ;;  %11098 = vmatprep.subr.bf16.mxu0 %v17102_v0  ;;  %v17138_v9 = vld [vmem:[#allocation9 + $0x894] ss:$28 sps:$4 sm:$0xff]  }
 0x661   :  { %10970 = vmatpush1.bf16.msra.mxu1 %v17097_v14  ;;  %11099 = vmatpush1.bf16.msra.mxu0 %v17100_v62 }
 0x662   :  { %10971 = vmatprep.subr.bf16.mxu1 %v17105_v3  ;;  %11100 = vmatprep.subr.bf16.mxu0 %v17108_v15 }
 0x665   :  { %10972 = vmatpush1.bf16.msra.mxu1 %v17103_v5  ;;  %11101 = vmatpush1.bf16.msra.mxu0 %v17106_v16  ;;  %v17133_v5 = vld [vmem:[#allocation9 + $0x888] ss:$28 sps:$4 sm:$0xff]  }
 0x666   :  { %10973 = vmatprep.subr.bf16.mxu1 %v17111_v2  ;;  %11102 = vmatprep.subr.bf16.mxu0 %v17114_v7  ;;  %v17141_v7 = vld [vmem:[#allocation9 + $0x8c4] ss:$28 sps:$4 sm:$0xff]  }
 0x669   :  { %10974 = vmatpush1.bf16.msra.mxu1 %v17109_v17  ;;  %11103 = vmatpush1.bf16.msra.mxu0 %v17112_v28  ;;  %v17144_v17 = vld [vmem:[#allocation9 + $0x8cc] ss:$28 sps:$4 sm:$0xff]  }
 0x66a   :  { %10975 = vmatprep.subr.bf16.mxu1 %v17117_v30  ;;  %11104 = vmatprep.subr.bf16.mxu0 %v17120_v31 }
 0x66d   :  { %10976 = vmatpush1.bf16.msra.mxu1 %v17115_v32  ;;  %11105 = vmatpush1.bf16.msra.mxu0 %v17118_v33  ;;  %v17139_v33 = vld [vmem:[#allocation9 + $0x8c0] ss:$28 sps:$4 sm:$0xff]  }
 0x66e   :  { %10977 = vmatprep.subr.bf16.mxu1 %v17123_v34  ;;  %11106 = vmatprep.subr.bf16.mxu0 %v17126_v35  ;;  %v17142_v34 = vld [vmem:[#allocation9 + $0x8c8] ss:$28 sps:$4 sm:$0xff]   ;;  %v17147_v35 = vld [vmem:[#allocation9 + $0x8fc] ss:$28 sps:$4 sm:$0xff]  }
 0x671   :  { %10978 = vmatpush1.bf16.msra.mxu1 %v17121_v36  ;;  %11107 = vmatpush1.bf16.msra.mxu0 %v17124_v24  ;;  %v8705_v43 = vpop.f32.mrb[8].mxu0  ;;  %v17150_v36 = vld [vmem:[#allocation9 + $0x904] ss:$28 sps:$4 sm:$0xff]   ;;  %v17145_v24 = vld [vmem:[#allocation9 + $0x8f8] ss:$28 sps:$4 sm:$0xff]  }
 0x672   :  { %v15155_v49 = vadd.f32 %v8705_v43, %v6846_v37  ;;  %v8707_v6 = vpop.f32.mrb[9].mxu0  ;;  %10979 = vmatprep.subr.bf16.mxu1 %v17129_v38  ;;  %11108 = vmatprep.subr.bf16.mxu0 %v17132_v39  ;;  %v17153_v38 = vld [vmem:[#allocation9 + $0x934] ss:$28 sps:$4 sm:$0xff]   ;;  %v17156_v39 = vld [vmem:[#allocation9 + $0x93c] ss:$28 sps:$4 sm:$0xff]  }
 0x673   :  { %v15156_v0 = vadd.f32 %v8707_v6, %v6850_v57  ;;  %v8709_v14 = vpop.f32.mrb[10].mxu0  ;;  %v17154_v43 = vld [vmem:[#allocation9 + $0x938] ss:$28 sps:$4 sm:$0xff]   ;;  %v17160_v6 = vld [vmem:[#allocation9 + $0x970] ss:$28 sps:$4 sm:$0xff]  }
 0x674   :  { %v15157_v62 = vadd.f32 %v8709_v14, %v6846_v37  ;;  %v8711_v3 = vpop.f32.mrb[11].mxu0  ;;  %v8718_v16 = vmax.f32 %v15155_v49, 0.0  ;;  %v17148_v37 = vld [vmem:[#allocation9 + $0x900] ss:$28 sps:$4 sm:$0xff]   ;;  %v17157_v49 = vld [vmem:[#allocation9 + $0x968] ss:$28 sps:$4 sm:$0xff]  }
 0x675   :  { %v15158_v15 = vadd.f32 %v8711_v3, %v6850_v57  ;;  %10980 = vmatpush1.bf16.msra.mxu1 %v17127_v52  ;;  %11109 = vmatpush1.bf16.msra.mxu0 %v17130_v53  ;;  %v8719_v28 = vmax.f32 %v15156_v0, 0.0  ;;  %v17151_v57 = vld [vmem:[#allocation9 + $0x930] ss:$28 sps:$4 sm:$0xff]   ;;  %v17163_v0 = vld [vmem:[#allocation9 + $0x9a0] ss:$28 sps:$4 sm:$0xff]  }
 0x676   :  { %v8724_v2 = vmax.f32 %v15157_v62, 0.0  ;;  %10981 = vmatprep.subr.bf16.mxu1 %v17135_v60  ;;  %11110 = vmatprep.subr.bf16.mxu0 %v17138_v9  ;;  %v17159_v52 = vld [vmem:[#allocation9 + $0x96c] ss:$28 sps:$4 sm:$0xff]   ;;  %v17162_v53 = vld [vmem:[#allocation9 + $0x974] ss:$28 sps:$4 sm:$0xff]  }
 0x677   :  { %v8725_v30 = vmax.f32 %v15158_v15, 0.0  ;;  %v17165_v60 = vld [vmem:[#allocation9 + $0x9a4] ss:$28 sps:$4 sm:$0xff]   ;;  %v17168_v9 = vld [vmem:[#allocation9 + $0x9ac] ss:$28 sps:$4 sm:$0xff]  }
 0x678   :  { %v18676_v31 = vpack.c.bf16 %v8724_v2, %v8718_v16  ;;  %v17166_v14 = vld [vmem:[#allocation9 + $0x9a8] ss:$28 sps:$4 sm:$0xff]   ;;  %v17171_v62 = vld [vmem:[#allocation9 + $0x9dc] ss:$28 sps:$4 sm:$0xff]   ;;  %v17175_v2 = vld [vmem:[#allocation9 + $0xa10] ss:$28 sps:$4 sm:$0xff]  }
 0x679   :  { %v18678_v32 = vpack.c.bf16 %v8725_v30, %v8719_v28  ;;  %10982 = vmatpush1.bf16.msra.mxu1 %v17133_v5  ;;  %11111 = vmatpush1.bf16.msra.mxu0 %v17136_v1  ;;  %v17174_v3 = vld [vmem:[#allocation9 + $0x9e4] ss:$28 sps:$4 sm:$0xff]   ;;  %v17169_v15 = vld [vmem:[#allocation9 + $0x9d8] ss:$28 sps:$4 sm:$0xff]  }
 0x67a   :  { %10983 = vmatprep.subr.bf16.mxu1 %v17141_v7  ;;  %11112 = vmatprep.subr.bf16.mxu0 %v17144_v17  ;;  %v17172_v5 = vld [vmem:[#allocation9 + $0x9e0] ss:$28 sps:$4 sm:$0xff]   ;;  %v17177_v1 = vld [vmem:[#allocation9 + $0xa14] ss:$28 sps:$4 sm:$0xff]   ;;  %v17183_v17 = vld [vmem:[#allocation9 + $0xa4c] ss:$28 sps:$4 sm:$0xff]  }
 0x67b   :  { %10999 = vmatprep.mubr.bf16.mxu1 %v18678_v32  ;;  %11128 = vmatprep.mubr.bf16.mxu0 %v18678_v32  ;;  %v17180_v16 = vld [vmem:[#allocation9 + $0xa1c] ss:$28 sps:$4 sm:$0xff]   ;;  %v17186_v28 = vld [vmem:[#allocation9 + $0xa54] ss:$28 sps:$4 sm:$0xff]   ;;  %v17181_v30 = vld [vmem:[#allocation9 + $0xa48] ss:$28 sps:$4 sm:$0xff]  }
 0x67c   :  { %v17178_v7 = vld [vmem:[#allocation9 + $0xa18] ss:$28 sps:$4 sm:$0xff]  }
 0x67d   :  { %10984 = vmatpush1.bf16.msra.mxu1 %v17139_v33  ;;  %11113 = vmatpush1.bf16.msra.mxu0 %v17142_v34  ;;  %v17184_v33 = vld [vmem:[#allocation9 + $0xa50] ss:$28 sps:$4 sm:$0xff]  }
 0x67e   :  { %10985 = vmatprep.subr.bf16.mxu1 %v17147_v35  ;;  %11114 = vmatprep.subr.bf16.mxu0 %v17150_v36  ;;  %v17189_v34 = vld [vmem:[#allocation9 + $0x14] ss:$28 sps:$4 sm:$0xff]  }
 0x67f   :  { %v17190_v35 = vld [vmem:[#allocation9 + $0x1d8] ss:$28 sps:$4 sm:$0xff]   ;;  %v17187_v36 = vld [vmem:[#allocation9 + $0x10] ss:$28 sps:$4 sm:$0xff]  }
 0x681   :  { %10986 = vmatpush1.bf16.msra.mxu1 %v17145_v24  ;;  %11115 = vmatpush1.bf16.msra.mxu0 %v17148_v37  ;;  %v17191_v24 = vld [vmem:[#allocation9 + $0x18] ss:$28 sps:$4 sm:$0xff]   ;;  %v17194_v37 = vld [vmem:[#allocation9 + $0x4c] ss:$28 sps:$4 sm:$0xff]  }
 0x682   :  { %10987 = vmatprep.subr.bf16.mxu1 %v17153_v38  ;;  %11116 = vmatprep.subr.bf16.mxu0 %v17156_v39  ;;  %v17195_v38 = vld [vmem:[#allocation9 + $0x210] ss:$28 sps:$4 sm:$0xff]   ;;  %v17192_v39 = vld [vmem:[#allocation9 + $0x48] ss:$28 sps:$4 sm:$0xff]  }
 0x685   :  { %10988 = vmatpush1.bf16.msra.mxu1 %v17151_v57  ;;  %11117 = vmatpush1.bf16.msra.mxu0 %v17154_v43  ;;  %v17196_v57 = vld [vmem:[#allocation9 + $0x50] ss:$28 sps:$4 sm:$0xff]   ;;  %v17199_v43 = vld [vmem:[#allocation9 + $0x84] ss:$28 sps:$4 sm:$0xff]  }
 0x686   :  { %10989 = vmatprep.subr.bf16.mxu1 %v17159_v52  ;;  %11118 = vmatprep.subr.bf16.mxu0 %v17162_v53  ;;  %v17200_v52 = vld [vmem:[#allocation9 + $0x248] ss:$28 sps:$4 sm:$0xff]   ;;  %v17197_v53 = vld [vmem:[#allocation9 + $0x80] ss:$28 sps:$4 sm:$0xff]  }
 0x689   :  { %10990 = vmatpush1.bf16.msra.mxu1 %v17157_v49  ;;  %11119 = vmatpush1.bf16.msra.mxu0 %v17160_v6  ;;  %v17201_v49 = vld [vmem:[#allocation9 + $0x88] ss:$28 sps:$4 sm:$0xff]   ;;  %v17204_v6 = vld [vmem:[#allocation9 + $0xbc] ss:$28 sps:$4 sm:$0xff]  }
 0x68a   :  { %10991 = vmatprep.subr.bf16.mxu1 %v17165_v60  ;;  %11120 = vmatprep.subr.bf16.mxu0 %v17168_v9  ;;  %v17205_v60 = vld [vmem:[#allocation9 + $0x280] ss:$28 sps:$4 sm:$0xff]   ;;  %v17202_v9 = vld [vmem:[#allocation9 + $0xb8] ss:$28 sps:$4 sm:$0xff]  }
 0x68d   :  { %10992 = vmatpush1.bf16.msra.mxu1 %v17163_v0  ;;  %11121 = vmatpush1.bf16.msra.mxu0 %v17166_v14  ;;  %v17206_v0 = vld [vmem:[#allocation9 + $0xc0] ss:$28 sps:$4 sm:$0xff]   ;;  %v17209_v14 = vld [vmem:[#allocation9 + $0xf4] ss:$28 sps:$4 sm:$0xff]  }
 0x68e   :  { %10993 = vmatprep.subr.bf16.mxu1 %v17171_v62  ;;  %11122 = vmatprep.subr.bf16.mxu0 %v17174_v3  ;;  %v17207_v62 = vld [vmem:[#allocation9 + $0xf0] ss:$28 sps:$4 sm:$0xff]   ;;  %v17211_v3 = vld [vmem:[#allocation9 + $0xf8] ss:$28 sps:$4 sm:$0xff]  }
 0x691   :  { %10994 = vmatpush1.bf16.msra.mxu1 %v17169_v15  ;;  %11123 = vmatpush1.bf16.msra.mxu0 %v17172_v5  ;;  %v17214_v15 = vld [vmem:[#allocation9 + $0x12c] ss:$28 sps:$4 sm:$0xff]  }
 0x692   :  { %10995 = vmatprep.subr.bf16.mxu1 %v17177_v1  ;;  %11124 = vmatprep.subr.bf16.mxu0 %v17180_v16  ;;  %v17215_v5 = vld [vmem:[#allocation9 + $0x2f0] ss:$28 sps:$4 sm:$0xff]   ;;  %v17212_v1 = vld [vmem:[#allocation9 + $0x128] ss:$28 sps:$4 sm:$0xff]  }
 0x693   :  { %v17216_v16 = vld [vmem:[#allocation9 + $0x130] ss:$28 sps:$4 sm:$0xff]  }
 0x695   :  { %10996 = vmatpush1.bf16.msra.mxu1 %v17175_v2  ;;  %11125 = vmatpush1.bf16.msra.mxu0 %v17178_v7  ;;  %v17219_v2 = vld [vmem:[#allocation9 + $0x164] ss:$28 sps:$4 sm:$0xff]  }
 0x696   :  { %10997 = vmatprep.subr.bf16.mxu1 %v17183_v17  ;;  %11126 = vmatprep.subr.bf16.mxu0 %v17186_v28  ;;  %v17220_v7 = vld [vmem:[#allocation9 + $0x328] ss:$28 sps:$4 sm:$0xff]   ;;  %v17217_v17 = vld [vmem:[#allocation9 + $0x160] ss:$28 sps:$4 sm:$0xff]  }
 0x697   :  { %v17221_v28 = vld [vmem:[#allocation9 + $0x168] ss:$28 sps:$4 sm:$0xff]  }
 0x699   :  { %10998 = vmatpush1.bf16.msra.mxu1 %v17181_v30  ;;  %11127 = vmatpush1.bf16.msra.mxu0 %v17184_v33  ;;  %v17224_v30 = vld [vmem:[#allocation9 + $0x19c] ss:$28 sps:$4 sm:$0xff]  }
 0x69a   :  { %11139 = vmatprep.subr.bf16.mxu1 %v17189_v34  ;;  %14762 = vmatprep.subr.bf16.mxu0 %v17190_v35  ;;  %v17225_v33 = vld [vmem:[#allocation9 + $0x360] ss:$28 sps:$4 sm:$0xff]   ;;  %v17222_v34 = vld [vmem:[#allocation9 + $0x198] ss:$28 sps:$4 sm:$0xff]  }
 0x69b   :  { %v17226_v35 = vld [vmem:[#allocation9 + $0x1a0] ss:$28 sps:$4 sm:$0xff]  }
 0x69c   :  { %11000 = vmatmul.mubr.bf16.vlgmr.msra.gmra.mrb[40].mxu1 %v18676_v31  ;;  %11129 = vmatmul.mubr.bf16.vlgmr.msra.gmra.mrb[12].mxu0 %v18676_v31 }
 0x69d   :  { %11140 = vmatpush1.bf16.msra.mxu1 %v17187_v36  ;;  %11171 = vmatprep.mubr.bf16.mxu1 %v18633_v56  ;;  %v17229_v36 = vld [vmem:[#allocation9 + $0x1d4] ss:$28 sps:$4 sm:$0xff]  }
 0x69e   :  { %14763 = vmatpush3.bf16.msra.mxu0 %v17191_v24  ;;  %11300 = vmatprep.mubr.bf16.mxu0 %v18633_v56  ;;  %v17210_v56 = vld [vmem:[#allocation9 + $0x2b8] ss:$28 sps:$4 sm:$0xff]  }
 0x69f   :  { %11141 = vmatprep.subr.bf16.mxu1 %v17194_v37  ;;  %14764 = vmatprep.subr.bf16.mxu0 %v17195_v38  ;;  %v17230_v24 = vld [vmem:[#allocation9 + $0x558] ss:$28 sps:$4 sm:$0xff]   ;;  %v17227_v37 = vld [vmem:[#allocation9 + $0x1d0] ss:$28 sps:$4 sm:$0xff]  }
 0x6a0   :  { %v17231_v38 = vld [vmem:[#allocation9 + $0x398] ss:$28 sps:$4 sm:$0xff]  }
 0x6a1   :  { %11142 = vmatpush1.bf16.msra.mxu1 %v17192_v39  ;;  %v17234_v39 = vld [vmem:[#allocation9 + $0x20c] ss:$28 sps:$4 sm:$0xff]  }
 0x6a2   :  { %14765 = vmatpush3.bf16.msra.mxu0 %v17196_v57  ;;  %11143 = vmatprep.subr.bf16.mxu1 %v17199_v43  ;;  %v17235_v57 = vld [vmem:[#allocation9 + $0x590] ss:$28 sps:$4 sm:$0xff]   ;;  %v17232_v43 = vld [vmem:[#allocation9 + $0x208] ss:$28 sps:$4 sm:$0xff]  }
 0x6a3   :  { %14766 = vmatprep.subr.bf16.mxu0 %v17200_v52  ;;  %v17236_v52 = vld [vmem:[#allocation9 + $0x3d0] ss:$28 sps:$4 sm:$0xff]  }
 0x6a5   :  { %11144 = vmatpush1.bf16.msra.mxu1 %v17197_v53  ;;  %v17239_v53 = vld [vmem:[#allocation9 + $0x244] ss:$28 sps:$4 sm:$0xff]  }
 0x6a6   :  { %14767 = vmatpush3.bf16.msra.mxu0 %v17201_v49  ;;  %11145 = vmatprep.subr.bf16.mxu1 %v17204_v6  ;;  %v17240_v49 = vld [vmem:[#allocation9 + $0x5c8] ss:$28 sps:$4 sm:$0xff]   ;;  %v17237_v6 = vld [vmem:[#allocation9 + $0x240] ss:$28 sps:$4 sm:$0xff]  }
 0x6a7   :  { %14768 = vmatprep.subr.bf16.mxu0 %v17205_v60  ;;  %v17241_v60 = vld [vmem:[#allocation9 + $0x408] ss:$28 sps:$4 sm:$0xff]  }
 0x6a9   :  { %11146 = vmatpush1.bf16.msra.mxu1 %v17202_v9  ;;  %v17244_v9 = vld [vmem:[#allocation9 + $0x27c] ss:$28 sps:$4 sm:$0xff]  }
 0x6aa   :  { %14769 = vmatpush3.bf16.msra.mxu0 %v17206_v0  ;;  %11147 = vmatprep.subr.bf16.mxu1 %v17209_v14  ;;  %v17245_v0 = vld [vmem:[#allocation9 + $0x600] ss:$28 sps:$4 sm:$0xff]   ;;  %v17242_v14 = vld [vmem:[#allocation9 + $0x278] ss:$28 sps:$4 sm:$0xff]  }
 0x6ab   :  { %14770 = vmatprep.subr.bf16.mxu0 %v17210_v56  ;;  %v17246_v56 = vld [vmem:[#allocation9 + $0x440] ss:$28 sps:$4 sm:$0xff]  }
 0x6ad   :  { %11148 = vmatpush1.bf16.msra.mxu1 %v17207_v62  ;;  %v17249_v62 = vld [vmem:[#allocation9 + $0x2b4] ss:$28 sps:$4 sm:$0xff]  }
 0x6ae   :  { %14771 = vmatpush3.bf16.msra.mxu0 %v17211_v3  ;;  %11149 = vmatprep.subr.bf16.mxu1 %v17214_v15  ;;  %v17250_v3 = vld [vmem:[#allocation9 + $0x638] ss:$28 sps:$4 sm:$0xff]   ;;  %v17247_v15 = vld [vmem:[#allocation9 + $0x2b0] ss:$28 sps:$4 sm:$0xff]  }
 0x6af   :  { %14772 = vmatprep.subr.bf16.mxu0 %v17215_v5  ;;  %v17251_v5 = vld [vmem:[#allocation9 + $0x478] ss:$28 sps:$4 sm:$0xff]  }
 0x6b1   :  { %11150 = vmatpush1.bf16.msra.mxu1 %v17212_v1  ;;  %v17254_v1 = vld [vmem:[#allocation9 + $0x2ec] ss:$28 sps:$4 sm:$0xff]  }
 0x6b2   :  { %14773 = vmatpush3.bf16.msra.mxu0 %v17216_v16  ;;  %11151 = vmatprep.subr.bf16.mxu1 %v17219_v2  ;;  %v17255_v16 = vld [vmem:[#allocation9 + $0x670] ss:$28 sps:$4 sm:$0xff]   ;;  %v17252_v2 = vld [vmem:[#allocation9 + $0x2e8] ss:$28 sps:$4 sm:$0xff]  }
 0x6b3   :  { %14774 = vmatprep.subr.bf16.mxu0 %v17220_v7  ;;  %v17256_v7 = vld [vmem:[#allocation9 + $0x4b0] ss:$28 sps:$4 sm:$0xff]  }
 0x6b5   :  { %11152 = vmatpush1.bf16.msra.mxu1 %v17217_v17  ;;  %v17259_v17 = vld [vmem:[#allocation9 + $0x324] ss:$28 sps:$4 sm:$0xff]  }
 0x6b6   :  { %14775 = vmatpush3.bf16.msra.mxu0 %v17221_v28  ;;  %11153 = vmatprep.subr.bf16.mxu1 %v17224_v30  ;;  %v17260_v28 = vld [vmem:[#allocation9 + $0x6a8] ss:$28 sps:$4 sm:$0xff]   ;;  %v17257_v30 = vld [vmem:[#allocation9 + $0x320] ss:$28 sps:$4 sm:$0xff]  }
 0x6b7   :  { %14776 = vmatprep.subr.bf16.mxu0 %v17225_v33  ;;  %v17261_v33 = vld [vmem:[#allocation9 + $0x4e8] ss:$28 sps:$4 sm:$0xff]  }
 0x6b9   :  { %11154 = vmatpush1.bf16.msra.mxu1 %v17222_v34  ;;  %v17264_v34 = vld [vmem:[#allocation9 + $0x35c] ss:$28 sps:$4 sm:$0xff]  }
 0x6ba   :  { %14777 = vmatpush3.bf16.msra.mxu0 %v17226_v35  ;;  %11155 = vmatprep.subr.bf16.mxu1 %v17229_v36  ;;  %v17265_v35 = vld [vmem:[#allocation9 + $0x6e0] ss:$28 sps:$4 sm:$0xff]   ;;  %v17262_v36 = vld [vmem:[#allocation9 + $0x358] ss:$28 sps:$4 sm:$0xff]  }
 0x6bb   :  { %14784 = vmatprep.subr.bf16.mxu0 %v17230_v24  ;;  %v17266_v24 = vld [vmem:[#allocation9 + $0x520] ss:$28 sps:$4 sm:$0xff]  }
 0x6bd   :  { %11301 = vmatmul.mubr.bf16.vlgmr.msra.gmra.mrb[16].mxu0 %v18631_v46  ;;  %11156 = vmatpush1.bf16.msra.mxu1 %v17227_v37  ;;  %v17269_v37 = vld [vmem:[#allocation9 + $0x394] ss:$28 sps:$4 sm:$0xff]  }
 0x6be   :  { %14785 = vmatpush3.bf16.msra.mxu0 %v17231_v38  ;;  %11341 = vmatprep.mubr.bf16.mxu0 %v18666_v4  ;;  %v17270_v38 = vld [vmem:[#allocation9 + $0x8d8] ss:$28 sps:$4 sm:$0xff]  }
 0x6bf   :  { %11157 = vmatprep.subr.bf16.mxu1 %v17234_v39  ;;  %14786 = vmatprep.subr.bf16.mxu0 %v17235_v57  ;;  %v17267_v39 = vld [vmem:[#allocation9 + $0x390] ss:$28 sps:$4 sm:$0xff]   ;;  %v17271_v57 = vld [vmem:[#allocation9 + $0x718] ss:$28 sps:$4 sm:$0xff]  }
 0x6c1   :  { %11158 = vmatpush1.bf16.msra.mxu1 %v17232_v43  ;;  %v17274_v43 = vld [vmem:[#allocation9 + $0x3cc] ss:$28 sps:$4 sm:$0xff]  }
 0x6c2   :  { %14787 = vmatpush3.bf16.msra.mxu0 %v17236_v52  ;;  %11159 = vmatprep.subr.bf16.mxu1 %v17239_v53  ;;  %v17275_v52 = vld [vmem:[#allocation9 + $0x910] ss:$28 sps:$4 sm:$0xff]   ;;  %v17272_v53 = vld [vmem:[#allocation9 + $0x3c8] ss:$28 sps:$4 sm:$0xff]  }
 0x6c3   :  { %14788 = vmatprep.subr.bf16.mxu0 %v17240_v49  ;;  %v17276_v49 = vld [vmem:[#allocation9 + $0x750] ss:$28 sps:$4 sm:$0xff]  }
 0x6c5   :  { %11160 = vmatpush1.bf16.msra.mxu1 %v17237_v6  ;;  %v17279_v6 = vld [vmem:[#allocation9 + $0x404] ss:$28 sps:$4 sm:$0xff]  }
 0x6c6   :  { %14789 = vmatpush3.bf16.msra.mxu0 %v17241_v60  ;;  %11161 = vmatprep.subr.bf16.mxu1 %v17244_v9  ;;  %v17280_v60 = vld [vmem:[#allocation9 + $0x948] ss:$28 sps:$4 sm:$0xff]   ;;  %v17277_v9 = vld [vmem:[#allocation9 + $0x400] ss:$28 sps:$4 sm:$0xff]  }
 0x6c7   :  { %14790 = vmatprep.subr.bf16.mxu0 %v17245_v0  ;;  %v17284_v0 = vld [vmem:[#allocation9 + $0x43c] ss:$28 sps:$4 sm:$0xff]  }
 0x6c9   :  { %11162 = vmatpush1.bf16.msra.mxu1 %v17242_v14  ;;  %v17285_v14 = vld [vmem:[#allocation9 + $0x980] ss:$28 sps:$4 sm:$0xff]  }
 0x6ca   :  { %14791 = vmatpush3.bf16.msra.mxu0 %v17246_v56  ;;  %11163 = vmatprep.subr.bf16.mxu1 %v17249_v62  ;;  %v17282_v56 = vld [vmem:[#allocation9 + $0x438] ss:$28 sps:$4 sm:$0xff]  }
 0x6cb   :  { %14792 = vmatprep.subr.bf16.mxu0 %v17250_v3  ;;  %v17289_v62 = vld [vmem:[#allocation9 + $0x474] ss:$28 sps:$4 sm:$0xff]  }
 0x6cc   :  { %v17290_v3 = vld [vmem:[#allocation9 + $0x9b8] ss:$28 sps:$4 sm:$0xff]  }
 0x6cd   :  { %11164 = vmatpush1.bf16.msra.mxu1 %v17247_v15  ;;  %v17287_v15 = vld [vmem:[#allocation9 + $0x470] ss:$28 sps:$4 sm:$0xff]  }
 0x6ce   :  { %14793 = vmatpush3.bf16.msra.mxu0 %v17251_v5  ;;  %11165 = vmatprep.subr.bf16.mxu1 %v17254_v1  ;;  %v17291_v5 = vld [vmem:[#allocation9 + $0x7f8] ss:$28 sps:$4 sm:$0xff]   ;;  %v17294_v1 = vld [vmem:[#allocation9 + $0x4ac] ss:$28 sps:$4 sm:$0xff]  }
 0x6cf   :  { %14794 = vmatprep.subr.bf16.mxu0 %v17255_v16  ;;  %v17295_v16 = vld [vmem:[#allocation9 + $0x9f0] ss:$28 sps:$4 sm:$0xff]  }
 0x6d1   :  { %11166 = vmatpush1.bf16.msra.mxu1 %v17252_v2  ;;  %v17292_v2 = vld [vmem:[#allocation9 + $0x4a8] ss:$28 sps:$4 sm:$0xff]  }
 0x6d2   :  { %14795 = vmatpush3.bf16.msra.mxu0 %v17256_v7  ;;  %11167 = vmatprep.subr.bf16.mxu1 %v17259_v17  ;;  %v17296_v7 = vld [vmem:[#allocation9 + $0x830] ss:$28 sps:$4 sm:$0xff]   ;;  %v17299_v17 = vld [vmem:[#allocation9 + $0x4e4] ss:$28 sps:$4 sm:$0xff]  }
 0x6d3   :  { %14796 = vmatprep.subr.bf16.mxu0 %v17260_v28  ;;  %v17300_v28 = vld [vmem:[#allocation9 + $0xa28] ss:$28 sps:$4 sm:$0xff]  }
 0x6d5   :  { %11168 = vmatpush1.bf16.msra.mxu1 %v17257_v30  ;;  %v17297_v30 = vld [vmem:[#allocation9 + $0x4e0] ss:$28 sps:$4 sm:$0xff]  }
 0x6d6   :  { %14797 = vmatpush3.bf16.msra.mxu0 %v17261_v33  ;;  %11169 = vmatprep.subr.bf16.mxu1 %v17264_v34  ;;  %v17301_v33 = vld [vmem:[#allocation9 + $0x868] ss:$28 sps:$4 sm:$0xff]   ;;  %v17304_v34 = vld [vmem:[#allocation9 + $0x51c] ss:$28 sps:$4 sm:$0xff]  }
 0x6d7   :  { %14798 = vmatprep.subr.bf16.mxu0 %v17265_v35  ;;  %v17305_v35 = vld [vmem:[#allocation9 + $0xa60] ss:$28 sps:$4 sm:$0xff]  }
 0x6d9   :  { %11170 = vmatpush1.bf16.msra.mxu1 %v17262_v36  ;;  %v17302_v36 = vld [vmem:[#allocation9 + $0x518] ss:$28 sps:$4 sm:$0xff]  }
 0x6da   :  { %14799 = vmatpush3.bf16.msra.mxu0 %v17266_v24  ;;  %11182 = vmatprep.subr.bf16.mxu1 %v17269_v37  ;;  %v17306_v24 = vld [vmem:[#allocation9 + $0x8a0] ss:$28 sps:$4 sm:$0xff]   ;;  %v17309_v37 = vld [vmem:[#allocation9 + $0x554] ss:$28 sps:$4 sm:$0xff]  }
 0x6db   :  { %14806 = vmatprep.subr.bf16.mxu0 %v17270_v38  ;;  %v17307_v38 = vld [vmem:[#allocation9 + $0x550] ss:$28 sps:$4 sm:$0xff]  }
 0x6dc   :  { %11172 = vmatmul.mubr.bf16.vlgmr.msra.gmra.mrb[44].mxu1 %v18631_v46  ;;  %v17281_v46 = vld [vmem:[#allocation9 + $0x788] ss:$28 sps:$4 sm:$0xff]  }
 0x6dd   :  { %11342 = vmatmul.mubr.bf16.vlgmr.msra.gmra.mrb[20].mxu0 %v18664_v58  ;;  %11183 = vmatpush1.bf16.msra.mxu1 %v17267_v39  ;;  %v18692_v39 = vld [vmem:[#allocation12] sm:$0xff]  }
 0x6de   :  { %11214 = vmatprep.mubr.bf16.mxu1 %v18666_v4  ;;  %14807 = vmatpush3.bf16.msra.mxu0 %v17271_v57  ;;  %v17286_v4 = vld [vmem:[#allocation9 + $0x7c0] ss:$28 sps:$4 sm:$0xff]   ;;  %v17313_v57 = vld [vmem:[#allocation9 + $0x58c] ss:$28 sps:$4 sm:$0xff]  }
 0x6df   :  { %11382 = vmatprep.mubr.bf16.mxu0 %v18678_v32  ;;  %11184 = vmatprep.subr.bf16.mxu1 %v17274_v43  ;;  %v19072_v43 = vmov 0.0  }
 0x6e0   :  { %14808 = vmatprep.subr.bf16.mxu0 %v17275_v52  ;;  %v17311_v52 = vld [vmem:[#allocation9 + $0x588] ss:$28 sps:$4 sm:$0xff]  }
 0x6e1   :  { %11185 = vmatpush1.bf16.msra.mxu1 %v17272_v53  ;;  %v18697_v53 = vld [vmem:[#allocation12 + $0x8] sm:$0xff]  }
 0x6e2   :  { %14809 = vmatpush3.bf16.msra.mxu0 %v17276_v49  ;;  %11186 = vmatprep.subr.bf16.mxu1 %v17279_v6  ;;  %v17317_v49 = vld [vmem:[#allocation9 + $0x5c4] ss:$28 sps:$4 sm:$0xff]  }
 0x6e3   :  { %14810 = vmatprep.subr.bf16.mxu0 %v17280_v60  ;;  %v17315_v6 = vld [vmem:[#allocation9 + $0x5c0] ss:$28 sps:$4 sm:$0xff]  }
 0x6e4   :  { %v18703_v60 = vld [vmem:[#allocation12 + $0x10] sm:$0xff]  }
 0x6e5   :  { %11187 = vmatpush1.bf16.msra.mxu1 %v17277_v9  ;;  %v17321_v9 = vld [vmem:[#allocation9 + $0x5fc] ss:$28 sps:$4 sm:$0xff]  }
 0x6e6   :  { %14811 = vmatpush3.bf16.msra.mxu0 %v17281_v46  ;;  %11188 = vmatprep.subr.bf16.mxu1 %v17284_v0  ;;  %v17319_v46 = vld [vmem:[#allocation9 + $0x5f8] ss:$28 sps:$4 sm:$0xff]   ;;  %v18707_v0 = vld [vmem:[#allocation12 + $0x18] sm:$0xff]  }
 0x6e7   :  { %14812 = vmatprep.subr.bf16.mxu0 %v17285_v14  ;;  %v17325_v14 = vld [vmem:[#allocation9 + $0x634] ss:$28 sps:$4 sm:$0xff]  }
 0x6e9   :  { %11189 = vmatpush1.bf16.msra.mxu1 %v17282_v56  ;;  %v17323_v56 = vld [vmem:[#allocation9 + $0x630] ss:$28 sps:$4 sm:$0xff]  }
 0x6ea   :  { %14813 = vmatpush3.bf16.msra.mxu0 %v17286_v4  ;;  %11190 = vmatprep.subr.bf16.mxu1 %v17289_v62  ;;  %v18711_v4 = vld [vmem:[#allocation12 + $0x20] sm:$0xff]  }
 0x6eb   :  { %14814 = vmatprep.subr.bf16.mxu0 %v17290_v3  ;;  %v17329_v62 = vld [vmem:[#allocation9 + $0x66c] ss:$28 sps:$4 sm:$0xff]  }
 0x6ec   :  { %v17327_v3 = vld [vmem:[#allocation9 + $0x668] ss:$28 sps:$4 sm:$0xff]  }
 0x6ed   :  { %11191 = vmatpush1.bf16.msra.mxu1 %v17287_v15  ;;  %v18715_v15 = vld [vmem:[#allocation12 + $0x28] sm:$0xff]  }
 0x6ee   :  { %14815 = vmatpush3.bf16.msra.mxu0 %v17291_v5  ;;  %11192 = vmatprep.subr.bf16.mxu1 %v17294_v1  ;;  %v17333_v5 = vld [vmem:[#allocation9 + $0x6a4] ss:$28 sps:$4 sm:$0xff]  }
 0x6ef   :  { %14816 = vmatprep.subr.bf16.mxu0 %v17295_v16  ;;  %v17331_v1 = vld [vmem:[#allocation9 + $0x6a0] ss:$28 sps:$4 sm:$0xff]  }
 0x6f0   :  { %v18719_v16 = vld [vmem:[#allocation12 + $0x30] sm:$0xff]  }
 0x6f1   :  { %11193 = vmatpush1.bf16.msra.mxu1 %v17292_v2  ;;  %v17337_v2 = vld [vmem:[#allocation9 + $0x6dc] ss:$28 sps:$4 sm:$0xff]  }
 0x6f2   :  { %14817 = vmatpush3.bf16.msra.mxu0 %v17296_v7  ;;  %11194 = vmatprep.subr.bf16.mxu1 %v17299_v17  ;;  %v17335_v7 = vld [vmem:[#allocation9 + $0x6d8] ss:$28 sps:$4 sm:$0xff]   ;;  %v18723_v17 = vld [vmem:[#allocation12 + $0x38] sm:$0xff]  }
 0x6f3   :  { %14818 = vmatprep.subr.bf16.mxu0 %v17300_v28  ;;  %v17341_v28 = vld [vmem:[#allocation9 + $0x714] ss:$28 sps:$4 sm:$0xff]  }
 0x6f5   :  { %11195 = vmatpush1.bf16.msra.mxu1 %v17297_v30  ;;  %v18726_v30 = vld [vmem:[#allocation15 + $0x40] sm:$0xff]  }
 0x6f6   :  { %14819 = vmatpush3.bf16.msra.mxu0 %v17301_v33  ;;  %11196 = vmatprep.subr.bf16.mxu1 %v17304_v34  ;;  %v17339_v33 = vld [vmem:[#allocation9 + $0x710] ss:$28 sps:$4 sm:$0xff]  }
 0x6f7   :  { %14820 = vmatprep.subr.bf16.mxu0 %v17305_v35  ;;  %v18729_v34 = vld [vmem:[#allocation15] sm:$0xff]  }
 0x6f8   :  { %v17346_v35 = vld [vmem:[#allocation9 + $0x74c] ss:$28 sps:$4 sm:$0xff]  }
 0x6f9   :  { %11197 = vmatpush1.bf16.msra.mxu1 %v17302_v36  ;;  %v18733_v36 = vld [vmem:[#allocation15 + $0x48] sm:$0xff]  }
 0x6fa   :  { %14821 = vmatpush3.bf16.msra.mxu0 %v17306_v24  ;;  %11198 = vmatprep.subr.bf16.mxu1 %v17309_v37  ;;  %v17344_v24 = vld [vmem:[#allocation9 + $0x748] ss:$28 sps:$4 sm:$0xff]   ;;  %v18740_v37 = vld [vmem:[#allocation15 + $0x8] sm:$0xff]  }
 0x6fb   :  { %15075 = vmatprep.subr.bf16.mxu0 %v19072_v43 }
 0x6fd   :  { %11383 = vmatmul.mubr.bf16.vlgmr.msra.gmra.mrb[24].mxu0 %v18676_v31  ;;  %11199 = vmatpush1.bf16.msra.mxu1 %v17307_v38  ;;  %v17351_v38 = vld [vmem:[#allocation9 + $0x784] ss:$28 sps:$4 sm:$0xff]  }
 0x6fe   :  { %15076 = vmatpush3.bf16.msra.mxu0 %v18692_v39  ;;  %11200 = vmatprep.subr.bf16.mxu1 %v17313_v57  ;;  %v18758_v57 = vld [vmem:[#allocation15 + $0x60] sm:$0xff]  }
 0x6ff   :  { %15077 = vmatprep.subr.bf16.mxu0 %v19072_v43  ;;  %15091 = vmatprep.mubr.msk.bf16.mxu0 %vm17976_vm0, %v19072_v43 }
 0x701   :  { %11201 = vmatpush1.bf16.msra.mxu1 %v17311_v52  ;;  %v17359_v52 = vld [vmem:[#allocation9 + $0x7f0] ss:$28 sps:$4 sm:$0xff]  }
 0x702   :  { %15078 = vmatpush3.bf16.msra.mxu0 %v18697_v53  ;;  %11202 = vmatprep.subr.bf16.mxu1 %v17317_v49  ;;  %v18761_v49 = vld [vmem:[#allocation15 + $0x20] sm:$0xff]  }
 0x703   :  { %15079 = vmatprep.subr.bf16.mxu0 %v19072_v43 }
 0x705   :  { %11203 = vmatpush1.bf16.msra.mxu1 %v17315_v6  ;;  %v17366_v6 = vld [vmem:[#allocation9 + $0x82c] ss:$28 sps:$4 sm:$0xff]  }
 0x706   :  { %15080 = vmatpush3.bf16.msra.mxu0 %v18703_v60  ;;  %11204 = vmatprep.subr.bf16.mxu1 %v17321_v9  ;;  %v18764_v9 = vld [vmem:[#allocation15 + $0x68] sm:$0xff]  }
 0x707   :  { %15081 = vmatprep.subr.bf16.mxu0 %v19072_v43 }
 0x709   :  { %11205 = vmatpush1.bf16.msra.mxu1 %v17319_v46  ;;  %v17364_v46 = vld [vmem:[#allocation9 + $0x828] ss:$28 sps:$4 sm:$0xff]  }
 0x70a   :  { %15082 = vmatpush3.bf16.msra.mxu0 %v18707_v0  ;;  %11206 = vmatprep.subr.bf16.mxu1 %v17325_v14  ;;  %v18767_v14 = vld [vmem:[#allocation15 + $0x28] sm:$0xff]  }
 0x70b   :  { %15083 = vmatprep.subr.bf16.mxu0 %v19072_v43 }
 0x70d   :  { %11207 = vmatpush1.bf16.msra.mxu1 %v17323_v56  ;;  %v17371_v56 = vld [vmem:[#allocation9 + $0x864] ss:$28 sps:$4 sm:$0xff]  }
 0x70e   :  { %15084 = vmatpush3.bf16.msra.mxu0 %v18711_v4  ;;  %11208 = vmatprep.subr.bf16.mxu1 %v17329_v62  ;;  %v18770_v62 = vld [vmem:[#allocation15 + $0x70] sm:$0xff]  }
 0x70f   :  { %15085 = vmatprep.subr.bf16.mxu0 %v19072_v43 }
 0x711   :  { %11209 = vmatpush1.bf16.msra.mxu1 %v17327_v3  ;;  %v17369_v3 = vld [vmem:[#allocation9 + $0x860] ss:$28 sps:$4 sm:$0xff]  }
 0x712   :  { %15086 = vmatpush3.bf16.msra.mxu0 %v18715_v15  ;;  %11210 = vmatprep.subr.bf16.mxu1 %v17333_v5  ;;  %v18773_v5 = vld [vmem:[#allocation15 + $0x30] sm:$0xff]  }
 0x713   :  { %15087 = vmatprep.subr.bf16.mxu0 %v19072_v43 }
 0x715   :  { %11211 = vmatpush1.bf16.msra.mxu1 %v17331_v1  ;;  %v17376_v1 = vld [vmem:[#allocation9 + $0x89c] ss:$28 sps:$4 sm:$0xff]  }
 0x716   :  { %15088 = vmatpush3.bf16.msra.mxu0 %v18719_v16  ;;  %11212 = vmatprep.subr.bf16.mxu1 %v17337_v2  ;;  %v18776_v2 = vld [vmem:[#allocation15 + $0x78] sm:$0xff]  }
 0x717   :  { %15089 = vmatprep.subr.bf16.mxu0 %v19072_v43 }
 0x719   :  { %11213 = vmatpush1.bf16.msra.mxu1 %v17335_v7  ;;  %v17374_v7 = vld [vmem:[#allocation9 + $0x898] ss:$28 sps:$4 sm:$0xff]  }
 0x71a   :  { %15090 = vmatpush3.bf16.msra.mxu0 %v18723_v17  ;;  %11225 = vmatprep.subr.bf16.mxu1 %v17341_v28  ;;  %v18779_v28 = vld [vmem:[#allocation15 + $0x38] sm:$0xff]  }
 0x71b   :  { %14837 = vmatprep.subr.bf16.mxu0 %v18726_v30 }
 0x71c   :  { %11215 = vmatmul.mubr.bf16.vlgmr.msra.gmra.mrb[44].mxu1 %v18664_v58  ;;  %v18745_v58 = vld [vmem:[#allocation15 + $0x50] sm:$0xff]  }
 0x71d   :  { %15092 = vmatmul.mubr.bf16.vlgmr.msra.gmra.mrb[28].mxu0 %v11405_v22  ;;  %11226 = vmatpush1.bf16.msra.mxu1 %v17339_v33  ;;  %v17356_v22 = vld [vmem:[#allocation9 + $0x7bc] ss:$28 sps:$4 sm:$0xff]   ;;  %v17381_v33 = vld [vmem:[#allocation9 + $0x8d4] ss:$28 sps:$4 sm:$0xff]  }
 0x71e   :  { %11257 = vmatprep.mubr.bf16.mxu1 %v18678_v32  ;;  %14838 = vmatpush3.bf16.msra.mxu0 %v18729_v34  ;;  %v18752_v32 = vld [vmem:[#allocation15 + $0x58] sm:$0xff]  }
 0x71f   :  { %11688 = vmatprep.mubr.bf16.mxu0 %v11520_v23  ;;  %11227 = vmatprep.subr.bf16.mxu1 %v17346_v35  ;;  %v17361_v23 = vld [vmem:[#allocation9 + $0x7f4] ss:$28 sps:$4 sm:$0xff]  }
 0x720   :  { %14839 = vmatprep.subr.bf16.mxu0 %v18733_v36  ;;  %v18782_v35 = vld [vmem:[#allocation18 + $0x40] sm:$0xff]  }
 0x721   :  { %11228 = vmatpush1.bf16.msra.mxu1 %v17344_v24  ;;  %v17379_v24 = vld [vmem:[#allocation9 + $0x8d0] ss:$28 sps:$4 sm:$0xff]  }
 0x722   :  { %14840 = vmatpush3.bf16.msra.mxu0 %v18740_v37  ;;  %11229 = vmatprep.subr.bf16.mxu1 %v17351_v38  ;;  %v18785_v38 = vld [vmem:[#allocation18] sm:$0xff]  }
 0x723   :  { %14841 = vmatprep.subr.bf16.mxu0 %v18745_v58 }
 0x725   :  { %11230 = vmatpush1.bf16.msra.mxu1 %v17349_v8  ;;  %v17386_v8 = vld [vmem:[#allocation9 + $0x90c] ss:$28 sps:$4 sm:$0xff]  }
 0x726   :  { %14842 = vmatpush3.bf16.msra.mxu0 %v18749_v12  ;;  %11231 = vmatprep.subr.bf16.mxu1 %v17356_v22  ;;  %v18788_v22 = vld [vmem:[#allocation18 + $0x48] sm:$0xff]  }
 0x727   :  { %14843 = vmatprep.subr.bf16.mxu0 %v18752_v32 }
 0x729   :  { %11232 = vmatpush1.bf16.msra.mxu1 %v17354_v11  ;;  %v17384_v11 = vld [vmem:[#allocation9 + $0x908] ss:$28 sps:$4 sm:$0xff]  }
 0x72a   :  { %14844 = vmatpush3.bf16.msra.mxu0 %v18755_v13  ;;  %11233 = vmatprep.subr.bf16.mxu1 %v17361_v23  ;;  %v18797_v23 = vld [vmem:[#allocation18 + $0x8] sm:$0xff]  }
 0x72b   :  { %14845 = vmatprep.subr.bf16.mxu0 %v18758_v57 }
 0x72d   :  { %11234 = vmatpush1.bf16.msra.mxu1 %v17359_v52  ;;  %v17391_v52 = vld [vmem:[#allocation9 + $0x944] ss:$28 sps:$4 sm:$0xff]  }
 0x72e   :  { %14846 = vmatpush3.bf16.msra.mxu0 %v18761_v49  ;;  %11235 = vmatprep.subr.bf16.mxu1 %v17366_v6  ;;  %v18800_v6 = vld [vmem:[#allocation18 + $0x50] sm:$0xff]  }
 0x72f   :  { %14847 = vmatprep.subr.bf16.mxu0 %v18764_v9 }
 0x731   :  { %11236 = vmatpush1.bf16.msra.mxu1 %v17364_v46  ;;  %v17389_v46 = vld [vmem:[#allocation9 + $0x940] ss:$28 sps:$4 sm:$0xff]  }
 0x732   :  { %14848 = vmatpush3.bf16.msra.mxu0 %v18767_v14  ;;  %11237 = vmatprep.subr.bf16.mxu1 %v17371_v56  ;;  %v18812_v56 = vld [vmem:[#allocation18 + $0x60] sm:$0xff]  }
 0x733   :  { %14849 = vmatprep.subr.bf16.mxu0 %v18770_v62 }
 0x735   :  { %11238 = vmatpush1.bf16.msra.mxu1 %v17369_v3  ;;  %v17399_v3 = vld [vmem:[#allocation9 + $0x9b0] ss:$28 sps:$4 sm:$0xff]  }
 0x736   :  { %14850 = vmatpush3.bf16.msra.mxu0 %v18773_v5  ;;  %11239 = vmatprep.subr.bf16.mxu1 %v17376_v1  ;;  %v18815_v1 = vld [vmem:[#allocation18 + $0x20] sm:$0xff]  }
 0x737   :  { %14851 = vmatprep.subr.bf16.mxu0 %v18776_v2 }
 0x739   :  { %11240 = vmatpush1.bf16.msra.mxu1 %v17374_v7  ;;  %v17406_v7 = vld [vmem:[#allocation9 + $0x9ec] ss:$28 sps:$4 sm:$0xff]  }
 0x73a   :  { %14852 = vmatpush3.bf16.msra.mxu0 %v18779_v28  ;;  %11241 = vmatprep.subr.bf16.mxu1 %v17381_v33  ;;  %v18818_v33 = vld [vmem:[#allocation18 + $0x68] sm:$0xff]  }
 0x73b   :  { %14859 = vmatprep.subr.bf16.mxu0 %v18782_v35 }
 0x73d   :  { %11689 = vmatmul.mubr.bf16.vlgmr.msra.gmra.mrb[32].mxu0 %v11519_v25  ;;  %11242 = vmatpush1.bf16.msra.mxu1 %v17379_v24  ;;  %v18806_v25 = vld [vmem:[#allocation18 + $0x58] sm:$0xff]  }
 0x73e   :  { %14860 = vmatpush3.bf16.msra.mxu0 %v18785_v38  ;;  %11997 = vmatprep.mubr.bf16.mxu0 %v11699_v63  ;;  %v17401_v63 = vld [vmem:[#allocation9 + $0x9b4] ss:$28 sps:$4 sm:$0xff]   ;;  %v17404_v24 = vld [vmem:[#allocation9 + $0x9e8] ss:$28 sps:$4 sm:$0xff]  }
 0x73f   :  { %11243 = vmatprep.subr.bf16.mxu1 %v17386_v8  ;;  %14861 = vmatprep.subr.bf16.mxu0 %v18788_v22  ;;  %v18821_v8 = vld [vmem:[#allocation18 + $0x28] sm:$0xff]  }
 0x741   :  { %11244 = vmatpush1.bf16.msra.mxu1 %v17384_v11  ;;  %v17411_v11 = vld [vmem:[#allocation9 + $0xa24] ss:$28 sps:$4 sm:$0xff]  }
 0x742   :  { %14862 = vmatpush3.bf16.msra.mxu0 %v18797_v23  ;;  %11245 = vmatprep.subr.bf16.mxu1 %v17391_v52  ;;  %v18824_v52 = vld [vmem:[#allocation18 + $0x70] sm:$0xff]  }
 0x743   :  { %14863 = vmatprep.subr.bf16.mxu0 %v18800_v6 }
 0x745   :  { %11246 = vmatpush1.bf16.msra.mxu1 %v17389_v46  ;;  %v17409_v46 = vld [vmem:[#allocation9 + $0xa20] ss:$28 sps:$4 sm:$0xff]  }
 0x746   :  { %14864 = vmatpush3.bf16.msra.mxu0 %v18803_v18  ;;  %11247 = vmatprep.subr.bf16.mxu1 %v17396_v20  ;;  %v18827_v20 = vld [vmem:[#allocation18 + $0x30] sm:$0xff]  }
 0x747   :  { %14865 = vmatprep.subr.bf16.mxu0 %v18806_v25 }
 0x749   :  { %11248 = vmatpush1.bf16.msra.mxu1 %v17394_v40  ;;  %v17416_v40 = vld [vmem:[#allocation9 + $0xa5c] ss:$28 sps:$4 sm:$0xff]  }
 0x74a   :  { %14866 = vmatpush3.bf16.msra.mxu0 %v18809_v41  ;;  %11249 = vmatprep.subr.bf16.mxu1 %v17401_v63  ;;  %v18830_v63 = vld [vmem:[#allocation18 + $0x78] sm:$0xff]  }
 0x74b   :  { %14867 = vmatprep.subr.bf16.mxu0 %v18812_v56 }
 0x74d   :  { %11250 = vmatpush1.bf16.msra.mxu1 %v17399_v3  ;;  %v17414_v3 = vld [vmem:[#allocation9 + $0xa58] ss:$28 sps:$4 sm:$0xff]  }
 0x74e   :  { %14868 = vmatpush3.bf16.msra.mxu0 %v18815_v1  ;;  %11251 = vmatprep.subr.bf16.mxu1 %v17406_v7  ;;  %v18833_v7 = vld [vmem:[#allocation18 + $0x38] sm:$0xff]  }
 0x74f   :  { %14869 = vmatprep.subr.bf16.mxu0 %v18818_v33 }
 0x751   :  { %11252 = vmatpush1.bf16.msra.mxu1 %v17404_v24  ;;  %v18838_v24 = vld [vmem:[#allocation18 + $0x80] sm:$0xff]  }
 0x752   :  { %14870 = vmatpush3.bf16.msra.mxu0 %v18821_v8  ;;  %11253 = vmatprep.subr.bf16.mxu1 %v17411_v11  ;;  %19103 = vst [vmem:[#allocation43_spill] sm:$0xff] %v18838_v24  ;;  %v18843_v11 = vld [vmem:[#allocation18 + $0xc8] sm:$0xff]  }
 0x753   :  { %14871 = vmatprep.subr.bf16.mxu0 %v18824_v52  ;;  %19104 = vst [vmem:[#allocation44_spill] sm:$0xff] %v18843_v11 }
 0x755   :  { %11254 = vmatpush1.bf16.msra.mxu1 %v17409_v46  ;;  %v18850_v46 = vld [vmem:[#allocation18 + $0x88] sm:$0xff]  }
 0x756   :  { %14872 = vmatpush3.bf16.msra.mxu0 %v18827_v20  ;;  %11255 = vmatprep.subr.bf16.mxu1 %v17416_v40  ;;  %19105 = vst [vmem:[#allocation45_spill] sm:$0xff] %v18850_v46  ;;  %v18856_v40 = vld [vmem:[#allocation18 + $0xd0] sm:$0xff]  }
 0x757   :  { %14873 = vmatprep.subr.bf16.mxu0 %v18830_v63  ;;  %19106 = vst [vmem:[#allocation46_spill] sm:$0xff] %v18856_v40 }
 0x759   :  { %11256 = vmatpush1.bf16.msra.mxu1 %v17414_v3  ;;  %v18897_v3 = vld [vmem:[#allocation18 + $0xa8] sm:$0xff]  }
 0x75a   :  { %14874 = vmatpush3.bf16.msra.mxu0 %v18833_v7  ;;  %14881 = vmatprep.subr.bf16.mxu1 %v18835_v42  ;;  %19114 = vst [vmem:[#allocation54_spill] sm:$0xff] %v18897_v3 }
 0x75b   :  { %15095 = vmatprep.subr.bf16.mxu0 %v19072_v43 }
 0x75c   :  { %11258 = vmatmul.mubr.bf16.vlgmr.msra.gmra.mrb[44].mxu1 %v18676_v31  ;;  %v18885_v31 = vld [vmem:[#allocation18 + $0xe8] sm:$0xff]  }
 0x75d   :  { %11998 = vmatmul.mubr.bf16.vlgmr.msra.gmra.mrb[36].mxu0 %v11698_v26  ;;  %14882 = vmatpush3.bf16.msra.mxu1 %v18838_v24  ;;  %v18871_v26 = vld [vmem:[#allocation18 + $0x98] sm:$0xff]   ;;  %19113 = vst [vmem:[#allocation53_spill] sm:$0xff] %v18885_v31 }
 0x75e   :  { %12038 = vmatprep.mubr.bf16.mxu1 %v11701_v59  ;;  %15096 = vmatpush3.bf16.msra.mxu0 %v18692_v39  ;;  %19109 = vst [vmem:[#allocation49_spill] sm:$0xff] %v18871_v26  ;;  %v18881_v59 = vld [vmem:[#allocation10] sm:$0xff] }
 0x75f   :  { %14883 = vmatprep.subr.bf16.mxu1 %v18843_v11  ;;  %15097 = vmatprep.subr.bf16.mxu0 %v19072_v43  ;;  %19112 = vst [vmem:[#allocation52_spill] sm:$0xff] %v18881_v59  ;;  %v9121_v39 = vrot.slane %v18881_v59, %v18453_v50 }
 0x760   :  { %15111 = vmatprep.mubr.msk.bf16.mxu0 %vm17976_vm0, %v19072_v43 }
 0x761   :  { %14884 = vmatpush3.bf16.msra.mxu1 %v18850_v46 }
 0x762   :  { %15098 = vmatpush3.bf16.msra.mxu0 %v18697_v53  ;;  %14885 = vmatprep.subr.bf16.mxu1 %v18856_v40  ;;  %v9129_v53 = vrot.slane %v18881_v59, %v18456_v51 }
 0x763   :  { %15099 = vmatprep.subr.bf16.mxu0 %v19072_v43 }
 0x765   :  { %14886 = vmatpush3.bf16.msra.mxu1 %v18863_v19 }
 0x766   :  { %15100 = vmatpush3.bf16.msra.mxu0 %v18703_v60  ;;  %14887 = vmatprep.subr.bf16.mxu1 %v18867_v21  ;;  %v9125_v60 = vrot.slane %v18881_v59, %v18459_v54 }
 0x767   :  { %15101 = vmatprep.subr.bf16.mxu0 %v19072_v43 }
 0x769   :  { %14888 = vmatpush3.bf16.msra.mxu1 %v18871_v26 }
 0x76a   :  { %15102 = vmatpush3.bf16.msra.mxu0 %v18707_v0  ;;  %14889 = vmatprep.subr.bf16.mxu1 %v18875_v29  ;;  %v9133_v0 = vrot.slane %v18881_v59, %v18462_v55  ;;  %v18905_v59 = vld [vmem:[#allocation18 + $0xb0] sm:$0xff]  }
 0x76b   :  { %15103 = vmatprep.subr.bf16.mxu0 %v19072_v43 }
 0x76d   :  { %14890 = vmatpush3.bf16.msra.mxu1 %v18879_v44 }
 0x76e   :  { %15104 = vmatpush3.bf16.msra.mxu0 %v18711_v4  ;;  %14891 = vmatprep.subr.bf16.mxu1 %v18885_v31 }
 0x76f   :  { %v11001_v50 = vpop.f32.mrb[40].mxu1  ;;  %v11130_v43 = vpop.f32.mrb[12].mxu0  ;;  %15105 = vmatprep.subr.bf16.mxu0 %v19115_v27 }
 0x770   :  { %v15159_v51 = vadd.f32 %v11001_v50, %v9121_v39  ;;  %v15163_v10 = vadd.f32 %v11130_v43, %v9129_v53  ;;  %v11003_v45 = vpop.f32.mrb[41].mxu1  ;;  %v11132_v44 = vpop.f32.mrb[13].mxu0  ;;  %v18909_v50 = vld [vmem:[#allocation18 + $0xf8] sm:$0xff]  }
 0x771   :  { %v15160_v54 = vadd.f32 %v11003_v45, %v9125_v60  ;;  %v15164_v29 = vadd.f32 %v11132_v44, %v9133_v0  ;;  %v11005_v26 = vpop.f32.mrb[42].mxu1  ;;  %v11134_v55 = vpop.f32.mrb[14].mxu0  ;;  %14892 = vmatpush3.bf16.msra.mxu1 %v18897_v3 }
 0x772   :  { %v15161_v4 = vadd.f32 %v11005_v26, %v9121_v39  ;;  %v15165_v31 = vadd.f32 %v11134_v55, %v9129_v53  ;;  %15106 = vmatpush3.bf16.msra.mxu0 %v18715_v15  ;;  %v11007_v21 = vpop.f32.mrb[43].mxu1  ;;  %v11136_v19 = vpop.f32.mrb[15].mxu0  ;;  %14893 = vmatprep.subr.bf16.mxu1 %v18901_v48  ;;  %v11391_v45 = vmax.f32 %v15159_v51, 0.0  ;;  %v11393_v44 = vmax.f32 %v15163_v10, 0.0  ;;  %v18913_v15 = vld [vmem:[#allocation18 + $0xb8] sm:$0xff]  }
 0x773   :  { %v15162_v43 = vadd.f32 %v11007_v21, %v9125_v60  ;;  %v15166_v40 = vadd.f32 %v11136_v19, %v9133_v0  ;;  %15107 = vmatprep.subr.bf16.mxu0 %v19115_v27  ;;  %v11392_v11 = vmax.f32 %v15160_v54, 0.0  ;;  %v11394_v24 = vmax.f32 %v15164_v29, 0.0 }
 0x774   :  { %v11398_v46 = vmax.f32 %v15161_v4, 0.0  ;;  %v11400_v3 = vmax.f32 %v15165_v31, 0.0  ;;  %v19116_v10 = vpack.c.bf16 %v18652_v47, %v18650_v61 }
 0x775   :  { %v11399_v26 = vmax.f32 %v15162_v43, 0.0  ;;  %v11401_v39 = vmax.f32 %v15166_v40, 0.0  ;;  %14894 = vmatpush3.bf16.msra.mxu1 %v18905_v59 }
 0x776   :  { %v12048_v53 = vpack.c.bf16 %v11398_v46, %v11391_v45  ;;  %v12092_v55 = vpack.c.bf16 %v11400_v3, %v11393_v44  ;;  %15108 = vmatpush3.bf16.msra.mxu0 %v18719_v16  ;;  %14895 = vmatprep.subr.bf16.mxu1 %v18909_v50 }
 0x777   :  { %v12091_v19 = vpack.c.bf16 %v11399_v26, %v11392_v11  ;;  %v18917_v21 = vpack.c.bf16 %v11401_v39, %v11394_v24  ;;  %15109 = vmatprep.subr.bf16.mxu0 %v19115_v27  ;;  %v18986_v26 = vld [vmem:[#allocation16] ss:$0 sm:$0xff] }
 0x779   :  { %14896 = vmatpush3.bf16.msra.mxu1 %v18913_v15 }
 0x77a   :  { %15110 = vmatpush3.bf16.msra.mxu0 %v18723_v17  ;;  %14912 = vmatprep.subr.bf16.mxu1 %v18726_v30 }
 0x77b   :  { %14934 = vmatprep.subr.bf16.mxu0 %v18782_v35 }
 0x77c   :  { %12039 = vmatmul.mubr.bf16.vlgmr.msra.gmra.mrb[48].mxu1 %v19116_v10  ;;  %v19131_v10 = vld [vmem:[#allocation41_spill] sm:$0xff] }
 0x77d   :  { %15112 = vmatmul.mubr.bf16.vlgmr.msra.gmra.mrb[40].mxu0 %v12048_v53  ;;  %14913 = vmatpush3.bf16.msra.mxu1 %v18729_v34 }
 0x77e   :  { %12125 = vmatprep.mubr.bf16.mxu1 %v12092_v55  ;;  %14914 = vmatprep.subr.bf16.mxu1 %v18733_v36  ;;  %v19117_v36 = vld [vmem:[#allocation43_spill] sm:$0xff] }
 0x77f   :  { %14935 = vmatpush3.bf16.msra.mxu0 %v18785_v38  ;;  %v19130_v38 = vld [vmem:[#allocation54_spill] sm:$0xff] }
 0x780   :  { %14936 = vmatprep.subr.bf16.mxu0 %v18788_v22 }
 0x781   :  { %14915 = vmatpush3.bf16.msra.mxu1 %v18740_v37  ;;  %v19118_v37 = vld [vmem:[#allocation44_spill] sm:$0xff] }
 0x782   :  { %14916 = vmatprep.subr.bf16.mxu1 %v18745_v58  ;;  %v19119_v58 = vld [vmem:[#allocation45_spill] sm:$0xff] }
 0x783   :  { %14937 = vmatpush3.bf16.msra.mxu0 %v18797_v23 }
 0x784   :  { %14938 = vmatprep.subr.bf16.mxu0 %v18800_v6 }
 0x785   :  { %14917 = vmatpush3.bf16.msra.mxu1 %v18749_v12  ;;  %v19120_v12 = vld [vmem:[#allocation46_spill] sm:$0xff] }
 0x786   :  { %14918 = vmatprep.subr.bf16.mxu1 %v18752_v32  ;;  %v19121_v32 = vld [vmem:[#allocation47_spill] sm:$0xff] }
 0x787   :  { %14939 = vmatpush3.bf16.msra.mxu0 %v18803_v18 }
 0x788   :  { %14940 = vmatprep.subr.bf16.mxu0 %v18806_v25 }
 0x789   :  { %14919 = vmatpush3.bf16.msra.mxu1 %v18755_v13  ;;  %v19122_v13 = vld [vmem:[#allocation48_spill] sm:$0xff] }
 0x78a   :  { %14920 = vmatprep.subr.bf16.mxu1 %v18758_v57  ;;  %v19123_v57 = vld [vmem:[#allocation49_spill] sm:$0xff] }
 0x78b   :  { %14941 = vmatpush3.bf16.msra.mxu0 %v18809_v41 }
 0x78c   :  { %14942 = vmatprep.subr.bf16.mxu0 %v18812_v56 }
 0x78d   :  { %14921 = vmatpush3.bf16.msra.mxu1 %v18761_v49  ;;  %v19124_v49 = vld [vmem:[#allocation50_spill] sm:$0xff] }
 0x78e   :  { %14922 = vmatprep.subr.bf16.mxu1 %v18764_v9  ;;  %v19126_v9 = vld [vmem:[#allocation40_spill] sm:$0xff] }
 0x78f   :  { %14943 = vmatpush3.bf16.msra.mxu0 %v18815_v1 }
 0x790   :  { %v14778_v61 = vpop.f32.mrb[16].mxu0  ;;  %14944 = vmatprep.subr.bf16.mxu0 %v18818_v33  ;;  %v17435_v33 = vld [vmem:[#allocation21 + $0x40] sm:$0xff]  }
 0x791   :  { %v14779_v47 = vpop.f32.mrb[17].mxu0  ;;  %14923 = vmatpush3.bf16.msra.mxu1 %v18767_v14  ;;  %v19127_v14 = vsub.s32 6, %v19126_v9 }
 0x792   :  { %v14780_v16 = vadd.f32 %v14779_v47, %v14778_v61  ;;  %v14781_v17 = vpop.f32.mrb[18].mxu0  ;;  %14924 = vmatprep.subr.bf16.mxu1 %v18770_v62  ;;  %v19128_v62 = vld [vmem:[#allocation52_spill] sm:$0xff]  ;;  %v19132_v47 = vld [vmem:[#allocation42_spill] sm:$0xff] }
 0x793   :  { %v14782_v30 = vpop.f32.mrb[19].mxu0  ;;  %14945 = vmatpush3.bf16.msra.mxu0 %v18821_v8  ;;  %v9137_v61 = vrot.slane %v19128_v62, %v19131_v10 }
 0x794   :  { %v14783_v34 = vadd.f32 %v14782_v30, %v14781_v17  ;;  %14946 = vmatprep.subr.bf16.mxu0 %v18824_v52 }
 0x795   :  { %14925 = vmatpush3.bf16.msra.mxu1 %v18773_v5  ;;  %v9145_v5 = vrot.slane %v19128_v62, %v19127_v14 }
 0x796   :  { %14926 = vmatprep.subr.bf16.mxu1 %v18776_v2  ;;  %v19129_v2 = vld [vmem:[#allocation53_spill] sm:$0xff] }
 0x797   :  { %14947 = vmatpush3.bf16.msra.mxu0 %v18827_v20  ;;  %v11303_v22 = vadd.f32 %v14780_v16, %v9145_v5  ;;  %v11306_v25 = vadd.f32 %v14783_v34, %v9145_v5  ;;  %v9141_v16 = vrot.slane %v19128_v62, %v19132_v47  ;;  %v17436_v62 = vld [vmem:[#allocation21] sm:$0xff]  }
 0x798   :  { %14948 = vmatprep.subr.bf16.mxu0 %v18830_v63  ;;  %v17454_v47 = vld [vmem:[#allocation24 + $0x98] sm:$0xff]  }
 0x799   :  { %14927 = vmatpush3.bf16.msra.mxu1 %v18779_v28 }
 0x79a   :  { %14956 = vmatprep.subr.bf16.mxu1 %v18835_v42  ;;  %v19125_v42 = vld [vmem:[#allocation51_spill] sm:$0xff] }
 0x79b   :  { %14949 = vmatpush3.bf16.msra.mxu0 %v18833_v7 }
 0x79c   :  { %12126 = vmatmul.mubr.bf16.vlgmr.msra.gmra.mrb[52].mxu1 %v12091_v19  ;;  %14978 = vmatprep.subr.bf16.mxu0 %v17435_v33  ;;  %v17444_v33 = vld [vmem:[#allocation21 + $0x20] sm:$0xff]  }
 0x79d   :  { %14957 = vmatpush3.bf16.msra.mxu1 %v19117_v36 }
 0x79e   :  { %14958 = vmatprep.subr.bf16.mxu1 %v19118_v37 }
 0x7a1   :  { %14959 = vmatpush3.bf16.msra.mxu1 %v19119_v58 }
 0x7a2   :  { %14960 = vmatprep.subr.bf16.mxu1 %v19120_v12 }
 0x7a5   :  { %14961 = vmatpush3.bf16.msra.mxu1 %v19121_v32 }
 0x7a6   :  { %14962 = vmatprep.subr.bf16.mxu1 %v19122_v13 }
 0x7a9   :  { %14963 = vmatpush3.bf16.msra.mxu1 %v19123_v57 }
 0x7aa   :  { %14964 = vmatprep.subr.bf16.mxu1 %v19124_v49 }
 0x7ad   :  { %14965 = vmatpush3.bf16.msra.mxu1 %v19125_v42 }
 0x7ae   :  { %14966 = vmatprep.subr.bf16.mxu1 %v19129_v2 }
 0x7b0   :  { %v14800_v28 = vpop.f32.mrb[20].mxu0 }
 0x7b1   :  { %v14801_v35 = vpop.f32.mrb[21].mxu0  ;;  %14967 = vmatpush3.bf16.msra.mxu1 %v19130_v38 }
 0x7b2   :  { %v14802_v23 = vadd.f32 %v14801_v35, %v14800_v28  ;;  %v14803_v6 = vpop.f32.mrb[22].mxu0  ;;  %14968 = vmatprep.subr.bf16.mxu1 %v18901_v48 }
 0x7b3   :  { %v14804_v18 = vpop.f32.mrb[23].mxu0 }
 0x7b4   :  { %v11344_v41 = vadd.f32 %v14802_v23, %v11303_v22  ;;  %v14805_v56 = vadd.f32 %v14804_v18, %v14803_v6  ;;  %v17437_v23 = vld [vmem:[#allocation21 + $0x48] sm:$0xff]   ;;  %v17439_v18 = vld [vmem:[#allocation21 + $0x50] sm:$0xff]  }
 0x7b5   :  { %14969 = vmatpush3.bf16.msra.mxu1 %v18905_v59  ;;  %v18976_v59 = vld [vmem:[#allocation13] ss:$0 sm:$0xff]  ;;  %v17438_v6 = vld [vmem:[#allocation21 + $0x8] sm:$0xff]  }
 0x7b6   :  { %v11347_v1 = vadd.f32 %v14805_v56, %v11306_v25  ;;  %14970 = vmatprep.subr.bf16.mxu1 %v18909_v50  ;;  %v17440_v25 = vld [vmem:[#allocation21 + $0x10] sm:$0xff]   ;;  %v17442_v56 = vld [vmem:[#allocation21 + $0x18] sm:$0xff]  }
 0x7b9   :  { %14971 = vmatpush3.bf16.msra.mxu1 %v18913_v15 }
 0x7d0   :  { %v14822_v8 = vpop.f32.mrb[24].mxu0 }
 0x7d1   :  { %v14823_v52 = vpop.f32.mrb[25].mxu0 }
 0x7d2   :  { %v14824_v20 = vadd.f32 %v14823_v52, %v14822_v8  ;;  %v14825_v63 = vpop.f32.mrb[26].mxu0  ;;  %v17445_v8 = vld [vmem:[#allocation21 + $0x68] sm:$0xff]   ;;  %v17447_v52 = vld [vmem:[#allocation21 + $0x70] sm:$0xff]  }
 0x7d3   :  { %v14826_v7 = vpop.f32.mrb[27].mxu0 }
 0x7d4   :  { %v11385_v24 = vadd.f32 %v14824_v20, %v11344_v41  ;;  %v14827_v48 = vadd.f32 %v14826_v7, %v14825_v63  ;;  %v17441_v41 = vld [vmem:[#allocation21 + $0x58] sm:$0xff]   ;;  %v17448_v63 = vld [vmem:[#allocation21 + $0x30] sm:$0xff]  }
 0x7d5   :  { %v18995_v20 = vld [vmem:[#allocation19] ss:$0 sm:$0xff] }
 0x7d6   :  { %v11388_v11 = vadd.f32 %v14827_v48, %v11347_v1  ;;  %v11397_v46 = vmax.f32 %v11385_v24, 0.0  ;;  %v17443_v1 = vld [vmem:[#allocation21 + $0x60] sm:$0xff]   ;;  %v17449_v24 = vld [vmem:[#allocation21 + $0x78] sm:$0xff]  }
 0x7d8   :  { %v11404_v40 = vmax.f32 %v11388_v11, 0.0 }
 0x7da   :  { %v12138_v29 = vpack.c.bf16 %v11404_v40, %v11397_v46 }
 0x7dc   :  { %12212 = vmatprep.mubr.bf16.mxu1 %v12138_v29 }
 0x7f0   :  { %v11511_v31 = vpop.f32.mrb[28].mxu0 }
 0x7f1   :  { %v15093_v60 = vpop.f32.mrb[29].mxu0  ;;  %v18979_v3 = vadd.f32 %v18976_v59, %v11511_v31 }
 0x7f2   :  { %v11514_v0 = vpop.f32.mrb[30].mxu0 }
 0x7f3   :  { %v18982_v51 = vadd.f32 %v18976_v59, %v11514_v0  ;;  %v15094_v54 = vpop.f32.mrb[31].mxu0 }
 0x7f5   :  { %v11518_v4 = vpack.c.bf16 %v18982_v51, %v18979_v3  ;;  %v17456_v3 = vld [vmem:[#allocation24 + $0xa8] sm:$0xff]   ;;  %v17457_v51 = vld [vmem:[#allocation24 + $0xb0] sm:$0xff]  }
 0x810   :  { %v14853_v50 = vpop.f32.mrb[32].mxu0 }
 0x811   :  { %v14854_v43 = vpop.f32.mrb[33].mxu0 }
 0x812   :  { %v14855_v45 = vadd.f32 %v14854_v43, %v14853_v50  ;;  %v14856_v44 = vpop.f32.mrb[34].mxu0  ;;  %v17450_v50 = vld [vmem:[#allocation21 + $0x38] sm:$0xff]  }
 0x813   :  { %v14857_v39 = vpop.f32.mrb[35].mxu0 }
 0x814   :  { %v14858_v15 = vadd.f32 %v14857_v39, %v14856_v44  ;;  %v11691_v53 = vadd.f32 %v14855_v45, %v18986_v26 }
 0x816   :  { %v11694_v55 = vadd.f32 %v14858_v15, %v18986_v26 }
 0x818   :  { %v11697_v19 = vpack.c.bf16 %v11694_v55, %v11691_v53 }
 0x82f   :  { %v11259_v17 = vpop.f32.mrb[44].mxu1 }
 0x830   :  { %v15167_v30 = vadd.f32 %v11259_v17, %v9137_v61  ;;  %v14875_v34 = vpop.f32.mrb[36].mxu0  ;;  %v11261_v36 = vpop.f32.mrb[45].mxu1 }
 0x831   :  { %v15168_v37 = vadd.f32 %v11261_v36, %v9141_v16  ;;  %v14876_v58 = vpop.f32.mrb[37].mxu0  ;;  %v11263_v12 = vpop.f32.mrb[46].mxu1 }
 0x832   :  { %v14877_v32 = vadd.f32 %v14876_v58, %v14875_v34  ;;  %v15169_v13 = vadd.f32 %v11263_v12, %v9137_v61  ;;  %v14878_v57 = vpop.f32.mrb[38].mxu0  ;;  %v11265_v49 = vpop.f32.mrb[47].mxu1  ;;  %v11395_v14 = vmax.f32 %v15167_v30, 0.0  ;;  %v17453_v61 = vld [vmem:[#allocation24 + $0x90] sm:$0xff]   ;;  %v17459_v12 = vld [vmem:[#allocation27 + $0xc0] sm:$0xff]  }
 0x833   :  { %v15170_v42 = vadd.f32 %v11265_v49, %v9141_v16  ;;  %v14879_v9 = vpop.f32.mrb[39].mxu0  ;;  %v11396_v28 = vmax.f32 %v15168_v37, 0.0  ;;  %v17455_v16 = vld [vmem:[#allocation24 + $0xa0] sm:$0xff]   ;;  %v17458_v37 = vld [vmem:[#allocation24 + $0xb8] sm:$0xff]  }
 0x834   :  { %v11402_v5 = vmax.f32 %v15169_v13, 0.0  ;;  %v14880_v2 = vadd.f32 %v14879_v9, %v14878_v57  ;;  %v12000_v46 = vadd.f32 %v14877_v32, %v18995_v20  ;;  %v17460_v57 = vld [vmem:[#allocation27 + $0x80] sm:$0xff]   ;;  %v17462_v9 = vld [vmem:[#allocation27 + $0x88] sm:$0xff]  }
 0x835   :  { %v11403_v35 = vmax.f32 %v15170_v42, 0.0  ;;  %v17461_v42 = vld [vmem:[#allocation27 + $0xc8] sm:$0xff]  }
 0x836   :  { %v12136_v38 = vpack.c.bf16 %v11402_v5, %v11395_v14  ;;  %v12003_v60 = vadd.f32 %v14880_v2, %v18995_v20  ;;  %v17463_v14 = vld [vmem:[#allocation27 + $0xd0] sm:$0xff]   ;;  %v17465_v2 = vld [vmem:[#allocation27 + $0xd8] sm:$0xff]  }
 0x837   :  { %v12137_v22 = vpack.c.bf16 %v11403_v35, %v11396_v28  ;;  %v17464_v5 = vld [vmem:[#allocation27 + $0x90] sm:$0xff]   ;;  %v17467_v28 = vld [vmem:[#allocation27 + $0xe0] sm:$0xff]   ;;  %v17469_v35 = vld [vmem:[#allocation27 + $0xe8] sm:$0xff]  }
 0x838   :  { %12171 = vmatprep.mubr.bf16.mxu0 %v12136_v38  ;;  %v17470_v38 = vld [vmem:[#allocation27 + $0xa8] sm:$0xff]  }
 0x839   :  { %12172 = vmatmul.mubr.bf16.vlgmr.msra.gmra.mrb[44].mxu0 %v18917_v21  ;;  %12213 = vmatmul.mubr.bf16.vlgmr.msra.gmra.mrb[56].mxu1 %v12137_v22  ;;  %v17446_v21 = vld [vmem:[#allocation21 + $0x28] sm:$0xff]   ;;  %v17472_v22 = vld [vmem:[#allocation27 + $0xb0] sm:$0xff]  }
 0x83a   :  { %14979 = vmatpush3.bf16.msra.mxu0 %v17436_v62  ;;  %12630 = vmatprep.mubr.bf16.mxu1 %v11697_v19  ;;  %v17451_v19 = vld [vmem:[#allocation24 + $0x80] sm:$0xff]   ;;  %v17471_v62 = vld [vmem:[#allocation27 + $0xf0] sm:$0xff]  }
 0x83b   :  { %14980 = vmatprep.subr.bf16.mxu0 %v17437_v23  ;;  %v17473_v23 = vld [vmem:[#allocation24 + $0x40] sm:$0xff]  }
 0x83c   :  { %15000 = vmatprep.subr.bf16.mxu1 %v17473_v23  ;;  %v17506_v23 = vld [vmem:[#allocation27 + $0x38] sm:$0xff]  }
 0x83e   :  { %14981 = vmatpush3.bf16.msra.mxu0 %v17438_v6  ;;  %v17474_v6 = vld [vmem:[#allocation27 + $0xf8] sm:$0xff]  }
 0x83f   :  { %14982 = vmatprep.subr.bf16.mxu0 %v17439_v18  ;;  %v17475_v18 = vld [vmem:[#allocation24] sm:$0xff]  }
 0x840   :  { %15001 = vmatpush3.bf16.msra.mxu1 %v17475_v18 }
 0x842   :  { %14983 = vmatpush3.bf16.msra.mxu0 %v17440_v25  ;;  %v17476_v25 = vld [vmem:[#allocation27 + $0xb8] sm:$0xff]  }
 0x843   :  { %14984 = vmatprep.subr.bf16.mxu0 %v17441_v41  ;;  %v17477_v41 = vld [vmem:[#allocation24 + $0x48] sm:$0xff]  }
 0x844   :  { %15002 = vmatprep.subr.bf16.mxu1 %v17477_v41 }
 0x846   :  { %14985 = vmatpush3.bf16.msra.mxu0 %v17442_v56  ;;  %v17478_v56 = vld [vmem:[#allocation24 + $0x8] sm:$0xff]  }
 0x847   :  { %14986 = vmatprep.subr.bf16.mxu0 %v17443_v1  ;;  %v17479_v1 = vld [vmem:[#allocation24 + $0x50] sm:$0xff]   ;;  %15003 = vmatpush3.bf16.msra.mxu1 %v17478_v56 }
 0x848   :  { %15004 = vmatprep.subr.bf16.mxu1 %v17479_v1 }
 0x84a   :  { %14987 = vmatpush3.bf16.msra.mxu0 %v17444_v33  ;;  %v17480_v33 = vld [vmem:[#allocation24 + $0x10] sm:$0xff]  }
 0x84b   :  { %14988 = vmatprep.subr.bf16.mxu0 %v17445_v8  ;;  %v17481_v8 = vld [vmem:[#allocation24 + $0x58] sm:$0xff]   ;;  %15005 = vmatpush3.bf16.msra.mxu1 %v17480_v33 }
 0x84c   :  { %15006 = vmatprep.subr.bf16.mxu1 %v17481_v8  ;;  %v14550_v8 = vld [vmem:[#allocation25] ss:$0 sm:$0xff] }
 0x84e   :  { %14989 = vmatpush3.bf16.msra.mxu0 %v17446_v21  ;;  %v17482_v21 = vld [vmem:[#allocation24 + $0x18] sm:$0xff]  }
 0x84f   :  { %v14897_v7 = vpop.f32.mrb[48].mxu1  ;;  %14990 = vmatprep.subr.bf16.mxu0 %v17447_v52  ;;  %v17483_v52 = vld [vmem:[#allocation24 + $0x60] sm:$0xff]   ;;  %15007 = vmatpush3.bf16.msra.mxu1 %v17482_v21 }
 0x850   :  { %v12083_v48 = vpop.f32.mrb[40].mxu0  ;;  %v14898_v11 = vpop.f32.mrb[49].mxu1  ;;  %15008 = vmatprep.subr.bf16.mxu1 %v17483_v52 }
 0x851   :  { %v14899_v40 = vadd.f32 %v14898_v11, %v14897_v7  ;;  %v15113_v29 = vpop.f32.mrb[41].mxu0  ;;  %v14900_v31 = vpop.f32.mrb[50].mxu1  ;;  %v12084_v43 = vadd.f32 %v18976_v59, %v12083_v48  ;;  %v17485_v7 = vld [vmem:[#allocation24 + $0x68] sm:$0xff]   ;;  %v17487_v48 = vld [vmem:[#allocation24 + $0x70] sm:$0xff]  }
 0x852   :  { %v12086_v0 = vpop.f32.mrb[42].mxu0  ;;  %14991 = vmatpush3.bf16.msra.mxu0 %v17448_v63  ;;  %v14901_v54 = vpop.f32.mrb[51].mxu1  ;;  %v17484_v63 = vld [vmem:[#allocation24 + $0x20] sm:$0xff]   ;;  %v17488_v11 = vld [vmem:[#allocation24 + $0x30] sm:$0xff]  }
 0x853   :  { %v19000_v45 = vadd.f32 %v14899_v40, %v12000_v46  ;;  %v12087_v44 = vadd.f32 %v18976_v59, %v12086_v0  ;;  %v14902_v39 = vadd.f32 %v14901_v54, %v14900_v31  ;;  %v15114_v15 = vpop.f32.mrb[43].mxu0  ;;  %14992 = vmatprep.subr.bf16.mxu0 %v17449_v24  ;;  %v17452_v59 = vld [vmem:[#allocation24 + $0x88] sm:$0xff]   ;;  %15009 = vmatpush3.bf16.msra.mxu1 %v17484_v63  ;;  %v17489_v46 = vld [vmem:[#allocation24 + $0x78] sm:$0xff]  }
 0x854   :  { %v17486_v24 = vld [vmem:[#allocation24 + $0x28] sm:$0xff]   ;;  %15010 = vmatprep.subr.bf16.mxu1 %v17485_v7  ;;  %v17490_v40 = vld [vmem:[#allocation24 + $0x38] sm:$0xff]  }
 0x855   :  { %v12090_v53 = vpack.c.bf16 %v12087_v44, %v12084_v43  ;;  %v19003_v55 = vadd.f32 %v14902_v39, %v12003_v60 }
 0x856   :  { %14993 = vmatpush3.bf16.msra.mxu0 %v17450_v50 }
 0x857   :  { %v12047_v10 = vpack.c.bf16 %v19003_v55, %v19000_v45  ;;  %12389 = vmatprep.mubr.bf16.mxu0 %v12090_v53  ;;  %15115 = vmatprep.subr.bf16.mxu0 %v19115_v27 }
 0x858   :  { %15011 = vmatpush3.bf16.msra.mxu1 %v17486_v24 }
 0x859   :  { %12390 = vmatmul.mubr.bf16.vlgmr.msra.gmra.mrb[48].mxu0 %v11518_v4  ;;  %15012 = vmatprep.subr.bf16.mxu1 %v17487_v48 }
 0x85a   :  { %15116 = vmatpush3.bf16.msra.mxu0 %v17451_v19  ;;  %15131 = vmatprep.mubr.msk.bf16.mxu0 %vm17976_vm0, %v19115_v27 }
 0x85b   :  { %15117 = vmatprep.subr.bf16.mxu0 %v19115_v27 }
 0x85c   :  { %15013 = vmatpush3.bf16.msra.mxu1 %v17488_v11 }
 0x85d   :  { %15014 = vmatprep.subr.bf16.mxu1 %v17489_v46 }
 0x85e   :  { %15118 = vmatpush3.bf16.msra.mxu0 %v17452_v59 }
 0x85f   :  { %15119 = vmatprep.subr.bf16.mxu0 %v19115_v27 }
 0x860   :  { %15015 = vmatpush3.bf16.msra.mxu1 %v17490_v40 }
 0x862   :  { %15120 = vmatpush3.bf16.msra.mxu0 %v17453_v61 }
 0x863   :  { %15121 = vmatprep.subr.bf16.mxu0 %v19115_v27 }
 0x866   :  { %15122 = vmatpush3.bf16.msra.mxu0 %v17454_v47 }
 0x867   :  { %15123 = vmatprep.subr.bf16.mxu0 %v19115_v27 }
 0x86a   :  { %15124 = vmatpush3.bf16.msra.mxu0 %v17455_v16 }
 0x86b   :  { %15125 = vmatprep.subr.bf16.mxu0 %v19115_v27 }
 0x86e   :  { %15126 = vmatpush3.bf16.msra.mxu0 %v17456_v3 }
 0x86f   :  { %v14928_v4 = vpop.f32.mrb[52].mxu1  ;;  %15127 = vmatprep.subr.bf16.mxu0 %v19115_v27 }
 0x870   :  { %v14929_v17 = vpop.f32.mrb[53].mxu1 }
 0x871   :  { %v14930_v30 = vadd.f32 %v14929_v17, %v14928_v4  ;;  %v14931_v34 = vpop.f32.mrb[54].mxu1  ;;  %v14533_v4 = vld [vmem:[#allocation22] ss:$0 sm:$0xff] }
 0x872   :  { %v14932_v36 = vpop.f32.mrb[55].mxu1  ;;  %15128 = vmatpush3.bf16.msra.mxu0 %v17457_v51 }
 0x873   :  { %v14933_v58 = vadd.f32 %v14932_v36, %v14931_v34  ;;  %15129 = vmatprep.subr.bf16.mxu0 %v19115_v27  ;;  %v12128_v32 = vadd.f32 %v14930_v30, %v18986_v26  ;;  %v17466_v27 = vld [vmem:[#allocation27 + $0x98] sm:$0xff]  }
 0x875   :  { %v12131_v13 = vadd.f32 %v14933_v58, %v18986_v26  ;;  %v17468_v26 = vld [vmem:[#allocation27 + $0xa0] sm:$0xff]  }
 0x876   :  { %15130 = vmatpush3.bf16.msra.mxu0 %v17458_v37 }
 0x877   :  { %v12134_v49 = vpack.c.bf16 %v12131_v13, %v12128_v32  ;;  %15053 = vmatprep.subr.bf16.mxu0 %v17459_v12  ;;  %v17491_v13 = vld [vmem:[#allocation27 + $0x40] sm:$0xff]  }
 0x878   :  { %15031 = vmatprep.subr.bf16.mxu1 %v17491_v13 }
 0x879   :  { %15132 = vmatmul.mubr.bf16.vlgmr.msra.gmra.mrb[52].mxu0 %v12134_v49  ;;  %v17493_v49 = vld [vmem:[#allocation27 + $0x48] sm:$0xff]  }
 0x87a   :  { %15054 = vmatpush3.bf16.msra.mxu0 %v17460_v57  ;;  %v17492_v57 = vld [vmem:[#allocation27] sm:$0xff]  }
 0x87b   :  { %15055 = vmatprep.subr.bf16.mxu0 %v17461_v42  ;;  %v17494_v42 = vld [vmem:[#allocation27 + $0x8] sm:$0xff]  }
 0x87e   :  { %15056 = vmatpush3.bf16.msra.mxu0 %v17462_v9  ;;  %v17495_v9 = vld [vmem:[#allocation27 + $0x50] sm:$0xff]  }
 0x87f   :  { %15057 = vmatprep.subr.bf16.mxu0 %v17463_v14  ;;  %v17496_v14 = vld [vmem:[#allocation27 + $0x10] sm:$0xff]  }
 0x882   :  { %15058 = vmatpush3.bf16.msra.mxu0 %v17464_v5  ;;  %v17497_v5 = vld [vmem:[#allocation27 + $0x58] sm:$0xff]  }
 0x883   :  { %15059 = vmatprep.subr.bf16.mxu0 %v17465_v2  ;;  %v17498_v2 = vld [vmem:[#allocation27 + $0x18] sm:$0xff]  }
 0x886   :  { %15060 = vmatpush3.bf16.msra.mxu0 %v17466_v27  ;;  %v17499_v27 = vld [vmem:[#allocation27 + $0x60] sm:$0xff]  }
 0x887   :  { %15061 = vmatprep.subr.bf16.mxu0 %v17467_v28  ;;  %v17500_v28 = vld [vmem:[#allocation27 + $0x20] sm:$0xff]  }
 0x88a   :  { %15062 = vmatpush3.bf16.msra.mxu0 %v17468_v26  ;;  %v17501_v26 = vld [vmem:[#allocation27 + $0x68] sm:$0xff]  }
 0x88b   :  { %15063 = vmatprep.subr.bf16.mxu0 %v17469_v35  ;;  %v17502_v35 = vld [vmem:[#allocation27 + $0x28] sm:$0xff]  }
 0x88e   :  { %15064 = vmatpush3.bf16.msra.mxu0 %v17470_v38  ;;  %v17503_v38 = vld [vmem:[#allocation27 + $0x70] sm:$0xff]  }
 0x88f   :  { %15065 = vmatprep.subr.bf16.mxu0 %v17471_v62  ;;  %v17504_v62 = vld [vmem:[#allocation27 + $0x30] sm:$0xff]  }
 0x892   :  { %15066 = vmatpush3.bf16.msra.mxu0 %v17472_v22  ;;  %v17505_v22 = vld [vmem:[#allocation27 + $0x78] sm:$0xff]  }
 0x893   :  { %15067 = vmatprep.subr.bf16.mxu0 %v17474_v6 }
 0x896   :  { %15068 = vmatpush3.bf16.msra.mxu0 %v17476_v25 }
 0x90c   :  { %v14950_v29 = vpop.f32.mrb[44].mxu0  ;;  %v14972_v31 = vpop.f32.mrb[56].mxu1 }
 0x90d   :  { %v14951_v60 = vpop.f32.mrb[45].mxu0  ;;  %v14973_v0 = vpop.f32.mrb[57].mxu1 }
 0x90e   :  { %v14952_v54 = vadd.f32 %v14951_v60, %v14950_v29  ;;  %v14974_v50 = vadd.f32 %v14973_v0, %v14972_v31  ;;  %v14953_v43 = vpop.f32.mrb[46].mxu0  ;;  %v14975_v44 = vpop.f32.mrb[58].mxu1  ;;  %v14575_v60 = vld [vmem:[#allocation28] ss:$0 sm:$0xff] }
 0x90f   :  { %v14954_v39 = vpop.f32.mrb[47].mxu0  ;;  %v14976_v15 = vpop.f32.mrb[59].mxu1 }
 0x910   :  { %v12174_v53 = vadd.f32 %v14952_v54, %v18995_v20  ;;  %v14955_v19 = vadd.f32 %v14954_v39, %v14953_v43  ;;  %v14977_v59 = vadd.f32 %v14976_v15, %v14975_v44 }
 0x912   :  { %v12215_v61 = vadd.f32 %v14974_v50, %v12174_v53  ;;  %v12177_v47 = vadd.f32 %v14955_v19, %v18995_v20 }
 0x914   :  { %v12218_v16 = vadd.f32 %v14977_v59, %v12177_v47 }
 0x916   :  { %v12221_v3 = vpack.c.bf16 %v12218_v16, %v12215_v61 }
 0x918   :  { %13017 = vmatprep.mubr.bf16.mxu0 %v12221_v3 }
 0x919   :  { %13018 = vmatmul.mubr.bf16.vlgmr.msra.gmra.mrb[56].mxu0 %v12047_v10 }
 0x92c   :  { %v14994_v51 = vpop.f32.mrb[48].mxu0 }
 0x92d   :  { %v14995_v17 = vpop.f32.mrb[49].mxu0 }
 0x92e   :  { %v14996_v30 = vadd.f32 %v14995_v17, %v14994_v51  ;;  %v14997_v34 = vpop.f32.mrb[50].mxu0 }
 0x92f   :  { %v14998_v36 = vpop.f32.mrb[51].mxu0 }
 0x930   :  { %v12392_v37 = vadd.f32 %v14996_v30, %v14533_v4  ;;  %v14999_v58 = vadd.f32 %v14998_v36, %v14997_v34 }
 0x932   :  { %13026 = vst [vmem:[%s19065_s20] sm:$0xff] %v12392_v37  ;;  %v12395_v20 = vadd.f32 %v14999_v58, %v14533_v4 }
 0x934   :  { %v12398_v12 = vpack.c.bf16 %v12395_v20, %v12392_v37  ;;  %13029 = vst [vmem:[%s19065_s20 + $0x18] sm:$0xff] %v12395_v20 }
 0x936   :  { %12631 = vmatmul.mubr.bf16.vlgmr.msra.gmra.mrb[60].mxu1 %v12398_v12 }
 0x937   :  { %15032 = vmatpush3.bf16.msra.mxu1 %v17492_v57 }
 0x938   :  { %15033 = vmatprep.subr.bf16.mxu1 %v17493_v49 }
 0x93b   :  { %15034 = vmatpush3.bf16.msra.mxu1 %v17494_v42 }
 0x93c   :  { %15035 = vmatprep.subr.bf16.mxu1 %v17495_v9 }
 0x93f   :  { %15036 = vmatpush3.bf16.msra.mxu1 %v17496_v14 }
 0x940   :  { %15037 = vmatprep.subr.bf16.mxu1 %v17497_v5 }
 0x943   :  { %15038 = vmatpush3.bf16.msra.mxu1 %v17498_v2 }
 0x944   :  { %15039 = vmatprep.subr.bf16.mxu1 %v17499_v27 }
 0x947   :  { %15040 = vmatpush3.bf16.msra.mxu1 %v17500_v28 }
 0x948   :  { %15041 = vmatprep.subr.bf16.mxu1 %v17501_v26 }
 0x94b   :  { %15042 = vmatpush3.bf16.msra.mxu1 %v17502_v35 }
 0x94c   :  { %v12673_v45 = vpop.f32.mrb[52].mxu0  ;;  %15043 = vmatprep.subr.bf16.mxu1 %v17503_v38 }
 0x94d   :  { %v15133_v55 = vpop.f32.mrb[53].mxu0 }
 0x94e   :  { %v12676_v10 = vpop.f32.mrb[54].mxu0 }
 0x94f   :  { %v15134_v32 = vpop.f32.mrb[55].mxu0  ;;  %15044 = vmatpush3.bf16.msra.mxu1 %v17504_v62 }
 0x950   :  { %15045 = vmatprep.subr.bf16.mxu1 %v17505_v22 }
 0x953   :  { %15046 = vmatpush3.bf16.msra.mxu1 %v17506_v23 }
 0x9ec   :  { %v15069_v6 = vpop.f32.mrb[56].mxu0 }
 0x9ed   :  { %v15070_v18 = vpop.f32.mrb[57].mxu0 }
 0x9ee   :  { %v15071_v25 = vadd.f32 %v15070_v18, %v15069_v6  ;;  %v15072_v41 = vpop.f32.mrb[58].mxu0 }
 0x9ef   :  { %v15073_v56 = vpop.f32.mrb[59].mxu0 }
 0x9f0   :  { %v15074_v1 = vadd.f32 %v15073_v56, %v15072_v41 }
 0xa09   :  { %v15016_v33 = vpop.f32.mrb[60].mxu1 }
 0xa0a   :  { %v15017_v21 = vpop.f32.mrb[61].mxu1 }
 0xa0b   :  { %v15018_v52 = vadd.f32 %v15017_v21, %v15016_v33  ;;  %v15019_v63 = vpop.f32.mrb[62].mxu1 }
 0xa0c   :  { %v15020_v7 = vpop.f32.mrb[63].mxu1 }
 0xa0d   :  { %v12633_v24 = vadd.f32 %v15018_v52, %v14550_v8  ;;  %v15021_v48 = vadd.f32 %v15020_v7, %v15019_v63 }
 0xa0f   :  { %v12674_v11 = vadd.f32 %v12673_v45, %v12633_v24  ;;  %v12636_v46 = vadd.f32 %v15021_v48, %v14550_v8 }
 0xa11   :  { %13027 = vst [vmem:[%s19065_s20 + $0x8] sm:$0xff] %v12674_v11  ;;  %v12677_v40 = vadd.f32 %v12676_v10, %v12636_v46 }
 0xa13   :  { %13030 = vst [vmem:[%s19065_s20 + $0x20] sm:$0xff] %v12677_v40  ;;  %v12680_v29 = vpack.c.bf16 %v12677_v40, %v12674_v11 }
 0xa15   :  { %12976 = vmatprep.mubr.bf16.mxu1 %v12680_v29 }
 0xa16   :  { %12977 = vmatmul.mubr.bf16.vlgmr.msra.gmra.mrb[64].mxu1 %v12398_v12 }
 0xae9   :  { %v15047_v31 = vpop.f32.mrb[64].mxu1 }
 0xaea   :  { %v15048_v0 = vpop.f32.mrb[65].mxu1 }
 0xaeb   :  { %v15049_v54 = vadd.f32 %v15048_v0, %v15047_v31  ;;  %v15050_v50 = vpop.f32.mrb[66].mxu1 }
 0xaec   :  { %v15051_v43 = vpop.f32.mrb[67].mxu1 }
 0xaed   :  { %v12979_v44 = vadd.f32 %v15049_v54, %v14575_v60  ;;  %v15052_v39 = vadd.f32 %v15051_v43, %v15050_v50 }
 0xaef   :  { %v13020_v15 = vadd.f32 %v15071_v25, %v12979_v44  ;;  %v12982_v53 = vadd.f32 %v15052_v39, %v14575_v60 }
 0xaf1   :  { %13028 = vst [vmem:[%s19065_s20 + $0x10] sm:$0xff] %v13020_v15  ;;  %v13023_v19 = vadd.f32 %v15074_v1, %v12982_v53 }
 0xaf3   :  { %13031 = vst [vmem:[%s19065_s20 + $0x28] sm:$0xff] %v13023_v19 }
 0xaf4   :  { %13036 = vsyncpa [#allocation3], 1 }
 0xaf5   :  { %13037 = vsyncpa [#allocation5], 1 }
 0xaf6   :  { %13038 = vsyncpa [#allocation8], 1 }
 0xaf7   :  { %13039 = vsyncpa [#allocation11], 1 }
 0xaf8   :  { %13040 = vsyncpa [#allocation14], 1 }
 0xaf9   :  { %13041 = vsyncpa [#allocation17], 1 }
 0xafa   :  { %13042 = vsyncpa [#allocation20], 1 }
 0xafb   :  { %13043 = vsyncpa [#allocation23], 1 }
 0xafc   :  { %13044 = vsyncpa [#allocation26], 1 }
 0xafd   :  { %13045 = vsyncpa [#allocation29], 1 }

</bundles_post_ra>
